<compile_context>
chip_gen: v6e
topology: v6e:2x2x1
jax: 0.10.0
libtpu: 0.0.40
codegen_flags: <defaults>
</compile_context>

<pallas_src>
import functools

import jax
import jax.numpy as jnp
from jax.experimental import pallas as pl
from jax.experimental.pallas import tpu as pltpu


# ----------------------------------------------------------------------------
# Layer configuration of DetailBranch: (Cin, Cout, stride), all 3x3 / pad=1.
# ----------------------------------------------------------------------------
_LAYER_CFG = (
    (3,   64, 2),   # conv1_1
    (64,  64, 1),   # conv1_2
    (64,  64, 2),   # conv2_1
    (64,  64, 1),   # conv2_2
    (64,  64, 1),   # conv2_3
    (64, 128, 2),   # conv3_1
    (128, 128, 1),  # conv3_2
    (128, 128, 1),  # conv3_3
)
_STRIDES = tuple(c[2] for c in _LAYER_CFG)


# ----------------------------------------------------------------------------
# In-kernel helpers (operate on values; all data stays in VMEM/vregs)
# ----------------------------------------------------------------------------
def _conv3x3_bias_relu(a, w_mat, b_row, stride):
    """3x3 conv (pad=1) + bias + ReLU as a single im2col GEMM.

    a:     (H, W, Cin)      f32 value
    w_mat: (9*Cin, Cout)    bf16 value (taps flattened kh-major, kw, cin)
    b_row: (1, Cout)        f32 value
    """
    H, W, Cin = a.shape
    Cout = w_mat.shape[-1]
    Ho = (H + 2 - 3) // stride + 1
    Wo = (W + 2 - 3) // stride + 1

    # 1-pixel zero halo built on values (no HBM pad copies).
    zrow = jnp.zeros((1, W, Cin), a.dtype)
    ap = jnp.concatenate([zrow, a, zrow], axis=0)           # (H+2, W,   Cin)
    zcol = jnp.zeros((H + 2, 1, Cin), a.dtype)
    ap = jnp.concatenate([zcol, ap, zcol], axis=1)          # (H+2, W+2, Cin)

    # im2col: the 9 taps concatenated along the lane axis -> ONE MXU GEMM.
    taps = []
    for kh in range(3):
        for kw in range(3):
            if stride == 1:
                p = ap[kh:kh + Ho, kw:kw + Wo, :]
            else:
                # Contiguous slab + parity select via reshapes (even H, W):
                # avoids strided Ref reads and per-tap relayout copies.
                slab = ap[kh:kh + stride * Ho, kw:kw + stride * Wo, :]
                slab = slab.reshape(Ho, stride, stride * Wo, Cin)[:, 0]
                p = slab.reshape(Ho, Wo, stride, Cin)[:, :, 0, :]
            taps.append(p)
    pat = jnp.concatenate(taps, axis=-1)                    # (Ho, Wo, 9*Cin)
    pat2d = pat.reshape(Ho * Wo, 9 * Cin).astype(jnp.bfloat16)

    acc = jnp.dot(pat2d, w_mat, preferred_element_type=jnp.float32)
    acc = jnp.maximum(acc + b_row, 0.0)                     # bias + ReLU in f32
    return acc.reshape(Ho, Wo, Cout)


def _detail_branch_kernel(x_ref, *refs, strides):
    """Fused 8-layer DetailBranch for one image.

    x_ref: (1, H, W, 3) f32
    refs : w1, b1, ..., w8, b8  (weights bf16 (9*Cin, Cout), biases f32 (1, Cout))
           followed by the output ref (1, H/8, W/8, 128) f32.
    """
    o_ref = refs[-1]
    wb = refs[:-1]

    a = x_ref[...][0]                                       # (H, W, 3) f32
    for li, s in enumerate(strides):
        w_mat = wb[2 * li][...]
        b_row = wb[2 * li + 1][...]
        a = _conv3x3_bias_relu(a, w_mat, b_row, s)

    o_ref[...] = a[None].astype(o_ref.dtype)                # lane-dense (C=128)


# ----------------------------------------------------------------------------
# Wrapper: one pallas_call for the whole branch, grid over batch.
# ----------------------------------------------------------------------------
def detail_branch_forward(x_nchw, params):
    """x_nchw: (N, 3, H, W) f32. params: list of (w_hwio f32, bias f32)."""
    x = jnp.transpose(x_nchw, (0, 2, 3, 1)).astype(jnp.float32)   # NCHW -> NHWC
    n, h, w, cin = x.shape
    assert cin == _LAYER_CFG[0][0]
    assert h % 8 == 0 and w % 8 == 0, "three stride-2 stages require H, W % 8 == 0"
    ho, wo = h // 8, w // 8
    cout = _LAYER_CFG[-1][1]

    # Pack weights for the kernel: (3,3,Cin,Cout) -> (9*Cin, Cout) bf16 for the
    # MXU; biases -> (1, Cout) f32.
    flat = []
    for (ci, co, _), (w_hwio, b) in zip(_LAYER_CFG, params):
        flat.append(w_hwio.reshape(9 * ci, co).astype(jnp.bfloat16))
        flat.append(b.reshape(1, co).astype(jnp.float32))

    in_specs = [pl.BlockSpec((1, h, w, cin), lambda i: (i, 0, 0, 0))]
    in_specs += [pl.BlockSpec(a.shape, lambda i: (0, 0)) for a in flat]

    kern = functools.partial(_detail_branch_kernel, strides=_STRIDES)
    out = pl.pallas_call(
        kern,
        out_shape=jax.ShapeDtypeStruct((n, ho, wo, cout), jnp.float32),
        grid=(n,),
        in_specs=in_specs,
        out_specs=pl.BlockSpec((1, ho, wo, cout), lambda i: (i, 0, 0, 0)),
        compiler_params=pltpu.CompilerParams(dimension_semantics=("parallel",)),
    )(x, *flat)
    return jnp.transpose(out, (0, 3, 1, 2))                 # NHWC -> NCHW


# ----------------------------------------------------------------------------
# Deterministic parameter construction (BN + 1x1 branch folded at setup time)
# ----------------------------------------------------------------------------
_BN_EPS = 1e-5


def _bn_params(key, c):
    k1, k2, k3, k4 = jax.random.split(key, 4)
    gamma = 1.0 + 0.1 * jax.random.normal(k1, (c,), jnp.float32)
    beta = 0.1 * jax.random.normal(k2, (c,), jnp.float32)
    mean = 0.1 * jax.random.normal(k3, (c,), jnp.float32)
    var = jnp.abs(jax.random.normal(k4, (c,), jnp.float32)) + 0.5
    return gamma, beta, mean, var


def _fold_bn(w_hwio, gamma, beta, mean, var):
    scale = gamma / jnp.sqrt(var + _BN_EPS)                  # (Cout,)
    return w_hwio * scale[None, None, None, :], beta - mean * scale


def _make_conv_bn(key, k, cin, cout):
    kw, kb = jax.random.split(key)
    std = jnp.sqrt(2.0 / (k * k * cin)).astype(jnp.float32)  # Kaiming-like
    w = std * jax.random.normal(kw, (k, k, cin, cout), jnp.float32)
    return _fold_bn(w, *_bn_params(kb, cout))


def _make_repconv(key, cin, cout):
    """RepVGG-style exact fusion of (3x3+BN) + (1x1+BN) into one 3x3 conv."""
    k3, k1 = jax.random.split(key)
    w3, b3 = _make_conv_bn(k3, 3, cin, cout)
    w1, b1 = _make_conv_bn(k1, 1, cin, cout)
    w = w3.at[1, 1].add(w1[0, 0])                            # 1x1 at centre tap
    # Round to bf16 once so the Pallas kernel (bf16 MXU) and the f32 reference
    # use bit-identical weights.
    w = w.astype(jnp.bfloat16).astype(jnp.float32)
    return w, b3 + b1


def make_detail_branch_params(key):
    keys = jax.random.split(key, len(_LAYER_CFG))
    return [_make_repconv(k, ci, co) for k, (ci, co, _) in zip(keys, _LAYER_CFG)]


# ----------------------------------------------------------------------------
# Pure-XLA reference (f32) for numerical validation
# ----------------------------------------------------------------------------
def detail_branch_reference(x_nchw, params):
    x = jnp.transpose(x_nchw, (0, 2, 3, 1)).astype(jnp.float32)
    for (w_hwio, b), (_, _, s) in zip(params, _LAYER_CFG):
        x = jax.lax.conv_general_dilated(
            x, w_hwio, window_strides=(s, s), padding=((1, 1), (1, 1)),
            dimension_numbers=("NHWC", "HWIO", "NHWC"))
        x = jnp.maximum(x + b[None, None, None, :], 0.0)
    return jnp.transpose(x, (0, 3, 1, 2))


if __name__ == "__main__":
    key = jax.random.PRNGKey(0)
    k_x, k_p = jax.random.split(key)

    x = jax.random.normal(k_x, (2, 3, 16, 16), jnp.float32)   # NCHW RGB input
    params = make_detail_branch_params(k_p)

    out = jax.block_until_ready(detail_branch_forward(x, params))
    assert out.shape == (2, 128, 2, 2), out.shape
    assert bool(jnp.all(jnp.isfinite(out)))

    # Validate against the f32 XLA reference (kernel uses bf16 MXU activations,
    # so allow a small relative-to-max tolerance).
    ref = jax.block_until_ready(detail_branch_reference(x, params))
    max_err = float(jnp.max(jnp.abs(out - ref)))
    tol = 5e-2 * float(jnp.max(jnp.abs(ref))) + 1e-3
    assert max_err <= tol, (max_err, tol)

    print("KERNEL_OK")
</pallas_src>

<mosaic_0001>
module attributes {stable_mosaic.version = 11 : i64} {
  func.func @_detail_branch_kernel(%arg0: i32, %arg1: memref<1x16x16x3xf32, #tpu.memory_space<vmem>>, %arg2: memref<27x64xbf16, #tpu.memory_space<vmem>>, %arg3: memref<1x64xf32, #tpu.memory_space<vmem>>, %arg4: memref<576x64xbf16, #tpu.memory_space<vmem>>, %arg5: memref<1x64xf32, #tpu.memory_space<vmem>>, %arg6: memref<576x64xbf16, #tpu.memory_space<vmem>>, %arg7: memref<1x64xf32, #tpu.memory_space<vmem>>, %arg8: memref<576x64xbf16, #tpu.memory_space<vmem>>, %arg9: memref<1x64xf32, #tpu.memory_space<vmem>>, %arg10: memref<576x64xbf16, #tpu.memory_space<vmem>>, %arg11: memref<1x64xf32, #tpu.memory_space<vmem>>, %arg12: memref<576x128xbf16, #tpu.memory_space<vmem>>, %arg13: memref<1x128xf32, #tpu.memory_space<vmem>>, %arg14: memref<1152x128xbf16, #tpu.memory_space<vmem>>, %arg15: memref<1x128xf32, #tpu.memory_space<vmem>>, %arg16: memref<1152x128xbf16, #tpu.memory_space<vmem>>, %arg17: memref<1x128xf32, #tpu.memory_space<vmem>>, %arg18: memref<1x2x2x128xf32, #tpu.memory_space<vmem>>) attributes {dimension_semantics = [#tpu.dimension_semantics<parallel>], iteration_bounds = array<i64: 2>, scalar_prefetch = 0 : i64, scratch_operands = 0 : i64, tpu.core_type = #tpu.core_type<tc>, window_params = [{transform_indices = @transform_0, window_bounds = array<i64: 1, 16, 16, 3>}, {pipeline_mode = #tpu.pipeline_mode<synchronous>, transform_indices = @transform_1, window_bounds = array<i64: 27, 64>}, {pipeline_mode = #tpu.pipeline_mode<synchronous>, transform_indices = @transform_2, window_bounds = array<i64: 1, 64>}, {pipeline_mode = #tpu.pipeline_mode<synchronous>, transform_indices = @transform_3, window_bounds = array<i64: 576, 64>}, {pipeline_mode = #tpu.pipeline_mode<synchronous>, transform_indices = @transform_4, window_bounds = array<i64: 1, 64>}, {pipeline_mode = #tpu.pipeline_mode<synchronous>, transform_indices = @transform_5, window_bounds = array<i64: 576, 64>}, {pipeline_mode = #tpu.pipeline_mode<synchronous>, transform_indices = @transform_6, window_bounds = array<i64: 1, 64>}, {pipeline_mode = #tpu.pipeline_mode<synchronous>, transform_indices = @transform_7, window_bounds = array<i64: 576, 64>}, {pipeline_mode = #tpu.pipeline_mode<synchronous>, transform_indices = @transform_8, window_bounds = array<i64: 1, 64>}, {pipeline_mode = #tpu.pipeline_mode<synchronous>, transform_indices = @transform_9, window_bounds = array<i64: 576, 64>}, {pipeline_mode = #tpu.pipeline_mode<synchronous>, transform_indices = @transform_10, window_bounds = array<i64: 1, 64>}, {pipeline_mode = #tpu.pipeline_mode<synchronous>, transform_indices = @transform_11, window_bounds = array<i64: 576, 128>}, {pipeline_mode = #tpu.pipeline_mode<synchronous>, transform_indices = @transform_12, window_bounds = array<i64: 1, 128>}, {pipeline_mode = #tpu.pipeline_mode<synchronous>, transform_indices = @transform_13, window_bounds = array<i64: 1152, 128>}, {pipeline_mode = #tpu.pipeline_mode<synchronous>, transform_indices = @transform_14, window_bounds = array<i64: 1, 128>}, {pipeline_mode = #tpu.pipeline_mode<synchronous>, transform_indices = @transform_15, window_bounds = array<i64: 1152, 128>}, {pipeline_mode = #tpu.pipeline_mode<synchronous>, transform_indices = @transform_16, window_bounds = array<i64: 1, 128>}, {transform_indices = @transform_17, window_bounds = array<i64: 1, 2, 2, 128>}]} {
    %c0 = arith.constant 0 : index
    %c0_0 = arith.constant 0 : index
    %c0_1 = arith.constant 0 : index
    %c0_2 = arith.constant 0 : index
    %0 = vector.load %arg1[%c0, %c0_0, %c0_1, %c0_2] : memref<1x16x16x3xf32, #tpu.memory_space<vmem>>, vector<1x16x16x3xf32>
    %1 = vector.shape_cast %0 : vector<1x16x16x3xf32> to vector<16x16x3xf32>
    %c0_3 = arith.constant 0 : index
    %c0_4 = arith.constant 0 : index
    %2 = vector.load %arg2[%c0_3, %c0_4] : memref<27x64xbf16, #tpu.memory_space<vmem>>, vector<27x64xbf16>
    %c0_5 = arith.constant 0 : index
    %c0_6 = arith.constant 0 : index
    %3 = vector.load %arg3[%c0_5, %c0_6] : memref<1x64xf32, #tpu.memory_space<vmem>>, vector<1x64xf32>
    %cst = arith.constant 0.000000e+00 : f32
    %4 = vector.broadcast %cst : f32 to vector<1x16x3xf32>
    %5 = tpu.concatenate %4, %1, %4 in 0 : vector<1x16x3xf32>, vector<16x16x3xf32>, vector<1x16x3xf32> -> vector<18x16x3xf32>
    %cst_7 = arith.constant 0.000000e+00 : f32
    %6 = vector.broadcast %cst_7 : f32 to vector<18x1x3xf32>
    %7 = tpu.concatenate %6, %5, %6 in 1 : vector<18x1x3xf32>, vector<18x16x3xf32>, vector<18x1x3xf32> -> vector<18x18x3xf32>
    %8 = vector.extract_strided_slice %7 {offsets = [0, 0, 0], sizes = [16, 16, 3], strides = [1, 1, 1]} : vector<18x18x3xf32> to vector<16x16x3xf32>
    %9 = vector.shape_cast %8 : vector<16x16x3xf32> to vector<8x2x16x3xf32>
    %10 = vector.extract_strided_slice %9 {offsets = [0, 0, 0, 0], sizes = [8, 1, 16, 3], strides = [1, 1, 1, 1]} : vector<8x2x16x3xf32> to vector<8x1x16x3xf32>
    %11 = vector.shape_cast %10 : vector<8x1x16x3xf32> to vector<8x16x3xf32>
    %12 = vector.shape_cast %11 : vector<8x16x3xf32> to vector<8x8x2x3xf32>
    %13 = vector.extract_strided_slice %12 {offsets = [0, 0, 0, 0], sizes = [8, 8, 1, 3], strides = [1, 1, 1, 1]} : vector<8x8x2x3xf32> to vector<8x8x1x3xf32>
    %14 = vector.shape_cast %13 : vector<8x8x1x3xf32> to vector<8x8x3xf32>
    %15 = vector.extract_strided_slice %7 {offsets = [0, 1, 0], sizes = [16, 16, 3], strides = [1, 1, 1]} : vector<18x18x3xf32> to vector<16x16x3xf32>
    %16 = vector.shape_cast %15 : vector<16x16x3xf32> to vector<8x2x16x3xf32>
    %17 = vector.extract_strided_slice %16 {offsets = [0, 0, 0, 0], sizes = [8, 1, 16, 3], strides = [1, 1, 1, 1]} : vector<8x2x16x3xf32> to vector<8x1x16x3xf32>
    %18 = vector.shape_cast %17 : vector<8x1x16x3xf32> to vector<8x16x3xf32>
    %19 = vector.shape_cast %18 : vector<8x16x3xf32> to vector<8x8x2x3xf32>
    %20 = vector.extract_strided_slice %19 {offsets = [0, 0, 0, 0], sizes = [8, 8, 1, 3], strides = [1, 1, 1, 1]} : vector<8x8x2x3xf32> to vector<8x8x1x3xf32>
    %21 = vector.shape_cast %20 : vector<8x8x1x3xf32> to vector<8x8x3xf32>
    %22 = vector.extract_strided_slice %7 {offsets = [0, 2, 0], sizes = [16, 16, 3], strides = [1, 1, 1]} : vector<18x18x3xf32> to vector<16x16x3xf32>
    %23 = vector.shape_cast %22 : vector<16x16x3xf32> to vector<8x2x16x3xf32>
    %24 = vector.extract_strided_slice %23 {offsets = [0, 0, 0, 0], sizes = [8, 1, 16, 3], strides = [1, 1, 1, 1]} : vector<8x2x16x3xf32> to vector<8x1x16x3xf32>
    %25 = vector.shape_cast %24 : vector<8x1x16x3xf32> to vector<8x16x3xf32>
    %26 = vector.shape_cast %25 : vector<8x16x3xf32> to vector<8x8x2x3xf32>
    %27 = vector.extract_strided_slice %26 {offsets = [0, 0, 0, 0], sizes = [8, 8, 1, 3], strides = [1, 1, 1, 1]} : vector<8x8x2x3xf32> to vector<8x8x1x3xf32>
    %28 = vector.shape_cast %27 : vector<8x8x1x3xf32> to vector<8x8x3xf32>
    %29 = vector.extract_strided_slice %7 {offsets = [1, 0, 0], sizes = [16, 16, 3], strides = [1, 1, 1]} : vector<18x18x3xf32> to vector<16x16x3xf32>
    %30 = vector.shape_cast %29 : vector<16x16x3xf32> to vector<8x2x16x3xf32>
    %31 = vector.extract_strided_slice %30 {offsets = [0, 0, 0, 0], sizes = [8, 1, 16, 3], strides = [1, 1, 1, 1]} : vector<8x2x16x3xf32> to vector<8x1x16x3xf32>
    %32 = vector.shape_cast %31 : vector<8x1x16x3xf32> to vector<8x16x3xf32>
    %33 = vector.shape_cast %32 : vector<8x16x3xf32> to vector<8x8x2x3xf32>
    %34 = vector.extract_strided_slice %33 {offsets = [0, 0, 0, 0], sizes = [8, 8, 1, 3], strides = [1, 1, 1, 1]} : vector<8x8x2x3xf32> to vector<8x8x1x3xf32>
    %35 = vector.shape_cast %34 : vector<8x8x1x3xf32> to vector<8x8x3xf32>
    %36 = vector.extract_strided_slice %7 {offsets = [1, 1, 0], sizes = [16, 16, 3], strides = [1, 1, 1]} : vector<18x18x3xf32> to vector<16x16x3xf32>
    %37 = vector.shape_cast %36 : vector<16x16x3xf32> to vector<8x2x16x3xf32>
    %38 = vector.extract_strided_slice %37 {offsets = [0, 0, 0, 0], sizes = [8, 1, 16, 3], strides = [1, 1, 1, 1]} : vector<8x2x16x3xf32> to vector<8x1x16x3xf32>
    %39 = vector.shape_cast %38 : vector<8x1x16x3xf32> to vector<8x16x3xf32>
    %40 = vector.shape_cast %39 : vector<8x16x3xf32> to vector<8x8x2x3xf32>
    %41 = vector.extract_strided_slice %40 {offsets = [0, 0, 0, 0], sizes = [8, 8, 1, 3], strides = [1, 1, 1, 1]} : vector<8x8x2x3xf32> to vector<8x8x1x3xf32>
    %42 = vector.shape_cast %41 : vector<8x8x1x3xf32> to vector<8x8x3xf32>
    %43 = vector.extract_strided_slice %7 {offsets = [1, 2, 0], sizes = [16, 16, 3], strides = [1, 1, 1]} : vector<18x18x3xf32> to vector<16x16x3xf32>
    %44 = vector.shape_cast %43 : vector<16x16x3xf32> to vector<8x2x16x3xf32>
    %45 = vector.extract_strided_slice %44 {offsets = [0, 0, 0, 0], sizes = [8, 1, 16, 3], strides = [1, 1, 1, 1]} : vector<8x2x16x3xf32> to vector<8x1x16x3xf32>
    %46 = vector.shape_cast %45 : vector<8x1x16x3xf32> to vector<8x16x3xf32>
    %47 = vector.shape_cast %46 : vector<8x16x3xf32> to vector<8x8x2x3xf32>
    %48 = vector.extract_strided_slice %47 {offsets = [0, 0, 0, 0], sizes = [8, 8, 1, 3], strides = [1, 1, 1, 1]} : vector<8x8x2x3xf32> to vector<8x8x1x3xf32>
    %49 = vector.shape_cast %48 : vector<8x8x1x3xf32> to vector<8x8x3xf32>
    %50 = vector.extract_strided_slice %7 {offsets = [2, 0, 0], sizes = [16, 16, 3], strides = [1, 1, 1]} : vector<18x18x3xf32> to vector<16x16x3xf32>
    %51 = vector.shape_cast %50 : vector<16x16x3xf32> to vector<8x2x16x3xf32>
    %52 = vector.extract_strided_slice %51 {offsets = [0, 0, 0, 0], sizes = [8, 1, 16, 3], strides = [1, 1, 1, 1]} : vector<8x2x16x3xf32> to vector<8x1x16x3xf32>
    %53 = vector.shape_cast %52 : vector<8x1x16x3xf32> to vector<8x16x3xf32>
    %54 = vector.shape_cast %53 : vector<8x16x3xf32> to vector<8x8x2x3xf32>
    %55 = vector.extract_strided_slice %54 {offsets = [0, 0, 0, 0], sizes = [8, 8, 1, 3], strides = [1, 1, 1, 1]} : vector<8x8x2x3xf32> to vector<8x8x1x3xf32>
    %56 = vector.shape_cast %55 : vector<8x8x1x3xf32> to vector<8x8x3xf32>
    %57 = vector.extract_strided_slice %7 {offsets = [2, 1, 0], sizes = [16, 16, 3], strides = [1, 1, 1]} : vector<18x18x3xf32> to vector<16x16x3xf32>
    %58 = vector.shape_cast %57 : vector<16x16x3xf32> to vector<8x2x16x3xf32>
    %59 = vector.extract_strided_slice %58 {offsets = [0, 0, 0, 0], sizes = [8, 1, 16, 3], strides = [1, 1, 1, 1]} : vector<8x2x16x3xf32> to vector<8x1x16x3xf32>
    %60 = vector.shape_cast %59 : vector<8x1x16x3xf32> to vector<8x16x3xf32>
    %61 = vector.shape_cast %60 : vector<8x16x3xf32> to vector<8x8x2x3xf32>
    %62 = vector.extract_strided_slice %61 {offsets = [0, 0, 0, 0], sizes = [8, 8, 1, 3], strides = [1, 1, 1, 1]} : vector<8x8x2x3xf32> to vector<8x8x1x3xf32>
    %63 = vector.shape_cast %62 : vector<8x8x1x3xf32> to vector<8x8x3xf32>
    %64 = vector.extract_strided_slice %7 {offsets = [2, 2, 0], sizes = [16, 16, 3], strides = [1, 1, 1]} : vector<18x18x3xf32> to vector<16x16x3xf32>
    %65 = vector.shape_cast %64 : vector<16x16x3xf32> to vector<8x2x16x3xf32>
    %66 = vector.extract_strided_slice %65 {offsets = [0, 0, 0, 0], sizes = [8, 1, 16, 3], strides = [1, 1, 1, 1]} : vector<8x2x16x3xf32> to vector<8x1x16x3xf32>
    %67 = vector.shape_cast %66 : vector<8x1x16x3xf32> to vector<8x16x3xf32>
    %68 = vector.shape_cast %67 : vector<8x16x3xf32> to vector<8x8x2x3xf32>
    %69 = vector.extract_strided_slice %68 {offsets = [0, 0, 0, 0], sizes = [8, 8, 1, 3], strides = [1, 1, 1, 1]} : vector<8x8x2x3xf32> to vector<8x8x1x3xf32>
    %70 = vector.shape_cast %69 : vector<8x8x1x3xf32> to vector<8x8x3xf32>
    %71 = tpu.concatenate %14, %21, %28, %35, %42, %49, %56, %63, %70 in 2 : vector<8x8x3xf32>, vector<8x8x3xf32>, vector<8x8x3xf32>, vector<8x8x3xf32>, vector<8x8x3xf32>, vector<8x8x3xf32>, vector<8x8x3xf32>, vector<8x8x3xf32>, vector<8x8x3xf32> -> vector<8x8x27xf32>
    %72 = vector.shape_cast %71 : vector<8x8x27xf32> to vector<64x27xf32>
    %73 = arith.truncf %72 : vector<64x27xf32> to vector<64x27xbf16>
    %cst_8 = arith.constant dense<0.000000e+00> : vector<64x64xf32>
    %74 = tpu.matmul %73, %2, %cst_8 {dimension_numbers = #tpu.dot_dimension_numbers<[1], [0], [0], [1], [0, 0, 1, 1], [], []>} : vector<64x27xbf16>, vector<27x64xbf16>, vector<64x64xf32> -> vector<64x64xf32>
    %75 = vector.broadcast %3 : vector<1x64xf32> to vector<64x64xf32>
    %76 = arith.addf %74, %75 : vector<64x64xf32>
    %cst_9 = arith.constant 0.000000e+00 : f32
    %77 = vector.broadcast %cst_9 : f32 to vector<64x64xf32>
    %78 = arith.maximumf %76, %77 : vector<64x64xf32>
    %79 = vector.shape_cast %78 : vector<64x64xf32> to vector<8x8x64xf32>
    %c0_10 = arith.constant 0 : index
    %c0_11 = arith.constant 0 : index
    %80 = vector.load %arg4[%c0_10, %c0_11] : memref<576x64xbf16, #tpu.memory_space<vmem>>, vector<576x64xbf16>
    %c0_12 = arith.constant 0 : index
    %c0_13 = arith.constant 0 : index
    %81 = vector.load %arg5[%c0_12, %c0_13] : memref<1x64xf32, #tpu.memory_space<vmem>>, vector<1x64xf32>
    %cst_14 = arith.constant 0.000000e+00 : f32
    %82 = vector.broadcast %cst_14 : f32 to vector<1x8x64xf32>
    %83 = tpu.concatenate %82, %79, %82 in 0 : vector<1x8x64xf32>, vector<8x8x64xf32>, vector<1x8x64xf32> -> vector<10x8x64xf32>
    %cst_15 = arith.constant 0.000000e+00 : f32
    %84 = vector.broadcast %cst_15 : f32 to vector<10x1x64xf32>
    %85 = tpu.concatenate %84, %83, %84 in 1 : vector<10x1x64xf32>, vector<10x8x64xf32>, vector<10x1x64xf32> -> vector<10x10x64xf32>
    %86 = vector.extract_strided_slice %85 {offsets = [0, 0, 0], sizes = [8, 8, 64], strides = [1, 1, 1]} : vector<10x10x64xf32> to vector<8x8x64xf32>
    %87 = vector.extract_strided_slice %85 {offsets = [0, 1, 0], sizes = [8, 8, 64], strides = [1, 1, 1]} : vector<10x10x64xf32> to vector<8x8x64xf32>
    %88 = vector.extract_strided_slice %85 {offsets = [0, 2, 0], sizes = [8, 8, 64], strides = [1, 1, 1]} : vector<10x10x64xf32> to vector<8x8x64xf32>
    %89 = vector.extract_strided_slice %85 {offsets = [1, 0, 0], sizes = [8, 8, 64], strides = [1, 1, 1]} : vector<10x10x64xf32> to vector<8x8x64xf32>
    %90 = vector.extract_strided_slice %85 {offsets = [1, 1, 0], sizes = [8, 8, 64], strides = [1, 1, 1]} : vector<10x10x64xf32> to vector<8x8x64xf32>
    %91 = vector.extract_strided_slice %85 {offsets = [1, 2, 0], sizes = [8, 8, 64], strides = [1, 1, 1]} : vector<10x10x64xf32> to vector<8x8x64xf32>
    %92 = vector.extract_strided_slice %85 {offsets = [2, 0, 0], sizes = [8, 8, 64], strides = [1, 1, 1]} : vector<10x10x64xf32> to vector<8x8x64xf32>
    %93 = vector.extract_strided_slice %85 {offsets = [2, 1, 0], sizes = [8, 8, 64], strides = [1, 1, 1]} : vector<10x10x64xf32> to vector<8x8x64xf32>
    %94 = vector.extract_strided_slice %85 {offsets = [2, 2, 0], sizes = [8, 8, 64], strides = [1, 1, 1]} : vector<10x10x64xf32> to vector<8x8x64xf32>
    %95 = tpu.concatenate %86, %87, %88, %89, %90, %91, %92, %93, %94 in 2 : vector<8x8x64xf32>, vector<8x8x64xf32>, vector<8x8x64xf32>, vector<8x8x64xf32>, vector<8x8x64xf32>, vector<8x8x64xf32>, vector<8x8x64xf32>, vector<8x8x64xf32>, vector<8x8x64xf32> -> vector<8x8x576xf32>
    %96 = vector.shape_cast %95 : vector<8x8x576xf32> to vector<64x576xf32>
    %97 = arith.truncf %96 : vector<64x576xf32> to vector<64x576xbf16>
    %cst_16 = arith.constant dense<0.000000e+00> : vector<64x64xf32>
    %98 = tpu.matmul %97, %80, %cst_16 {dimension_numbers = #tpu.dot_dimension_numbers<[1], [0], [0], [1], [0, 0, 1, 1], [], []>} : vector<64x576xbf16>, vector<576x64xbf16>, vector<64x64xf32> -> vector<64x64xf32>
    %99 = vector.broadcast %81 : vector<1x64xf32> to vector<64x64xf32>
    %100 = arith.addf %98, %99 : vector<64x64xf32>
    %cst_17 = arith.constant 0.000000e+00 : f32
    %101 = vector.broadcast %cst_17 : f32 to vector<64x64xf32>
    %102 = arith.maximumf %100, %101 : vector<64x64xf32>
    %103 = vector.shape_cast %102 : vector<64x64xf32> to vector<8x8x64xf32>
    %c0_18 = arith.constant 0 : index
    %c0_19 = arith.constant 0 : index
    %104 = vector.load %arg6[%c0_18, %c0_19] : memref<576x64xbf16, #tpu.memory_space<vmem>>, vector<576x64xbf16>
    %c0_20 = arith.constant 0 : index
    %c0_21 = arith.constant 0 : index
    %105 = vector.load %arg7[%c0_20, %c0_21] : memref<1x64xf32, #tpu.memory_space<vmem>>, vector<1x64xf32>
    %cst_22 = arith.constant 0.000000e+00 : f32
    %106 = vector.broadcast %cst_22 : f32 to vector<1x8x64xf32>
    %107 = tpu.concatenate %106, %103, %106 in 0 : vector<1x8x64xf32>, vector<8x8x64xf32>, vector<1x8x64xf32> -> vector<10x8x64xf32>
    %cst_23 = arith.constant 0.000000e+00 : f32
    %108 = vector.broadcast %cst_23 : f32 to vector<10x1x64xf32>
    %109 = tpu.concatenate %108, %107, %108 in 1 : vector<10x1x64xf32>, vector<10x8x64xf32>, vector<10x1x64xf32> -> vector<10x10x64xf32>
    %110 = vector.extract_strided_slice %109 {offsets = [0, 0, 0], sizes = [8, 8, 64], strides = [1, 1, 1]} : vector<10x10x64xf32> to vector<8x8x64xf32>
    %111 = vector.shape_cast %110 : vector<8x8x64xf32> to vector<4x2x8x64xf32>
    %112 = vector.extract_strided_slice %111 {offsets = [0, 0, 0, 0], sizes = [4, 1, 8, 64], strides = [1, 1, 1, 1]} : vector<4x2x8x64xf32> to vector<4x1x8x64xf32>
    %113 = vector.shape_cast %112 : vector<4x1x8x64xf32> to vector<4x8x64xf32>
    %114 = vector.shape_cast %113 : vector<4x8x64xf32> to vector<4x4x2x64xf32>
    %115 = vector.extract_strided_slice %114 {offsets = [0, 0, 0, 0], sizes = [4, 4, 1, 64], strides = [1, 1, 1, 1]} : vector<4x4x2x64xf32> to vector<4x4x1x64xf32>
    %116 = vector.shape_cast %115 : vector<4x4x1x64xf32> to vector<4x4x64xf32>
    %117 = vector.extract_strided_slice %109 {offsets = [0, 1, 0], sizes = [8, 8, 64], strides = [1, 1, 1]} : vector<10x10x64xf32> to vector<8x8x64xf32>
    %118 = vector.shape_cast %117 : vector<8x8x64xf32> to vector<4x2x8x64xf32>
    %119 = vector.extract_strided_slice %118 {offsets = [0, 0, 0, 0], sizes = [4, 1, 8, 64], strides = [1, 1, 1, 1]} : vector<4x2x8x64xf32> to vector<4x1x8x64xf32>
    %120 = vector.shape_cast %119 : vector<4x1x8x64xf32> to vector<4x8x64xf32>
    %121 = vector.shape_cast %120 : vector<4x8x64xf32> to vector<4x4x2x64xf32>
    %122 = vector.extract_strided_slice %121 {offsets = [0, 0, 0, 0], sizes = [4, 4, 1, 64], strides = [1, 1, 1, 1]} : vector<4x4x2x64xf32> to vector<4x4x1x64xf32>
    %123 = vector.shape_cast %122 : vector<4x4x1x64xf32> to vector<4x4x64xf32>
    %124 = vector.extract_strided_slice %109 {offsets = [0, 2, 0], sizes = [8, 8, 64], strides = [1, 1, 1]} : vector<10x10x64xf32> to vector<8x8x64xf32>
    %125 = vector.shape_cast %124 : vector<8x8x64xf32> to vector<4x2x8x64xf32>
    %126 = vector.extract_strided_slice %125 {offsets = [0, 0, 0, 0], sizes = [4, 1, 8, 64], strides = [1, 1, 1, 1]} : vector<4x2x8x64xf32> to vector<4x1x8x64xf32>
    %127 = vector.shape_cast %126 : vector<4x1x8x64xf32> to vector<4x8x64xf32>
    %128 = vector.shape_cast %127 : vector<4x8x64xf32> to vector<4x4x2x64xf32>
    %129 = vector.extract_strided_slice %128 {offsets = [0, 0, 0, 0], sizes = [4, 4, 1, 64], strides = [1, 1, 1, 1]} : vector<4x4x2x64xf32> to vector<4x4x1x64xf32>
    %130 = vector.shape_cast %129 : vector<4x4x1x64xf32> to vector<4x4x64xf32>
    %131 = vector.extract_strided_slice %109 {offsets = [1, 0, 0], sizes = [8, 8, 64], strides = [1, 1, 1]} : vector<10x10x64xf32> to vector<8x8x64xf32>
    %132 = vector.shape_cast %131 : vector<8x8x64xf32> to vector<4x2x8x64xf32>
    %133 = vector.extract_strided_slice %132 {offsets = [0, 0, 0, 0], sizes = [4, 1, 8, 64], strides = [1, 1, 1, 1]} : vector<4x2x8x64xf32> to vector<4x1x8x64xf32>
    %134 = vector.shape_cast %133 : vector<4x1x8x64xf32> to vector<4x8x64xf32>
    %135 = vector.shape_cast %134 : vector<4x8x64xf32> to vector<4x4x2x64xf32>
    %136 = vector.extract_strided_slice %135 {offsets = [0, 0, 0, 0], sizes = [4, 4, 1, 64], strides = [1, 1, 1, 1]} : vector<4x4x2x64xf32> to vector<4x4x1x64xf32>
    %137 = vector.shape_cast %136 : vector<4x4x1x64xf32> to vector<4x4x64xf32>
    %138 = vector.extract_strided_slice %109 {offsets = [1, 1, 0], sizes = [8, 8, 64], strides = [1, 1, 1]} : vector<10x10x64xf32> to vector<8x8x64xf32>
    %139 = vector.shape_cast %138 : vector<8x8x64xf32> to vector<4x2x8x64xf32>
    %140 = vector.extract_strided_slice %139 {offsets = [0, 0, 0, 0], sizes = [4, 1, 8, 64], strides = [1, 1, 1, 1]} : vector<4x2x8x64xf32> to vector<4x1x8x64xf32>
    %141 = vector.shape_cast %140 : vector<4x1x8x64xf32> to vector<4x8x64xf32>
    %142 = vector.shape_cast %141 : vector<4x8x64xf32> to vector<4x4x2x64xf32>
    %143 = vector.extract_strided_slice %142 {offsets = [0, 0, 0, 0], sizes = [4, 4, 1, 64], strides = [1, 1, 1, 1]} : vector<4x4x2x64xf32> to vector<4x4x1x64xf32>
    %144 = vector.shape_cast %143 : vector<4x4x1x64xf32> to vector<4x4x64xf32>
    %145 = vector.extract_strided_slice %109 {offsets = [1, 2, 0], sizes = [8, 8, 64], strides = [1, 1, 1]} : vector<10x10x64xf32> to vector<8x8x64xf32>
    %146 = vector.shape_cast %145 : vector<8x8x64xf32> to vector<4x2x8x64xf32>
    %147 = vector.extract_strided_slice %146 {offsets = [0, 0, 0, 0], sizes = [4, 1, 8, 64], strides = [1, 1, 1, 1]} : vector<4x2x8x64xf32> to vector<4x1x8x64xf32>
    %148 = vector.shape_cast %147 : vector<4x1x8x64xf32> to vector<4x8x64xf32>
    %149 = vector.shape_cast %148 : vector<4x8x64xf32> to vector<4x4x2x64xf32>
    %150 = vector.extract_strided_slice %149 {offsets = [0, 0, 0, 0], sizes = [4, 4, 1, 64], strides = [1, 1, 1, 1]} : vector<4x4x2x64xf32> to vector<4x4x1x64xf32>
    %151 = vector.shape_cast %150 : vector<4x4x1x64xf32> to vector<4x4x64xf32>
    %152 = vector.extract_strided_slice %109 {offsets = [2, 0, 0], sizes = [8, 8, 64], strides = [1, 1, 1]} : vector<10x10x64xf32> to vector<8x8x64xf32>
    %153 = vector.shape_cast %152 : vector<8x8x64xf32> to vector<4x2x8x64xf32>
    %154 = vector.extract_strided_slice %153 {offsets = [0, 0, 0, 0], sizes = [4, 1, 8, 64], strides = [1, 1, 1, 1]} : vector<4x2x8x64xf32> to vector<4x1x8x64xf32>
    %155 = vector.shape_cast %154 : vector<4x1x8x64xf32> to vector<4x8x64xf32>
    %156 = vector.shape_cast %155 : vector<4x8x64xf32> to vector<4x4x2x64xf32>
    %157 = vector.extract_strided_slice %156 {offsets = [0, 0, 0, 0], sizes = [4, 4, 1, 64], strides = [1, 1, 1, 1]} : vector<4x4x2x64xf32> to vector<4x4x1x64xf32>
    %158 = vector.shape_cast %157 : vector<4x4x1x64xf32> to vector<4x4x64xf32>
    %159 = vector.extract_strided_slice %109 {offsets = [2, 1, 0], sizes = [8, 8, 64], strides = [1, 1, 1]} : vector<10x10x64xf32> to vector<8x8x64xf32>
    %160 = vector.shape_cast %159 : vector<8x8x64xf32> to vector<4x2x8x64xf32>
    %161 = vector.extract_strided_slice %160 {offsets = [0, 0, 0, 0], sizes = [4, 1, 8, 64], strides = [1, 1, 1, 1]} : vector<4x2x8x64xf32> to vector<4x1x8x64xf32>
    %162 = vector.shape_cast %161 : vector<4x1x8x64xf32> to vector<4x8x64xf32>
    %163 = vector.shape_cast %162 : vector<4x8x64xf32> to vector<4x4x2x64xf32>
    %164 = vector.extract_strided_slice %163 {offsets = [0, 0, 0, 0], sizes = [4, 4, 1, 64], strides = [1, 1, 1, 1]} : vector<4x4x2x64xf32> to vector<4x4x1x64xf32>
    %165 = vector.shape_cast %164 : vector<4x4x1x64xf32> to vector<4x4x64xf32>
    %166 = vector.extract_strided_slice %109 {offsets = [2, 2, 0], sizes = [8, 8, 64], strides = [1, 1, 1]} : vector<10x10x64xf32> to vector<8x8x64xf32>
    %167 = vector.shape_cast %166 : vector<8x8x64xf32> to vector<4x2x8x64xf32>
    %168 = vector.extract_strided_slice %167 {offsets = [0, 0, 0, 0], sizes = [4, 1, 8, 64], strides = [1, 1, 1, 1]} : vector<4x2x8x64xf32> to vector<4x1x8x64xf32>
    %169 = vector.shape_cast %168 : vector<4x1x8x64xf32> to vector<4x8x64xf32>
    %170 = vector.shape_cast %169 : vector<4x8x64xf32> to vector<4x4x2x64xf32>
    %171 = vector.extract_strided_slice %170 {offsets = [0, 0, 0, 0], sizes = [4, 4, 1, 64], strides = [1, 1, 1, 1]} : vector<4x4x2x64xf32> to vector<4x4x1x64xf32>
    %172 = vector.shape_cast %171 : vector<4x4x1x64xf32> to vector<4x4x64xf32>
    %173 = tpu.concatenate %116, %123, %130, %137, %144, %151, %158, %165, %172 in 2 : vector<4x4x64xf32>, vector<4x4x64xf32>, vector<4x4x64xf32>, vector<4x4x64xf32>, vector<4x4x64xf32>, vector<4x4x64xf32>, vector<4x4x64xf32>, vector<4x4x64xf32>, vector<4x4x64xf32> -> vector<4x4x576xf32>
    %174 = vector.shape_cast %173 : vector<4x4x576xf32> to vector<16x576xf32>
    %175 = arith.truncf %174 : vector<16x576xf32> to vector<16x576xbf16>
    %cst_24 = arith.constant dense<0.000000e+00> : vector<16x64xf32>
    %176 = tpu.matmul %175, %104, %cst_24 {dimension_numbers = #tpu.dot_dimension_numbers<[1], [0], [0], [1], [0, 0, 1, 1], [], []>} : vector<16x576xbf16>, vector<576x64xbf16>, vector<16x64xf32> -> vector<16x64xf32>
    %177 = vector.broadcast %105 : vector<1x64xf32> to vector<16x64xf32>
    %178 = arith.addf %176, %177 : vector<16x64xf32>
    %cst_25 = arith.constant 0.000000e+00 : f32
    %179 = vector.broadcast %cst_25 : f32 to vector<16x64xf32>
    %180 = arith.maximumf %178, %179 : vector<16x64xf32>
    %181 = vector.shape_cast %180 : vector<16x64xf32> to vector<4x4x64xf32>
    %c0_26 = arith.constant 0 : index
    %c0_27 = arith.constant 0 : index
    %182 = vector.load %arg8[%c0_26, %c0_27] : memref<576x64xbf16, #tpu.memory_space<vmem>>, vector<576x64xbf16>
    %c0_28 = arith.constant 0 : index
    %c0_29 = arith.constant 0 : index
    %183 = vector.load %arg9[%c0_28, %c0_29] : memref<1x64xf32, #tpu.memory_space<vmem>>, vector<1x64xf32>
    %cst_30 = arith.constant 0.000000e+00 : f32
    %184 = vector.broadcast %cst_30 : f32 to vector<1x4x64xf32>
    %185 = tpu.concatenate %184, %181, %184 in 0 : vector<1x4x64xf32>, vector<4x4x64xf32>, vector<1x4x64xf32> -> vector<6x4x64xf32>
    %cst_31 = arith.constant 0.000000e+00 : f32
    %186 = vector.broadcast %cst_31 : f32 to vector<6x1x64xf32>
    %187 = tpu.concatenate %186, %185, %186 in 1 : vector<6x1x64xf32>, vector<6x4x64xf32>, vector<6x1x64xf32> -> vector<6x6x64xf32>
    %188 = vector.extract_strided_slice %187 {offsets = [0, 0, 0], sizes = [4, 4, 64], strides = [1, 1, 1]} : vector<6x6x64xf32> to vector<4x4x64xf32>
    %189 = vector.extract_strided_slice %187 {offsets = [0, 1, 0], sizes = [4, 4, 64], strides = [1, 1, 1]} : vector<6x6x64xf32> to vector<4x4x64xf32>
    %190 = vector.extract_strided_slice %187 {offsets = [0, 2, 0], sizes = [4, 4, 64], strides = [1, 1, 1]} : vector<6x6x64xf32> to vector<4x4x64xf32>
    %191 = vector.extract_strided_slice %187 {offsets = [1, 0, 0], sizes = [4, 4, 64], strides = [1, 1, 1]} : vector<6x6x64xf32> to vector<4x4x64xf32>
    %192 = vector.extract_strided_slice %187 {offsets = [1, 1, 0], sizes = [4, 4, 64], strides = [1, 1, 1]} : vector<6x6x64xf32> to vector<4x4x64xf32>
    %193 = vector.extract_strided_slice %187 {offsets = [1, 2, 0], sizes = [4, 4, 64], strides = [1, 1, 1]} : vector<6x6x64xf32> to vector<4x4x64xf32>
    %194 = vector.extract_strided_slice %187 {offsets = [2, 0, 0], sizes = [4, 4, 64], strides = [1, 1, 1]} : vector<6x6x64xf32> to vector<4x4x64xf32>
    %195 = vector.extract_strided_slice %187 {offsets = [2, 1, 0], sizes = [4, 4, 64], strides = [1, 1, 1]} : vector<6x6x64xf32> to vector<4x4x64xf32>
    %196 = vector.extract_strided_slice %187 {offsets = [2, 2, 0], sizes = [4, 4, 64], strides = [1, 1, 1]} : vector<6x6x64xf32> to vector<4x4x64xf32>
    %197 = tpu.concatenate %188, %189, %190, %191, %192, %193, %194, %195, %196 in 2 : vector<4x4x64xf32>, vector<4x4x64xf32>, vector<4x4x64xf32>, vector<4x4x64xf32>, vector<4x4x64xf32>, vector<4x4x64xf32>, vector<4x4x64xf32>, vector<4x4x64xf32>, vector<4x4x64xf32> -> vector<4x4x576xf32>
    %198 = vector.shape_cast %197 : vector<4x4x576xf32> to vector<16x576xf32>
    %199 = arith.truncf %198 : vector<16x576xf32> to vector<16x576xbf16>
    %cst_32 = arith.constant dense<0.000000e+00> : vector<16x64xf32>
    %200 = tpu.matmul %199, %182, %cst_32 {dimension_numbers = #tpu.dot_dimension_numbers<[1], [0], [0], [1], [0, 0, 1, 1], [], []>} : vector<16x576xbf16>, vector<576x64xbf16>, vector<16x64xf32> -> vector<16x64xf32>
    %201 = vector.broadcast %183 : vector<1x64xf32> to vector<16x64xf32>
    %202 = arith.addf %200, %201 : vector<16x64xf32>
    %cst_33 = arith.constant 0.000000e+00 : f32
    %203 = vector.broadcast %cst_33 : f32 to vector<16x64xf32>
    %204 = arith.maximumf %202, %203 : vector<16x64xf32>
    %205 = vector.shape_cast %204 : vector<16x64xf32> to vector<4x4x64xf32>
    %c0_34 = arith.constant 0 : index
    %c0_35 = arith.constant 0 : index
    %206 = vector.load %arg10[%c0_34, %c0_35] : memref<576x64xbf16, #tpu.memory_space<vmem>>, vector<576x64xbf16>
    %c0_36 = arith.constant 0 : index
    %c0_37 = arith.constant 0 : index
    %207 = vector.load %arg11[%c0_36, %c0_37] : memref<1x64xf32, #tpu.memory_space<vmem>>, vector<1x64xf32>
    %cst_38 = arith.constant 0.000000e+00 : f32
    %208 = vector.broadcast %cst_38 : f32 to vector<1x4x64xf32>
    %209 = tpu.concatenate %208, %205, %208 in 0 : vector<1x4x64xf32>, vector<4x4x64xf32>, vector<1x4x64xf32> -> vector<6x4x64xf32>
    %cst_39 = arith.constant 0.000000e+00 : f32
    %210 = vector.broadcast %cst_39 : f32 to vector<6x1x64xf32>
    %211 = tpu.concatenate %210, %209, %210 in 1 : vector<6x1x64xf32>, vector<6x4x64xf32>, vector<6x1x64xf32> -> vector<6x6x64xf32>
    %212 = vector.extract_strided_slice %211 {offsets = [0, 0, 0], sizes = [4, 4, 64], strides = [1, 1, 1]} : vector<6x6x64xf32> to vector<4x4x64xf32>
    %213 = vector.extract_strided_slice %211 {offsets = [0, 1, 0], sizes = [4, 4, 64], strides = [1, 1, 1]} : vector<6x6x64xf32> to vector<4x4x64xf32>
    %214 = vector.extract_strided_slice %211 {offsets = [0, 2, 0], sizes = [4, 4, 64], strides = [1, 1, 1]} : vector<6x6x64xf32> to vector<4x4x64xf32>
    %215 = vector.extract_strided_slice %211 {offsets = [1, 0, 0], sizes = [4, 4, 64], strides = [1, 1, 1]} : vector<6x6x64xf32> to vector<4x4x64xf32>
    %216 = vector.extract_strided_slice %211 {offsets = [1, 1, 0], sizes = [4, 4, 64], strides = [1, 1, 1]} : vector<6x6x64xf32> to vector<4x4x64xf32>
    %217 = vector.extract_strided_slice %211 {offsets = [1, 2, 0], sizes = [4, 4, 64], strides = [1, 1, 1]} : vector<6x6x64xf32> to vector<4x4x64xf32>
    %218 = vector.extract_strided_slice %211 {offsets = [2, 0, 0], sizes = [4, 4, 64], strides = [1, 1, 1]} : vector<6x6x64xf32> to vector<4x4x64xf32>
    %219 = vector.extract_strided_slice %211 {offsets = [2, 1, 0], sizes = [4, 4, 64], strides = [1, 1, 1]} : vector<6x6x64xf32> to vector<4x4x64xf32>
    %220 = vector.extract_strided_slice %211 {offsets = [2, 2, 0], sizes = [4, 4, 64], strides = [1, 1, 1]} : vector<6x6x64xf32> to vector<4x4x64xf32>
    %221 = tpu.concatenate %212, %213, %214, %215, %216, %217, %218, %219, %220 in 2 : vector<4x4x64xf32>, vector<4x4x64xf32>, vector<4x4x64xf32>, vector<4x4x64xf32>, vector<4x4x64xf32>, vector<4x4x64xf32>, vector<4x4x64xf32>, vector<4x4x64xf32>, vector<4x4x64xf32> -> vector<4x4x576xf32>
    %222 = vector.shape_cast %221 : vector<4x4x576xf32> to vector<16x576xf32>
    %223 = arith.truncf %222 : vector<16x576xf32> to vector<16x576xbf16>
    %cst_40 = arith.constant dense<0.000000e+00> : vector<16x64xf32>
    %224 = tpu.matmul %223, %206, %cst_40 {dimension_numbers = #tpu.dot_dimension_numbers<[1], [0], [0], [1], [0, 0, 1, 1], [], []>} : vector<16x576xbf16>, vector<576x64xbf16>, vector<16x64xf32> -> vector<16x64xf32>
    %225 = vector.broadcast %207 : vector<1x64xf32> to vector<16x64xf32>
    %226 = arith.addf %224, %225 : vector<16x64xf32>
    %cst_41 = arith.constant 0.000000e+00 : f32
    %227 = vector.broadcast %cst_41 : f32 to vector<16x64xf32>
    %228 = arith.maximumf %226, %227 : vector<16x64xf32>
    %229 = vector.shape_cast %228 : vector<16x64xf32> to vector<4x4x64xf32>
    %c0_42 = arith.constant 0 : index
    %c0_43 = arith.constant 0 : index
    %230 = vector.load %arg12[%c0_42, %c0_43] : memref<576x128xbf16, #tpu.memory_space<vmem>>, vector<576x128xbf16>
    %c0_44 = arith.constant 0 : index
    %c0_45 = arith.constant 0 : index
    %231 = vector.load %arg13[%c0_44, %c0_45] : memref<1x128xf32, #tpu.memory_space<vmem>>, vector<1x128xf32>
    %cst_46 = arith.constant 0.000000e+00 : f32
    %232 = vector.broadcast %cst_46 : f32 to vector<1x4x64xf32>
    %233 = tpu.concatenate %232, %229, %232 in 0 : vector<1x4x64xf32>, vector<4x4x64xf32>, vector<1x4x64xf32> -> vector<6x4x64xf32>
    %cst_47 = arith.constant 0.000000e+00 : f32
    %234 = vector.broadcast %cst_47 : f32 to vector<6x1x64xf32>
    %235 = tpu.concatenate %234, %233, %234 in 1 : vector<6x1x64xf32>, vector<6x4x64xf32>, vector<6x1x64xf32> -> vector<6x6x64xf32>
    %236 = vector.extract_strided_slice %235 {offsets = [0, 0, 0], sizes = [4, 4, 64], strides = [1, 1, 1]} : vector<6x6x64xf32> to vector<4x4x64xf32>
    %237 = vector.shape_cast %236 : vector<4x4x64xf32> to vector<2x2x4x64xf32>
    %238 = vector.extract_strided_slice %237 {offsets = [0, 0, 0, 0], sizes = [2, 1, 4, 64], strides = [1, 1, 1, 1]} : vector<2x2x4x64xf32> to vector<2x1x4x64xf32>
    %239 = vector.shape_cast %238 : vector<2x1x4x64xf32> to vector<2x4x64xf32>
    %240 = vector.shape_cast %239 : vector<2x4x64xf32> to vector<2x2x2x64xf32>
    %241 = vector.extract_strided_slice %240 {offsets = [0, 0, 0, 0], sizes = [2, 2, 1, 64], strides = [1, 1, 1, 1]} : vector<2x2x2x64xf32> to vector<2x2x1x64xf32>
    %242 = vector.shape_cast %241 : vector<2x2x1x64xf32> to vector<2x2x64xf32>
    %243 = vector.extract_strided_slice %235 {offsets = [0, 1, 0], sizes = [4, 4, 64], strides = [1, 1, 1]} : vector<6x6x64xf32> to vector<4x4x64xf32>
    %244 = vector.shape_cast %243 : vector<4x4x64xf32> to vector<2x2x4x64xf32>
    %245 = vector.extract_strided_slice %244 {offsets = [0, 0, 0, 0], sizes = [2, 1, 4, 64], strides = [1, 1, 1, 1]} : vector<2x2x4x64xf32> to vector<2x1x4x64xf32>
    %246 = vector.shape_cast %245 : vector<2x1x4x64xf32> to vector<2x4x64xf32>
    %247 = vector.shape_cast %246 : vector<2x4x64xf32> to vector<2x2x2x64xf32>
    %248 = vector.extract_strided_slice %247 {offsets = [0, 0, 0, 0], sizes = [2, 2, 1, 64], strides = [1, 1, 1, 1]} : vector<2x2x2x64xf32> to vector<2x2x1x64xf32>
    %249 = vector.shape_cast %248 : vector<2x2x1x64xf32> to vector<2x2x64xf32>
    %250 = vector.extract_strided_slice %235 {offsets = [0, 2, 0], sizes = [4, 4, 64], strides = [1, 1, 1]} : vector<6x6x64xf32> to vector<4x4x64xf32>
    %251 = vector.shape_cast %250 : vector<4x4x64xf32> to vector<2x2x4x64xf32>
    %252 = vector.extract_strided_slice %251 {offsets = [0, 0, 0, 0], sizes = [2, 1, 4, 64], strides = [1, 1, 1, 1]} : vector<2x2x4x64xf32> to vector<2x1x4x64xf32>
    %253 = vector.shape_cast %252 : vector<2x1x4x64xf32> to vector<2x4x64xf32>
    %254 = vector.shape_cast %253 : vector<2x4x64xf32> to vector<2x2x2x64xf32>
    %255 = vector.extract_strided_slice %254 {offsets = [0, 0, 0, 0], sizes = [2, 2, 1, 64], strides = [1, 1, 1, 1]} : vector<2x2x2x64xf32> to vector<2x2x1x64xf32>
    %256 = vector.shape_cast %255 : vector<2x2x1x64xf32> to vector<2x2x64xf32>
    %257 = vector.extract_strided_slice %235 {offsets = [1, 0, 0], sizes = [4, 4, 64], strides = [1, 1, 1]} : vector<6x6x64xf32> to vector<4x4x64xf32>
    %258 = vector.shape_cast %257 : vector<4x4x64xf32> to vector<2x2x4x64xf32>
    %259 = vector.extract_strided_slice %258 {offsets = [0, 0, 0, 0], sizes = [2, 1, 4, 64], strides = [1, 1, 1, 1]} : vector<2x2x4x64xf32> to vector<2x1x4x64xf32>
    %260 = vector.shape_cast %259 : vector<2x1x4x64xf32> to vector<2x4x64xf32>
    %261 = vector.shape_cast %260 : vector<2x4x64xf32> to vector<2x2x2x64xf32>
    %262 = vector.extract_strided_slice %261 {offsets = [0, 0, 0, 0], sizes = [2, 2, 1, 64], strides = [1, 1, 1, 1]} : vector<2x2x2x64xf32> to vector<2x2x1x64xf32>
    %263 = vector.shape_cast %262 : vector<2x2x1x64xf32> to vector<2x2x64xf32>
    %264 = vector.extract_strided_slice %235 {offsets = [1, 1, 0], sizes = [4, 4, 64], strides = [1, 1, 1]} : vector<6x6x64xf32> to vector<4x4x64xf32>
    %265 = vector.shape_cast %264 : vector<4x4x64xf32> to vector<2x2x4x64xf32>
    %266 = vector.extract_strided_slice %265 {offsets = [0, 0, 0, 0], sizes = [2, 1, 4, 64], strides = [1, 1, 1, 1]} : vector<2x2x4x64xf32> to vector<2x1x4x64xf32>
    %267 = vector.shape_cast %266 : vector<2x1x4x64xf32> to vector<2x4x64xf32>
    %268 = vector.shape_cast %267 : vector<2x4x64xf32> to vector<2x2x2x64xf32>
    %269 = vector.extract_strided_slice %268 {offsets = [0, 0, 0, 0], sizes = [2, 2, 1, 64], strides = [1, 1, 1, 1]} : vector<2x2x2x64xf32> to vector<2x2x1x64xf32>
    %270 = vector.shape_cast %269 : vector<2x2x1x64xf32> to vector<2x2x64xf32>
    %271 = vector.extract_strided_slice %235 {offsets = [1, 2, 0], sizes = [4, 4, 64], strides = [1, 1, 1]} : vector<6x6x64xf32> to vector<4x4x64xf32>
    %272 = vector.shape_cast %271 : vector<4x4x64xf32> to vector<2x2x4x64xf32>
    %273 = vector.extract_strided_slice %272 {offsets = [0, 0, 0, 0], sizes = [2, 1, 4, 64], strides = [1, 1, 1, 1]} : vector<2x2x4x64xf32> to vector<2x1x4x64xf32>
    %274 = vector.shape_cast %273 : vector<2x1x4x64xf32> to vector<2x4x64xf32>
    %275 = vector.shape_cast %274 : vector<2x4x64xf32> to vector<2x2x2x64xf32>
    %276 = vector.extract_strided_slice %275 {offsets = [0, 0, 0, 0], sizes = [2, 2, 1, 64], strides = [1, 1, 1, 1]} : vector<2x2x2x64xf32> to vector<2x2x1x64xf32>
    %277 = vector.shape_cast %276 : vector<2x2x1x64xf32> to vector<2x2x64xf32>
    %278 = vector.extract_strided_slice %235 {offsets = [2, 0, 0], sizes = [4, 4, 64], strides = [1, 1, 1]} : vector<6x6x64xf32> to vector<4x4x64xf32>
    %279 = vector.shape_cast %278 : vector<4x4x64xf32> to vector<2x2x4x64xf32>
    %280 = vector.extract_strided_slice %279 {offsets = [0, 0, 0, 0], sizes = [2, 1, 4, 64], strides = [1, 1, 1, 1]} : vector<2x2x4x64xf32> to vector<2x1x4x64xf32>
    %281 = vector.shape_cast %280 : vector<2x1x4x64xf32> to vector<2x4x64xf32>
    %282 = vector.shape_cast %281 : vector<2x4x64xf32> to vector<2x2x2x64xf32>
    %283 = vector.extract_strided_slice %282 {offsets = [0, 0, 0, 0], sizes = [2, 2, 1, 64], strides = [1, 1, 1, 1]} : vector<2x2x2x64xf32> to vector<2x2x1x64xf32>
    %284 = vector.shape_cast %283 : vector<2x2x1x64xf32> to vector<2x2x64xf32>
    %285 = vector.extract_strided_slice %235 {offsets = [2, 1, 0], sizes = [4, 4, 64], strides = [1, 1, 1]} : vector<6x6x64xf32> to vector<4x4x64xf32>
    %286 = vector.shape_cast %285 : vector<4x4x64xf32> to vector<2x2x4x64xf32>
    %287 = vector.extract_strided_slice %286 {offsets = [0, 0, 0, 0], sizes = [2, 1, 4, 64], strides = [1, 1, 1, 1]} : vector<2x2x4x64xf32> to vector<2x1x4x64xf32>
    %288 = vector.shape_cast %287 : vector<2x1x4x64xf32> to vector<2x4x64xf32>
    %289 = vector.shape_cast %288 : vector<2x4x64xf32> to vector<2x2x2x64xf32>
    %290 = vector.extract_strided_slice %289 {offsets = [0, 0, 0, 0], sizes = [2, 2, 1, 64], strides = [1, 1, 1, 1]} : vector<2x2x2x64xf32> to vector<2x2x1x64xf32>
    %291 = vector.shape_cast %290 : vector<2x2x1x64xf32> to vector<2x2x64xf32>
    %292 = vector.extract_strided_slice %235 {offsets = [2, 2, 0], sizes = [4, 4, 64], strides = [1, 1, 1]} : vector<6x6x64xf32> to vector<4x4x64xf32>
    %293 = vector.shape_cast %292 : vector<4x4x64xf32> to vector<2x2x4x64xf32>
    %294 = vector.extract_strided_slice %293 {offsets = [0, 0, 0, 0], sizes = [2, 1, 4, 64], strides = [1, 1, 1, 1]} : vector<2x2x4x64xf32> to vector<2x1x4x64xf32>
    %295 = vector.shape_cast %294 : vector<2x1x4x64xf32> to vector<2x4x64xf32>
    %296 = vector.shape_cast %295 : vector<2x4x64xf32> to vector<2x2x2x64xf32>
    %297 = vector.extract_strided_slice %296 {offsets = [0, 0, 0, 0], sizes = [2, 2, 1, 64], strides = [1, 1, 1, 1]} : vector<2x2x2x64xf32> to vector<2x2x1x64xf32>
    %298 = vector.shape_cast %297 : vector<2x2x1x64xf32> to vector<2x2x64xf32>
    %299 = tpu.concatenate %242, %249, %256, %263, %270, %277, %284, %291, %298 in 2 : vector<2x2x64xf32>, vector<2x2x64xf32>, vector<2x2x64xf32>, vector<2x2x64xf32>, vector<2x2x64xf32>, vector<2x2x64xf32>, vector<2x2x64xf32>, vector<2x2x64xf32>, vector<2x2x64xf32> -> vector<2x2x576xf32>
    %300 = vector.shape_cast %299 : vector<2x2x576xf32> to vector<4x576xf32>
    %301 = arith.truncf %300 : vector<4x576xf32> to vector<4x576xbf16>
    %cst_48 = arith.constant dense<0.000000e+00> : vector<4x128xf32>
    %302 = tpu.matmul %301, %230, %cst_48 {dimension_numbers = #tpu.dot_dimension_numbers<[1], [0], [0], [1], [0, 0, 1, 1], [], []>} : vector<4x576xbf16>, vector<576x128xbf16>, vector<4x128xf32> -> vector<4x128xf32>
    %303 = vector.broadcast %231 : vector<1x128xf32> to vector<4x128xf32>
    %304 = arith.addf %302, %303 : vector<4x128xf32>
    %cst_49 = arith.constant 0.000000e+00 : f32
    %305 = vector.broadcast %cst_49 : f32 to vector<4x128xf32>
    %306 = arith.maximumf %304, %305 : vector<4x128xf32>
    %307 = vector.shape_cast %306 : vector<4x128xf32> to vector<2x2x128xf32>
    %c0_50 = arith.constant 0 : index
    %c0_51 = arith.constant 0 : index
    %308 = vector.load %arg14[%c0_50, %c0_51] : memref<1152x128xbf16, #tpu.memory_space<vmem>>, vector<1152x128xbf16>
    %c0_52 = arith.constant 0 : index
    %c0_53 = arith.constant 0 : index
    %309 = vector.load %arg15[%c0_52, %c0_53] : memref<1x128xf32, #tpu.memory_space<vmem>>, vector<1x128xf32>
    %cst_54 = arith.constant 0.000000e+00 : f32
    %310 = vector.broadcast %cst_54 : f32 to vector<1x2x128xf32>
    %311 = tpu.concatenate %310, %307, %310 in 0 : vector<1x2x128xf32>, vector<2x2x128xf32>, vector<1x2x128xf32> -> vector<4x2x128xf32>
    %cst_55 = arith.constant 0.000000e+00 : f32
    %312 = vector.broadcast %cst_55 : f32 to vector<4x1x128xf32>
    %313 = tpu.concatenate %312, %311, %312 in 1 : vector<4x1x128xf32>, vector<4x2x128xf32>, vector<4x1x128xf32> -> vector<4x4x128xf32>
    %314 = vector.extract_strided_slice %313 {offsets = [0, 0, 0], sizes = [2, 2, 128], strides = [1, 1, 1]} : vector<4x4x128xf32> to vector<2x2x128xf32>
    %315 = vector.extract_strided_slice %313 {offsets = [0, 1, 0], sizes = [2, 2, 128], strides = [1, 1, 1]} : vector<4x4x128xf32> to vector<2x2x128xf32>
    %316 = vector.extract_strided_slice %313 {offsets = [0, 2, 0], sizes = [2, 2, 128], strides = [1, 1, 1]} : vector<4x4x128xf32> to vector<2x2x128xf32>
    %317 = vector.extract_strided_slice %313 {offsets = [1, 0, 0], sizes = [2, 2, 128], strides = [1, 1, 1]} : vector<4x4x128xf32> to vector<2x2x128xf32>
    %318 = vector.extract_strided_slice %313 {offsets = [1, 1, 0], sizes = [2, 2, 128], strides = [1, 1, 1]} : vector<4x4x128xf32> to vector<2x2x128xf32>
    %319 = vector.extract_strided_slice %313 {offsets = [1, 2, 0], sizes = [2, 2, 128], strides = [1, 1, 1]} : vector<4x4x128xf32> to vector<2x2x128xf32>
    %320 = vector.extract_strided_slice %313 {offsets = [2, 0, 0], sizes = [2, 2, 128], strides = [1, 1, 1]} : vector<4x4x128xf32> to vector<2x2x128xf32>
    %321 = vector.extract_strided_slice %313 {offsets = [2, 1, 0], sizes = [2, 2, 128], strides = [1, 1, 1]} : vector<4x4x128xf32> to vector<2x2x128xf32>
    %322 = vector.extract_strided_slice %313 {offsets = [2, 2, 0], sizes = [2, 2, 128], strides = [1, 1, 1]} : vector<4x4x128xf32> to vector<2x2x128xf32>
    %323 = tpu.concatenate %314, %315, %316, %317, %318, %319, %320, %321, %322 in 2 : vector<2x2x128xf32>, vector<2x2x128xf32>, vector<2x2x128xf32>, vector<2x2x128xf32>, vector<2x2x128xf32>, vector<2x2x128xf32>, vector<2x2x128xf32>, vector<2x2x128xf32>, vector<2x2x128xf32> -> vector<2x2x1152xf32>
    %324 = vector.shape_cast %323 : vector<2x2x1152xf32> to vector<4x1152xf32>
    %325 = arith.truncf %324 : vector<4x1152xf32> to vector<4x1152xbf16>
    %cst_56 = arith.constant dense<0.000000e+00> : vector<4x128xf32>
    %326 = tpu.matmul %325, %308, %cst_56 {dimension_numbers = #tpu.dot_dimension_numbers<[1], [0], [0], [1], [0, 0, 1, 1], [], []>} : vector<4x1152xbf16>, vector<1152x128xbf16>, vector<4x128xf32> -> vector<4x128xf32>
    %327 = vector.broadcast %309 : vector<1x128xf32> to vector<4x128xf32>
    %328 = arith.addf %326, %327 : vector<4x128xf32>
    %cst_57 = arith.constant 0.000000e+00 : f32
    %329 = vector.broadcast %cst_57 : f32 to vector<4x128xf32>
    %330 = arith.maximumf %328, %329 : vector<4x128xf32>
    %331 = vector.shape_cast %330 : vector<4x128xf32> to vector<2x2x128xf32>
    %c0_58 = arith.constant 0 : index
    %c0_59 = arith.constant 0 : index
    %332 = vector.load %arg16[%c0_58, %c0_59] : memref<1152x128xbf16, #tpu.memory_space<vmem>>, vector<1152x128xbf16>
    %c0_60 = arith.constant 0 : index
    %c0_61 = arith.constant 0 : index
    %333 = vector.load %arg17[%c0_60, %c0_61] : memref<1x128xf32, #tpu.memory_space<vmem>>, vector<1x128xf32>
    %cst_62 = arith.constant 0.000000e+00 : f32
    %334 = vector.broadcast %cst_62 : f32 to vector<1x2x128xf32>
    %335 = tpu.concatenate %334, %331, %334 in 0 : vector<1x2x128xf32>, vector<2x2x128xf32>, vector<1x2x128xf32> -> vector<4x2x128xf32>
    %cst_63 = arith.constant 0.000000e+00 : f32
    %336 = vector.broadcast %cst_63 : f32 to vector<4x1x128xf32>
    %337 = tpu.concatenate %336, %335, %336 in 1 : vector<4x1x128xf32>, vector<4x2x128xf32>, vector<4x1x128xf32> -> vector<4x4x128xf32>
    %338 = vector.extract_strided_slice %337 {offsets = [0, 0, 0], sizes = [2, 2, 128], strides = [1, 1, 1]} : vector<4x4x128xf32> to vector<2x2x128xf32>
    %339 = vector.extract_strided_slice %337 {offsets = [0, 1, 0], sizes = [2, 2, 128], strides = [1, 1, 1]} : vector<4x4x128xf32> to vector<2x2x128xf32>
    %340 = vector.extract_strided_slice %337 {offsets = [0, 2, 0], sizes = [2, 2, 128], strides = [1, 1, 1]} : vector<4x4x128xf32> to vector<2x2x128xf32>
    %341 = vector.extract_strided_slice %337 {offsets = [1, 0, 0], sizes = [2, 2, 128], strides = [1, 1, 1]} : vector<4x4x128xf32> to vector<2x2x128xf32>
    %342 = vector.extract_strided_slice %337 {offsets = [1, 1, 0], sizes = [2, 2, 128], strides = [1, 1, 1]} : vector<4x4x128xf32> to vector<2x2x128xf32>
    %343 = vector.extract_strided_slice %337 {offsets = [1, 2, 0], sizes = [2, 2, 128], strides = [1, 1, 1]} : vector<4x4x128xf32> to vector<2x2x128xf32>
    %344 = vector.extract_strided_slice %337 {offsets = [2, 0, 0], sizes = [2, 2, 128], strides = [1, 1, 1]} : vector<4x4x128xf32> to vector<2x2x128xf32>
    %345 = vector.extract_strided_slice %337 {offsets = [2, 1, 0], sizes = [2, 2, 128], strides = [1, 1, 1]} : vector<4x4x128xf32> to vector<2x2x128xf32>
    %346 = vector.extract_strided_slice %337 {offsets = [2, 2, 0], sizes = [2, 2, 128], strides = [1, 1, 1]} : vector<4x4x128xf32> to vector<2x2x128xf32>
    %347 = tpu.concatenate %338, %339, %340, %341, %342, %343, %344, %345, %346 in 2 : vector<2x2x128xf32>, vector<2x2x128xf32>, vector<2x2x128xf32>, vector<2x2x128xf32>, vector<2x2x128xf32>, vector<2x2x128xf32>, vector<2x2x128xf32>, vector<2x2x128xf32>, vector<2x2x128xf32> -> vector<2x2x1152xf32>
    %348 = vector.shape_cast %347 : vector<2x2x1152xf32> to vector<4x1152xf32>
    %349 = arith.truncf %348 : vector<4x1152xf32> to vector<4x1152xbf16>
    %cst_64 = arith.constant dense<0.000000e+00> : vector<4x128xf32>
    %350 = tpu.matmul %349, %332, %cst_64 {dimension_numbers = #tpu.dot_dimension_numbers<[1], [0], [0], [1], [0, 0, 1, 1], [], []>} : vector<4x1152xbf16>, vector<1152x128xbf16>, vector<4x128xf32> -> vector<4x128xf32>
    %351 = vector.broadcast %333 : vector<1x128xf32> to vector<4x128xf32>
    %352 = arith.addf %350, %351 : vector<4x128xf32>
    %cst_65 = arith.constant 0.000000e+00 : f32
    %353 = vector.broadcast %cst_65 : f32 to vector<4x128xf32>
    %354 = arith.maximumf %352, %353 : vector<4x128xf32>
    %355 = vector.shape_cast %354 : vector<4x128xf32> to vector<2x2x128xf32>
    %356 = vector.shape_cast %355 : vector<2x2x128xf32> to vector<1x2x2x128xf32>
    %c0_66 = arith.constant 0 : index
    %c0_67 = arith.constant 0 : index
    %c0_68 = arith.constant 0 : index
    %c0_69 = arith.constant 0 : index
    %357 = vector.load %arg18[%c0_66, %c0_67, %c0_68, %c0_69] : memref<1x2x2x128xf32, #tpu.memory_space<vmem>>, vector<1x2x2x128xf32>
    tpu.vector_store %arg18[%c0_66, %c0_67, %c0_68, %c0_69], %356 {strides = array<i32>} : memref<1x2x2x128xf32, #tpu.memory_space<vmem>>, vector<1x2x2x128xf32>,
    return
  }
  func.func @transform_0(%arg0: i32) -> (i32, i32, i32, i32) {
    %c0_i32 = arith.constant 0 : i32
    %c0_i32_0 = arith.constant 0 : i32
    %c0_i32_1 = arith.constant 0 : i32
    %c0_i32_2 = arith.constant 0 : i32
    return %arg0, %c0_i32, %c0_i32_0, %c0_i32_1 : i32, i32, i32, i32
  }
  func.func @transform_1(%arg0: i32) -> (i32, i32) {
    %c0_i32 = arith.constant 0 : i32
    %c0_i32_0 = arith.constant 0 : i32
    %c0_i32_1 = arith.constant 0 : i32
    return %c0_i32, %c0_i32_0 : i32, i32
  }
  func.func @transform_2(%arg0: i32) -> (i32, i32) {
    %c0_i32 = arith.constant 0 : i32
    %c0_i32_0 = arith.constant 0 : i32
    %c0_i32_1 = arith.constant 0 : i32
    return %c0_i32, %c0_i32_0 : i32, i32
  }
  func.func @transform_3(%arg0: i32) -> (i32, i32) {
    %c0_i32 = arith.constant 0 : i32
    %c0_i32_0 = arith.constant 0 : i32
    %c0_i32_1 = arith.constant 0 : i32
    return %c0_i32, %c0_i32_0 : i32, i32
  }
  func.func @transform_4(%arg0: i32) -> (i32, i32) {
    %c0_i32 = arith.constant 0 : i32
    %c0_i32_0 = arith.constant 0 : i32
    %c0_i32_1 = arith.constant 0 : i32
    return %c0_i32, %c0_i32_0 : i32, i32
  }
  func.func @transform_5(%arg0: i32) -> (i32, i32) {
    %c0_i32 = arith.constant 0 : i32
    %c0_i32_0 = arith.constant 0 : i32
    %c0_i32_1 = arith.constant 0 : i32
    return %c0_i32, %c0_i32_0 : i32, i32
  }
  func.func @transform_6(%arg0: i32) -> (i32, i32) {
    %c0_i32 = arith.constant 0 : i32
    %c0_i32_0 = arith.constant 0 : i32
    %c0_i32_1 = arith.constant 0 : i32
    return %c0_i32, %c0_i32_0 : i32, i32
  }
  func.func @transform_7(%arg0: i32) -> (i32, i32) {
    %c0_i32 = arith.constant 0 : i32
    %c0_i32_0 = arith.constant 0 : i32
    %c0_i32_1 = arith.constant 0 : i32
    return %c0_i32, %c0_i32_0 : i32, i32
  }
  func.func @transform_8(%arg0: i32) -> (i32, i32) {
    %c0_i32 = arith.constant 0 : i32
    %c0_i32_0 = arith.constant 0 : i32
    %c0_i32_1 = arith.constant 0 : i32
    return %c0_i32, %c0_i32_0 : i32, i32
  }
  func.func @transform_9(%arg0: i32) -> (i32, i32) {
    %c0_i32 = arith.constant 0 : i32
    %c0_i32_0 = arith.constant 0 : i32
    %c0_i32_1 = arith.constant 0 : i32
    return %c0_i32, %c0_i32_0 : i32, i32
  }
  func.func @transform_10(%arg0: i32) -> (i32, i32) {
    %c0_i32 = arith.constant 0 : i32
    %c0_i32_0 = arith.constant 0 : i32
    %c0_i32_1 = arith.constant 0 : i32
    return %c0_i32, %c0_i32_0 : i32, i32
  }
  func.func @transform_11(%arg0: i32) -> (i32, i32) {
    %c0_i32 = arith.constant 0 : i32
    %c0_i32_0 = arith.constant 0 : i32
    %c0_i32_1 = arith.constant 0 : i32
    return %c0_i32, %c0_i32_0 : i32, i32
  }
  func.func @transform_12(%arg0: i32) -> (i32, i32) {
    %c0_i32 = arith.constant 0 : i32
    %c0_i32_0 = arith.constant 0 : i32
    %c0_i32_1 = arith.constant 0 : i32
    return %c0_i32, %c0_i32_0 : i32, i32
  }
  func.func @transform_13(%arg0: i32) -> (i32, i32) {
    %c0_i32 = arith.constant 0 : i32
    %c0_i32_0 = arith.constant 0 : i32
    %c0_i32_1 = arith.constant 0 : i32
    return %c0_i32, %c0_i32_0 : i32, i32
  }
  func.func @transform_14(%arg0: i32) -> (i32, i32) {
    %c0_i32 = arith.constant 0 : i32
    %c0_i32_0 = arith.constant 0 : i32
    %c0_i32_1 = arith.constant 0 : i32
    return %c0_i32, %c0_i32_0 : i32, i32
  }
  func.func @transform_15(%arg0: i32) -> (i32, i32) {
    %c0_i32 = arith.constant 0 : i32
    %c0_i32_0 = arith.constant 0 : i32
    %c0_i32_1 = arith.constant 0 : i32
    return %c0_i32, %c0_i32_0 : i32, i32
  }
  func.func @transform_16(%arg0: i32) -> (i32, i32) {
    %c0_i32 = arith.constant 0 : i32
    %c0_i32_0 = arith.constant 0 : i32
    %c0_i32_1 = arith.constant 0 : i32
    return %c0_i32, %c0_i32_0 : i32, i32
  }
  func.func @transform_17(%arg0: i32) -> (i32, i32, i32, i32) {
    %c0_i32 = arith.constant 0 : i32
    %c0_i32_0 = arith.constant 0 : i32
    %c0_i32_1 = arith.constant 0 : i32
    %c0_i32_2 = arith.constant 0 : i32
    return %arg0, %c0_i32, %c0_i32_0, %c0_i32_1 : i32, i32, i32, i32
  }
}

</mosaic_0001>

<bundles_post_ra>
// kernel: tpu_custom_call.1
= control target key start
LH: loop header
LB: loop body
LE: loop exit
PB: predicated region body
PF: predicated region fallthrough
CT: control target
= control target key end

     0   :  { %s17136_s0 = inlined_call_operand.vmem [shape: f32[2,16,16,3], index: 0, kind: input, shape index: {}]   ;;  %s17137_s1 = inlined_call_operand.vmem [shape: bf16[27,64], index: 1, kind: input, shape index: {}]   ;;  %s17138_s2 = inlined_call_operand.vmem [shape: f32[1,64], index: 2, kind: input, shape index: {}]   ;;  %s17139_s3 = inlined_call_operand.vmem [shape: bf16[576,64], index: 3, kind: input, shape index: {}]   ;;  %s17140_s4 = inlined_call_operand.vmem [shape: f32[1,64], index: 4, kind: input, shape index: {}]   ;;  %s17141_s5 = inlined_call_operand.vmem [shape: bf16[576,64], index: 5, kind: input, shape index: {}]   ;;  %s17142_s6 = inlined_call_operand.vmem [shape: f32[1,64], index: 6, kind: input, shape index: {}]   ;;  %s17143_s7 = inlined_call_operand.vmem [shape: bf16[576,64], index: 7, kind: input, shape index: {}]   ;;  %s17144_s8 = inlined_call_operand.vmem [shape: f32[1,64], index: 8, kind: input, shape index: {}]   ;;  %s17145_s9 = inlined_call_operand.vmem [shape: bf16[576,64], index: 9, kind: input, shape index: {}]   ;;  %s17146_s10 = inlined_call_operand.vmem [shape: f32[1,64], index: 10, kind: input, shape index: {}]   ;;  %s17147_s11 = inlined_call_operand.vmem [shape: bf16[576,128], index: 11, kind: input, shape index: {}]   ;;  %s17148_s12 = inlined_call_operand.vmem [shape: f32[1,128], index: 12, kind: input, shape index: {}]   ;;  %s17149_s13 = inlined_call_operand.vmem [shape: bf16[1152,128], index: 13, kind: input, shape index: {}]   ;;  %s17150_s14 = inlined_call_operand.vmem [shape: f32[1,128], index: 14, kind: input, shape index: {}]   ;;  %s17151_s15 = inlined_call_operand.vmem [shape: bf16[1152,128], index: 15, kind: input, shape index: {}]   ;;  %s17152_s16 = inlined_call_operand.vmem [shape: f32[1,128], index: 16, kind: input, shape index: {}]   ;;  %s17153_s17 = inlined_call_operand.hbm [shape: f32[2,2,2,128], index: 17, kind: output, shape index: {}]  }
   0x1   :  { %17405 = sst [smem:[#allocation131_spill]] %s17136_s0 }
   0x2   :  { %17406 = sst [smem:[#allocation132_spill]] %s17137_s1 }
   0x3   :  { %17407 = sst [smem:[#allocation133_spill]] %s17138_s2 }
   0x4   :  { %17408 = sst [smem:[#allocation134_spill]] %s17139_s3 }
   0x5   :  { %17409 = sst [smem:[#allocation135_spill]] %s17140_s4 }
   0x6   :  { %22 = vsyncpa [#allocation3], 0 }
   0x7   :  { %24 = vsyncpa [#allocation3 + $0x1], 0  ;;  %s11487_s24 = smov 0   ;;  %s11489_s25 = smov 0  }
   0x8   :  { %s11491_s26 = smov 0   ;;  %s11493_s27 = smov 0  }
   0x9 LB: > { %17410 = sst [smem:[#allocation5_spill]] %s11375_s26  ;;  %s11508_s28 = sadd.s32 4294967295, %s11379_s27   ;;  %s11379_s27 = sphi %s11493_s27, %s18004_s27   ;;  %s11375_s26 = sphi %s11491_s26, %s18006_s26   ;;  %s11371_s25 = sphi %s11489_s25, %s18008_s25   ;;  %s11367_s24 = sphi %s11487_s24, %s18007_s24  }
   0xa   : > { %s9694_s29 = sadd.s32 4294967294, %s11379_s27   ;;  %s11512_s0 = sadd.s32 1, %s11379_s27  }
   0xb   : > { %17411 = sst [smem:[#allocation6_spill]] %s11512_s0  ;;  %s399_s30 = sadd.s32 1, %s11375_s26 }
   0xc   : > { %s396_s18 = ssub.s32 %s11379_s27, %s11512_s0  ;;  %p409_p0 = scmp.ne.s32.totalorder %s11375_s26, %s11371_s25 }
   0xd   : > { %p397_p1 = scmp.eq.s32.totalorder %s396_s18, 0  ;;  %p410_p2 = scmp.eq.s32.totalorder %s11508_s28, 1 }
   0xe   : > { %p415_p3 = scmp.ne.s32.totalorder %s11371_s25, %s11367_s24  ;;  %p416_p4 = scmp.eq.s32.totalorder %s9694_s29, 1 }
   0xf   : > { %s11523_s19 = scalar_select %p397_p1, %s11375_s26, %s399_s30  }
  0x10   : > { %p11525_p5 = por %p410_p2, %p409_p0  ;;  %p11529_p6 = por %p416_p4, %p415_p3 }
  0x11   : > { %17412 = sst [smem:[#allocation7_spill]] %s11523_s19  ;;  %p9697_p7 = scmp.ge.s32.totalorder %s11379_s27, 1 }
  0x12   : > { %p490_p8 = scmp.lt.s32.totalorder %s11379_s27, 3 }
  0x14   : > { %p491_p9 = pnand %p9697_p7, %p490_p8 }
  0x16   : > { %494 = sbr.rel (%p491_p9) target bundleno = 3118 (0xc2e), region = 88 }
  0x1b   : > { %p542_p10 = scmp.lt.s32.totalorder %s11508_s28, 1  ;;  %v748_v0 = vlaneseq  ;;  %v11381_v1 = vmov 1983009808   ;;  %vm618_vm0 = vcmask 1040384   ;;  %v17155_v6 = vmov 0.0   ;;  %s17415_s30 = sld [smem:[#allocation131_spill]] }
  0x1c   : > { %v746_v2 = vunpack.c.l.s4 %v11381_v1  ;;  %v11540_v7 = vrot.slane %v17155_v6, 7  ;;  %vm2154_vm1 = vcmask 1041409   ;;  %vm1080_vm2 = vcmask 1042434   ;;  %s11385_s23 = smov 6   ;;  %s17317_s29 = smov 15  }
  0x1d   : > { %s543_s21 = scalar_select %p542_p10, %s11508_s28, 1  ;;  %v749_v3 = vshrl.u32 %v748_v0, 7  ;;  %vm2157_vm3 = vcmask 1043459   ;;  %vm1082_vm4 = vcmask 1044484   ;;  %vm2160_vm5 = vcmask 1045509   ;;  %vm12505_vm8 = vmor %vm618_vm0, %vm1080_vm2 }
  0x1e   : > { %v747_v4 = vunpack.c.0.s8 %v746_v2  ;;  %v11556_v12 = vsel %vm618_vm0, 0.0, %v11540_v7  ;;  %v11560_v13 = vsel %vm618_vm0, %v11540_v7, 0.0  ;;  %vm1084_vm6 = vcmask 1046534   ;;  %vm12553_vm9 = vmor %vm12505_vm8, %vm1082_vm4  ;;  %s17900_s2 = sld [smem:[#allocation133_spill]]  ;;  %s539_s0 = sand.u32 1, %s11371_s25  }
  0x1f   : > { %s10117_s22 = sshll.u32 %s543_s21, 8  ;;  %v11537_v5 = vsub.s32 0, %v749_v3  ;;  %17416 = vst [vmem:[#allocation8_spill] sm:$0xff] %v11556_v12  ;;  %17417 = vst [vmem:[#allocation9_spill] sm:$0xff] %v11560_v13  ;;  %vm2163_vm7 = vcmask 1047559   ;;  %s11383_s21 = smov 9  }
  0x20   : > { %v11552_v11 = vsub.s32 %v747_v4, %v749_v3  ;;  %vm12587_vm10 = vmor %vm12553_vm9, %vm1084_vm6  ;;  %vm3615_vm11 = vcmask 23552   ;;  %vm3624_vm12 = vcmask 48128   ;;  %vm3633_vm13 = vcmask 72704   ;;  %s17903_s3 = sld [smem:[#allocation134_spill]] }
  0x21   : > { %s11545_s18 = scalar_lea.vmem %s17415_s30, %s10117_s22  ;;  %s17313_s22 = smov 18   ;;  %vm3642_vm14 = vcmask 97280   ;;  %vm3651_vm15 = vcmask 121856   ;;  %vm3678_vm8 = vcmask 195584   ;;  %vm3708_vm9 = vcmask 220160  }
  0x22   : > { %v556_v8 = vld [vmem:[%s11545_s18 + $0x40] sm:$0xff]  ;;  %v11549_v9 = vld [vmem:[%s11545_s18 + $0x48] sm:$0xff]  ;;  %v11584_v26 = vrot.slane %v11556_v12, %v11552_v11  ;;  %s17315_s30 = smov 24   ;;  %s17909_s4 = sld [smem:[#allocation135_spill]] }
  0x23   : > { %v560_v10 = vld [vmem:[%s11545_s18 + $0x60] sm:$0xff]  ;;  %v11565_v15 = vld [vmem:[%s11545_s18 + $0x68] sm:$0xff]  ;;  %v633_v16 = vrot.slane %v556_v8, 7  ;;  %v17165_v17 = vrot.slane %v11549_v9, 7 }
  0x24   : > { %v639_v18 = vrot.slane %v560_v10, 7  ;;  %v11569_v19 = vld [vmem:[%s11545_s18] sm:$0xff]  ;;  %v11572_v20 = vld [vmem:[%s11545_s18 + $0x8] sm:$0xff]  ;;  %v17164_v22 = vrot.slane %v11565_v15, 7  ;;  %17418 = vst [vmem:[#allocation10_spill] sm:$0xff] %v11584_v26 }
  0x25   : > { %v11578_v23 = vld [vmem:[%s11545_s18 + $0x20] sm:$0xff]  ;;  %v621_v24 = vrot.slane %v11569_v19, 7  ;;  %v17166_v25 = vrot.slane %v11572_v20, 7  ;;  %v635_v27 = vsel %vm618_vm0, %v633_v16, %v17165_v17  ;;  %v707_v28 = vsel %vm618_vm0, 0.0, %v633_v16 }
  0x26   : > { %v709_v29 = vsel %vm618_vm0, 0.0, %v639_v18  ;;  %v627_v30 = vrot.slane %v11578_v23, 7  ;;  %v641_v31 = vsel %vm618_vm0, %v639_v18, %v17164_v22  ;;  %v1362_v32 = vcombine.high %v707_v28, %v707_v28 }
  0x27   : > { %v11596_v33 = vrot.slane %v707_v28, %v11552_v11  ;;  %v1379_v34 = vcombine.high %v635_v27, %v635_v27  ;;  %v11599_v35 = vrot.slane %v635_v27, %v11552_v11  ;;  %v1396_v36 = vcombine.high %v709_v29, %v709_v29 }
  0x28   : > { %v11602_v37 = vrot.slane %v709_v29, %v11552_v11  ;;  %v1413_v38 = vcombine.high %v641_v31, %v641_v31  ;;  %v11605_v39 = vrot.slane %v1362_v32, %v11552_v11  ;;  %v11615_v42 = vrot.slane %v641_v31, %v11552_v11 }
  0x29   : > { %17419 = vst [vmem:[#allocation11_spill] sm:$0xff] %v11596_v33  ;;  %17420 = vst [vmem:[#allocation12_spill] sm:$0xff] %v11599_v35  ;;  %v11609_v40 = vcombine.high %v11596_v33, %v11596_v33  ;;  %v11612_v41 = vrot.slane %v1379_v34, %v11552_v11  ;;  %v11619_v43 = vcombine.high %v11599_v35, %v11599_v35 }
  0x2a   : > { %17421 = vst [vmem:[#allocation13_spill] sm:$0xff] %v11602_v37  ;;  %17422 = vst [vmem:[#allocation14_spill] sm:$0xff] %v11605_v39  ;;  %v11622_v44 = vrot.slane %v1396_v36, %v11552_v11  ;;  %v11626_v45 = vcombine.high %v11602_v37, %v11602_v37  ;;  %v11629_v46 = vrot.slane %v1413_v38, %v11552_v11  ;;  %v11719_v36 = vld [vmem:[%s11545_s18 + $0x28] sm:$0xff] }
  0x2b   : > { %17423 = vst [vmem:[#allocation15_spill] sm:$0xff] %v11609_v40  ;;  %17424 = vst [vmem:[#allocation16_spill] sm:$0xff] %v11612_v41  ;;  %v11633_v47 = vcombine.high %v11605_v39, %v11605_v39  ;;  %v11637_v48 = vcombine.high %v11612_v41, %v11612_v41  ;;  %v11641_v49 = vcombine.high %v11615_v42, %v11615_v42  ;;  %v17163_v50 = vrot.slane %v11609_v40, 7 }
  0x2c   : > { %17425 = vst [vmem:[#allocation17_spill] sm:$0xff] %v11615_v42  ;;  %17426 = vst [vmem:[#allocation18_spill] sm:$0xff] %v11619_v43  ;;  %v11646_v51 = vcombine.high %v11622_v44, %v11622_v44  ;;  %v11650_v52 = vcombine.high %v11629_v46, %v11629_v46  ;;  %v17161_v57 = vrot.slane %v11619_v43, 7  ;;  %v17160_v59 = vrot.slane %v11626_v45, 7 }
  0x2d   : > { %17427 = vst [vmem:[#allocation19_spill] sm:$0xff] %v11622_v44  ;;  %17428 = vst [vmem:[#allocation20_spill] sm:$0xff] %v11626_v45  ;;  %v11656_v55 = vrot.slane %v17163_v50, 2  ;;  %v17162_v56 = vrot.slane %v11633_v47, 7  ;;  %v17158_v1 = vrot.slane %v11641_v49, 7  ;;  %v2737_v10 = vrot.slane %v11596_v33, %v11537_v5 }
  0x2e   : > { %17429 = vst [vmem:[#allocation21_spill] sm:$0xff] %v11629_v46  ;;  %17430 = vst [vmem:[#allocation22_spill] sm:$0xff] %v11633_v47  ;;  %v17159_v61 = vrot.slane %v11646_v51, 7  ;;  %v11671_v0 = vrot.slane %v17161_v57, 2  ;;  %v11677_v3 = vrot.slane %v17160_v59, 2  ;;  %v17157_v8 = vrot.slane %v11650_v52, 7 }
  0x2f   : > { %17431 = vst [vmem:[#allocation23_spill] sm:$0xff] %v11637_v48  ;;  %17432 = vst [vmem:[#allocation24_spill] sm:$0xff] %v11641_v49  ;;  %v11667_v63 = vrot.slane %v17162_v56, 2  ;;  %v11688_v16 = vrot.slane %v17158_v1, 2  ;;  %v11692_v18 = vrot.slane %v11609_v40, %v11537_v5  ;;  %v11696_v27 = vrot.slane %v11605_v39, %v11537_v5 }
  0x30   : > { %17433 = vst [vmem:[#allocation25_spill] sm:$0xff] %v11646_v51  ;;  %17434 = vst [vmem:[#allocation26_spill] sm:$0xff] %v11650_v52  ;;  %v11681_v4 = vrot.slane %v17159_v61, 2  ;;  %v11700_v28 = vrot.slane %v11633_v47, %v11537_v5  ;;  %v11704_v29 = vrot.slane %v17157_v8, 2  ;;  %v11708_v31 = vrot.slane %v11599_v35, %v11537_v5 }
  0x31   : > { %17435 = vst [vmem:[#allocation27_spill] sm:$0xff] %v11656_v55  ;;  %17436 = vst [vmem:[#allocation28_spill] sm:$0xff] %v11667_v63  ;;  %v11712_v32 = vrot.slane %v11619_v43, %v11537_v5  ;;  %v11716_v34 = vrot.slane %v11612_v41, %v11537_v5  ;;  %v11723_v38 = vrot.slane %v11637_v48, %v11537_v5  ;;  %v17167_v56 = vrot.slane %v11637_v48, 7 }
  0x32   : > { %17437 = vst [vmem:[#allocation29_spill] sm:$0xff] %v11671_v0  ;;  %17438 = vst [vmem:[#allocation30_spill] sm:$0xff] %v11677_v3  ;;  %v2769_v6 = vrot.slane %v11602_v37, %v11537_v5  ;;  %v11729_v8 = vrot.slane %v11626_v45, %v11537_v5  ;;  %v11733_v1 = vrot.slane %v11622_v44, %v11537_v5  ;;  %v17168_v22 = vrot.slane %v11719_v36, 7 }
  0x33   : > { %17439 = vst [vmem:[#allocation31_spill] sm:$0xff] %v11681_v4  ;;  %17440 = vst [vmem:[#allocation32_spill] sm:$0xff] %v11688_v16  ;;  %v11737_v2 = vrot.slane %v11646_v51, %v11537_v5  ;;  %v11741_v61 = vrot.slane %v11615_v42, %v11537_v5  ;;  %v11745_v62 = vrot.slane %v11641_v49, %v11537_v5  ;;  %v558_v4 = vld [vmem:[%s11545_s18 + $0x50] sm:$0xff] }
  0x34   : > { %17441 = vst [vmem:[#allocation33_spill] sm:$0xff] %v11700_v28  ;;  %17442 = vst [vmem:[#allocation34_spill] sm:$0xff] %v11704_v29  ;;  %v11749_v59 = vrot.slane %v11629_v46, %v11537_v5  ;;  %v11753_v60 = vrot.slane %v11650_v52, %v11537_v5  ;;  %v2940_v57 = vsel %vm2154_vm1, %v11692_v18, %v2737_v10  ;;  %v636_v48 = vrot.slane %v558_v4, 7 }
  0x35   : > { %17443 = vst [vmem:[#allocation35_spill] sm:$0xff] %v11708_v31  ;;  %17444 = vst [vmem:[#allocation36_spill] sm:$0xff] %v11712_v32  ;;  %v2947_v58 = vsel %vm2154_vm1, %v11729_v8, %v2769_v6  ;;  %v2941_v50 = vsel %vm1080_vm2, %v11696_v27, %v2940_v57  ;;  %v623_v53 = vsel %vm618_vm0, %v621_v24, %v17166_v25  ;;  %v11776_v57 = vrot.slane %v17167_v56, 2 }
  0x36   : > { %17445 = vst [vmem:[#allocation37_spill] sm:$0xff] %v11716_v34  ;;  %17446 = vst [vmem:[#allocation38_spill] sm:$0xff] %v11723_v38  ;;  %v2948_v54 = vsel %vm1080_vm2, %v11733_v1, %v2947_v58  ;;  %v2942_v10 = vsel %vm2157_vm3, %v11700_v28, %v2941_v50  ;;  %v703_v58 = vsel %vm618_vm0, 0.0, %v621_v24  ;;  %v629_v50 = vsel %vm618_vm0, %v627_v30, %v17168_v22 }
  0x37   : > { %17447 = vst [vmem:[#allocation39_spill] sm:$0xff] %v11733_v1  ;;  %17448 = vst [vmem:[#allocation40_spill] sm:$0xff] %v11737_v2  ;;  %v2949_v6 = vsel %vm2157_vm3, %v11737_v2, %v2948_v54  ;;  %v2943_v17 = vsel %vm1082_vm4, %v11708_v31, %v2942_v10  ;;  %v705_v54 = vsel %vm618_vm0, 0.0, %v627_v30  ;;  %v1294_v10 = vcombine.high %v703_v58, %v703_v58 }
  0x38   : > { %17449 = vst [vmem:[#allocation41_spill] sm:$0xff] %v11741_v61  ;;  %17450 = vst [vmem:[#allocation42_spill] sm:$0xff] %v11745_v62  ;;  %v2950_v25 = vsel %vm1082_vm4, %v11741_v61, %v2949_v6  ;;  %v2944_v19 = vsel %vm2160_vm5, %v11712_v32, %v2943_v17  ;;  %v11798_v56 = vrot.slane %v703_v58, %v11552_v11 }
  0x39   : > { %17451 = vst [vmem:[#allocation43_spill] sm:$0xff] %v11749_v59  ;;  %17452 = vst [vmem:[#allocation44_spill] sm:$0xff] %v11753_v60  ;;  %v2951_v24 = vsel %vm2160_vm5, %v11745_v62, %v2950_v25  ;;  %v2945_v6 = vsel %vm1084_vm6, %v11716_v34, %v2944_v19  ;;  %v1311_v14 = vcombine.high %v623_v53, %v623_v53 }
  0x3a   : > { %17453 = vst [vmem:[#allocation45_spill] sm:$0xff] %v11776_v57  ;;  %17454 = vst [vmem:[#allocation46_spill] sm:$0xff] %v11798_v56  ;;  %v2952_v22 = vsel %vm1084_vm6, %v11749_v59, %v2951_v24  ;;  %v11805_v23 = vrot.slane %v623_v53, %v11552_v11  ;;  %v2946_v17 = vsel %vm2163_vm7, %v11723_v38, %v2945_v6 }
  0x3b   : > { %v2953_v25 = vsel %vm2163_vm7, %v11753_v60, %v2952_v22  ;;  %v11812_v30 = vrot.slane %v1294_v10, %v11552_v11  ;;  %v11816_v58 = vcombine.high %v11798_v56, %v11798_v56  ;;  %v11819_v24 = vrot.slane %v1311_v14, %v11552_v11 }
  0x3c   : > { %17455 = vst [vmem:[#allocation47_spill] sm:$0xff] %v11805_v23  ;;  %v10778_v19 = vpack.i.bf16 %v2953_v25, %v2946_v17  ;;  %v11823_v53 = vcombine.high %v11805_v23, %v11805_v23  ;;  %v1328_v21 = vcombine.high %v705_v54, %v705_v54  ;;  %v11830_v22 = vrot.slane %v705_v54, %v11552_v11 }
  0x3d   : > { %17456 = vst [vmem:[#allocation48_spill] sm:$0xff] %v11812_v30  ;;  %17457 = vst [vmem:[#allocation49_spill] sm:$0xff] %v11816_v58  ;;  %v11827_v6 = vcombine.high %v11812_v30, %v11812_v30  ;;  %v1345_v10 = vcombine.high %v629_v50, %v629_v50  ;;  %v11833_v52 = vrot.slane %v629_v50, %v11552_v11  ;;  %v17176_v25 = vrot.slane %v11816_v58, 7 }
  0x3e   : > { %17458 = vst [vmem:[#allocation50_spill] sm:$0xff] %v11819_v24  ;;  %17459 = vst [vmem:[#allocation51_spill] sm:$0xff] %v11823_v53  ;;  %10779 = vrot.lane.b32.xlu1 %v10778_v19, %s11383_s21  ;;  %v11838_v14 = vcombine.high %v11819_v24, %v11819_v24  ;;  %v11841_v17 = vrot.slane %v1328_v21, %v11552_v11  ;;  %v11847_v54 = vcombine.high %v11830_v22, %v11830_v22 }
  0x3f   : > { %17460 = vst [vmem:[#allocation52_spill] sm:$0xff] %v11827_v6  ;;  %17461 = vst [vmem:[#allocation53_spill] sm:$0xff] %v11830_v22  ;;  %v11850_v50 = vrot.slane %v1345_v10, %v11552_v11  ;;  %v11854_v19 = vcombine.high %v11833_v52, %v11833_v52  ;;  %v17178_v29 = vrot.slane %v11827_v6, 7  ;;  %v11863_v49 = vrot.slane %v17176_v25, 2 }
  0x40   : > { %17462 = vst [vmem:[#allocation54_spill] sm:$0xff] %v11833_v52  ;;  %17463 = vst [vmem:[#allocation55_spill] sm:$0xff] %v11838_v14  ;;  %v11859_v21 = vcombine.high %v11841_v17, %v11841_v17  ;;  %v17179_v46 = vrot.slane %v11823_v53, 7  ;;  %v17180_v42 = vrot.slane %v11847_v54, 7  ;;  %v11899_v45 = vrot.slane %v11816_v58, %v11537_v5  ;;  %v11923_v58 = vld [vmem:[%s11545_s18 + $0x58] sm:$0xff] }
  0x41   : > { %17464 = vst [vmem:[#allocation56_spill] sm:$0xff] %v11841_v17  ;;  %17465 = vst [vmem:[#allocation57_spill] sm:$0xff] %v11847_v54  ;;  %v11869_v10 = vcombine.high %v11850_v50, %v11850_v50  ;;  %v11873_v51 = vrot.slane %v17178_v29, 2  ;;  %v17185_v29 = vrot.slane %v11854_v19, 7 }
  0x42   : > { %17466 = vst [vmem:[#allocation58_spill] sm:$0xff] %v11850_v50  ;;  %17467 = vst [vmem:[#allocation59_spill] sm:$0xff] %v11854_v19  ;;  %v11879_v25 = vrot.slane %v17179_v46, 2  ;;  %v11886_v3 = vrot.slane %v17180_v42, 2  ;;  %v2673_v46 = vrot.slane %v11798_v56, %v11537_v5  ;;  %v11903_v42 = vrot.slane %v11812_v30, %v11537_v5 }
  0x43   : > { %17468 = vst [vmem:[#allocation60_spill] sm:$0xff] %v11859_v21  ;;  %17469 = vst [vmem:[#allocation61_spill] sm:$0xff] %v11863_v49  ;;  %v17181_v49 = vrot.slane %v11859_v21, 7  ;;  %v11927_v30 = vrot.slane %v11823_v53, %v11537_v5  ;;  %v11949_v53 = vrot.slane %v11841_v17, %v11537_v5  ;;  %v11957_v56 = vrot.slane %v11833_v52, %v11537_v5 }
  0x44   : > { %17470 = vst [vmem:[#allocation62_spill] sm:$0xff] %v11869_v10  ;;  %17471 = vst [vmem:[#allocation63_spill] sm:$0xff] %v11873_v51  ;;  %v11908_v51 = vrot.slane %v17185_v29, 2  ;;  %v11931_v29 = vrot.slane %v11819_v24, %v11537_v5  ;;  %v11953_v24 = vrot.slane %v11859_v21, %v11537_v5  ;;  %v11969_v17 = vrot.slane %v11869_v10, %v11537_v5 }
  0x45   : > { %17472 = vst [vmem:[#allocation64_spill] sm:$0xff] %v11879_v25  ;;  %17473 = vst [vmem:[#allocation65_spill] sm:$0xff] %v11886_v3  ;;  %v11893_v16 = vrot.slane %v17181_v49, 2  ;;  %v17476_v3 = vrot.slane %v11869_v10, 7  ;;  %v11920_v25 = vrot.slane %v11805_v23, %v11537_v5  ;;  %v11945_v23 = vrot.slane %v11847_v54, %v11537_v5 }
  0x46   : > { %17475 = vst [vmem:[#allocation67_spill] sm:$0xff] %v11908_v51  ;;  %v562_v51 = vld [vmem:[%s11545_s18 + $0x70] sm:$0xff]  ;;  %v11965_v54 = vrot.slane %v11850_v50, %v11537_v5  ;;  %v2926_v21 = vsel %vm2154_vm1, %v11899_v45, %v2673_v46  ;;  %v17210_v10 = vrot.slane %v11923_v58, 7 }
  0x47   : > { %17474 = vst [vmem:[#allocation66_spill] sm:$0xff] %v11893_v16  ;;  %v11912_v49 = vrot.slane %v17476_v3, 2  ;;  %v11916_v16 = vrot.slane %v11827_v6, %v11537_v5  ;;  %v11935_v3 = vrot.slane %v11838_v14, %v11537_v5  ;;  %v11941_v6 = vld [vmem:[%s11545_s18 + $0x78] sm:$0xff]  ;;  %v2927_v44 = vsel %vm1080_vm2, %v11903_v42, %v2926_v21 }
  0x48   : > { %17478 = vst [vmem:[#allocation69_spill] sm:$0xff] %v11941_v6  ;;  %v642_v57 = vrot.slane %v562_v51, 7  ;;  %v17212_v4 = vrot.slane %v11941_v6, 7  ;;  %v638_v51 = vsel %vm618_vm0, %v636_v48, %v17210_v10  ;;  %v12116_v6 = vld [vmem:[%s11545_s18 + $0x38] sm:$0xff] }
  0x49   : > { %17477 = vst [vmem:[#allocation68_spill] sm:$0xff] %v11912_v49  ;;  %v2705_v49 = vrot.slane %v11830_v22, %v11537_v5  ;;  %v11961_v22 = vrot.slane %v11854_v19, %v11537_v5  ;;  %v17208_v19 = vrot.slane %v11838_v14, 7  ;;  %v2928_v50 = vsel %vm2157_vm3, %v11916_v16, %v2927_v44 }
  0x4a   : > { %v2929_v46 = vsel %vm1082_vm4, %v11920_v25, %v2928_v50  ;;  %v708_v50 = vsel %vm618_vm0, 0.0, %v636_v48  ;;  %v644_v14 = vsel %vm618_vm0, %v642_v57, %v17212_v4  ;;  %v12018_v43 = vrot.slane %v638_v51, %v11552_v11 }
  0x4b   : > { %v2933_v52 = vsel %vm2154_vm1, %v11945_v23, %v2705_v49  ;;  %v11989_v49 = vrot.slane %v17208_v19, 2  ;;  %v2930_v44 = vsel %vm2160_vm5, %v11927_v30, %v2929_v46  ;;  %v710_v46 = vsel %vm618_vm0, 0.0, %v642_v57 }
  0x4c   : > { %v2934_v37 = vsel %vm1080_vm2, %v11949_v53, %v2933_v52  ;;  %v12013_v48 = vrot.slane %v708_v50, %v11552_v11  ;;  %17481 = vst [vmem:[#allocation72_spill] sm:$0xff] %v12018_v43  ;;  %v880_v4 = vcombine.high %v710_v46, %v710_v46  ;;  %v12094_v33 = vrot.slane %v12018_v43, %v11537_v5 }
  0x4d   : > { %v2935_v21 = vsel %vm2157_vm3, %v11953_v24, %v2934_v37  ;;  %17479 = vst [vmem:[#allocation70_spill] sm:$0xff] %v11989_v49  ;;  %v2931_v37 = vsel %vm1084_vm6, %v11931_v29, %v2930_v44  ;;  %v846_v49 = vcombine.high %v708_v50, %v708_v50 }
  0x4e   : > { %v2936_v52 = vsel %vm1082_vm4, %v11957_v56, %v2935_v21  ;;  %v2932_v21 = vsel %vm2163_vm7, %v11935_v3, %v2931_v37  ;;  %17480 = vst [vmem:[#allocation71_spill] sm:$0xff] %v12013_v48  ;;  %v12025_v37 = vcombine.high %v12013_v48, %v12013_v48  ;;  %v1997_v63 = vrot.slane %v12013_v48, %v11537_v5  ;;  %v554_v48 = vld [vmem:[%s11545_s18 + $0x30] sm:$0xff] }
  0x4f   : > { %v2937_v19 = vsel %vm2160_vm5, %v11961_v22, %v2936_v52  ;;  %v863_v52 = vcombine.high %v638_v51, %v638_v51  ;;  %v12021_v57 = vrot.slane %v846_v49, %v11552_v11  ;;  %v12038_v51 = vrot.slane %v880_v4, %v11552_v11 }
  0x50   : > { %v2938_v10 = vsel %vm1084_vm6, %v11965_v54, %v2937_v19  ;;  %17483 = vst [vmem:[#allocation74_spill] sm:$0xff] %v12025_v37  ;;  %v12028_v19 = vrot.slane %v710_v46, %v11552_v11  ;;  %v12080_v47 = vrot.slane %v12025_v37, %v11537_v5  ;;  %v12101_v37 = vld [vmem:[%s11545_s18 + $0x18] sm:$0xff]  ;;  %v630_v62 = vrot.slane %v554_v48, 7 }
  0x51   : > { %v2939_v44 = vsel %vm2163_vm7, %v11969_v17, %v2938_v10  ;;  %17482 = vst [vmem:[#allocation73_spill] sm:$0xff] %v12021_v57  ;;  %v12031_v50 = vrot.slane %v863_v52, %v11552_v11  ;;  %v12035_v10 = vcombine.high %v12018_v43, %v12018_v43  ;;  %17487 = vst [vmem:[#allocation78_spill] sm:$0xff] %v12038_v51  ;;  %v550_v52 = vld [vmem:[%s11545_s18 + $0x10] sm:$0xff] }
  0x52   : > { %v10773_v0 = vpack.i.bf16 %v2939_v44, %v2932_v21  ;;  %17484 = vst [vmem:[#allocation75_spill] sm:$0xff] %v12028_v19  ;;  %v897_v21 = vcombine.high %v644_v14, %v644_v14  ;;  %v12043_v49 = vcombine.high %v12021_v57, %v12021_v57  ;;  %v12047_v46 = vcombine.high %v12028_v19, %v12028_v19 }
  0x53   : > { %17485 = vst [vmem:[#allocation76_spill] sm:$0xff] %v12031_v50  ;;  %17486 = vst [vmem:[#allocation77_spill] sm:$0xff] %v12035_v10  ;;  %v12050_v44 = vrot.slane %v644_v14, %v11552_v11  ;;  %v12055_v4 = vcombine.high %v12031_v50, %v12031_v50  ;;  %v12084_v55 = vrot.slane %v12021_v57, %v11537_v5  ;;  %v624_v59 = vrot.slane %v550_v52, 7 }
  0x54   : > { %10774 = vrot.lane.b32.xlu0 %v10773_v0, %s11383_s21  ;;  %17488 = vst [vmem:[#allocation79_spill] sm:$0xff] %v12043_v49  ;;  %17489 = vst [vmem:[#allocation80_spill] sm:$0xff] %v12047_v46  ;;  %v12059_v0 = vcombine.high %v12038_v51, %v12038_v51  ;;  %v12062_v41 = vrot.slane %v897_v21, %v11552_v11  ;;  %v12090_v39 = vrot.slane %v12043_v49, %v11537_v5 }
  0x55   : > { %17490 = vst [vmem:[#allocation81_spill] sm:$0xff] %v12050_v44  ;;  %17491 = vst [vmem:[#allocation82_spill] sm:$0xff] %v12055_v4  ;;  %v12067_v14 = vcombine.high %v12050_v44, %v12050_v44  ;;  %v12098_v21 = vrot.slane %v12035_v10, %v11537_v5  ;;  %v12107_v40 = vrot.slane %v12031_v50, %v11537_v5 }
  0x56   : > { %17492 = vst [vmem:[#allocation83_spill] sm:$0xff] %v12059_v0  ;;  %17493 = vst [vmem:[#allocation84_spill] sm:$0xff] %v12062_v41  ;;  %v12075_v35 = vcombine.high %v12062_v41, %v12062_v41  ;;  %v12111_v49 = vrot.slane %v12055_v4, %v11537_v5  ;;  %v2029_v43 = vrot.slane %v12028_v19, %v11537_v5 }
  0x57   : > { %17494 = vst [vmem:[#allocation85_spill] sm:$0xff] %v12067_v14  ;;  %17496 = vst [vmem:[#allocation87_spill] sm:$0xff] %v12107_v40  ;;  %v12120_v10 = vrot.slane %v12047_v46, %v11537_v5  ;;  %v12124_v57 = vrot.slane %v12038_v51, %v11537_v5  ;;  %v12128_v50 = vrot.slane %v12059_v0, %v11537_v5 }
  0x58   : > { %17495 = vst [vmem:[#allocation86_spill] sm:$0xff] %v12075_v35  ;;  %17497 = vst [vmem:[#allocation88_spill] sm:$0xff] %v12111_v49  ;;  %v12132_v60 = vrot.slane %v12050_v44, %v11537_v5  ;;  %v12136_v19 = vrot.slane %v12067_v14, %v11537_v5  ;;  %v12140_v46 = vrot.slane %v12062_v41, %v11537_v5  ;;  %v704_v14 = vsel %vm618_vm0, 0.0, %v624_v59 }
  0x59   : > { %17498 = vst [vmem:[#allocation89_spill] sm:$0xff] %v12120_v10  ;;  %17499 = vst [vmem:[#allocation90_spill] sm:$0xff] %v12124_v57  ;;  %v12144_v51 = vrot.slane %v12075_v35, %v11537_v5  ;;  %v2179_v0 = vsel %vm2154_vm1, %v12080_v47, %v1997_v63  ;;  %v2186_v44 = vsel %vm2154_vm1, %v12120_v10, %v2029_v43  ;;  %v17252_v35 = vrot.slane %v12101_v37, 7 }
  0x5a   : > { %17500 = vst [vmem:[#allocation91_spill] sm:$0xff] %v12128_v50  ;;  %17501 = vst [vmem:[#allocation92_spill] sm:$0xff] %v12132_v60  ;;  %v2180_v38 = vsel %vm1080_vm2, %v12084_v55, %v2179_v0  ;;  %v2187_v34 = vsel %vm1080_vm2, %v12124_v57, %v2186_v44  ;;  %v17254_v43 = vrot.slane %v12116_v6, 7  ;;  %v706_v44 = vsel %vm618_vm0, 0.0, %v630_v62 }
  0x5b   : > { %17502 = vst [vmem:[#allocation93_spill] sm:$0xff] %v12136_v19  ;;  %17503 = vst [vmem:[#allocation94_spill] sm:$0xff] %v12140_v46  ;;  %v2181_v41 = vsel %vm2157_vm3, %v12090_v39, %v2180_v38  ;;  %v2188_v0 = vsel %vm2157_vm3, %v12128_v50, %v2187_v34  ;;  %v626_v48 = vsel %vm618_vm0, %v624_v59, %v17252_v35 }
  0x5c   : > { %17504 = vst [vmem:[#allocation95_spill] sm:$0xff] %v12144_v51  ;;  %v2182_v63 = vsel %vm1082_vm4, %v12094_v33, %v2181_v41  ;;  %v2189_v38 = vsel %vm1082_vm4, %v12132_v60, %v2188_v0  ;;  %v632_v4 = vsel %vm618_vm0, %v630_v62, %v17254_v43  ;;  %v12186_v35 = vrot.slane %v704_v14, %v11552_v11 }
  0x5d   : > { %v2183_v52 = vsel %vm2160_vm5, %v12098_v21, %v2182_v63  ;;  %v2190_v34 = vsel %vm2160_vm5, %v12136_v19, %v2189_v38  ;;  %v778_v63 = vcombine.high %v704_v14, %v704_v14  ;;  %v795_v60 = vcombine.high %v626_v48, %v626_v48 }
  0x5e   : > { %v2184_v41 = vsel %vm1084_vm6, %v12107_v40, %v2183_v52  ;;  %v2191_v59 = vsel %vm1084_vm6, %v12140_v46, %v2190_v34  ;;  %17506 = vst [vmem:[#allocation97_spill] sm:$0xff] %v12186_v35  ;;  %v12196_v62 = vrot.slane %v626_v48, %v11552_v11  ;;  %v812_v43 = vcombine.high %v706_v44, %v706_v44 }
  0x5f   : > { %v12181_v0 = vsel %vm2163_vm7, %v12111_v49, %v2184_v41  ;;  %v12190_v52 = vsel %vm2163_vm7, %v12144_v51, %v2191_v59  ;;  %v12193_v38 = vrot.slane %v778_v63, %v11552_v11  ;;  %v12202_v34 = vcombine.high %v12186_v35, %v12186_v35 }
  0x60   : > { %17505 = vst [vmem:[#allocation96_spill] sm:$0xff] %v12181_v0  ;;  %17507 = vst [vmem:[#allocation98_spill] sm:$0xff] %v12190_v52  ;;  %v10788_v41 = vpack.i.bf16 %v12190_v52, %v12181_v0  ;;  %v12205_v14 = vrot.slane %v795_v60, %v11552_v11  ;;  %v12208_v59 = vrot.slane %v706_v44, %v11552_v11 }
  0x61   : > { %17508 = vst [vmem:[#allocation99_spill] sm:$0xff] %v12193_v38  ;;  %17509 = vst [vmem:[#allocation100_spill] sm:$0xff] %v12196_v62  ;;  %v12212_v63 = vcombine.high %v12193_v38, %v12193_v38  ;;  %v12216_v48 = vcombine.high %v12196_v62, %v12196_v62  ;;  %v12219_v52 = vrot.slane %v812_v43, %v11552_v11 }
  0x62   : > { %17510 = vst [vmem:[#allocation101_spill] sm:$0xff] %v12202_v34  ;;  %17511 = vst [vmem:[#allocation102_spill] sm:$0xff] %v12205_v14  ;;  %v829_v0 = vcombine.high %v632_v4, %v632_v4  ;;  %10789 = vrot.lane.b32.xlu1 %v10788_v41, %s17313_s22  ;;  %v12224_v60 = vcombine.high %v12205_v14, %v12205_v14  ;;  %v12228_v44 = vcombine.high %v12208_v59, %v12208_v59 }
  0x63   : > { %17512 = vst [vmem:[#allocation103_spill] sm:$0xff] %v12208_v59  ;;  %17513 = vst [vmem:[#allocation104_spill] sm:$0xff] %v12212_v63  ;;  %v12231_v51 = vrot.slane %v632_v4, %v11552_v11  ;;  %v12236_v43 = vcombine.high %v12219_v52, %v12219_v52  ;;  %v1933_v46 = vrot.slane %v12186_v35, %v11537_v5 }
  0x64   : > { %17514 = vst [vmem:[#allocation105_spill] sm:$0xff] %v12216_v48  ;;  %17515 = vst [vmem:[#allocation106_spill] sm:$0xff] %v12219_v52  ;;  %v12239_v19 = vrot.slane %v829_v0, %v11552_v11  ;;  %v12252_v10 = vrot.slane %v12202_v34, %v11537_v5  ;;  %v1941_v50 = vrot.slane %v12193_v38, %v11537_v5 }
  0x65   : > { %17516 = vst [vmem:[#allocation107_spill] sm:$0xff] %v12224_v60  ;;  %17517 = vst [vmem:[#allocation108_spill] sm:$0xff] %v12228_v44  ;;  %v12245_v57 = vcombine.high %v12231_v51, %v12231_v51  ;;  %v12263_v32 = vrot.slane %v12212_v63, %v11537_v5  ;;  %v12268_v35 = vrot.slane %v12196_v62, %v11537_v5 }
  0x66   : > { %17518 = vst [vmem:[#allocation109_spill] sm:$0xff] %v12231_v51  ;;  %17519 = vst [vmem:[#allocation110_spill] sm:$0xff] %v12236_v43  ;;  %v12256_v0 = vcombine.high %v12239_v19, %v12239_v19  ;;  %v12272_v34 = vrot.slane %v12216_v48, %v11537_v5  ;;  %v12276_v41 = vrot.slane %v12205_v14, %v11537_v5 }
  0x67   : > { %17520 = vst [vmem:[#allocation111_spill] sm:$0xff] %v12239_v19  ;;  %17521 = vst [vmem:[#allocation112_spill] sm:$0xff] %v12245_v57  ;;  %v12281_v63 = vrot.slane %v12224_v60, %v11537_v5  ;;  %v1965_v4 = vrot.slane %v12208_v59, %v11537_v5  ;;  %v12287_v62 = vrot.slane %v12228_v44, %v11537_v5 }
  0x68   : > { %17522 = vst [vmem:[#allocation113_spill] sm:$0xff] %v12256_v0  ;;  %v12291_v48 = vrot.slane %v12219_v52, %v11537_v5  ;;  %v12295_v14 = vrot.slane %v12236_v43, %v11537_v5  ;;  %v12299_v38 = vrot.slane %v12231_v51, %v11537_v5  ;;  %v12303_v61 = vrot.slane %v12245_v57, %v11537_v5 }
  0x69   : > { %v12307_v44 = vrot.slane %v12239_v19, %v11537_v5  ;;  %v12311_v52 = vrot.slane %v12256_v0, %v11537_v5  ;;  %v2165_v43 = vsel %vm2154_vm1, %v12252_v10, %v1933_v46  ;;  %v2172_v59 = vsel %vm2154_vm1, %v12287_v62, %v1965_v4 }
  0x6a   : > { %v2166_v51 = vsel %vm1080_vm2, %v1941_v50, %v2165_v43  ;;  %v2173_v57 = vsel %vm1080_vm2, %v12291_v48, %v2172_v59  ;;  %v17523_v19 = vrot.slane %v12101_v37, 7  ;;  %v17524_v4 = vcombine.high %v11556_v12, %v11556_v12 }
  0x6b   : > { %v2167_v0 = vsel %vm2157_vm3, %v12263_v32, %v2166_v51  ;;  %v2174_v46 = vsel %vm2157_vm3, %v12295_v14, %v2173_v57  ;;  %v12336_v59 = vcombine.high %v11584_v26, %v11584_v26  ;;  %v12344_v51 = vrot.slane %v11540_v7, %v11552_v11 }
  0x6c   : > { %v721_v2 = vsel %vm618_vm0, %v17523_v19, 0.0  ;;  %v12332_v43 = vrot.slane %v17524_v4, %v11552_v11  ;;  %v2168_v37 = vsel %vm1082_vm4, %v12268_v35, %v2167_v0  ;;  %v2175_v19 = vsel %vm1082_vm4, %v12299_v38, %v2174_v46 }
  0x6d   : > { %17525 = vst [vmem:[#allocation114_spill] sm:$0xff] %v12344_v51  ;;  %v17526_v57 = vcombine.high %v11540_v7, %v11540_v7  ;;  %v2169_v31 = vsel %vm2160_vm5, %v12272_v34, %v2168_v37  ;;  %v2176_v12 = vsel %vm2160_vm5, %v12303_v61, %v2175_v19  ;;  %v12362_v46 = vrot.slane %v11560_v13, %v11552_v11 }
  0x6e   : > { %v12358_v0 = vcombine.high %v12332_v43, %v12332_v43  ;;  %v2170_v60 = vsel %vm1084_vm6, %v12276_v41, %v2169_v31  ;;  %v2177_v7 = vsel %vm1084_vm6, %v12307_v44, %v2176_v12  ;;  %v12370_v37 = vcombine.high %v12344_v51, %v12344_v51 }
  0x6f   : > { %v12350_v4 = vrot.slane %v17526_v57, %v11552_v11  ;;  %17528 = vst [vmem:[#allocation116_spill] sm:$0xff] %v12362_v46  ;;  %v12378_v57 = vsel %vm2163_vm7, %v12281_v63, %v2170_v60  ;;  %v12382_v13 = vsel %vm2163_vm7, %v12311_v52, %v2177_v7  ;;  %v12385_v31 = vrot.slane %v721_v2, %v11552_v11 }
  0x70   : > { %17529 = vst [vmem:[#allocation117_spill] sm:$0xff] %v12370_v37  ;;  %17531 = vst [vmem:[#allocation119_spill] sm:$0xff] %v12378_v57  ;;  %v10783_v26 = vpack.i.bf16 %v12382_v13, %v12378_v57  ;;  %v12397_v7 = vrot.slane %v12336_v59, %v11537_v5  ;;  %v12401_v2 = vrot.slane %v12332_v43, %v11537_v5 }
  0x71   : > { %17527 = vst [vmem:[#allocation115_spill] sm:$0xff] %v12350_v4  ;;  %v12374_v19 = vcombine.high %v12350_v4, %v12350_v4  ;;  %17532 = vst [vmem:[#allocation120_spill] sm:$0xff] %v12382_v13  ;;  %v12406_v28 = vrot.slane %v12358_v0, %v11537_v5  ;;  %v12410_v40 = vrot.slane %v12344_v51, %v11537_v5 }
  0x72   : > { %17533 = vst [vmem:[#allocation121_spill] sm:$0xff] %v12385_v31  ;;  %17534 = vst [vmem:[#allocation122_spill] sm:$0xff] %v12397_v7  ;;  %10784 = vrot.lane.b32.xlu0 %v10783_v26, %s17313_s22  ;;  %v12414_v1 = vrot.slane %v12370_v37, %v11537_v5  ;;  %v12418_v60 = vrot.slane %v12350_v4, %v11537_v5  ;;  %v12426_v26 = vrot.slane %v12362_v46, %v11537_v5  ;;  %s11388_s22 = smov 3  }
  0x73   : > { %17530 = vst [vmem:[#allocation118_spill] sm:$0xff] %v12374_v19  ;;  %17535 = vst [vmem:[#allocation123_spill] sm:$0xff] %v12401_v2  ;;  %v12422_v49 = vrot.slane %v12374_v19, %v11537_v5  ;;  %v2565_v12 = vrot.slane %v12385_v31, %v11537_v5  ;;  %v2590_v13 = vsel %vm2154_vm1, %v12401_v2, %v12397_v7  ;;  %v17543_v19 = vrot.slane %v11572_v20, 7 }
  0x74   : > { %17536 = vst [vmem:[#allocation124_spill] sm:$0xff] %v12406_v28  ;;  %17537 = vst [vmem:[#allocation125_spill] sm:$0xff] %v12410_v40  ;;  %v12435_v57 = vsel %vm1080_vm2, %v12406_v28, %v2590_v13  ;;  %v2597_v4 = vsel %vm2154_vm1, %v1941_v50, %v12252_v10  ;;  %v17544_v46 = vrot.slane %v11719_v36, 7  ;;  %v3374_v10 = vsel %vm2154_vm1, %v11903_v42, %v11899_v45  ;;  %v568_v28 = vld [vmem:[%s11545_s18 + $0xa0] sm:$0xff] }
  0x75   : > { %17538 = vst [vmem:[#allocation126_spill] sm:$0xff] %v12414_v1  ;;  %17539 = vst [vmem:[#allocation127_spill] sm:$0xff] %v12418_v60  ;;  %v720_v37 = vsel %vm618_vm0, %v17543_v19, 0.0  ;;  %v2592_v31 = vsel %vm2157_vm3, %v12410_v40, %v12435_v57  ;;  %v2598_v2 = vsel %vm1080_vm2, %v12263_v32, %v2597_v4  ;;  %v3381_v32 = vsel %vm2154_vm1, %v11949_v53, %v11945_v23  ;;  %v13690_v40 = vld [vmem:[%s11545_s18 + $0x88] sm:$0xff] }
  0x76   : > { %17540 = vst [vmem:[#allocation128_spill] sm:$0xff] %v12422_v49  ;;  %17541 = vst [vmem:[#allocation129_spill] sm:$0xff] %v12426_v26  ;;  %v722_v51 = vsel %vm618_vm0, %v17544_v46, 0.0  ;;  %v12451_v13 = vrot.slane %v720_v37, %v11552_v11  ;;  %v2593_v20 = vsel %vm1082_vm4, %v12414_v1, %v2592_v31  ;;  %v2599_v36 = vsel %vm2157_vm3, %v12268_v35, %v2598_v2 }
  0x77   : > { %17542 = vst [vmem:[#allocation130_spill] sm:$0xff] %v12435_v57  ;;  %v12454_v50 = vrot.slane %v722_v51, %v11552_v11  ;;  %v2594_v4 = vsel %vm2160_vm5, %v12418_v60, %v2593_v20  ;;  %v2600_v51 = vsel %vm1082_vm4, %v12272_v34, %v2599_v36  ;;  %v3375_v19 = vsel %vm1080_vm2, %v11916_v16, %v3374_v10  ;;  %v567_v57 = vld [vmem:[%s11545_s18 + $0x98] sm:$0xff] }
  0x78   : > { %v1653_v46 = vrot.slane %v12451_v13, 7  ;;  %v2595_v35 = vsel %vm1084_vm6, %v12422_v49, %v2594_v4  ;;  %v2601_v42 = vsel %vm2160_vm5, %v12276_v41, %v2600_v51  ;;  %v3345_v45 = vrot.slane %v12451_v13, %v11537_v5 }
  0x79   : > { %v1678_v37 = vrot.slane %v12454_v50, 7  ;;  %v3349_v23 = vrot.slane %v12454_v50, %v11537_v5  ;;  %v2596_v53 = vsel %vm2163_vm7, %v12426_v26, %v2595_v35  ;;  %v2602_v34 = vsel %vm1084_vm6, %v12281_v63, %v2601_v42 }
  0x7a   : > { %v3382_v31 = vsel %vm1080_vm2, %v11953_v24, %v3381_v32  ;;  %v2603_v41 = vsel %vm2163_vm7, %v2565_v12, %v2602_v34  ;;  %v3376_v2 = vsel %vm2157_vm3, %v11920_v25, %v3375_v19  ;;  %v17545_v36 = vrot.slane %v12116_v6, 7  ;;  %v17558_v25 = vld [vmem:[#allocation33_spill] sm:$0xff] }
  0x7b   : > { %v3383_v20 = vsel %vm2157_vm3, %v11957_v56, %v3382_v31  ;;  %v10793_v51 = vpack.i.bf16 %v2603_v41, %v2596_v53  ;;  %v3377_v63 = vsel %vm1082_vm4, %v11927_v30, %v3376_v2  ;;  %v17546_v24 = vrot.slane %v11923_v58, 7  ;;  %v17567_v31 = vld [vmem:[#allocation43_spill] sm:$0xff] }
  0x7c   : > { %v723_v4 = vsel %vm618_vm0, %v17545_v36, 0.0  ;;  %v3384_v16 = vsel %vm1082_vm4, %v11961_v22, %v3383_v20  ;;  %v3378_v56 = vsel %vm2160_vm5, %v11931_v29, %v3377_v63  ;;  %v2604_v29 = vsel %vm2154_vm1, %v12291_v48, %v12287_v62 }
  0x7d   : > { %v725_v12 = vsel %vm618_vm0, %v17546_v24, 0.0  ;;  %v3385_v6 = vsel %vm2160_vm5, %v11965_v54, %v3384_v16  ;;  %v12514_v30 = vrot.slane %v723_v4, %v11552_v11  ;;  %10794 = vrot.lane.b32.xlu1 %v10793_v51, %s11385_s23  ;;  %v3379_v58 = vsel %vm1084_vm6, %v11935_v3, %v3378_v56  ;;  %v17554_v4 = vld [vmem:[#allocation87_spill] sm:$0xff] }
  0x7e   : > { %v12517_v22 = vrot.slane %v725_v12, %v11552_v11  ;;  %v3386_v10 = vsel %vm1084_vm6, %v11969_v17, %v3385_v6  ;;  %v2611_v54 = vsel %vm2154_vm1, %v12084_v55, %v12080_v47  ;;  %v3380_v32 = vsel %vm2163_vm7, %v3345_v45, %v3379_v58  ;;  %v17559_v6 = vld [vmem:[#allocation40_spill] sm:$0xff] }
  0x7f   : > { %v3387_v35 = vsel %vm2163_vm7, %v3349_v23, %v3386_v10  ;;  %v1159_v42 = vrot.slane %v12514_v30, 7  ;;  %v2569_v17 = vrot.slane %v12514_v30, %v11537_v5  ;;  %v2605_v62 = vsel %vm1080_vm2, %v12295_v14, %v2604_v29  ;;  %v17560_v29 = vld [vmem:[#allocation35_spill] sm:$0xff] }
  0x80   : > { %v1184_v53 = vrot.slane %v12517_v22, 7  ;;  %v10803_v3 = vpack.i.bf16 %v3387_v35, %v3380_v32  ;;  %v2573_v34 = vrot.slane %v12517_v22, %v11537_v5  ;;  %v2606_v47 = vsel %vm2157_vm3, %v12299_v38, %v2605_v62  ;;  %v17561_v32 = vld [vmem:[#allocation41_spill] sm:$0xff]  ;;  %v17564_v62 = vld [vmem:[#allocation42_spill] sm:$0xff] }
  0x81   : > { %v2612_v55 = vsel %vm1080_vm2, %v12090_v39, %v2611_v54  ;;  %v17549_v48 = vrot.slane %v11549_v9, 7  ;;  %v17550_v23 = vrot.slane %v11565_v15, 7  ;;  %v2607_v39 = vsel %vm1082_vm4, %v12303_v61, %v2606_v47  ;;  %v17553_v61 = vld [vmem:[#allocation39_spill] sm:$0xff] }
  0x82   : > { %10804 = vrot.lane.b32.xlu0 %v10803_v3, %s17317_s29  ;;  %v2613_v9 = vsel %vm2157_vm3, %v12094_v33, %v2612_v55  ;;  %v2608_v14 = vsel %vm2160_vm5, %v12307_v44, %v2607_v39  ;;  %v3388_v20 = vsel %vm2154_vm1, %v11696_v27, %v11692_v18  ;;  %v3395_v33 = vsel %vm2154_vm1, %v17553_v61, %v11729_v8  ;;  %v17557_v8 = vld [vmem:[#allocation88_spill] sm:$0xff]  ;;  %v17562_v3 = vld [vmem:[#allocation10_spill] sm:$0xff] }
  0x83   : > { %v724_v45 = vsel %vm618_vm0, %v17549_v48, 0.0  ;;  %v726_v19 = vsel %vm618_vm0, %v17550_v23, 0.0  ;;  %v2614_v2 = vsel %vm1082_vm4, %v12098_v21, %v2613_v9  ;;  %v2609_v36 = vsel %vm1084_vm6, %v12311_v52, %v2608_v14  ;;  %v17566_v23 = vld [vmem:[#allocation37_spill] sm:$0xff]  ;;  %v17571_v61 = vld [vmem:[#allocation38_spill] sm:$0xff]  ;;  %v11167_v21 = vld [vmem:[%s17147_s11 + $0xc8] sm:$0xff]  }
  0x84   : > { %v12563_v15 = vrot.slane %v724_v45, %v11552_v11  ;;  %v12566_v38 = vrot.slane %v726_v19, %v11552_v11  ;;  %v2615_v51 = vsel %vm2160_vm5, %v17554_v4, %v2614_v2  ;;  %v2610_v18 = vsel %vm2163_vm7, %v2569_v17, %v2609_v36 }
  0x85   : > { %v2616_v27 = vsel %vm1084_vm6, %v17557_v8, %v2615_v51  ;;  %v10813_v12 = vpack.i.bf16 %v2610_v18, %v2603_v41  ;;  %v3389_v56 = vsel %vm1080_vm2, %v17558_v25, %v3388_v20  ;;  %v3396_v58 = vsel %vm1080_vm2, %v17559_v6, %v3395_v33  ;;  %v17563_v41 = vld [vmem:[#allocation36_spill] sm:$0xff]  ;;  %v17573_v8 = vld [vmem:[#allocation114_spill] sm:$0xff] }
  0x86   : > { %v1703_v63 = vrot.slane %v12563_v15, 7  ;;  %v1728_v44 = vrot.slane %v12566_v38, 7  ;;  %v3353_v52 = vrot.slane %v12563_v15, %v11537_v5  ;;  %v3357_v16 = vrot.slane %v12566_v38, %v11537_v5  ;;  %v17572_v33 = vld [vmem:[#allocation44_spill] sm:$0xff] }
  0x87   : > { %v12599_v24 = vsel %vm2163_vm7, %v2573_v34, %v2616_v27  ;;  %v3390_v54 = vsel %vm2157_vm3, %v17560_v29, %v3389_v56  ;;  %v3397_v35 = vsel %vm2157_vm3, %v17561_v32, %v3396_v58  ;;  %v9701_v17 = vrot.slane %v17562_v3, 9  ;;  %10814 = vrot.lane.b32.xlu0 %v10813_v12, %s17315_s30  ;;  %v17574_v12 = vld [vmem:[#allocation117_spill] sm:$0xff]  ;;  %v17577_v29 = vld [vmem:[#allocation115_spill] sm:$0xff]  ;;  %v17578_v32 = vld [vmem:[#allocation118_spill] sm:$0xff] }
  0x88   : > { %v10798_v10 = vpack.i.bf16 %v12599_v24, %v2610_v18  ;;  %v3391_v34 = vsel %vm1082_vm4, %v17563_v41, %v3390_v54  ;;  %v3398_v47 = vsel %vm1082_vm4, %v17564_v62, %v3397_v35  ;;  %v17565_v55 = vrot.slane %v12336_v59, 7  ;;  %v17580_v41 = vld [vmem:[#allocation97_spill] sm:$0xff] }
  0x89   : > { %v1091_v45 = vrot.slane %v12332_v43, 7  ;;  %v3392_v19 = vsel %vm2160_vm5, %v17566_v23, %v3391_v34  ;;  %v3399_v39 = vsel %vm2160_vm5, %v17567_v31, %v3398_v47  ;;  %v17569_v2 = vrot.slane %v12358_v0, 7  ;;  %v17581_v62 = vld [vmem:[#allocation101_spill] sm:$0xff]  ;;  %v17585_v31 = vld [vmem:[#allocation99_spill] sm:$0xff] }
  0x8a   : > { %v1090_v48 = vrot.slane %v17565_v55, 2  ;;  %10799 = vrot.lane.b32.xlu1 %v10798_v10, %s11385_s23  ;;  %v17568_v9 = vmov %v17565_v55  ;;  %v3393_v43 = vsel %vm1084_vm6, %v17571_v61, %v3392_v19  ;;  %v3400_v36 = vsel %vm1084_vm6, %v17572_v33, %v3399_v39  ;;  %v17588_v33 = vld [vmem:[#allocation104_spill] sm:$0xff] }
  0x8b   : > { %v1089_v14 = vsel %vm12587_vm10, %v9701_v17, %v17568_v9  ;;  %v12630_v20 = vrot.slane %v17569_v2, 2  ;;  %v1093_v51 = vrot.slane %v1091_v45, 2  ;;  %v3394_v18 = vsel %vm2163_vm7, %v3353_v52, %v3393_v43 }
  0x8c   : > { %v1092_v4 = vsel %vm12587_vm10, %v1090_v48, %v1091_v45  ;;  %v3401_v59 = vsel %vm2163_vm7, %v3357_v16, %v3400_v36  ;;  %v1097_v27 = vrot.slane %v17573_v8, 7  ;;  %v17575_v25 = vrot.slane %v17574_v12, 7  ;;  %v17583_v45 = vld [vmem:[#allocation116_spill] sm:$0xff] }
  0x8d   : > { %17570 = vst [vmem:[#allocation39_spill] sm:$0xff] %v12630_v20  ;;  %v10808_v6 = vpack.i.bf16 %v3401_v59, %v3394_v18  ;;  %v17576_v58 = vmov %v17569_v2  ;;  %v1103_v54 = vrot.slane %v17577_v29, 7  ;;  %v17579_v35 = vrot.slane %v17578_v32, 7  ;;  %v17590_v18 = vld [vmem:[#allocation100_spill] sm:$0xff] }
  0x8e   : > { %v1102_v56 = vrot.slane %v17575_v25, 2  ;;  %v1095_v10 = vsel %vm12587_vm10, %v1093_v51, %v17576_v58  ;;  %v1098_v52 = vsel %vm12587_vm10, %v12630_v20, %v1097_v27  ;;  %v1099_v16 = vrot.slane %v1097_v27, 2 }
  0x8f   : > { %v1108_v17 = vrot.slane %v17579_v35, 2  ;;  %v9702_v34 = vrot.slane %v17580_v41, 9  ;;  %v17582_v47 = vrot.slane %v17581_v62, 7  ;;  %10809 = vrot.lane.b32.xlu1 %v10808_v6, %s17317_s29  ;;  %v1105_v48 = vrot.slane %v1103_v54, 2  ;;  %s11390_s29 = smov 21  }
  0x90   : > { %v1104_v0 = vsel %vm12587_vm10, %v1102_v56, %v1103_v54  ;;  %v17584_v23 = vrot.slane %v17583_v45, 7  ;;  %v1116_v39 = vrot.slane %v17585_v31, 7  ;;  %v17586_v9 = vmov %v17575_v25  ;;  %v17592_v56 = vld [vmem:[#allocation105_spill] sm:$0xff] }
  0x91   : > { %v1115_v55 = vrot.slane %v17582_v47, 2  ;;  %v1101_v2 = vsel %vm12587_vm10, %v1099_v16, %v17586_v9  ;;  %v17587_v61 = vmov %v17582_v47  ;;  %v17589_v36 = vrot.slane %v17588_v33, 7  ;;  %v17595_v16 = vld [vmem:[#allocation107_spill] sm:$0xff] }
  0x92   : > { %v1110_v19 = vsel %vm12587_vm10, %v1108_v17, %v17584_v23  ;;  %v1114_v43 = vsel %vm12587_vm10, %v9702_v34, %v17587_v61  ;;  %v1122_v59 = vrot.slane %v17590_v18, 7  ;;  %v17591_v8 = vmov %v17579_v35  ;;  %v17594_v35 = vld [vmem:[#allocation102_spill] sm:$0xff]  ;;  %v17599_v61 = vld [vmem:[#allocation121_spill] sm:$0xff] }
  0x93   : > { %v1121_v51 = vrot.slane %v17589_v36, 2  ;;  %v1107_v27 = vsel %vm12587_vm10, %v1105_v48, %v17591_v8  ;;  %v1117_v12 = vsel %vm12587_vm10, %v1115_v55, %v1116_v39  ;;  %v1118_v25 = vrot.slane %v1116_v39, 2 }
  0x94   : > { %v17593_v6 = vrot.slane %v17592_v56, 7  ;;  %v1124_v54 = vrot.slane %v1122_v59, 2  ;;  %v1128_v17 = vrot.slane %v17594_v35, 7  ;;  %v17596_v41 = vrot.slane %v17595_v16, 7  ;;  %v17603_v35 = vld [vmem:[#allocation69_spill] sm:$0xff] }
  0x95   : > { %v1123_v29 = vsel %vm12587_vm10, %v1121_v51, %v1122_v59  ;;  %v17597_v32 = vmov %v17589_v36  ;;  %v2225_v47 = vrot.slane %v1089_v14, %v11537_v5  ;;  %v2229_v55 = vrot.slane %v1092_v4, %v11537_v5  ;;  %v17605_v16 = vld [vmem:[#allocation89_spill] sm:$0xff] }
  0x96   : > { %v1127_v58 = vrot.slane %v17593_v6, 2  ;;  %v1133_v34 = vrot.slane %v17596_v41, 2  ;;  %v1120_v62 = vsel %vm12587_vm10, %v1118_v25, %v17597_v32  ;;  %v2233_v48 = vrot.slane %v1095_v10, %v11537_v5 }
  0x97   : > { %v17598_v23 = vmov %v17593_v6  ;;  %v1130_v9 = vrot.slane %v1128_v17, 2  ;;  %v17600_v33 = vrot.slane %v17599_v61, 7  ;;  %v2237_v14 = vrot.slane %v1098_v52, %v11537_v5  ;;  %v17609_v61 = vld [vmem:[#allocation103_spill] sm:$0xff] }
  0x98   : > { %v1126_v31 = vsel %vm12587_vm10, %v1124_v54, %v17598_v23  ;;  %v1129_v39 = vsel %vm12587_vm10, %v1127_v58, %v1128_v17  ;;  %v2241_v4 = vrot.slane %v1101_v2, %v11537_v5  ;;  %v2245_v10 = vrot.slane %v1104_v0, %v11537_v5 }
  0x99   : > { %v1135_v36 = vsel %vm12587_vm10, %v1133_v34, %v17600_v33  ;;  %v2249_v51 = vrot.slane %v1107_v27, %v11537_v5  ;;  %v17601_v18 = vmov %v17596_v41  ;;  %v2253_v8 = vrot.slane %v1110_v19, %v11537_v5  ;;  %v17606_v41 = vld [vmem:[#allocation90_spill] sm:$0xff] }
  0x9a   : > { %v1132_v59 = vsel %vm12587_vm10, %v1130_v9, %v17601_v18  ;;  %v2257_v25 = vrot.slane %v1114_v43, %v11537_v5  ;;  %v2261_v56 = vrot.slane %v1117_v12, %v11537_v5  ;;  %v2265_v6 = vrot.slane %v1120_v62, %v11537_v5 }
  0x9b   : > { %v2269_v52 = vrot.slane %v1123_v29, %v11537_v5  ;;  %v2273_v2 = vrot.slane %v1126_v31, %v11537_v5  ;;  %v2277_v0 = vrot.slane %v1129_v39, %v11537_v5  ;;  %v2281_v27 = vrot.slane %v1132_v59, %v11537_v5  ;;  %v17608_v39 = vld [vmem:[#allocation92_spill] sm:$0xff] }
  0x9c   : > { %v2285_v58 = vrot.slane %v1135_v36, %v11537_v5  ;;  %v2478_v54 = vsel %vm2154_vm1, %v2229_v55, %v2225_v47  ;;  %v2485_v19 = vsel %vm2154_vm1, %v2261_v56, %v2257_v25  ;;  %v17604_v17 = vrot.slane %v17603_v35, 7  ;;  %v17607_v55 = vld [vmem:[#allocation91_spill] sm:$0xff]  ;;  %v17610_v56 = vld [vmem:[#allocation93_spill] sm:$0xff] }
  0x9d   : > { %v12725_v43 = vsel %vm1080_vm2, %v2233_v48, %v2478_v54  ;;  %v2486_v12 = vsel %vm1080_vm2, %v2265_v6, %v2485_v19  ;;  %v2618_v34 = vsel %vm2154_vm1, %v17606_v41, %v17605_v16  ;;  %v9703_v33 = vrot.slane %v17609_v61, 9  ;;  %v17613_v19 = vld [vmem:[#allocation94_spill] sm:$0xff] }
  0x9e   : > { %17602 = vst [vmem:[#allocation87_spill] sm:$0xff] %v12725_v43  ;;  %v727_v29 = vsel %vm618_vm0, %v17604_v17, 0.0  ;;  %v2480_v32 = vsel %vm2157_vm3, %v2237_v14, %v12725_v43  ;;  %v2487_v62 = vsel %vm2157_vm3, %v2269_v52, %v2486_v12  ;;  %v2619_v48 = vsel %vm1080_vm2, %v17607_v55, %v2618_v34  ;;  %v17611_v52 = vld [vmem:[#allocation108_spill] sm:$0xff]  ;;  %v17615_v17 = vld [vmem:[#allocation95_spill] sm:$0xff]  ;;  %v17616_v16 = vld [vmem:[#allocation106_spill] sm:$0xff] }
  0x9f   : > { %v12738_v47 = vrot.slane %v727_v29, %v11552_v11  ;;  %v2481_v23 = vsel %vm1082_vm4, %v2241_v4, %v2480_v32  ;;  %v2488_v31 = vsel %vm1082_vm4, %v2273_v2, %v2487_v62  ;;  %v2620_v9 = vsel %vm2157_vm3, %v17608_v39, %v2619_v48  ;;  %v17617_v34 = vld [vmem:[#allocation110_spill] sm:$0xff]  ;;  %v17620_v48 = vld [vmem:[#allocation112_spill] sm:$0xff]  ;;  %v17622_v39 = vld [vmem:[#allocation111_spill] sm:$0xff] }
  0xa0   : > { %v2482_v36 = vsel %vm2160_vm5, %v2245_v10, %v2481_v23  ;;  %v2489_v14 = vsel %vm2160_vm5, %v2277_v0, %v2488_v31  ;;  %v2621_v6 = vsel %vm1082_vm4, %v17610_v56, %v2620_v9  ;;  %v17612_v2 = vrot.slane %v17611_v52, 7 }
  0xa1   : > { %v1209_v18 = vrot.slane %v12738_v47, 7  ;;  %v2577_v59 = vrot.slane %v12738_v47, %v11537_v5  ;;  %v2483_v25 = vsel %vm1084_vm6, %v2249_v51, %v2482_v36  ;;  %v2490_v4 = vsel %vm1084_vm6, %v2281_v27, %v2489_v14  ;;  %v17623_v14 = vld [vmem:[#allocation113_spill] sm:$0xff] }
  0xa2   : > { %v12760_v54 = vsel %vm12587_vm10, %v9703_v33, %v17612_v2  ;;  %v2484_v10 = vsel %vm2163_vm7, %v2253_v8, %v2483_v25  ;;  %v12764_v0 = vsel %vm2163_vm7, %v2285_v58, %v2490_v4  ;;  %v2622_v12 = vsel %vm2160_vm5, %v17613_v19, %v2621_v6  ;;  %v17619_v58 = vld [vmem:[#allocation109_spill] sm:$0xff]  ;;  %v17626_v19 = vld [vmem:[#allocation71_spill] sm:$0xff] }
  0xa3   : > { %v17614_v51 = vmov %v17612_v2  ;;  %v10823_v35 = vpack.i.bf16 %v12764_v0, %v2484_v10  ;;  %v2623_v29 = vsel %vm1084_vm6, %v17615_v17, %v2622_v12  ;;  %v1141_v41 = vrot.slane %v17616_v16, 7 }
  0xa4   : > { %v1140_v27 = vrot.slane %v17614_v51, 2  ;;  %v17618_v32 = vrot.slane %v17617_v34, 7  ;;  %v12777_v8 = vsel %vm2163_vm7, %v2577_v59, %v2623_v29  ;;  %v1147_v55 = vrot.slane %v17619_v58, 7  ;;  %v17627_v51 = vld [vmem:[#allocation74_spill] sm:$0xff]  ;;  %v17631_v34 = vld [vmem:[#allocation73_spill] sm:$0xff] }
  0xa5   : > { %v17621_v23 = vrot.slane %v17620_v48, 7  ;;  %v1153_v9 = vrot.slane %v17622_v39, 7  ;;  %10824 = vrot.lane.b32.xlu0 %v10823_v35, %s11388_s22  ;;  %v10818_v61 = vpack.i.bf16 %v12777_v8, %v12599_v24  ;;  %v1143_v36 = vrot.slane %v1141_v41, 2 }
  0xa6   : > { %v1146_v62 = vrot.slane %v17618_v32, 2  ;;  %v1142_v33 = vsel %vm12587_vm10, %v1140_v27, %v1141_v41  ;;  %v17624_v59 = vrot.slane %v17623_v14, 7  ;;  %v1149_v56 = vrot.slane %v1147_v55, 2 }
  0xa7   : > { %v1152_v31 = vrot.slane %v17621_v23, 2  ;;  %v1155_v52 = vrot.slane %v1153_v9, 2  ;;  %10819 = vrot.lane.b32.xlu1 %v10818_v61, %s17315_s30  ;;  %v17625_v2 = vmov %v17618_v32  ;;  %v9704_v12 = vrot.slane %v17626_v19, 9  ;;  %v17632_v32 = vld [vmem:[#allocation79_spill] sm:$0xff]  ;;  %v17638_v61 = vld [vmem:[#allocation76_spill] sm:$0xff]  ;;  %s11389_s30 = smov 12  }
  0xa8   : > { %v1158_v25 = vrot.slane %v17624_v59, 2  ;;  %v1148_v4 = vsel %vm12587_vm10, %v1146_v62, %v1147_v55  ;;  %v1145_v24 = vsel %vm12587_vm10, %v1143_v36, %v17625_v2  ;;  %v17628_v27 = vrot.slane %v17627_v51, 7 }
  0xa9   : > { %v1154_v6 = vsel %vm12587_vm10, %v1152_v31, %v1153_v9  ;;  %v17629_v17 = vmov %v17621_v23  ;;  %v17630_v16 = vmov %v17624_v59  ;;  %v1166_v30 = vrot.slane %v17631_v34, 7  ;;  %v17635_v23 = vld [vmem:[#allocation72_spill] sm:$0xff]  ;;  %v17636_v31 = vld [vmem:[#allocation77_spill] sm:$0xff] }
  0xaa   : > { %v1160_v10 = vsel %vm12587_vm10, %v1158_v25, %v1159_v42  ;;  %v1165_v35 = vrot.slane %v17628_v27, 2  ;;  %v1151_v29 = vsel %vm12587_vm10, %v1149_v56, %v17629_v17  ;;  %v1157_v41 = vsel %vm12587_vm10, %v1155_v52, %v17630_v16  ;;  %v17639_v25 = vld [vmem:[#allocation82_spill] sm:$0xff] }
  0xab   : > { %v17633_v62 = vrot.slane %v17632_v32, 7  ;;  %v17634_v58 = vmov %v17628_v27  ;;  %v1172_v48 = vrot.slane %v17635_v23, 7  ;;  %v17637_v39 = vrot.slane %v17636_v31, 7 }
  0xac   : > { %v1164_v55 = vsel %vm12587_vm10, %v9704_v12, %v17634_v58  ;;  %v1178_v36 = vrot.slane %v17638_v61, 7  ;;  %v1167_v14 = vsel %vm12587_vm10, %v1165_v35, %v1166_v30  ;;  %v1168_v59 = vrot.slane %v1166_v30, 2  ;;  %v17644_v61 = vld [vmem:[#allocation11_spill] sm:$0xff] }
  0xad   : > { %v1171_v42 = vrot.slane %v17633_v62, 2  ;;  %v1177_v9 = vrot.slane %v17637_v39, 2  ;;  %v17640_v56 = vrot.slane %v17639_v25, 7  ;;  %v2289_v2 = vrot.slane %v12760_v54, %v11537_v5  ;;  %v17647_v25 = vld [vmem:[#allocation27_spill] sm:$0xff] }
  0xae   : > { %v1174_v12 = vrot.slane %v1172_v48, 2  ;;  %v1180_v27 = vrot.slane %v1178_v36, 2  ;;  %v17641_v17 = vmov %v17633_v62  ;;  %v2293_v54 = vrot.slane %v1142_v33, %v11537_v5 }
  0xaf   : > { %v1183_v52 = vrot.slane %v17640_v56, 2  ;;  %v1173_v19 = vsel %vm12587_vm10, %v1171_v42, %v1172_v48  ;;  %v1179_v51 = vsel %vm12587_vm10, %v1177_v9, %v1178_v36  ;;  %v1170_v35 = vsel %vm12587_vm10, %v1168_v59, %v17641_v17  ;;  %v17651_v17 = vld [vmem:[#allocation28_spill] sm:$0xff] }
  0xb0   : > { %v2297_v34 = vrot.slane %v1145_v24, %v11537_v5  ;;  %v17642_v30 = vmov %v17637_v39  ;;  %v17643_v42 = vmov %v17640_v56  ;;  %v2301_v58 = vrot.slane %v1148_v4, %v11537_v5 }
  0xb1   : > { %v1185_v16 = vsel %vm12587_vm10, %v1183_v52, %v1184_v53  ;;  %v1176_v62 = vsel %vm12587_vm10, %v1174_v12, %v17642_v30  ;;  %v1182_v32 = vsel %vm12587_vm10, %v1180_v27, %v17643_v42  ;;  %v2305_v22 = vrot.slane %v1151_v29, %v11537_v5 }
  0xb2   : > { %v2309_v53 = vrot.slane %v1154_v6, %v11537_v5  ;;  %v2313_v33 = vrot.slane %v1157_v41, %v11537_v5  ;;  %v2317_v24 = vrot.slane %v1160_v10, %v11537_v5  ;;  %v2321_v23 = vrot.slane %v1164_v55, %v11537_v5 }
  0xb3   : > { %v2325_v48 = vrot.slane %v1167_v14, %v11537_v5  ;;  %v2329_v31 = vrot.slane %v1170_v35, %v11537_v5  ;;  %v2333_v39 = vrot.slane %v1173_v19, %v11537_v5  ;;  %v2337_v9 = vrot.slane %v1176_v62, %v11537_v5  ;;  %v17645_v14 = vld [vmem:[#allocation14_spill] sm:$0xff] }
  0xb4   : > { %v2341_v4 = vrot.slane %v1179_v51, %v11537_v5  ;;  %v2345_v29 = vrot.slane %v1182_v32, %v11537_v5  ;;  %v2349_v6 = vrot.slane %v1185_v16, %v11537_v5  ;;  %v2492_v41 = vsel %vm2154_vm1, %v2293_v54, %v2289_v2  ;;  %v17649_v2 = vld [vmem:[#allocation12_spill] sm:$0xff] }
  0xb5   : > { %v2493_v10 = vsel %vm1080_vm2, %v2297_v34, %v2492_v41  ;;  %v2499_v55 = vsel %vm2154_vm1, %v2325_v48, %v2321_v23  ;;  %v9711_v36 = vrot.slane %v17644_v61, 9  ;;  %v17646_v59 = vrot.slane %v17645_v14, 7  ;;  %v17652_v34 = vld [vmem:[#allocation15_spill] sm:$0xff]  ;;  %v17655_v48 = vld [vmem:[#allocation22_spill] sm:$0xff] }
  0xb6   : > { %v2494_v52 = vsel %vm2157_vm3, %v2301_v58, %v2493_v10  ;;  %v2500_v19 = vsel %vm1080_vm2, %v2329_v31, %v2499_v55  ;;  %v17650_v27 = vrot.slane %v17649_v2, 7  ;;  %v17653_v30 = vrot.slane %v17652_v34, 7  ;;  %v17660_v14 = vld [vmem:[#allocation18_spill] sm:$0xff] }
  0xb7   : > { %v1686_v56 = vsel %vm12587_vm10, %v17647_v25, %v17646_v59  ;;  %v17648_v12 = vmov %v17646_v59  ;;  %v2495_v16 = vsel %vm1082_vm4, %v2305_v22, %v2494_v52  ;;  %v2501_v54 = vsel %vm2157_vm3, %v2333_v39, %v2500_v19  ;;  %v17657_v22 = vld [vmem:[#allocation16_spill] sm:$0xff]  ;;  %v17659_v39 = vld [vmem:[#allocation29_spill] sm:$0xff]  ;;  %v17669_v34 = vld [vmem:[#allocation30_spill] sm:$0xff] }
  0xb8   : > { %v1687_v51 = vrot.slane %v17648_v12, 2  ;;  %v1692_v35 = vsel %vm12587_vm10, %v17651_v17, %v17650_v27  ;;  %v1683_v62 = vsel %vm12587_vm10, %v9711_v36, %v17653_v30  ;;  %v17654_v42 = vmov %v17650_v27  ;;  %v17663_v12 = vld [vmem:[#allocation45_spill] sm:$0xff]  ;;  %v17665_v27 = vld [vmem:[#allocation23_spill] sm:$0xff] }
  0xb9   : > { %v1693_v32 = vrot.slane %v17654_v42, 2  ;;  %v2496_v58 = vsel %vm2160_vm5, %v2309_v53, %v2495_v16  ;;  %v2502_v23 = vsel %vm1082_vm4, %v2337_v9, %v2501_v54  ;;  %v17656_v31 = vrot.slane %v17655_v48, 7  ;;  %v17671_v42 = vld [vmem:[#allocation20_spill] sm:$0xff]  ;;  %v17675_v48 = vld [vmem:[#allocation31_spill] sm:$0xff] }
  0xba   : > { %v17658_v10 = vrot.slane %v17657_v22, 7  ;;  %v2497_v61 = vsel %vm1084_vm6, %v2313_v33, %v2496_v58  ;;  %v2503_v36 = vsel %vm2160_vm5, %v2341_v4, %v2502_v23  ;;  %v17661_v59 = vrot.slane %v17660_v14, 7  ;;  %v17664_v4 = vld [vmem:[#allocation13_spill] sm:$0xff] }
  0xbb   : > { %v1689_v41 = vsel %vm12587_vm10, %v1687_v51, %v17656_v31  ;;  %v12912_v52 = vsel %vm2163_vm7, %v2317_v24, %v2497_v61  ;;  %v2504_v19 = vsel %vm1084_vm6, %v2345_v29, %v2503_v36  ;;  %v1704_v33 = vsel %vm12587_vm10, %v17663_v12, %v1703_v63  ;;  %v17667_v24 = vld [vmem:[#allocation19_spill] sm:$0xff]  ;;  %v17673_v58 = vld [vmem:[#allocation17_spill] sm:$0xff] }
  0xbc   : > { %v1698_v55 = vsel %vm12587_vm10, %v17659_v39, %v17658_v10  ;;  %v1695_v53 = vsel %vm12587_vm10, %v1693_v32, %v17661_v59  ;;  %v17662_v9 = vmov %v17658_v10  ;;  %v9712_v51 = vrot.slane %v17664_v4, 9  ;;  %v17677_v39 = vld [vmem:[#allocation25_spill] sm:$0xff]  ;;  %v17683_v4 = vld [vmem:[#allocation34_spill] sm:$0xff] }
  0xbd   : > { %v1699_v25 = vrot.slane %v17662_v9, 2  ;;  %v12922_v2 = vsel %vm2163_vm7, %v2349_v6, %v2504_v19  ;;  %v17666_v17 = vrot.slane %v17665_v27, 7  ;;  %v17668_v54 = vrot.slane %v17667_v24, 7  ;;  %v17679_v14 = vld [vmem:[#allocation21_spill] sm:$0xff]  ;;  %v17681_v9 = vld [vmem:[#allocation32_spill] sm:$0xff] }
  0xbe   : > { %v10828_v63 = vpack.i.bf16 %v12922_v2, %v12912_v52  ;;  %v17672_v6 = vrot.slane %v17671_v42, 7  ;;  %v17674_v23 = vrot.slane %v17673_v58, 7  ;;  %v17678_v61 = vrot.slane %v17677_v39, 7  ;;  %v17684_v27 = vld [vmem:[#allocation24_spill] sm:$0xff] }
  0xbf   : > { %v1701_v16 = vsel %vm12587_vm10, %v1699_v25, %v17666_v17  ;;  %v1711_v15 = vsel %vm12587_vm10, %v17669_v34, %v17668_v54  ;;  %v17670_v29 = vmov %v17668_v54  ;;  %v17680_v59 = vrot.slane %v17679_v14, 7 }
  0xc0   : > { %v1712_v30 = vrot.slane %v17670_v29, 2  ;;  %v1708_v32 = vsel %vm12587_vm10, %v9712_v51, %v17672_v6  ;;  %v1717_v31 = vsel %vm12587_vm10, %v17675_v48, %v17674_v23  ;;  %v17676_v22 = vmov %v17674_v23  ;;  %10829 = vrot.lane.b32.xlu0 %v10828_v63, %s11388_s22 }
  0xc1   : > { %v1718_v10 = vrot.slane %v17676_v22, 2  ;;  %v1723_v25 = vsel %vm12587_vm10, %v17681_v9, %v17680_v59  ;;  %v17682_v19 = vmov %v17680_v59  ;;  %v1729_v51 = vsel %vm12587_vm10, %v17683_v4, %v1728_v44 }
  0xc2   : > { %v1714_v36 = vsel %vm12587_vm10, %v1712_v30, %v17678_v61  ;;  %v1724_v12 = vrot.slane %v17682_v19, 2  ;;  %v17685_v17 = vrot.slane %v17684_v27, 7  ;;  %v3073_v54 = vrot.slane %v1683_v62, %v11537_v5  ;;  %v17686_v30 = vld [vmem:[#allocation26_spill] sm:$0xff]  ;;  %v17689_v61 = vld [vmem:[#allocation48_spill] sm:$0xff] }
  0xc3   : > { %v3077_v34 = vrot.slane %v1686_v56, %v11537_v5  ;;  %v3081_v29 = vrot.slane %v1689_v41, %v11537_v5  ;;  %v17687_v42 = vrot.slane %v17686_v30, 7  ;;  %v3085_v44 = vrot.slane %v1692_v35, %v11537_v5 }
  0xc4   : > { %v1720_v24 = vsel %vm12587_vm10, %v1718_v10, %v17685_v17  ;;  %v3089_v63 = vrot.slane %v1695_v53, %v11537_v5  ;;  %v3093_v6 = vrot.slane %v1698_v55, %v11537_v5  ;;  %v3097_v58 = vrot.slane %v1701_v16, %v11537_v5  ;;  %v17688_v10 = vld [vmem:[#allocation46_spill] sm:$0xff] }
  0xc5   : > { %v1726_v38 = vsel %vm12587_vm10, %v1724_v12, %v17687_v42  ;;  %v3101_v23 = vrot.slane %v1704_v33, %v11537_v5  ;;  %v3105_v62 = vrot.slane %v1708_v32, %v11537_v5  ;;  %v3109_v56 = vrot.slane %v1711_v15, %v11537_v5  ;;  %v17693_v12 = vld [vmem:[#allocation47_spill] sm:$0xff] }
  0xc6   : > { %v3113_v41 = vrot.slane %v1714_v36, %v11537_v5  ;;  %v3117_v48 = vrot.slane %v1717_v31, %v11537_v5  ;;  %v3121_v22 = vrot.slane %v1720_v24, %v11537_v5  ;;  %v3125_v35 = vrot.slane %v1723_v25, %v11537_v5  ;;  %v17691_v36 = vld [vmem:[#allocation61_spill] sm:$0xff] }
  0xc7   : > { %v3129_v53 = vrot.slane %v1726_v38, %v11537_v5  ;;  %v3133_v55 = vrot.slane %v1729_v51, %v11537_v5  ;;  %v3276_v16 = vsel %vm2154_vm1, %v3077_v34, %v3073_v54  ;;  %v3283_v33 = vsel %vm2154_vm1, %v3109_v56, %v3105_v62  ;;  %v17695_v51 = vld [vmem:[#allocation63_spill] sm:$0xff]  ;;  %v17696_v54 = vld [vmem:[#allocation49_spill] sm:$0xff]  ;;  %v17699_v62 = vld [vmem:[#allocation52_spill] sm:$0xff] }
  0xc8   : > { %v3277_v32 = vsel %vm1080_vm2, %v3081_v29, %v3276_v16  ;;  %v3284_v15 = vsel %vm1080_vm2, %v3113_v41, %v3283_v33  ;;  %v9709_v39 = vrot.slane %v17688_v10, 9  ;;  %v17690_v31 = vrot.slane %v17689_v61, 7 }
  0xc9   : > { %v3278_v59 = vsel %vm2157_vm3, %v3085_v44, %v3277_v32  ;;  %v3285_v9 = vsel %vm2157_vm3, %v3117_v48, %v3284_v15  ;;  %v17694_v4 = vrot.slane %v17693_v12, 7  ;;  %v17697_v34 = vrot.slane %v17696_v54, 7  ;;  %v17704_v15 = vld [vmem:[#allocation51_spill] sm:$0xff] }
  0xca   : > { %v1636_v14 = vsel %vm12587_vm10, %v17691_v36, %v17690_v31  ;;  %v17692_v25 = vmov %v17690_v31  ;;  %v3279_v17 = vsel %vm1082_vm4, %v3089_v63, %v3278_v59  ;;  %v3286_v24 = vsel %vm1082_vm4, %v3121_v22, %v3285_v9  ;;  %v17701_v63 = vld [vmem:[#allocation50_spill] sm:$0xff]  ;;  %v17703_v22 = vld [vmem:[#allocation64_spill] sm:$0xff]  ;;  %v17708_v59 = vld [vmem:[#allocation53_spill] sm:$0xff] }
  0xcb   : > { %v1637_v19 = vrot.slane %v17692_v25, 2  ;;  %v1642_v27 = vsel %vm12587_vm10, %v17695_v51, %v17694_v4  ;;  %v1633_v29 = vsel %vm12587_vm10, %v9709_v39, %v17697_v34  ;;  %v17698_v30 = vmov %v17694_v4  ;;  %v17707_v36 = vld [vmem:[#allocation70_spill] sm:$0xff]  ;;  %v17709_v25 = vld [vmem:[#allocation55_spill] sm:$0xff]  ;;  %v17711_v4 = vld [vmem:[#allocation56_spill] sm:$0xff] }
  0xcc   : > { %v1643_v42 = vrot.slane %v17698_v30, 2  ;;  %v3280_v38 = vsel %vm2160_vm5, %v3093_v6, %v3279_v17  ;;  %v3287_v44 = vsel %vm2160_vm5, %v3125_v35, %v3286_v24  ;;  %v17700_v56 = vrot.slane %v17699_v62, 7  ;;  %v17713_v17 = vld [vmem:[#allocation65_spill] sm:$0xff]  ;;  %v17717_v34 = vld [vmem:[#allocation54_spill] sm:$0xff] }
  0xcd   : > { %v17702_v48 = vrot.slane %v17701_v63, 7  ;;  %v3281_v33 = vsel %vm1084_vm6, %v3097_v58, %v3280_v38  ;;  %v3288_v32 = vsel %vm1084_vm6, %v3129_v53, %v3287_v44  ;;  %v17705_v10 = vrot.slane %v17704_v15, 7  ;;  %v17715_v24 = vld [vmem:[#allocation57_spill] sm:$0xff] }
  0xce   : > { %v1639_v41 = vsel %vm12587_vm10, %v1637_v19, %v17700_v56  ;;  %v3282_v61 = vsel %vm2163_vm7, %v3101_v23, %v3281_v33  ;;  %v3289_v31 = vsel %vm2163_vm7, %v3133_v55, %v3288_v32  ;;  %v1654_v58 = vsel %vm12587_vm10, %v17707_v36, %v1653_v46  ;;  %v17721_v56 = vld [vmem:[#allocation58_spill] sm:$0xff]  ;;  %v17724_v33 = vld [vmem:[#allocation60_spill] sm:$0xff]  ;;  %v17728_v36 = vld [vmem:[#allocation59_spill] sm:$0xff] }
  0xcf   : > { %v1648_v16 = vsel %vm12587_vm10, %v17703_v22, %v17702_v48  ;;  %v1645_v6 = vsel %vm12587_vm10, %v1643_v42, %v17705_v10  ;;  %v17706_v35 = vmov %v17702_v48  ;;  %v9710_v53 = vrot.slane %v17708_v59, 9  ;;  %v17719_v42 = vld [vmem:[#allocation66_spill] sm:$0xff]  ;;  %v17723_v48 = vld [vmem:[#allocation67_spill] sm:$0xff] }
  0xd0   : > { %v1649_v39 = vrot.slane %v17706_v35, 2  ;;  %v10838_v9 = vpack.i.bf16 %v3289_v31, %v3282_v61  ;;  %v17710_v19 = vrot.slane %v17709_v25, 7  ;;  %v17712_v51 = vrot.slane %v17711_v4, 7  ;;  %v17730_v4 = vld [vmem:[#allocation62_spill] sm:$0xff] }
  0xd1   : > { %v17716_v54 = vrot.slane %v17715_v24, 7  ;;  %v17718_v30 = vrot.slane %v17717_v34, 7  ;;  %v17722_v63 = vrot.slane %v17721_v56, 7  ;;  %v17725_v32 = vrot.slane %v17724_v33, 7  ;;  %v17732_v34 = vld [vmem:[#allocation75_spill] sm:$0xff] }
  0xd2   : > { %v1651_v12 = vsel %vm12587_vm10, %v1649_v39, %v17710_v19  ;;  %v1661_v23 = vsel %vm12587_vm10, %v17713_v17, %v17712_v51  ;;  %v17714_v13 = vmov %v17712_v51  ;;  %10839 = vrot.lane.b32.xlu1 %v10838_v9, %s11389_s30  ;;  %v17727_v39 = vld [vmem:[#allocation68_spill] sm:$0xff]  ;;  %v3009_v31 = vrot.slane %v1633_v29, %v11537_v5 }
  0xd3   : > { %v1662_v55 = vrot.slane %v17714_v13, 2  ;;  %v1658_v46 = vsel %vm12587_vm10, %v9710_v53, %v17716_v54  ;;  %v1667_v38 = vsel %vm12587_vm10, %v17719_v42, %v17718_v30  ;;  %v17720_v44 = vmov %v17718_v30  ;;  %v17733_v42 = vld [vmem:[#allocation80_spill] sm:$0xff] }
  0xd4   : > { %v1668_v62 = vrot.slane %v17720_v44, 2  ;;  %v1673_v22 = vsel %vm12587_vm10, %v17723_v48, %v17722_v63  ;;  %v17726_v10 = vmov %v17722_v63  ;;  %v1679_v61 = vsel %vm12587_vm10, %v17727_v39, %v1678_v37 }
  0xd5   : > { %v1664_v15 = vsel %vm12587_vm10, %v1662_v55, %v17725_v32  ;;  %v1674_v35 = vrot.slane %v17726_v10, 2  ;;  %v17729_v59 = vrot.slane %v17728_v36, 7  ;;  %v3013_v9 = vrot.slane %v1636_v14, %v11537_v5  ;;  %v17737_v32 = vld [vmem:[#allocation83_spill] sm:$0xff] }
  0xd6   : > { %v3017_v25 = vrot.slane %v1639_v41, %v11537_v5  ;;  %v3021_v19 = vrot.slane %v1642_v27, %v11537_v5  ;;  %v17731_v51 = vrot.slane %v17730_v4, 7  ;;  %v3025_v37 = vrot.slane %v1645_v6, %v11537_v5 }
  0xd7   : > { %v1670_v53 = vsel %vm12587_vm10, %v1668_v62, %v17729_v59  ;;  %v3029_v29 = vrot.slane %v1648_v16, %v11537_v5  ;;  %v3033_v17 = vrot.slane %v1651_v12, %v11537_v5  ;;  %v3037_v13 = vrot.slane %v1654_v58, %v11537_v5  ;;  %v17735_v62 = vld [vmem:[#allocation78_spill] sm:$0xff] }
  0xd8   : > { %v1676_v50 = vsel %vm12587_vm10, %v1674_v35, %v17731_v51  ;;  %v3041_v55 = vrot.slane %v1658_v46, %v11537_v5  ;;  %v3045_v14 = vrot.slane %v1661_v23, %v11537_v5  ;;  %v3049_v41 = vrot.slane %v1664_v15, %v11537_v5 }
  0xd9   : > { %v3053_v27 = vrot.slane %v1667_v38, %v11537_v5  ;;  %v3057_v24 = vrot.slane %v1670_v53, %v11537_v5  ;;  %v3061_v54 = vrot.slane %v1673_v22, %v11537_v5  ;;  %v3065_v6 = vrot.slane %v1676_v50, %v11537_v5  ;;  %v17739_v53 = vld [vmem:[#allocation81_spill] sm:$0xff] }
  0xda   : > { %v3069_v16 = vrot.slane %v1679_v61, %v11537_v5  ;;  %v3262_v12 = vsel %vm2154_vm1, %v3013_v9, %v3009_v31  ;;  %v3269_v58 = vsel %vm2154_vm1, %v3045_v14, %v3041_v55  ;;  %v9705_v46 = vrot.slane %v17732_v34, 9 }
  0xdb   : > { %v3263_v23 = vsel %vm1080_vm2, %v3017_v25, %v3262_v12  ;;  %v3270_v30 = vsel %vm1080_vm2, %v3049_v41, %v3269_v58  ;;  %v17734_v38 = vrot.slane %v17733_v42, 7  ;;  %v1191_v56 = vrot.slane %v17735_v62, 7  ;;  %v17740_v25 = vld [vmem:[#allocation85_spill] sm:$0xff] }
  0xdc   : > { %v3264_v63 = vsel %vm2157_vm3, %v3021_v19, %v3263_v23  ;;  %v3271_v48 = vsel %vm2157_vm3, %v3053_v27, %v3270_v30  ;;  %v17738_v15 = vrot.slane %v17737_v32, 7  ;;  %v1197_v9 = vrot.slane %v17739_v53, 7  ;;  %v570_v12 = vld [vmem:[%s11545_s18 + $0xb0] sm:$0xff] }
  0xdd   : > { %v1190_v44 = vrot.slane %v17734_v38, 2  ;;  %v17736_v22 = vmov %v17734_v38  ;;  %v3265_v35 = vsel %vm1082_vm4, %v3025_v37, %v3264_v63  ;;  %v3272_v39 = vsel %vm1082_vm4, %v3057_v24, %v3271_v48  ;;  %v574_v42 = vld [vmem:[%s11545_s18 + $0xd0] sm:$0xff]  ;;  %v575_v38 = vld [vmem:[%s11545_s18 + $0xd8] sm:$0xff] }
  0xde   : > { %v1189_v33 = vsel %vm12587_vm10, %v9705_v46, %v17736_v22  ;;  %v1196_v10 = vrot.slane %v17738_v15, 2  ;;  %v1193_v31 = vrot.slane %v1191_v56, 2  ;;  %v3266_v36 = vsel %vm2160_vm5, %v3029_v29, %v3265_v35  ;;  %v17743_v29 = vld [vmem:[#allocation84_spill] sm:$0xff]  ;;  %v17744_v46 = vld [vmem:[#allocation86_spill] sm:$0xff] }
  0xdf   : > { %v1192_v61 = vsel %vm12587_vm10, %v1190_v44, %v1191_v56  ;;  %v3273_v59 = vsel %vm2160_vm5, %v3061_v54, %v3272_v39  ;;  %v17741_v19 = vrot.slane %v17740_v25, 7  ;;  %v3267_v51 = vsel %vm1084_vm6, %v3033_v17, %v3266_v36  ;;  %v571_v17 = vld [vmem:[%s11545_s18 + $0xb8] sm:$0xff]  ;;  %v13151_v44 = vld [vmem:[%s11545_s18 + $0x90] sm:$0xff] }
  0xe0   : > { %v3274_v50 = vsel %vm1084_vm6, %v3065_v6, %v3273_v59  ;;  %v17742_v37 = vmov %v17738_v15  ;;  %v1203_v14 = vrot.slane %v17743_v29, 7  ;;  %v3268_v41 = vsel %vm2163_vm7, %v3037_v13, %v3267_v51 }
  0xe1   : > { %v1202_v4 = vrot.slane %v17741_v19, 2  ;;  %v1195_v55 = vsel %vm12587_vm10, %v1193_v31, %v17742_v37  ;;  %v3275_v27 = vsel %vm2163_vm7, %v3069_v16, %v3274_v50  ;;  %v1198_v24 = vsel %vm12587_vm10, %v1196_v10, %v1197_v9 }
  0xe2   : > { %v1199_v54 = vrot.slane %v1197_v9, 2  ;;  %v10833_v58 = vpack.i.bf16 %v3275_v27, %v3268_v41  ;;  %v1205_v34 = vrot.slane %v1203_v14, 2  ;;  %v17745_v23 = vrot.slane %v17744_v46, 7 }
  0xe3   : > { %v1204_v6 = vsel %vm12587_vm10, %v1202_v4, %v1203_v14  ;;  %v17746_v13 = vmov %v17741_v19  ;;  %v2353_v62 = vrot.slane %v1189_v33, %v11537_v5  ;;  %v2357_v56 = vrot.slane %v1192_v61, %v11537_v5 }
  0xe4   : > { %v1208_v30 = vrot.slane %v17745_v23, 2  ;;  %v1201_v16 = vsel %vm12587_vm10, %v1199_v54, %v17746_v13  ;;  %v2361_v63 = vrot.slane %v1195_v55, %v11537_v5  ;;  %10834 = vrot.lane.b32.xlu0 %v10833_v58, %s11389_s30  ;;  %v17747_v48 = vmov %v17745_v23 }
  0xe5   : > { %v1207_v22 = vsel %vm12587_vm10, %v1205_v34, %v17747_v48  ;;  %v2365_v15 = vrot.slane %v1198_v24, %v11537_v5  ;;  %v2369_v33 = vrot.slane %v1201_v16, %v11537_v5  ;;  %v2373_v10 = vrot.slane %v1204_v6, %v11537_v5 }
  0xe6   : > { %v1210_v32 = vsel %vm12587_vm10, %v1208_v30, %v1209_v18  ;;  %v2377_v35 = vrot.slane %v1207_v22, %v11537_v5  ;;  %v2506_v61 = vsel %vm2154_vm1, %v2357_v56, %v2353_v62  ;;  %v10843_v47 = vpack.i.bf16 %v12912_v52, %v12764_v0 }
  0xe7   : > { %v2381_v39 = vrot.slane %v1210_v32, %v11537_v5  ;;  %v2507_v31 = vsel %vm1080_vm2, %v2361_v63, %v2506_v61  ;;  %v654_v36 = vrot.slane %v570_v12, 7  ;;  %v655_v59 = vrot.slane %v571_v17, 7 }
  0xe8   : > { %v2508_v18 = vsel %vm2157_vm3, %v2365_v15, %v2507_v31  ;;  %v660_v53 = vrot.slane %v574_v42, 7  ;;  %v661_v9 = vrot.slane %v575_v38, 7  ;;  %10844 = vrot.lane.b32.xlu0 %v10843_v47, %s11390_s29 }
  0xe9   : > { %v2509_v19 = vsel %vm1082_vm4, %v2369_v33, %v2508_v18  ;;  %v656_v4 = vsel %vm618_vm0, %v654_v36, %v655_v59  ;;  %v714_v51 = vsel %vm618_vm0, 0.0, %v654_v36  ;;  %v731_v50 = vsel %vm618_vm0, %v655_v59, 0.0 }
  0xea   : > { %v2510_v0 = vsel %vm2160_vm5, %v2373_v10, %v2509_v19  ;;  %v662_v52 = vsel %vm618_vm0, %v660_v53, %v661_v9  ;;  %v716_v37 = vsel %vm618_vm0, 0.0, %v660_v53  ;;  %v733_v55 = vsel %vm618_vm0, %v661_v9, 0.0 }
  0xeb   : > { %v2511_v29 = vsel %vm1084_vm6, %v2377_v35, %v2510_v0  ;;  %v948_v14 = vcombine.high %v714_v51, %v714_v51  ;;  %v13191_v41 = vrot.slane %v714_v51, %v11552_v11  ;;  %v965_v27 = vcombine.high %v656_v4, %v656_v4 }
  0xec   : > { %v13194_v24 = vsel %vm2163_vm7, %v2381_v39, %v2511_v29  ;;  %v13197_v54 = vrot.slane %v656_v4, %v11552_v11  ;;  %v982_v12 = vcombine.high %v716_v37, %v716_v37  ;;  %v13200_v17 = vrot.slane %v716_v37, %v11552_v11 }
  0xed   : > { %17748 = vst [vmem:[#allocation88_spill] sm:$0xff] %v13191_v41  ;;  %v10848_v58 = vpack.i.bf16 %v13194_v24, %v12922_v2  ;;  %v13205_v6 = vrot.slane %v948_v14, %v11552_v11  ;;  %v13209_v34 = vcombine.high %v13191_v41, %v13191_v41  ;;  %v13212_v46 = vrot.slane %v965_v27, %v11552_v11 }
  0xee   : > { %17749 = vst [vmem:[#allocation33_spill] sm:$0xff] %v13200_v17  ;;  %v13216_v23 = vcombine.high %v13197_v54, %v13197_v54  ;;  %v13219_v30 = vrot.slane %v982_v12, %v11552_v11  ;;  %v13223_v2 = vcombine.high %v13200_v17, %v13200_v17  ;;  %v999_v42 = vcombine.high %v662_v52, %v662_v52 }
  0xef   : > { %10849 = vrot.lane.b32.xlu1 %v10848_v58, %s11390_s29  ;;  %v13228_v38 = vcombine.high %v13205_v6, %v13205_v6  ;;  %v13232_v13 = vcombine.high %v13212_v46, %v13212_v46  ;;  %v13235_v16 = vrot.slane %v662_v52, %v11552_v11  ;;  %v13238_v62 = vrot.slane %v731_v50, %v11552_v11 }
  0xf0   : > { %v13242_v56 = vcombine.high %v13219_v30, %v13219_v30  ;;  %v13245_v63 = vrot.slane %v999_v42, %v11552_v11  ;;  %v13248_v48 = vrot.slane %v733_v55, %v11552_v11  ;;  %v9707_v22 = vrot.slane %v13191_v41, 9 }
  0xf1   : > { %v13253_v32 = vcombine.high %v13235_v16, %v13235_v16  ;;  %v1238_v15 = vrot.slane %v13209_v34, 7  ;;  %v1241_v33 = vrot.slane %v13205_v6, 7  ;;  %v1244_v10 = vrot.slane %v13228_v38, 7 }
  0xf2   : > { %v13260_v35 = vcombine.high %v13245_v63, %v13245_v63  ;;  %v1247_v39 = vrot.slane %v13197_v54, 7  ;;  %v1250_v61 = vrot.slane %v13216_v23, 7  ;;  %v1253_v31 = vrot.slane %v13212_v46, 7 }
  0xf3   : > { %v1239_v47 = vsel %vm12587_vm10, %v9707_v22, %v1238_v15  ;;  %v1240_v36 = vrot.slane %v1238_v15, 2  ;;  %v1243_v59 = vrot.slane %v1241_v33, 2  ;;  %v1246_v18 = vrot.slane %v1244_v10, 2 }
  0xf4   : > { %v1249_v53 = vrot.slane %v1247_v39, 2  ;;  %v1252_v9 = vrot.slane %v1250_v61, 2  ;;  %v1255_v19 = vrot.slane %v1253_v31, 2  ;;  %v1256_v4 = vrot.slane %v13232_v13, 7 }
  0xf5   : > { %v1242_v51 = vsel %vm12587_vm10, %v1240_v36, %v1241_v33  ;;  %v1245_v50 = vsel %vm12587_vm10, %v1243_v59, %v1244_v10  ;;  %v1248_v0 = vsel %vm12587_vm10, %v1246_v18, %v1247_v39  ;;  %v1259_v52 = vrot.slane %v13238_v62, 7 }
  0xf6   : > { %v1251_v37 = vsel %vm12587_vm10, %v1249_v53, %v1250_v61  ;;  %v1254_v55 = vsel %vm12587_vm10, %v1252_v9, %v1253_v31  ;;  %v13281_v29 = vsel %vm12587_vm10, %v1255_v19, %v1256_v4  ;;  %v1258_v14 = vrot.slane %v1256_v4, 2 }
  0xf7   : > { %v9708_v27 = vrot.slane %v13200_v17, 9  ;;  %v1263_v12 = vrot.slane %v13223_v2, 7  ;;  %v1266_v58 = vrot.slane %v13219_v30, 7  ;;  %v1269_v42 = vrot.slane %v13242_v56, 7 }
  0xf8   : > { %v13289_v22 = vsel %vm12587_vm10, %v1258_v14, %v1259_v52  ;;  %v1272_v15 = vrot.slane %v13235_v16, 7  ;;  %v1275_v33 = vrot.slane %v13253_v32, 7  ;;  %v1278_v10 = vrot.slane %v13245_v63, 7 }
  0xf9   : > { %v1264_v39 = vsel %vm12587_vm10, %v9708_v27, %v1263_v12  ;;  %v1265_v61 = vrot.slane %v1263_v12, 2  ;;  %v1268_v31 = vrot.slane %v1266_v58, 2  ;;  %v1271_v36 = vrot.slane %v1269_v42, 2 }
  0xfa   : > { %v1274_v59 = vrot.slane %v1272_v15, 2  ;;  %v1277_v18 = vrot.slane %v1275_v33, 2  ;;  %v1280_v53 = vrot.slane %v1278_v10, 2  ;;  %v1281_v9 = vrot.slane %v13260_v35, 7 }
  0xfb   : > { %v1267_v19 = vsel %vm12587_vm10, %v1265_v61, %v1266_v58  ;;  %v1270_v4 = vsel %vm12587_vm10, %v1268_v31, %v1269_v42  ;;  %v1273_v52 = vsel %vm12587_vm10, %v1271_v36, %v1272_v15  ;;  %v1284_v14 = vrot.slane %v13248_v48, 7 }
  0xfc   : > { %v1276_v27 = vsel %vm12587_vm10, %v1274_v59, %v1275_v33  ;;  %v1279_v12 = vsel %vm12587_vm10, %v1277_v18, %v1278_v10  ;;  %v1282_v25 = vsel %vm12587_vm10, %v1280_v53, %v1281_v9  ;;  %v1283_v26 = vrot.slane %v1281_v9, 2 }
  0xfd   : > { %v2417_v58 = vrot.slane %v1239_v47, %v11537_v5  ;;  %v2421_v42 = vrot.slane %v1242_v51, %v11537_v5  ;;  %v2425_v61 = vrot.slane %v1245_v50, %v11537_v5  ;;  %v2429_v15 = vrot.slane %v1248_v0, %v11537_v5 }
  0xfe   : > { %v1285_v31 = vsel %vm12587_vm10, %v1283_v26, %v1284_v14  ;;  %v2433_v33 = vrot.slane %v1251_v37, %v11537_v5  ;;  %v2437_v10 = vrot.slane %v1254_v55, %v11537_v5  ;;  %v2441_v36 = vrot.slane %v13281_v29, %v11537_v5 }
  0xff   : > { %v2445_v59 = vrot.slane %v13289_v22, %v11537_v5  ;;  %v2449_v47 = vrot.slane %v1264_v39, %v11537_v5  ;;  %v2453_v51 = vrot.slane %v1267_v19, %v11537_v5  ;;  %v2457_v50 = vrot.slane %v1270_v4, %v11537_v5 }
 0x100   : > { %v2461_v0 = vrot.slane %v1273_v52, %v11537_v5  ;;  %v2465_v26 = vrot.slane %v1276_v27, %v11537_v5  ;;  %v2469_v37 = vrot.slane %v1279_v12, %v11537_v5  ;;  %v2473_v55 = vrot.slane %v1282_v25, %v11537_v5 }
 0x101   : > { %v2477_v18 = vrot.slane %v1285_v31, %v11537_v5  ;;  %v2520_v29 = vsel %vm2154_vm1, %v2421_v42, %v2417_v58  ;;  %v2527_v22 = vsel %vm2154_vm1, %v2453_v51, %v2449_v47  ;;  %v649_v53 = vrot.slane %v567_v57, 7 }
 0x102   : > { %v2521_v39 = vsel %vm1080_vm2, %v2425_v61, %v2520_v29  ;;  %v2528_v9 = vsel %vm1080_vm2, %v2457_v50, %v2527_v22  ;;  %v17750_v19 = vrot.slane %v13151_v44, 7  ;;  %v13340_v52 = vrot.slane %v13209_v34, %v11537_v5 }
 0x103   : > { %v2522_v25 = vsel %vm2157_vm3, %v2429_v15, %v2521_v39  ;;  %v2529_v14 = vsel %vm2157_vm3, %v2461_v0, %v2528_v9  ;;  %v729_v12 = vsel %vm618_vm0, %v649_v53, 0.0 }
 0x104   : > { %v712_v4 = vsel %vm618_vm0, 0.0, %v17750_v19  ;;  %17751 = vst [vmem:[#allocation40_spill] sm:$0xff] %v13340_v52  ;;  %v17752_v27 = vmov %v17750_v19  ;;  %v2523_v58 = vsel %vm1082_vm4, %v2433_v33, %v2522_v25  ;;  %v2530_v42 = vsel %vm1082_vm4, %v2465_v26, %v2529_v14 }
 0x105   : > { %v650_v57 = vsel %vm618_vm0, %v17752_v27, %v649_v53  ;;  %v914_v61 = vcombine.high %v712_v4, %v712_v4  ;;  %v13351_v31 = vrot.slane %v712_v4, %v11552_v11  ;;  %v2524_v34 = vsel %vm2160_vm5, %v2437_v10, %v2523_v58 }
 0x106   : > { %v2531_v15 = vsel %vm2160_vm5, %v2469_v37, %v2530_v42  ;;  %v931_v47 = vcombine.high %v650_v57, %v650_v57  ;;  %v13356_v51 = vrot.slane %v650_v57, %v11552_v11  ;;  %v2525_v44 = vsel %vm1084_vm6, %v2441_v36, %v2524_v34 }
 0x107   : > { %17753 = vst [vmem:[#allocation35_spill] sm:$0xff] %v13351_v31  ;;  %v2532_v50 = vsel %vm1084_vm6, %v2473_v55, %v2531_v15  ;;  %v13361_v33 = vrot.slane %v914_v61, %v11552_v11  ;;  %v13365_v0 = vcombine.high %v13351_v31, %v13351_v31  ;;  %v13368_v26 = vsel %vm2163_vm7, %v2445_v59, %v2525_v44 }
 0x108   : > { %17754 = vst [vmem:[#allocation41_spill] sm:$0xff] %v13368_v26  ;;  %v13371_v10 = vsel %vm2163_vm7, %v2477_v18, %v2532_v50  ;;  %v13374_v37 = vrot.slane %v931_v47, %v11552_v11  ;;  %v13378_v36 = vcombine.high %v13356_v51, %v13356_v51  ;;  %v13387_v59 = vrot.slane %v729_v12, %v11552_v11 }
 0x109   : > { %17755 = vst [vmem:[#allocation36_spill] sm:$0xff] %v13371_v10  ;;  %v10858_v55 = vpack.i.bf16 %v13371_v10, %v13368_v26  ;;  %v13384_v29 = vcombine.high %v13361_v33, %v13361_v33  ;;  %v9706_v18 = vrot.slane %v13351_v31, 9  ;;  %v1213_v53 = vrot.slane %v13365_v0, 7  ;;  %v13705_v10 = vld [vmem:[%s11545_s18 + $0xa8] sm:$0xff] }
 0x10a   : > { %v13392_v22 = vcombine.high %v13374_v37, %v13374_v37  ;;  %v1216_v39 = vrot.slane %v13361_v33, 7  ;;  %v1222_v9 = vrot.slane %v13356_v51, 7  ;;  %v1225_v4 = vrot.slane %v13378_v36, 7 }
 0x10b   : > { %10859 = vrot.lane.b32.xlu1 %v10858_v55, %s11388_s22  ;;  %v1219_v19 = vrot.slane %v13384_v29, 7  ;;  %v1228_v25 = vrot.slane %v13374_v37, 7  ;;  %v1234_v14 = vrot.slane %v13387_v59, 7  ;;  %v1214_v27 = vsel %vm12587_vm10, %v9706_v18, %v1213_v53 }
 0x10c   : > { %v1215_v57 = vrot.slane %v1213_v53, 2  ;;  %v1218_v12 = vrot.slane %v1216_v39, 2  ;;  %v1224_v58 = vrot.slane %v1222_v9, 2  ;;  %v1227_v61 = vrot.slane %v1225_v4, 2 }
 0x10d   : > { %v1221_v42 = vrot.slane %v1219_v19, 2  ;;  %v1230_v34 = vrot.slane %v1228_v25, 2  ;;  %v1231_v15 = vrot.slane %v13392_v22, 7  ;;  %v2385_v55 = vrot.slane %v1214_v27, %v11537_v5 }
 0x10e   : > { %v1217_v47 = vsel %vm12587_vm10, %v1215_v57, %v1216_v39  ;;  %v1220_v44 = vsel %vm12587_vm10, %v1218_v12, %v1219_v19  ;;  %v1226_v50 = vsel %vm12587_vm10, %v1224_v58, %v1225_v4  ;;  %v1229_v53 = vsel %vm12587_vm10, %v1227_v61, %v1228_v25 }
 0x10f   : > { %v1223_v18 = vsel %vm12587_vm10, %v1221_v42, %v1222_v9  ;;  %v1232_v43 = vsel %vm12587_vm10, %v1230_v34, %v1231_v15  ;;  %v1233_v20 = vrot.slane %v1231_v15, 2  ;;  %v2389_v39 = vrot.slane %v1217_v47, %v11537_v5 }
 0x110   : > { %v2393_v57 = vrot.slane %v1220_v44, %v11537_v5  ;;  %v2397_v19 = vrot.slane %v1223_v18, %v11537_v5  ;;  %v2401_v4 = vrot.slane %v1226_v50, %v11537_v5  ;;  %v2405_v9 = vrot.slane %v1229_v53, %v11537_v5  ;;  %v572_v53 = vld [vmem:[%s11545_s18 + $0xc0] sm:$0xff] }
 0x111   : > { %v1235_v27 = vsel %vm12587_vm10, %v1233_v20, %v1234_v14  ;;  %v2409_v12 = vrot.slane %v1232_v43, %v11537_v5  ;;  %v13428_v25 = vrot.slane %v13205_v6, %v11537_v5  ;;  %v2513_v42 = vsel %vm2154_vm1, %v2389_v39, %v2385_v55 }
 0x112   : > { %v2413_v58 = vrot.slane %v1235_v27, %v11537_v5  ;;  %v13434_v61 = vrot.slane %v13228_v38, %v11537_v5  ;;  %v13438_v34 = vrot.slane %v13197_v54, %v11537_v5  ;;  %v2514_v20 = vsel %vm1080_vm2, %v2393_v57, %v2513_v42  ;;  %v576_v27 = vld [vmem:[%s11545_s18 + $0xe0] sm:$0xff] }
 0x113   : > { %17756 = vst [vmem:[#allocation42_spill] sm:$0xff] %v13428_v25  ;;  %v13443_v43 = vrot.slane %v13216_v23, %v11537_v5  ;;  %v13447_v6 = vrot.slane %v13212_v46, %v11537_v5  ;;  %v13451_v14 = vrot.slane %v13232_v13, %v11537_v5  ;;  %v2515_v38 = vsel %vm2157_vm3, %v2397_v19, %v2514_v20 }
 0x114   : > { %17757 = vst [vmem:[#allocation37_spill] sm:$0xff] %v13434_v61  ;;  %17758 = vst [vmem:[#allocation43_spill] sm:$0xff] %v13438_v34  ;;  %v13456_v54 = vrot.slane %v13223_v2, %v11537_v5  ;;  %v13460_v15 = vrot.slane %v13219_v30, %v11537_v5  ;;  %v13464_v23 = vrot.slane %v13242_v56, %v11537_v5 }
 0x115   : > { %17759 = vst [vmem:[#allocation38_spill] sm:$0xff] %v13443_v43  ;;  %17760 = vst [vmem:[#allocation44_spill] sm:$0xff] %v13447_v6  ;;  %v2516_v46 = vsel %vm1082_vm4, %v2401_v4, %v2515_v38  ;;  %v13469_v13 = vrot.slane %v13235_v16, %v11537_v5  ;;  %v13473_v47 = vrot.slane %v13253_v32, %v11537_v5  ;;  %v13522_v4 = vld [vmem:[%s11545_s18 + $0xc8] sm:$0xff] }
 0x116   : > { %17761 = vst [vmem:[#allocation114_spill] sm:$0xff] %v13451_v14  ;;  %17762 = vst [vmem:[#allocation117_spill] sm:$0xff] %v13456_v54  ;;  %v13477_v2 = vrot.slane %v13245_v63, %v11537_v5  ;;  %v2517_v30 = vsel %vm2160_vm5, %v2405_v9, %v2516_v46  ;;  %v13482_v56 = vrot.slane %v13260_v35, %v11537_v5 }
 0x117   : > { %17763 = vst [vmem:[#allocation115_spill] sm:$0xff] %v13460_v15  ;;  %17764 = vst [vmem:[#allocation118_spill] sm:$0xff] %v13464_v23  ;;  %v2585_v44 = vrot.slane %v13238_v62, %v11537_v5  ;;  %v2589_v16 = vrot.slane %v13248_v48, %v11537_v5  ;;  %v2518_v32 = vsel %vm1084_vm6, %v2409_v12, %v2517_v30 }
 0x118   : > { %17765 = vst [vmem:[#allocation97_spill] sm:$0xff] %v13469_v13  ;;  %17766 = vst [vmem:[#allocation101_spill] sm:$0xff] %v13473_v47  ;;  %v2632_v63 = vsel %vm2154_vm1, %v13428_v25, %v13340_v52  ;;  %v2639_v50 = vsel %vm2154_vm1, %v13460_v15, %v13456_v54  ;;  %v13497_v35 = vrot.slane %v13365_v0, %v11537_v5  ;;  %v17350_v25 = vrot.slane %v13705_v10, 7 }
 0x119   : > { %17767 = vst [vmem:[#allocation99_spill] sm:$0xff] %v13477_v2  ;;  %17768 = vst [vmem:[#allocation104_spill] sm:$0xff] %v13482_v56  ;;  %v13500_v62 = vsel %vm2163_vm7, %v2413_v58, %v2518_v32  ;;  %v2633_v48 = vsel %vm1080_vm2, %v13434_v61, %v2632_v63  ;;  %v2640_v55 = vsel %vm1080_vm2, %v13464_v23, %v2639_v50  ;;  %v13538_v58 = vld [vmem:[%s11545_s18 + $0xe8] sm:$0xff]  ;;  %v657_v50 = vrot.slane %v572_v53, 7 }
 0x11a   : > { %17769 = vst [vmem:[#allocation100_spill] sm:$0xff] %v13497_v35  ;;  %17770 = vst [vmem:[#allocation105_spill] sm:$0xff] %v13500_v62  ;;  %v13508_v18 = vrot.slane %v13361_v33, %v11537_v5  ;;  %v10853_v39 = vpack.i.bf16 %v13500_v62, %v13194_v24  ;;  %v2634_v0 = vsel %vm2157_vm3, %v13438_v34, %v2633_v48 }
 0x11b   : > { %v2641_v57 = vsel %vm2157_vm3, %v13469_v13, %v2640_v55  ;;  %v13519_v19 = vrot.slane %v13384_v29, %v11537_v5  ;;  %v2635_v33 = vsel %vm1082_vm4, %v13443_v43, %v2634_v0  ;;  %v13531_v9 = vrot.slane %v13356_v51, %v11537_v5 }
 0x11c   : > { %17771 = vst [vmem:[#allocation102_spill] sm:$0xff] %v13508_v18  ;;  %v2642_v24 = vsel %vm1082_vm4, %v13473_v47, %v2641_v57  ;;  %v13535_v12 = vrot.slane %v13378_v36, %v11537_v5  ;;  %10854 = vrot.lane.b32.xlu0 %v10853_v39, %s11388_s22  ;;  %v2636_v29 = vsel %vm2160_vm5, %v13447_v6, %v2635_v33  ;;  %v13554_v36 = vld [vmem:[%s11545_s18 + $0x80] sm:$0xff]  ;;  %v17324_v55 = vrot.slane %v13522_v4, 7  ;;  %s17883_s22 = smov 24  }
 0x11d   : > { %17772 = vst [vmem:[#allocation107_spill] sm:$0xff] %v13519_v19  ;;  %17773 = vst [vmem:[#allocation121_spill] sm:$0xff] %v13531_v9  ;;  %v2643_v42 = vsel %vm2160_vm5, %v13477_v2, %v2642_v24  ;;  %v13547_v20 = vrot.slane %v13374_v37, %v11537_v5  ;;  %v13551_v51 = vrot.slane %v13392_v22, %v11537_v5  ;;  %v663_v39 = vrot.slane %v576_v27, 7 }
 0x11e   : > { %17774 = vst [vmem:[#allocation69_spill] sm:$0xff] %v13535_v12  ;;  %v2637_v38 = vsel %vm1084_vm6, %v13451_v14, %v2636_v29  ;;  %v2644_v46 = vsel %vm1084_vm6, %v13482_v56, %v2643_v42  ;;  %v2581_v30 = vrot.slane %v13387_v59, %v11537_v5  ;;  %v2625_v37 = vsel %vm2154_vm1, %v13508_v18, %v13497_v35 }
 0x11f   : > { %17775 = vst [vmem:[#allocation89_spill] sm:$0xff] %v13547_v20  ;;  %17776 = vst [vmem:[#allocation90_spill] sm:$0xff] %v13551_v51  ;;  %v13566_v32 = vsel %vm2163_vm7, %v2585_v44, %v2637_v38  ;;  %v13569_v22 = vsel %vm2163_vm7, %v2589_v16, %v2644_v46  ;;  %v2626_v63 = vsel %vm1080_vm2, %v13519_v19, %v2625_v37  ;;  %v17323_v0 = vrot.slane %v13538_v58, 7 }
 0x120   : > { %17777 = vst [vmem:[#allocation91_spill] sm:$0xff] %v13566_v32  ;;  %17778 = vst [vmem:[#allocation92_spill] sm:$0xff] %v13569_v22  ;;  %v10868_v48 = vpack.i.bf16 %v13569_v22, %v13566_v32  ;;  %v2627_v59 = vsel %vm2157_vm3, %v13531_v9, %v2626_v63  ;;  %v715_v16 = vsel %vm618_vm0, 0.0, %v657_v50  ;;  %v659_v33 = vsel %vm618_vm0, %v657_v50, %v17324_v55 }
 0x121   : > { %v2628_v44 = vsel %vm1082_vm4, %v13535_v12, %v2627_v59  ;;  %v717_v27 = vsel %vm618_vm0, 0.0, %v663_v39  ;;  %v1498_v24 = vcombine.high %v715_v16, %v715_v16  ;;  %v665_v42 = vsel %vm618_vm0, %v663_v39, %v17323_v0 }
 0x122   : > { %10869 = vrot.lane.b32.xlu1 %v10868_v48, %s11385_s23  ;;  %v2629_v53 = vsel %vm2160_vm5, %v13547_v20, %v2628_v44  ;;  %v13596_v38 = vrot.slane %v715_v16, %v11552_v11  ;;  %v1515_v46 = vcombine.high %v659_v33, %v659_v33  ;;  %v13605_v50 = vrot.slane %v659_v33, %v11552_v11 }
 0x123   : > { %v2630_v29 = vsel %vm1084_vm6, %v13551_v51, %v2629_v53  ;;  %v13602_v63 = vrot.slane %v1498_v24, %v11552_v11  ;;  %v1532_v48 = vcombine.high %v717_v27, %v717_v27  ;;  %v1549_v33 = vcombine.high %v665_v42, %v665_v42 }
 0x124   : > { %v13599_v37 = vsel %vm2163_vm7, %v2581_v30, %v2630_v29  ;;  %v13611_v39 = vcombine.high %v13596_v38, %v13596_v38  ;;  %v13614_v44 = vrot.slane %v1515_v46, %v11552_v11  ;;  %v13617_v30 = vrot.slane %v717_v27, %v11552_v11 }
 0x125   : > { %17779 = vst [vmem:[#allocation103_spill] sm:$0xff] %v13599_v37  ;;  %v10863_v59 = vpack.i.bf16 %v13599_v37, %v12777_v8  ;;  %v13621_v16 = vcombine.high %v13602_v63, %v13602_v63  ;;  %v13625_v53 = vcombine.high %v13605_v50, %v13605_v50  ;;  %v13628_v8 = vrot.slane %v1532_v48, %v11552_v11 }
 0x126   : > { %v13633_v24 = vcombine.high %v13614_v44, %v13614_v44  ;;  %v13637_v27 = vcombine.high %v13617_v30, %v13617_v30  ;;  %v13640_v29 = vrot.slane %v665_v42, %v11552_v11  ;;  %v2865_v46 = vrot.slane %v13596_v38, %v11537_v5 }
 0x127   : > { %10864 = vrot.lane.b32.xlu0 %v10863_v59, %s11385_s23  ;;  %v13645_v48 = vcombine.high %v13628_v8, %v13628_v8  ;;  %v13648_v59 = vrot.slane %v1549_v33, %v11552_v11  ;;  %v13661_v45 = vrot.slane %v13611_v39, %v11537_v5  ;;  %v13670_v0 = vrot.slane %v13602_v63, %v11537_v5 }
 0x128   : > { %v13654_v57 = vcombine.high %v13640_v29, %v13640_v29  ;;  %v13674_v42 = vrot.slane %v13621_v16, %v11537_v5  ;;  %v13679_v60 = vrot.slane %v13605_v50, %v11537_v5  ;;  %v13683_v1 = vrot.slane %v13625_v53, %v11537_v5 }
 0x129   : > { %17780 = vst [vmem:[#allocation93_spill] sm:$0xff] %v13661_v45  ;;  %v13665_v33 = vcombine.high %v13648_v59, %v13648_v59  ;;  %17781 = vst [vmem:[#allocation108_spill] sm:$0xff] %v13670_v0  ;;  %v13687_v55 = vrot.slane %v13614_v44, %v11537_v5  ;;  %v13696_v49 = vrot.slane %v13633_v24, %v11537_v5  ;;  %v17349_v12 = vrot.slane %v13690_v40, 7 }
 0x12a   : > { %17782 = vst [vmem:[#allocation94_spill] sm:$0xff] %v13674_v42  ;;  %17783 = vst [vmem:[#allocation95_spill] sm:$0xff] %v13679_v60  ;;  %v2897_v3 = vrot.slane %v13617_v30, %v11537_v5  ;;  %v13702_v22 = vrot.slane %v13637_v27, %v11537_v5  ;;  %v13709_v32 = vrot.slane %v13628_v8, %v11537_v5 }
 0x12b   : > { %17784 = vst [vmem:[#allocation106_spill] sm:$0xff] %v13683_v1  ;;  %17785 = vst [vmem:[#allocation110_spill] sm:$0xff] %v13687_v55  ;;  %v13713_v7 = vrot.slane %v13645_v48, %v11537_v5  ;;  %v13717_v37 = vrot.slane %v13640_v29, %v11537_v5  ;;  %v13721_v26 = vrot.slane %v13654_v57, %v11537_v5 }
 0x12c   : > { %17786 = vst [vmem:[#allocation109_spill] sm:$0xff] %v13696_v49  ;;  %17787 = vst [vmem:[#allocation112_spill] sm:$0xff] %v13702_v22  ;;  %v13725_v62 = vrot.slane %v13648_v59, %v11537_v5  ;;  %v13729_v14 = vrot.slane %v13665_v33, %v11537_v5  ;;  %v2968_v6 = vsel %vm2154_vm1, %v13661_v45, %v2865_v46  ;;  %v651_v46 = vrot.slane %v568_v28, 7 }
 0x12d   : > { %17788 = vst [vmem:[#allocation111_spill] sm:$0xff] %v13709_v32  ;;  %17789 = vst [vmem:[#allocation113_spill] sm:$0xff] %v13713_v7  ;;  %v2975_v51 = vsel %vm2154_vm1, %v13702_v22, %v2897_v3  ;;  %v2969_v43 = vsel %vm1080_vm2, %v13670_v0, %v2968_v6  ;;  %v17801_v0 = vrot.slane %v13538_v58, 7 }
 0x12e   : > { %17790 = vst [vmem:[#allocation71_spill] sm:$0xff] %v13717_v37  ;;  %17791 = vst [vmem:[#allocation74_spill] sm:$0xff] %v13721_v26  ;;  %v2976_v20 = vsel %vm1080_vm2, %v13709_v32, %v2975_v51  ;;  %v2970_v61 = vsel %vm2157_vm3, %v13674_v42, %v2969_v43  ;;  %v17794_v51 = vrot.slane %v13554_v36, 7 }
 0x12f   : > { %17792 = vst [vmem:[#allocation73_spill] sm:$0xff] %v13725_v62  ;;  %17793 = vst [vmem:[#allocation79_spill] sm:$0xff] %v13729_v14  ;;  %v2977_v9 = vsel %vm2157_vm3, %v13713_v7, %v2976_v20  ;;  %v2971_v3 = vsel %vm1082_vm4, %v13679_v60, %v2970_v61  ;;  %v653_v61 = vsel %vm618_vm0, %v651_v46, %v17350_v25  ;;  %v17800_v7 = vrot.slane %v13522_v4, 7 }
 0x130   : > { %v2978_v6 = vsel %vm1082_vm4, %v13717_v37, %v2977_v9  ;;  %v647_v34 = vsel %vm618_vm0, %v17794_v51, %v17349_v12  ;;  %v17795_v43 = vmov %v17794_v51  ;;  %v2972_v28 = vsel %vm2160_vm5, %v13683_v1, %v2971_v3 }
 0x131   : > { %v711_v19 = vsel %vm618_vm0, 0.0, %v17795_v43  ;;  %v2979_v20 = vsel %vm2160_vm5, %v13721_v26, %v2978_v6  ;;  %v713_v9 = vsel %vm618_vm0, 0.0, %v651_v46  ;;  %v2973_v52 = vsel %vm1084_vm6, %v13687_v55, %v2972_v28 }
 0x132   : > { %v2980_v36 = vsel %vm1084_vm6, %v13725_v62, %v2979_v20  ;;  %v1430_v51 = vcombine.high %v711_v19, %v711_v19  ;;  %v13771_v43 = vrot.slane %v711_v19, %v11552_v11  ;;  %v2974_v3 = vsel %vm2163_vm7, %v13696_v49, %v2973_v52 }
 0x133   : > { %v2981_v6 = vsel %vm2163_vm7, %v13729_v14, %v2980_v36  ;;  %v1447_v12 = vcombine.high %v647_v34, %v647_v34  ;;  %v13778_v25 = vrot.slane %v647_v34, %v11552_v11  ;;  %v1464_v19 = vcombine.high %v713_v9, %v713_v9 }
 0x134   : > { %v10878_v46 = vpack.i.bf16 %v2981_v6, %v2974_v3  ;;  %v13781_v28 = vrot.slane %v1430_v51, %v11552_v11  ;;  %v13785_v20 = vcombine.high %v13771_v43, %v13771_v43  ;;  %v13795_v36 = vrot.slane %v713_v9, %v11552_v11 }
 0x135   : > { %v13788_v18 = vrot.slane %v1447_v12, %v11552_v11  ;;  %v13792_v52 = vcombine.high %v13778_v25, %v13778_v25  ;;  %v1481_v34 = vcombine.high %v653_v61, %v653_v61  ;;  %v13803_v3 = vrot.slane %v1464_v19, %v11552_v11 }
 0x136   : > { %10879 = vrot.lane.b32.xlu1 %v10878_v46, %s11383_s21  ;;  %v13800_v51 = vcombine.high %v13781_v28, %v13781_v28  ;;  %v13806_v12 = vrot.slane %v653_v61, %v11552_v11  ;;  %v13815_v9 = vcombine.high %v13795_v36, %v13795_v36  ;;  %v2801_v41 = vrot.slane %v13771_v43, %v11537_v5 }
 0x137   : > { %v13811_v35 = vcombine.high %v13788_v18, %v13788_v18  ;;  %v13818_v46 = vrot.slane %v1481_v34, %v11552_v11  ;;  %v13823_v19 = vcombine.high %v13803_v3, %v13803_v3  ;;  %v13839_v56 = vrot.slane %v13785_v20, %v11537_v5 }
 0x138   : > { %v13827_v61 = vcombine.high %v13806_v12, %v13806_v12  ;;  %v13843_v47 = vrot.slane %v13781_v28, %v11537_v5  ;;  %v13849_v23 = vrot.slane %v13800_v51, %v11537_v5  ;;  %v13853_v15 = vrot.slane %v13778_v25, %v11537_v5 }
 0x139   : > { %v13834_v2 = vcombine.high %v13818_v46, %v13818_v46  ;;  %v13858_v54 = vrot.slane %v13792_v52, %v11537_v5  ;;  %v13862_v31 = vrot.slane %v13788_v18, %v11537_v5  ;;  %v13866_v6 = vrot.slane %v13811_v35, %v11537_v5 }
 0x13a   : > { %17796 = vst [vmem:[#allocation72_spill] sm:$0xff] %v13853_v15  ;;  %v2833_v13 = vrot.slane %v13795_v36, %v11537_v5  ;;  %v13872_v17 = vrot.slane %v13815_v9, %v11537_v5  ;;  %v13876_v34 = vrot.slane %v13803_v3, %v11537_v5  ;;  %v13880_v14 = vrot.slane %v13823_v19, %v11537_v5 }
 0x13b   : > { %v13884_v49 = vrot.slane %v13806_v12, %v11537_v5  ;;  %v13888_v62 = vrot.slane %v13827_v61, %v11537_v5  ;;  %v13892_v55 = vrot.slane %v13818_v46, %v11537_v5  ;;  %v13896_v26 = vrot.slane %v13834_v2, %v11537_v5 }
 0x13c   : > { %v2954_v1 = vsel %vm2154_vm1, %v13839_v56, %v2801_v41  ;;  %v2961_v37 = vsel %vm2154_vm1, %v13872_v17, %v2833_v13  ;;  %v732_v42 = vsel %vm618_vm0, %v17800_v7, 0.0  ;;  %v734_v45 = vsel %vm618_vm0, %v17801_v0, 0.0 }
 0x13d   : > { %17797 = vst [vmem:[#allocation77_spill] sm:$0xff] %v13888_v62  ;;  %17798 = vst [vmem:[#allocation76_spill] sm:$0xff] %v13892_v55  ;;  %v2955_v32 = vsel %vm1080_vm2, %v13843_v47, %v2954_v1  ;;  %v2962_v22 = vsel %vm1080_vm2, %v13876_v34, %v2961_v37  ;;  %v13914_v41 = vrot.slane %v732_v42, %v11552_v11  ;;  %v9715_v1 = vrot.slane %v13596_v38, 9 }
 0x13e   : > { %17799 = vst [vmem:[#allocation82_spill] sm:$0xff] %v13896_v26  ;;  %v2956_v13 = vsel %vm2157_vm3, %v13849_v23, %v2955_v32  ;;  %v2963_v4 = vsel %vm2157_vm3, %v13880_v14, %v2962_v22  ;;  %v13921_v7 = vrot.slane %v734_v45, %v11552_v11  ;;  %v17802_v0 = vrot.slane %v13611_v39, 7 }
 0x13f   : > { %v2957_v37 = vsel %vm1082_vm4, %v13853_v15, %v2956_v13  ;;  %v2964_v58 = vsel %vm1082_vm4, %v13884_v49, %v2963_v4  ;;  %v1785_v60 = vrot.slane %v13602_v63, 7  ;;  %v17804_v13 = vrot.slane %v13621_v16, 7 }
 0x140   : > { %v1784_v42 = vrot.slane %v17802_v0, 2  ;;  %v2958_v32 = vsel %vm2160_vm5, %v13858_v54, %v2957_v37  ;;  %v2965_v45 = vsel %vm2160_vm5, %v13888_v62, %v2964_v58  ;;  %v17803_v22 = vmov %v17802_v0 }
 0x141   : > { %v1783_v38 = vsel %vm12587_vm10, %v9715_v1, %v17803_v22  ;;  %v1790_v15 = vrot.slane %v17804_v13, 2  ;;  %v2959_v4 = vsel %vm1084_vm6, %v13862_v31, %v2958_v32  ;;  %v2966_v63 = vsel %vm1084_vm6, %v13892_v55, %v2965_v45 }
 0x142   : > { %v1786_v37 = vsel %vm12587_vm10, %v1784_v42, %v1785_v60  ;;  %v1787_v0 = vrot.slane %v1785_v60, 2  ;;  %v2960_v58 = vsel %vm2163_vm7, %v13866_v6, %v2959_v4  ;;  %v2967_v39 = vsel %vm2163_vm7, %v13896_v26, %v2966_v63 }
 0x143   : > { %v1791_v1 = vrot.slane %v13605_v50, 7  ;;  %v17805_v22 = vrot.slane %v13625_v53, 7  ;;  %v10873_v62 = vpack.i.bf16 %v2967_v39, %v2960_v58  ;;  %v17806_v32 = vrot.slane %v13621_v16, 7 }
 0x144   : > { %v1797_v42 = vrot.slane %v13614_v44, 7  ;;  %v17807_v60 = vrot.slane %v13633_v24, 7  ;;  %v1803_v50 = vrot.slane %v13914_v41, 7  ;;  %v9716_v26 = vrot.slane %v13617_v30, 9 }
 0x145   : > { %v1796_v13 = vrot.slane %v17805_v22, 2  ;;  %v1789_v45 = vsel %vm12587_vm10, %v1787_v0, %v17806_v32  ;;  %v1792_v4 = vsel %vm12587_vm10, %v1790_v15, %v1791_v1  ;;  %v1793_v63 = vrot.slane %v1791_v1, 2  ;;  %10874 = vrot.lane.b32.xlu0 %v10873_v62, %s11383_s21  ;;  %s17878_s21 = smov 18  }
 0x146   : > { %v1802_v55 = vrot.slane %v17807_v60, 2  ;;  %v1799_v58 = vrot.slane %v1797_v42, 2  ;;  %v17808_v0 = vrot.slane %v13637_v27, 7  ;;  %v1810_v39 = vrot.slane %v13628_v8, 7 }
 0x147   : > { %v1798_v16 = vsel %vm12587_vm10, %v1796_v13, %v1797_v42  ;;  %v1795_v15 = vsel %vm12587_vm10, %v1793_v63, %v17805_v22  ;;  %v17810_v13 = vrot.slane %v13645_v48, 7  ;;  %v17811_v42 = vmov %v17807_v60 }
 0x148   : > { %v1809_v44 = vrot.slane %v17808_v0, 2  ;;  %v1804_v1 = vsel %vm12587_vm10, %v1802_v55, %v1803_v50  ;;  %v17809_v30 = vmov %v17808_v0  ;;  %v1801_v8 = vsel %vm12587_vm10, %v1799_v58, %v17811_v42 }
 0x149   : > { %v1808_v62 = vsel %vm12587_vm10, %v9716_v26, %v17809_v30  ;;  %v1815_v32 = vrot.slane %v17810_v13, 2  ;;  %v1812_v60 = vrot.slane %v1810_v39, 2  ;;  %v1816_v63 = vrot.slane %v13640_v29, 7 }
 0x14a   : > { %v1811_v53 = vsel %vm12587_vm10, %v1809_v44, %v1810_v39  ;;  %v17812_v55 = vrot.slane %v13654_v57, 7  ;;  %v1822_v50 = vrot.slane %v13648_v59, 7  ;;  %v17813_v26 = vrot.slane %v13665_v33, 7 }
 0x14b   : > { %v1828_v22 = vrot.slane %v13921_v7, 7  ;;  %v17814_v24 = vmov %v17810_v13  ;;  %v1817_v44 = vsel %vm12587_vm10, %v1815_v32, %v1816_v63  ;;  %v1818_v39 = vrot.slane %v1816_v63, 2 }
 0x14c   : > { %v1821_v27 = vrot.slane %v17812_v55, 2  ;;  %v1827_v0 = vrot.slane %v17813_v26, 2  ;;  %v1814_v58 = vsel %vm12587_vm10, %v1812_v60, %v17814_v24  ;;  %v3201_v29 = vrot.slane %v1783_v38, %v11537_v5 }
 0x14d   : > { %v1824_v59 = vrot.slane %v1822_v50, 2  ;;  %v3205_v42 = vrot.slane %v1786_v37, %v11537_v5  ;;  %v17815_v48 = vmov %v17812_v55  ;;  %v3209_v55 = vrot.slane %v1789_v45, %v11537_v5 }
 0x14e   : > { %v1823_v30 = vsel %vm12587_vm10, %v1821_v27, %v1822_v50  ;;  %v1829_v13 = vsel %vm12587_vm10, %v1827_v0, %v1828_v22  ;;  %v1820_v60 = vsel %vm12587_vm10, %v1818_v39, %v17815_v48  ;;  %v3213_v32 = vrot.slane %v1792_v4, %v11537_v5 }
 0x14f   : > { %v3217_v38 = vrot.slane %v1795_v15, %v11537_v5  ;;  %v17816_v63 = vmov %v17813_v26  ;;  %v3221_v50 = vrot.slane %v1798_v16, %v11537_v5  ;;  %v3225_v37 = vrot.slane %v1801_v8, %v11537_v5 }
 0x150   : > { %v1826_v27 = vsel %vm12587_vm10, %v1824_v59, %v17816_v63  ;;  %v3229_v57 = vrot.slane %v1804_v1, %v11537_v5  ;;  %v3233_v26 = vrot.slane %v1808_v62, %v11537_v5  ;;  %v3237_v0 = vrot.slane %v1811_v53, %v11537_v5 }
 0x151   : > { %v3241_v45 = vrot.slane %v1814_v58, %v11537_v5  ;;  %v3245_v4 = vrot.slane %v1817_v44, %v11537_v5  ;;  %v3249_v15 = vrot.slane %v1820_v60, %v11537_v5  ;;  %v3253_v33 = vrot.slane %v1823_v30, %v11537_v5 }
 0x152   : > { %v3257_v22 = vrot.slane %v1826_v27, %v11537_v5  ;;  %v3261_v16 = vrot.slane %v1829_v13, %v11537_v5  ;;  %v3304_v8 = vsel %vm2154_vm1, %v3205_v42, %v3201_v29  ;;  %v3311_v1 = vsel %vm2154_vm1, %v3237_v0, %v3233_v26 }
 0x153   : > { %v17817_v62 = vrot.slane %v13690_v40, 7  ;;  %v17818_v24 = vrot.slane %v13705_v10, 7  ;;  %v3305_v44 = vsel %vm1080_vm2, %v3209_v55, %v3304_v8  ;;  %v3312_v39 = vsel %vm1080_vm2, %v3241_v45, %v3311_v1 }
 0x154   : > { %v3306_v29 = vsel %vm2157_vm3, %v3213_v32, %v3305_v44  ;;  %v3313_v40 = vsel %vm2157_vm3, %v3245_v4, %v3312_v39  ;;  %v9713_v13 = vrot.slane %v13771_v43, 9  ;;  %v17819_v10 = vrot.slane %v13785_v20, 7 }
 0x155   : > { %v728_v53 = vsel %vm618_vm0, %v17817_v62, 0.0  ;;  %v730_v58 = vsel %vm618_vm0, %v17818_v24, 0.0  ;;  %v3307_v48 = vsel %vm1082_vm4, %v3217_v38, %v3306_v29  ;;  %v3314_v60 = vsel %vm1082_vm4, %v3249_v15, %v3313_v40 }
 0x156   : > { %v14041_v30 = vrot.slane %v728_v53, %v11552_v11  ;;  %v14044_v59 = vrot.slane %v730_v58, %v11552_v11  ;;  %v1734_v42 = vrot.slane %v17819_v10, 2  ;;  %v1735_v55 = vrot.slane %v13781_v28, 7 }
 0x157   : > { %v17820_v63 = vrot.slane %v13800_v51, 7  ;;  %v3308_v26 = vsel %vm2160_vm5, %v3221_v50, %v3307_v48  ;;  %v3315_v32 = vsel %vm2160_vm5, %v3253_v33, %v3314_v60  ;;  %v17821_v0 = vmov %v17819_v10 }
 0x158   : > { %v1733_v43 = vsel %vm12587_vm10, %v9713_v13, %v17821_v0  ;;  %v1741_v45 = vrot.slane %v13778_v25, 7  ;;  %v3309_v38 = vsel %vm1084_vm6, %v3225_v37, %v3308_v26  ;;  %v3316_v4 = vsel %vm1084_vm6, %v3257_v22, %v3315_v32 }
 0x159   : > { %v1740_v27 = vrot.slane %v17820_v63, 2  ;;  %v1736_v28 = vsel %vm12587_vm10, %v1734_v42, %v1735_v55  ;;  %v1737_v15 = vrot.slane %v1735_v55, 2  ;;  %v3310_v8 = vsel %vm2163_vm7, %v3229_v57, %v3309_v38 }
 0x15a   : > { %v3317_v50 = vsel %vm2163_vm7, %v3261_v16, %v3316_v4  ;;  %v1743_v33 = vrot.slane %v1741_v45, 2  ;;  %v17822_v62 = vmov %v17820_v63  ;;  %v17823_v37 = vrot.slane %v13792_v52, 7 }
 0x15b   : > { %v1742_v20 = vsel %vm12587_vm10, %v1740_v27, %v1741_v45  ;;  %v10888_v1 = vpack.i.bf16 %v3317_v50, %v3310_v8  ;;  %v1739_v25 = vsel %vm12587_vm10, %v1737_v15, %v17822_v62  ;;  %v1747_v53 = vrot.slane %v13788_v18, 7 }
 0x15c   : > { %v1746_v22 = vrot.slane %v17823_v37, 2  ;;  %v17824_v24 = vmov %v17823_v37  ;;  %v17825_v16 = vrot.slane %v13811_v35, 7  ;;  %v1753_v44 = vrot.slane %v14041_v30, 7 }
 0x15d   : > { %v1745_v57 = vsel %vm12587_vm10, %v1743_v33, %v17824_v24  ;;  %v9714_v51 = vrot.slane %v13795_v36, 9  ;;  %10889 = vrot.lane.b32.xlu1 %v10888_v1, %s11389_s30  ;;  %v1749_v29 = vrot.slane %v1747_v53, 2  ;;  %v17826_v18 = vrot.slane %v13815_v9, 7 }
 0x15e   : > { %v1752_v58 = vrot.slane %v17825_v16, 2  ;;  %v1748_v39 = vsel %vm12587_vm10, %v1746_v22, %v1747_v53  ;;  %v1760_v52 = vrot.slane %v13803_v3, 7  ;;  %v17828_v36 = vrot.slane %v13823_v19, 7 }
 0x15f   : > { %v1759_v40 = vrot.slane %v17826_v18, 2  ;;  %v17827_v10 = vmov %v17826_v18  ;;  %v1766_v60 = vrot.slane %v13806_v12, 7  ;;  %v17829_v55 = vmov %v17825_v16 }
 0x160   : > { %v1754_v13 = vsel %vm12587_vm10, %v1752_v58, %v1753_v44  ;;  %v1758_v42 = vsel %vm12587_vm10, %v9714_v51, %v17827_v10  ;;  %v1765_v48 = vrot.slane %v17828_v36, 2  ;;  %v1751_v63 = vsel %vm12587_vm10, %v1749_v29, %v17829_v55  ;;  %v17837_v55 = vld [vmem:[#allocation112_spill] sm:$0xff] }
 0x161   : > { %v1761_v3 = vsel %vm12587_vm10, %v1759_v40, %v1760_v52  ;;  %v1762_v27 = vrot.slane %v1760_v52, 2  ;;  %v17830_v26 = vrot.slane %v13827_v61, 7  ;;  %v1768_v0 = vrot.slane %v1766_v60, 2 }
 0x162   : > { %v1767_v32 = vsel %vm12587_vm10, %v1765_v48, %v1766_v60  ;;  %v1772_v45 = vrot.slane %v13818_v46, 7  ;;  %v17831_v12 = vrot.slane %v13834_v2, 7  ;;  %v17832_v35 = vmov %v17828_v36  ;;  %v17835_v36 = vld [vmem:[#allocation93_spill] sm:$0xff]  ;;  %v17836_v48 = vld [vmem:[#allocation108_spill] sm:$0xff] }
 0x163   : > { %v1771_v9 = vrot.slane %v17830_v26, 2  ;;  %v1764_v4 = vsel %vm12587_vm10, %v1762_v27, %v17832_v35  ;;  %v1778_v15 = vrot.slane %v14044_v59, 7  ;;  %v3137_v8 = vrot.slane %v1733_v43, %v11537_v5  ;;  %v17842_v35 = vld [vmem:[#allocation71_spill] sm:$0xff] }
 0x164   : > { %v1777_v38 = vrot.slane %v17831_v12, 2  ;;  %v3141_v50 = vrot.slane %v1736_v28, %v11537_v5  ;;  %v17833_v33 = vmov %v17830_v26  ;;  %v1774_v62 = vrot.slane %v1772_v45, 2  ;;  %v17839_v26 = vld [vmem:[#allocation94_spill] sm:$0xff] }
 0x165   : > { %v1770_v1 = vsel %vm12587_vm10, %v1768_v0, %v17833_v33  ;;  %v1773_v46 = vsel %vm12587_vm10, %v1771_v9, %v1772_v45  ;;  %v3145_v19 = vrot.slane %v1739_v25, %v11537_v5  ;;  %v3149_v22 = vrot.slane %v1742_v20, %v11537_v5  ;;  %v17840_v9 = vld [vmem:[#allocation113_spill] sm:$0xff] }
 0x166   : > { %v1779_v37 = vsel %vm12587_vm10, %v1777_v38, %v1778_v15  ;;  %v3153_v43 = vrot.slane %v1745_v57, %v11537_v5  ;;  %v3157_v28 = vrot.slane %v1748_v39, %v11537_v5  ;;  %v17834_v61 = vmov %v17831_v12  ;;  %v17841_v12 = vld [vmem:[#allocation95_spill] sm:$0xff] }
 0x167   : > { %v1776_v53 = vsel %vm12587_vm10, %v1774_v62, %v17834_v61  ;;  %v3161_v24 = vrot.slane %v1751_v63, %v11537_v5  ;;  %v3165_v16 = vrot.slane %v1754_v13, %v11537_v5  ;;  %v3169_v25 = vrot.slane %v1758_v42, %v11537_v5  ;;  %v17838_v63 = vld [vmem:[#allocation111_spill] sm:$0xff]  ;;  %v578_v61 = vld [vmem:[%s11545_s18 + $0xf0] sm:$0xff] }
 0x168   : > { %v3173_v58 = vrot.slane %v1761_v3, %v11537_v5  ;;  %v3177_v44 = vrot.slane %v1764_v4, %v11537_v5  ;;  %v3181_v20 = vrot.slane %v1767_v32, %v11537_v5  ;;  %v3185_v57 = vrot.slane %v1770_v1, %v11537_v5  ;;  %v17844_v1 = vld [vmem:[#allocation74_spill] sm:$0xff] }
 0x169   : > { %v3189_v51 = vrot.slane %v1773_v46, %v11537_v5  ;;  %v3193_v2 = vrot.slane %v1776_v53, %v11537_v5  ;;  %v3197_v39 = vrot.slane %v1779_v37, %v11537_v5  ;;  %v3290_v29 = vsel %vm2154_vm1, %v3141_v50, %v3137_v8  ;;  %v17843_v50 = vld [vmem:[#allocation106_spill] sm:$0xff]  ;;  %v14187_v53 = vpop.permute.xlu1 %10779 }
 0x16a   : > { %v3291_v18 = vsel %vm1080_vm2, %v3145_v19, %v3290_v29  ;;  %v3297_v40 = vsel %vm2154_vm1, %v3173_v58, %v3169_v25  ;;  %v3369_v52 = vrot.slane %v13914_v41, %v11537_v5  ;;  %v3373_v13 = vrot.slane %v13921_v7, %v11537_v5  ;;  %v17845_v37 = vld [vmem:[#allocation110_spill] sm:$0xff]  ;;  %v17847_v58 = vld [vmem:[#allocation109_spill] sm:$0xff] }
 0x16b   : > { %v3292_v10 = vsel %vm2157_vm3, %v3149_v22, %v3291_v18  ;;  %v3298_v42 = vsel %vm1080_vm2, %v3177_v44, %v3297_v40  ;;  %v3416_v60 = vsel %vm2154_vm1, %v17836_v48, %v17835_v36  ;;  %v3423_v3 = vsel %vm2154_vm1, %v17838_v63, %v17837_v55  ;;  %v17849_v36 = vld [vmem:[#allocation33_spill] sm:$0xff] }
 0x16c   : > { %v3293_v27 = vsel %vm1082_vm4, %v3153_v43, %v3292_v10  ;;  %v3299_v41 = vsel %vm2157_vm3, %v3181_v20, %v3298_v42  ;;  %v3417_v7 = vsel %vm1080_vm2, %v17839_v26, %v3416_v60  ;;  %v3424_v32 = vsel %vm1080_vm2, %v17840_v9, %v3423_v3  ;;  %v17846_v43 = vld [vmem:[#allocation73_spill] sm:$0xff]  ;;  %v17848_v20 = vld [vmem:[#allocation79_spill] sm:$0xff] }
 0x16d   : > { %v3294_v0 = vsel %vm2160_vm5, %v3157_v28, %v3293_v27  ;;  %v3300_v45 = vsel %vm1082_vm4, %v3185_v57, %v3299_v41  ;;  %v3418_v38 = vsel %vm2157_vm3, %v17841_v12, %v3417_v7  ;;  %v3425_v4 = vsel %vm2157_vm3, %v17842_v35, %v3424_v32  ;;  %v17853_v55 = vld [vmem:[#allocation77_spill] sm:$0xff]  ;;  %v14232_v41 = vpop.permute.xlu1 %10789  ;;  %v17854_v7 = vld [vmem:[#allocation76_spill] sm:$0xff] }
 0x16e   : > { %v3295_v15 = vsel %vm1084_vm6, %v3161_v24, %v3294_v0  ;;  %v3301_v8 = vsel %vm2160_vm5, %v3189_v51, %v3300_v45  ;;  %v3419_v33 = vsel %vm1082_vm4, %v17843_v50, %v3418_v38  ;;  %v3426_v46 = vsel %vm1082_vm4, %v17844_v1, %v3425_v4  ;;  %v14189_v24 = vpop.permute.xlu0 %10774  ;;  %v14199_v51 = vld [vmem:[%s11545_s18 + $0xf8] sm:$0xff]  ;;  %s17850_s18 = smov 15   ;;  %v17856_v1 = vld [vmem:[#allocation117_spill] sm:$0xff] }
 0x16f   : > { %v3296_v62 = vsel %vm2163_vm7, %v3165_v16, %v3295_v15  ;;  %v3302_v19 = vsel %vm1084_vm6, %v3193_v2, %v3301_v8  ;;  %v3420_v22 = vsel %vm2160_vm5, %v17845_v37, %v3419_v33  ;;  %v3427_v28 = vsel %vm2160_vm5, %v17846_v43, %v3426_v46  ;;  %v17855_v45 = vld [vmem:[#allocation82_spill] sm:$0xff]  ;;  %v17857_v37 = vld [vmem:[#allocation115_spill] sm:$0xff] }
 0x170   : > { %v3303_v25 = vsel %vm2163_vm7, %v3197_v39, %v3302_v19  ;;  %v3421_v44 = vsel %vm1084_vm6, %v17847_v58, %v3420_v22  ;;  %v3428_v16 = vsel %vm1084_vm6, %v17848_v20, %v3427_v28  ;;  %v3361_v57 = vrot.slane %v14041_v30, %v11537_v5 }
 0x171   : > { %v10883_v2 = vpack.i.bf16 %v3303_v25, %v3296_v62  ;;  %v3422_v29 = vsel %vm2163_vm7, %v3369_v52, %v3421_v44  ;;  %v3429_v18 = vsel %vm2163_vm7, %v3373_v13, %v3428_v16  ;;  %v3365_v40 = vrot.slane %v14044_v59, %v11537_v5  ;;  %v17858_v25 = vld [vmem:[#allocation118_spill] sm:$0xff]  ;;  %v14281_v20 = vpop.permute.xlu1 %10794 }
 0x172   : > { %v10898_v39 = vpack.i.bf16 %v3429_v18, %v3422_v29  ;;  %v3402_v10 = vsel %vm2154_vm1, %v13843_v47, %v13839_v56  ;;  %v3409_v42 = vsel %vm2154_vm1, %v13876_v34, %v13872_v17  ;;  %v666_v30 = vrot.slane %v578_v61, 7  ;;  %v17851_v47 = vld [vmem:[#allocation72_spill] sm:$0xff]  ;;  %v14234_v26 = vpop.permute.xlu0 %10784 }
 0x173   : > { %10884 = vrot.lane.b32.xlu0 %v10883_v2, %s11389_s30  ;;  %v3403_v52 = vsel %vm1080_vm2, %v13849_v23, %v3402_v10  ;;  %v3410_v13 = vsel %vm1080_vm2, %v13880_v14, %v3409_v42  ;;  %v667_v59 = vrot.slane %v14199_v51, 7  ;;  %v2125_v48 = vrot.slane %v17849_v36, %v11537_v5  ;;  %v17852_v23 = vld [vmem:[#allocation35_spill] sm:$0xff]  ;;  %v17859_v51 = vld [vmem:[#allocation97_spill] sm:$0xff]  ;;  %s17898_s30 = sld [smem:[#allocation132_spill]] }
 0x174   : > { %10899 = vrot.lane.b32.xlu1 %v10898_v39, %s17850_s18  ;;  %v3404_v56 = vsel %vm2157_vm3, %v17851_v47, %v3403_v52  ;;  %v3411_v17 = vsel %vm2157_vm3, %v13884_v49, %v3410_v13  ;;  %v718_v34 = vsel %vm618_vm0, 0.0, %v666_v30  ;;  %v2061_v60 = vrot.slane %v17852_v23, %v11537_v5  ;;  %v17861_v52 = vld [vmem:[#allocation99_spill] sm:$0xff]  ;;  %v17862_v47 = vld [vmem:[#allocation88_spill] sm:$0xff] }
 0x175   : > { %v3405_v14 = vsel %vm1082_vm4, %v13858_v54, %v3404_v56  ;;  %v3412_v63 = vsel %vm1082_vm4, %v17853_v55, %v3411_v17  ;;  %v668_v3 = vsel %vm618_vm0, %v666_v30, %v667_v59  ;;  %v1831_v27 = vcombine.high %v718_v34, %v718_v34  ;;  %v17863_v17 = vld [vmem:[#allocation104_spill] sm:$0xff] }
 0x176   : > { %v3406_v49 = vsel %vm2160_vm5, %v13862_v31, %v3405_v14  ;;  %v3413_v9 = vsel %vm2160_vm5, %v17854_v7, %v3412_v63  ;;  %v1838_v32 = vrot.slane %v718_v34, %v11552_v11  ;;  %v1848_v0 = vcombine.high %v668_v3, %v668_v3  ;;  %v14283_v16 = vpop.permute.xlu0 %10804  ;;  %v17864_v14 = vld [vmem:[#allocation100_spill] sm:$0xff] }
 0x177   : > { %v3407_v54 = vsel %vm1084_vm6, %v13866_v6, %v3406_v49  ;;  %v3414_v12 = vsel %vm1084_vm6, %v17855_v45, %v3413_v9  ;;  %v14246_v38 = vrot.slane %v1831_v27, %v11552_v11  ;;  %v14249_v35 = vrot.slane %v668_v3, %v11552_v11  ;;  %v17865_v27 = vld [vmem:[#allocation102_spill] sm:$0xff]  ;;  %v17866_v7 = vld [vmem:[#allocation40_spill] sm:$0xff]  ;;  %v17867_v45 = vld [vmem:[#allocation107_spill] sm:$0xff] }
 0x178   : > { %v3408_v31 = vsel %vm2163_vm7, %v3361_v57, %v3407_v54  ;;  %v3415_v4 = vsel %vm2163_vm7, %v3365_v40, %v3414_v12  ;;  %v1846_v15 = vcombine.high %v1838_v32, %v1838_v32  ;;  %v14254_v8 = vrot.slane %v1848_v0, %v11552_v11  ;;  %v17860_v40 = vld [vmem:[#allocation101_spill] sm:$0xff]  ;;  %v17868_v12 = vld [vmem:[#allocation42_spill] sm:$0xff] }
 0x179   : > { %v10893_v50 = vpack.i.bf16 %v3415_v4, %v3408_v31  ;;  %v14258_v6 = vcombine.high %v14246_v38, %v14246_v38  ;;  %v14262_v33 = vcombine.high %v14249_v35, %v14249_v35  ;;  %v2207_v46 = vsel %vm2154_vm1, %v17856_v1, %v2125_v48  ;;  %v14344_v4 = vpop.permute.xlu1 %10799 }
 0x17a   : > { %v14268_v62 = vcombine.high %v14254_v8, %v14254_v8  ;;  %v1875_v19 = vrot.slane %v1846_v15, 7  ;;  %v2208_v22 = vsel %vm1080_vm2, %v17857_v37, %v2207_v46  ;;  %v3457_v43 = vrot.slane %v1838_v32, %v11537_v5  ;;  %v17870_v46 = vld [vmem:[#allocation37_spill] sm:$0xff] }
 0x17b   : > { %10894 = vrot.lane.b32.xlu0 %v10893_v50, %s17850_s18  ;;  %v1881_v28 = vrot.slane %v14258_v6, 7  ;;  %v1887_v61 = vrot.slane %v14262_v33, 7  ;;  %v2209_v58 = vsel %vm2157_vm3, %v17858_v25, %v2208_v22  ;;  %v14279_v44 = vrot.slane %v1846_v15, %v11537_v5  ;;  %v14346_v15 = vpop.permute.xlu0 %10814  ;;  %v17871_v25 = vld [vmem:[#allocation69_spill] sm:$0xff] }
 0x17c   : > { %v1893_v57 = vrot.slane %v14268_v62, 7  ;;  %v2210_v2 = vsel %vm1082_vm4, %v17859_v51, %v2209_v58  ;;  %v14290_v29 = vrot.slane %v14246_v38, %v11537_v5  ;;  %v14294_v18 = vrot.slane %v14258_v6, %v11537_v5  ;;  %v17869_v6 = vld [vmem:[#allocation121_spill] sm:$0xff]  ;;  %v17872_v58 = vld [vmem:[#allocation43_spill] sm:$0xff] }
 0x17d   : > { %v2211_v39 = vsel %vm2160_vm5, %v17860_v40, %v2210_v2  ;;  %v14300_v10 = vrot.slane %v14249_v35, %v11537_v5  ;;  %v14304_v42 = vrot.slane %v14262_v33, %v11537_v5  ;;  %v14308_v30 = vrot.slane %v14254_v8, %v11537_v5 }
 0x17e   : > { %v2212_v13 = vsel %vm1084_vm6, %v17861_v52, %v2211_v39  ;;  %v14314_v36 = vrot.slane %v14268_v62, %v11537_v5  ;;  %v3486_v48 = vsel %vm2154_vm1, %v14279_v44, %v3457_v43  ;;  %v2093_v56 = vrot.slane %v17862_v47, %v11537_v5  ;;  %v17873_v39 = vld [vmem:[#allocation89_spill] sm:$0xff] }
 0x17f   : > { %v14322_v34 = vsel %vm2163_vm7, %v17863_v17, %v2212_v13  ;;  %v3487_v23 = vsel %vm1080_vm2, %v14290_v29, %v3486_v48  ;;  %v2193_v55 = vsel %vm2154_vm1, %v17864_v14, %v2061_v60  ;;  %v735_v63 = vsel %vm618_vm0, %v667_v59, 0.0  ;;  %v17874_v13 = vld [vmem:[#allocation38_spill] sm:$0xff]  ;;  %v17876_v14 = vld [vmem:[#allocation44_spill] sm:$0xff] }
 0x180   : > { %v3488_v3 = vsel %vm2157_vm3, %v14294_v18, %v3487_v23  ;;  %v2194_v49 = vsel %vm1080_vm2, %v17865_v27, %v2193_v55  ;;  %v2200_v9 = vsel %vm2154_vm1, %v17866_v7, %v2093_v56  ;;  %v14336_v0 = vrot.slane %v735_v63, %v11552_v11  ;;  %v17875_v17 = vld [vmem:[#allocation90_spill] sm:$0xff] }
 0x181   : > { %v3489_v54 = vsel %vm1082_vm4, %v14300_v10, %v3488_v3  ;;  %v2195_v60 = vsel %vm2157_vm3, %v17867_v45, %v2194_v49  ;;  %v2201_v59 = vsel %vm1080_vm2, %v17868_v12, %v2200_v9  ;;  %v9717_v31 = vrot.slane %v1838_v32, 9  ;;  %v17877_v63 = vld [vmem:[#allocation114_spill] sm:$0xff]  ;;  %v14393_v12 = vpop.permute.xlu0 %10824 }
 0x182   : > { %v3490_v50 = vsel %vm2160_vm5, %v14304_v42, %v3489_v54  ;;  %v2196_v1 = vsel %vm1082_vm4, %v17869_v6, %v2195_v60  ;;  %v2202_v37 = vsel %vm2157_vm3, %v17870_v46, %v2201_v59  ;;  %v1877_v22 = vrot.slane %v1875_v19, 2  ;;  %v14391_v60 = vpop.permute.xlu1 %10809 }
 0x183   : > { %v3491_v43 = vsel %vm1084_vm6, %v14308_v30, %v3490_v50  ;;  %v2197_v32 = vsel %vm2160_vm5, %v17871_v25, %v2196_v1  ;;  %v2203_v51 = vsel %vm1082_vm4, %v17872_v58, %v2202_v37  ;;  %v1876_v2 = vsel %vm12587_vm10, %v9717_v31, %v1875_v19 }
 0x184   : > { %v3492_v40 = vsel %vm2163_vm7, %v14314_v36, %v3491_v43  ;;  %v2198_v52 = vsel %vm1084_vm6, %v17873_v39, %v2197_v32  ;;  %v2204_v48 = vsel %vm2160_vm5, %v17874_v13, %v2203_v51  ;;  %v1878_v47 = vrot.slane %v14246_v38, 7  ;;  %v17881_v13 = vld [vmem:[#allocation103_spill] sm:$0xff] }
 0x185   : > { %v10908_v56 = vpack.i.bf16 %v3492_v40, %v14322_v34  ;;  %v14372_v23 = vsel %vm2163_vm7, %v17875_v17, %v2198_v52  ;;  %v2205_v19 = vsel %vm1084_vm6, %v17876_v14, %v2204_v48  ;;  %v1883_v55 = vrot.slane %v1881_v28, 2  ;;  %v17880_v40 = vld [vmem:[#allocation41_spill] sm:$0xff]  ;;  %v17882_v48 = vld [vmem:[#allocation91_spill] sm:$0xff]  ;;  %v10830_v14 = vpop.permute.xlu0 %10829 }
 0x186   : > { %v14378_v3 = vsel %vm2163_vm7, %v17877_v63, %v2205_v19  ;;  %v1879_v27 = vsel %vm12587_vm10, %v1877_v22, %v1878_v47  ;;  %v1880_v49 = vrot.slane %v1878_v47, 2  ;;  %v1884_v38 = vrot.slane %v14249_v35, 7  ;;  %v14433_v17 = vpop.permute.xlu1 %10819 }
 0x187   : > { %10909 = vrot.lane.b32.xlu1 %v10908_v56, %s17878_s21  ;;  %v10903_v7 = vpack.i.bf16 %v14378_v3, %v14372_v23  ;;  %v1889_v9 = vrot.slane %v1887_v61, 2  ;;  %v1890_v54 = vrot.slane %v14254_v8, 7  ;;  %v1895_v45 = vrot.slane %v1893_v57, 2 }
 0x188   : > { %v1882_v35 = vsel %vm12587_vm10, %v1880_v49, %v1881_v28  ;;  %v1885_v59 = vsel %vm12587_vm10, %v1883_v55, %v1884_v38  ;;  %v1886_v31 = vrot.slane %v1884_v38, 2  ;;  %v1896_v50 = vrot.slane %v14336_v0, 7 }
 0x189   : > { %10904 = vrot.lane.b32.xlu0 %v10903_v7, %s17878_s21  ;;  %v1891_v8 = vsel %vm12587_vm10, %v1889_v9, %v1890_v54  ;;  %v1892_v6 = vrot.slane %v1890_v54, 2  ;;  %v3520_v1 = vrot.slane %v1876_v2, %v11537_v5  ;;  %v3524_v46 = vrot.slane %v1879_v27, %v11537_v5  ;;  %v17879_v2 = vld [vmem:[#allocation105_spill] sm:$0xff]  ;;  %s11394_s21 = smov [#allocation2]  }
 0x18a   : > { %v1888_v28 = vsel %vm12587_vm10, %v1886_v31, %v1887_v61  ;;  %v1897_v37 = vsel %vm12587_vm10, %v1895_v45, %v1896_v50  ;;  %v3528_v22 = vrot.slane %v1882_v35, %v11537_v5  ;;  %v3532_v43 = vrot.slane %v1885_v59, %v11537_v5 }
 0x18b   : > { %v1894_v25 = vsel %vm12587_vm10, %v1892_v6, %v1893_v57  ;;  %v3536_v32 = vrot.slane %v1888_v28, %v11537_v5  ;;  %v3540_v58 = vrot.slane %v1891_v8, %v11537_v5  ;;  %v3548_v33 = vrot.slane %v1897_v37, %v11537_v5  ;;  %v17884_v8 = vld [vmem:[#allocation36_spill] sm:$0xff]  ;;  %v10840_v28 = vpop.permute.xlu1 %10839  ;;  %v10835_v37 = vpop.permute.xlu0 %10834 }
 0x18c   : > { %v3544_v61 = vrot.slane %v1894_v25, %v11537_v5  ;;  %v3549_v51 = vsel %vm2154_vm1, %v3524_v46, %v3520_v1  ;;  %v10913_v39 = vpack.i.bf16 %v17880_v40, %v17879_v2  ;;  %v3583_v52 = vrot.slane %v14336_v0, %v11537_v5  ;;  %v17887_v40 = vld [vmem:[#allocation122_spill] sm:$0xff] }
 0x18d   : > { %v3550_v62 = vsel %vm1080_vm2, %v3528_v22, %v3549_v51  ;;  %v3584_v57 = vsel %vm2154_vm1, %v14290_v29, %v14279_v44  ;;  %v10923_v47 = vpack.i.bf16 %v17882_v48, %v17881_v13  ;;  %v10782_v56 = vunpack.i.h.bf16 %v14187_v53  ;;  %v17885_v22 = vld [vmem:[#allocation92_spill] sm:$0xff]  ;;  %v17888_v13 = vld [vmem:[#allocation123_spill] sm:$0xff] }
 0x18e   : > { %v3551_v19 = vsel %vm2157_vm3, %v3532_v43, %v3550_v62  ;;  %10914 = vrot.lane.b32.xlu0 %v10913_v39, %s11390_s29  ;;  %v3585_v0 = vsel %vm1080_vm2, %v14294_v18, %v3584_v57  ;;  %v10781_v55 = vunpack.i.l.bf16 %v14187_v53  ;;  %v10777_v63 = vunpack.i.h.bf16 %v14189_v24  ;;  %v17889_v48 = vld [vmem:[#allocation119_spill] sm:$0xff] }
 0x18f   : > { %v3552_v44 = vsel %vm1082_vm4, %v3536_v32, %v3551_v19  ;;  %v3586_v29 = vsel %vm2157_vm3, %v14300_v10, %v3585_v0  ;;  %v10776_v27 = vunpack.i.l.bf16 %v14189_v24  ;;  %v10792_v49 = vunpack.i.h.bf16 %v14232_v41 }
 0x190   : > { %v3553_v38 = vsel %vm2160_vm5, %v3540_v58, %v3552_v44  ;;  %v3587_v7 = vsel %vm1082_vm4, %v14304_v42, %v3586_v29  ;;  %v10791_v18 = vunpack.i.l.bf16 %v14232_v41  ;;  %v10787_v9 = vunpack.i.h.bf16 %v14234_v26  ;;  %v17892_v44 = vld [vmem:[#allocation96_spill] sm:$0xff] }
 0x191   : > { %v3554_v54 = vsel %vm1084_vm6, %v3544_v61, %v3553_v38  ;;  %v3588_v45 = vsel %vm2160_vm5, %v14308_v30, %v3587_v7  ;;  %v10786_v10 = vunpack.i.l.bf16 %v14234_v26  ;;  %v10797_v35 = vunpack.i.h.bf16 %v14281_v20  ;;  %v10850_v7 = vpop.permute.xlu1 %10849 }
 0x192   : > { %v3555_v59 = vsel %vm2163_vm7, %v3548_v33, %v3554_v54  ;;  %v3589_v31 = vsel %vm1084_vm6, %v14314_v36, %v3588_v45  ;;  %10924 = vrot.lane.b32.xlu0 %v10923_v47, %s17883_s22  ;;  %v10796_v42 = vunpack.i.l.bf16 %v14281_v20  ;;  %v10807_v50 = vunpack.i.h.bf16 %v14283_v16  ;;  %v17886_v33 = vld [vmem:[#allocation10_spill] sm:$0xff]  ;;  %v14495_v54 = vpop.permute.xlu0 %10844  ;;  %v17894_v45 = vld [vmem:[#allocation125_spill] sm:$0xff] }
 0x193   : > { %v10918_v6 = vpack.i.bf16 %v3555_v59, %v17884_v8  ;;  %v3590_v1 = vsel %vm2163_vm7, %v3583_v52, %v3589_v31  ;;  %v10806_v30 = vunpack.i.l.bf16 %v14283_v16  ;;  %v10802_v46 = vunpack.i.h.bf16 %v14344_v4  ;;  %v10994_v16 = vld [vmem:[%s17898_s30] sm:$0xff]  }
 0x194   : > { %v10928_v43 = vpack.i.bf16 %v3590_v1, %v17885_v22  ;;  %v10801_v36 = vunpack.i.l.bf16 %v14344_v4  ;;  %v10817_v25 = vunpack.i.h.bf16 %v14346_v15  ;;  %v10816_v20 = vunpack.i.l.bf16 %v14346_v15 }
 0x195   : > { %10919 = vrot.lane.b32.xlu1 %v10918_v6, %s11390_s29  ;;  %v10812_v32 = vunpack.i.h.bf16 %v14391_v60  ;;  %v10811_v58 = vunpack.i.l.bf16 %v14391_v60  ;;  %v1901_v61 = vrot.slane %v17886_v33, %v11537_v5  ;;  %v10827_v51 = vunpack.i.h.bf16 %v14393_v12  ;;  %v17895_v6 = vld [vmem:[#allocation126_spill] sm:$0xff]  ;;  %v17896_v33 = vld [vmem:[#allocation127_spill] sm:$0xff]  ;;  %s17383_s29 = smov 64  }
 0x196   : > { %v10826_v2 = vunpack.i.l.bf16 %v14393_v12  ;;  %v10822_v4 = vunpack.i.h.bf16 %v14433_v17  ;;  %v10821_v52 = vunpack.i.l.bf16 %v14433_v17  ;;  %v10832_v62 = vunpack.i.h.bf16 %v10830_v14  ;;  %v17890_v12 = vld [vmem:[#allocation124_spill] sm:$0xff] }
 0x197   : > { %v2155_v39 = vsel %vm2154_vm1, %v17887_v40, %v1901_v61  ;;  %v10831_v57 = vunpack.i.l.bf16 %v10830_v14  ;;  %v3617_v47 = vsel %vm3615_vm11, %v17889_v48, %v10827_v51  ;;  %v17893_v14 = vld [vmem:[#allocation120_spill] sm:$0xff]  ;;  %v10842_v1 = vunpack.i.h.bf16 %v10840_v28 }
 0x198   : > { %v2156_v60 = vsel %vm1080_vm2, %v17888_v13, %v2155_v39  ;;  %v3626_v0 = vsel %vm3624_vm12, %v3617_v47, %v10797_v35  ;;  %v3619_v29 = vsel %vm3615_vm11, %v17892_v44, %v10832_v62  ;;  %v10841_v22 = vunpack.i.l.bf16 %v10840_v28  ;;  %v17897_v40 = vld [vmem:[#allocation128_spill] sm:$0xff]  ;;  %v10860_v47 = vpop.permute.xlu1 %10859 }
 0x199   : > { %10929 = vrot.lane.b32.xlu1 %v10928_v43, %s17883_s22  ;;  %v14488_v19 = vsel %vm2157_vm3, %v17890_v12, %v2156_v60  ;;  %v3618_v38 = vsel %vm3615_vm11, %v17893_v14, %v10831_v57  ;;  %v3628_v31 = vsel %vm3624_vm12, %v3619_v29, %v10802_v46  ;;  %v3635_v46 = vsel %vm3633_vm13, %v3626_v0, %v10777_v63  ;;  %v10993_v48 = vld [vmem:[%s17898_s30 + $0x8] sm:$0x3f]   ;;  %s11323_s22 = sshll.u32 %s11394_s21, 4  ;;  %s11324_s22 = int_to_ptr.vmem [resolvable:$false] %s11323_s22 }
 0x19a   : > { %17891 = vst [vmem:[#allocation11_spill] sm:$0xff] %v14488_v19  ;;  %v2159_v59 = vsel %vm1082_vm4, %v17894_v45, %v14488_v19  ;;  %v3627_v8 = vsel %vm3624_vm12, %v3618_v38, %v10801_v36  ;;  %v3637_v51 = vsel %vm3633_vm13, %v3628_v31, %v10782_v56  ;;  %v10837_v36 = vunpack.i.h.bf16 %v10835_v37 }
 0x19b   : > { %v2161_v35 = vsel %vm2160_vm5, %v17895_v6, %v2159_v59  ;;  %v3636_v43 = vsel %vm3633_vm13, %v3627_v8, %v10781_v55  ;;  %v3646_v28 = vsel %vm3642_vm14, %v3637_v51, %v10842_v1  ;;  %v10836_v55 = vunpack.i.l.bf16 %v10835_v37  ;;  %v10855_v37 = vpop.permute.xlu0 %10854 }
 0x19c   : > { %v2162_v61 = vsel %vm1084_vm6, %v17896_v33, %v2161_v35  ;;  %v3645_v62 = vsel %vm3642_vm14, %v3636_v43, %v10841_v22  ;;  %v3655_v53 = vsel %vm3651_vm15, %v3646_v28, %v10812_v32  ;;  %v3644_v56 = vsel %vm3642_vm14, %v3635_v46, %v10837_v36  ;;  %v10870_v8 = vpop.permute.xlu1 %10869 }
 0x19d   : > { %v2164_v39 = vsel %vm2163_vm7, %v17897_v40, %v2162_v61  ;;  %v3654_v13 = vsel %vm3651_vm15, %v3645_v62, %v10811_v58  ;;  %v3653_v63 = vsel %vm3651_vm15, %v3644_v56, %v10807_v50  ;;  %vm3721_vm4 = vcmask 1044480  }
 0x19e   : > { %v3616_v57 = vsel %vm3615_vm11, %v2164_v39, %v10826_v2  ;;  %vm3722_vm5 = vcmask 1045504   ;;  %vm3660_vm6 = vcmask 146432   ;;  %vm3669_vm7 = vcmask 171008  }
 0x19f   : > { %v3625_v60 = vsel %vm3624_vm12, %v3616_v57, %v10796_v42  ;;  %v11391_v2 = vmov 65535   ;;  %v10852_v50 = vunpack.i.h.bf16 %v10850_v7  ;;  %v10851_v12 = vunpack.i.l.bf16 %v10850_v7  ;;  %v10865_v6 = vpop.permute.xlu0 %10864 }
 0x1a0   : > { %v3634_v58 = vsel %vm3633_vm13, %v3625_v60, %v10776_v27  ;;  %v3723_v42 = vsel %vm3721_vm4, 4294967295, %v11391_v2  ;;  %v3663_v24 = vsel %vm3660_vm6, %v3654_v13, %v10791_v18  ;;  %v3664_v27 = vsel %vm3660_vm6, %v3655_v53, %v10792_v49 }
 0x1a1   : > { %v3643_v32 = vsel %vm3642_vm14, %v3634_v58, %v10836_v55  ;;  %v3724_v44 = vsel %vm3722_vm5, %v3723_v42, 0  ;;  %v3672_v14 = vsel %vm3669_vm7, %v3663_v24, %v10851_v12  ;;  %v3673_v38 = vsel %vm3669_vm7, %v3664_v27, %v10852_v50 }
 0x1a2   : > { %v3652_v0 = vsel %vm3651_vm15, %v3643_v32, %v10806_v30  ;;  %v3726_v29 = vand.u32 %v10993_v48, %v3724_v44  ;;  %v10847_v7 = vunpack.i.h.bf16 %v14495_v54  ;;  %v10846_v30 = vunpack.i.l.bf16 %v14495_v54 }
 0x1a3   : > { %v10862_v45 = vunpack.i.h.bf16 %v10860_v47  ;;  %v10861_v59 = vunpack.i.l.bf16 %v10860_v47  ;;  %v10857_v18 = vunpack.i.h.bf16 %v10855_v37  ;;  %v10856_v41 = vunpack.i.l.bf16 %v10855_v37 }
 0x1a4   : > { %10603 = vmatprep.subr.bf16.mxu0 %v3726_v29  ;;  %v3661_v49 = vsel %vm3660_vm6, %v3652_v0, %v10786_v10  ;;  %v3662_v31 = vsel %vm3660_vm6, %v3653_v63, %v10787_v9  ;;  %v17899_v10 = vld [vmem:[#allocation98_spill] sm:$0xff]  ;;  %v10871_v33 = vunpack.i.l.bf16 %v10870_v8  ;;  %v10866_v51 = vunpack.i.l.bf16 %v10865_v6 }
 0x1a5   : > { %10604 = vmatpush3.bf16.msra.mxu0 %v3726_v29  ;;  %v3623_v54 = vsel %vm3615_vm11, %v14322_v34, %v10862_v45  ;;  %v3622_v35 = vsel %vm3615_vm11, %v14378_v3, %v10861_v59  ;;  %v3621_v1 = vsel %vm3615_vm11, %v14372_v23, %v10857_v18  ;;  %v3670_v22 = vsel %vm3669_vm7, %v3661_v49, %v10846_v30 }
 0x1a6   : > { %10605 = vmatprep.subr.bf16.mxu0 %v10994_v16  ;;  %v3620_v26 = vsel %vm3615_vm11, %v17899_v10, %v10856_v41  ;;  %v3671_v9 = vsel %vm3669_vm7, %v3662_v31, %v10847_v7  ;;  %v3679_v43 = vsel %vm3678_vm8, %v3670_v22, %v10816_v20  ;;  %v10872_v3 = vunpack.i.h.bf16 %v10870_v8 }
 0x1a7   : > { %v3680_v34 = vsel %vm3678_vm8, %v3671_v9, %v10817_v25  ;;  %v10867_v23 = vunpack.i.h.bf16 %v10865_v6  ;;  %v3681_v46 = vsel %vm3678_vm8, %v3672_v14, %v10821_v52  ;;  %v3682_v36 = vsel %vm3678_vm8, %v3673_v38, %v10822_v4 }
 0x1a8   : > { %v3687_v61 = vpack.c.bf16 %v3680_v34, %v3679_v43  ;;  %v3631_v20 = vsel %vm3624_vm12, %v3622_v35, %v10871_v33  ;;  %v3632_v15 = vsel %vm3624_vm12, %v3623_v54, %v10872_v3  ;;  %v3688_v40 = vpack.c.bf16 %v3682_v36, %v3681_v46  ;;  %v10880_v62 = vpop.permute.xlu1 %10879 }
 0x1a9   : > { %10606 = vmatpush3.bf16.msra.mxu0 %v10994_v16  ;;  %v3630_v25 = vsel %vm3624_vm12, %v3621_v1, %v10867_v23  ;;  %v3629_v39 = vsel %vm3624_vm12, %v3620_v26, %v10866_v51  ;;  %v10882_v52 = vunpack.i.h.bf16 %v10880_v62  ;;  %v10881_v28 = vunpack.i.l.bf16 %v10880_v62 }
 0x1aa   : > { %10607 = vmatprep.mubr.msk.bf16.mxu0 %vm3708_vm9, %v3687_v61  ;;  %vm3928_vm11 = vcmask 1046528   ;;  %vm4077_vm12 = vcmask 523264  }
 0x1ab   : > { %v3640_v17 = vsel %vm3633_vm13, %v3631_v20, %v10881_v28  ;;  %v3641_v4 = vsel %vm3633_vm13, %v3632_v15, %v10882_v52  ;;  %v14611_v28 = vld [vmem:[%s17900_s2] ss:$0 sm:$0xff]  ;;  %s17904_s2 = smov 64  }
 0x1ac   : > { %10608 = vmatmul.mubr.msk.bf16.vlgmr.msra.gmra.mxu0 %vm3708_vm9, %v3688_v40 }
 0x1b7   : > { %v10875_v55 = vpop.permute.xlu0 %10874 }
 0x1b8   : > { %v10877_v57 = vunpack.i.h.bf16 %v10875_v55  ;;  %v10876_v13 = vunpack.i.l.bf16 %v10875_v55 }
 0x1ba   : > { %v3638_v53 = vsel %vm3633_vm13, %v3629_v39, %v10876_v13  ;;  %v3639_v56 = vsel %vm3633_vm13, %v3630_v25, %v10877_v57 }
 0x1cf   : > { %v10890_v63 = vpop.permute.xlu1 %10889 }
 0x1d0   : > { %v10892_v41 = vunpack.i.h.bf16 %v10890_v63  ;;  %v10891_v49 = vunpack.i.l.bf16 %v10890_v63 }
 0x1d2   : > { %v3649_v3 = vsel %vm3642_vm14, %v3640_v17, %v10891_v49  ;;  %v3650_v33 = vsel %vm3642_vm14, %v3641_v4, %v10892_v41  ;;  %v11011_v49 = vld [vmem:[%s17903_s3 + $0xf8] sm:$0xff]  }
 0x1d3   : > { %10165 = vmatprep.subr.bf16.mxu0 %v11011_v49 }
 0x1e5   : > { %v10885_v60 = vpop.permute.xlu0 %10884 }
 0x1e6   : > { %v10900_v47 = vpop.permute.xlu1 %10899  ;;  %v10887_v58 = vunpack.i.h.bf16 %v10885_v60  ;;  %v10886_v32 = vunpack.i.l.bf16 %v10885_v60 }
 0x1e7   : > { %v10902_v6 = vunpack.i.h.bf16 %v10900_v47  ;;  %v10901_v54 = vunpack.i.l.bf16 %v10900_v47 }
 0x1e8   : > { %v3647_v29 = vsel %vm3642_vm14, %v3638_v53, %v10886_v32  ;;  %v3648_v14 = vsel %vm3642_vm14, %v3639_v56, %v10887_v58  ;;  %v17902_v32 = vld [vmem:[#allocation9_spill] sm:$0xff] }
 0x1e9   : > { %v3658_v23 = vsel %vm3651_vm15, %v3649_v3, %v10901_v54  ;;  %v3659_v61 = vsel %vm3651_vm15, %v3650_v33, %v10902_v6  ;;  %v11014_v33 = vld [vmem:[%s17903_s3 + $0xb0] sm:$0xff]  }
 0x1ed   : > { %v10895_v48 = vpop.permute.xlu0 %10894 }
 0x1ee   : > { %v10897_v2 = vunpack.i.h.bf16 %v10895_v48  ;;  %v10896_v42 = vunpack.i.l.bf16 %v10895_v48 }
 0x1f0   : > { %v3656_v38 = vsel %vm3651_vm15, %v3647_v29, %v10896_v42  ;;  %v3657_v7 = vsel %vm3651_vm15, %v3648_v14, %v10897_v2  ;;  %v3930_v2 = vrot.slane %v17902_v32, 1  ;;  %v10995_v42 = vld [vmem:[%s17903_s3 + $0x78] sm:$0xff]  }
 0x1f1   : > { %10125 = vmatprep.subr.bf16.mxu1 %v10995_v42 }
 0x1f9   : > { %v10910_v12 = vpop.permute.xlu1 %10909 }
 0x1fa   : > { %v10912_v10 = vunpack.i.h.bf16 %v10910_v12  ;;  %v10911_v26 = vunpack.i.l.bf16 %v10910_v12  ;;  %v10997_v12 = vld [vmem:[%s17903_s3 + $0x70] sm:$0xff]  }
 0x1fb   : > { %v10905_v37 = vpop.permute.xlu0 %10904 }
 0x1fc   : > { %v10907_v0 = vunpack.i.h.bf16 %v10905_v37  ;;  %v10906_v44 = vunpack.i.l.bf16 %v10905_v37  ;;  %v3667_v46 = vsel %vm3660_vm6, %v3658_v23, %v10911_v26  ;;  %v3668_v36 = vsel %vm3660_vm6, %v3659_v61, %v10912_v10  ;;  %v17901_v37 = vld [vmem:[#allocation8_spill] sm:$0xff]  ;;  %v11001_v10 = vld [vmem:[%s17903_s3 + $0x60] sm:$0xff]   ;;  %v11012_v26 = vld [vmem:[%s17903_s3 + $0xb8] sm:$0xff]  }
 0x1fd   : > { %v3929_v58 = vrot.slane %v17901_v37, 1  ;;  %10166 = vmatpush3.bf16.msra.mxu0 %v11012_v26 }
 0x1fe   : > { %v3665_v30 = vsel %vm3660_vm6, %v3656_v38, %v10906_v44  ;;  %v3666_v45 = vsel %vm3660_vm6, %v3657_v7, %v10907_v0  ;;  %v10998_v38 = vld [vmem:[%s17903_s3 + $0x30] sm:$0xff]  }
 0x200   : > { %v10915_v50 = vpop.permute.xlu0 %10914 }
 0x201   : > { %v10917_v24 = vunpack.i.h.bf16 %v10915_v50  ;;  %v10916_v27 = vunpack.i.l.bf16 %v10915_v50  ;;  %v10996_v50 = vld [vmem:[%s17903_s3 + $0x38] sm:$0xff]  }
 0x202   : > { %10126 = vmatpush3.bf16.msra.mxu1 %v10996_v50 }
 0x203   : > { %v3674_v31 = vsel %vm3669_vm7, %v3665_v30, %v10916_v27  ;;  %v3675_v8 = vsel %vm3669_vm7, %v3666_v45, %v10917_v24  ;;  %v3931_v45 = vsel %vm3928_vm11, %v3929_v58, %v3930_v2  ;;  %10127 = vmatprep.subr.bf16.mxu1 %v10997_v12 }
 0x204   : > { %v10925_v16 = vpop.permute.xlu0 %10924 }
 0x205   : > { %v10927_v59 = vunpack.i.h.bf16 %v10925_v16  ;;  %v10926_v18 = vunpack.i.l.bf16 %v10925_v16 }
 0x206   : > { %10128 = vmatpush3.bf16.msra.mxu1 %v10998_v38 }
 0x207   : > { %v10920_v35 = vpop.permute.xlu1 %10919  ;;  %v3683_v1 = vsel %vm3678_vm8, %v3674_v31, %v10926_v18  ;;  %v3684_v22 = vsel %vm3678_vm8, %v3675_v8, %v10927_v59  ;;  %v10999_v59 = vld [vmem:[%s17903_s3 + $0x68] sm:$0xff]  }
 0x208   : > { %v3689_v9 = vpack.c.bf16 %v3684_v22, %v3683_v1  ;;  %v10922_v43 = vunpack.i.h.bf16 %v10920_v35  ;;  %v10921_v34 = vunpack.i.l.bf16 %v10920_v35  ;;  %v11000_v35 = vld [vmem:[%s17903_s3 + $0x28] sm:$0xff]   ;;  %10129 = vmatprep.subr.bf16.mxu1 %v10999_v59 }
 0x20a   : > { %10611 = vmatprep.mubr.msk.bf16.mxu0 %vm3708_vm9, %v3689_v9  ;;  %v3676_v25 = vsel %vm3669_vm7, %v3667_v46, %v10921_v34  ;;  %v3677_v40 = vsel %vm3669_vm7, %v3668_v36, %v10922_v43  ;;  %v11013_v9 = vld [vmem:[%s17903_s3 + $0xf0] sm:$0xff]   ;;  %10130 = vmatpush3.bf16.msra.mxu1 %v11000_v35  ;;  %v11002_v46 = vld [vmem:[%s17903_s3 + $0x20] sm:$0xff]  }
 0x20b   : > { %v10930_v51 = vpop.permute.xlu1 %10929  ;;  %10167 = vmatprep.subr.bf16.mxu0 %v11013_v9  ;;  %10131 = vmatprep.subr.bf16.mxu1 %v11001_v10  ;;  %v11027_v9 = vld [vmem:[%s17903_s3 + $0xc0] sm:$0xff]  }
 0x20c   : > { %v10932_v20 = vunpack.i.h.bf16 %v10930_v51  ;;  %v10931_v15 = vunpack.i.l.bf16 %v10930_v51  ;;  %10168 = vmatpush3.bf16.msra.mxu0 %v11014_v33  ;;  %v11028_v33 = vld [vmem:[%s17903_s3 + $0x80] sm:$0xff]  }
 0x20e   : > { %v3685_v39 = vsel %vm3678_vm8, %v3676_v25, %v10931_v15  ;;  %v3686_v62 = vsel %vm3678_vm8, %v3677_v40, %v10932_v20  ;;  %v11003_v20 = vld [vmem:[%s17903_s3 + $0x58] sm:$0xff]   ;;  %v11015_v15 = vld [vmem:[%s17903_s3 + $0xe8] sm:$0xff]   ;;  %10132 = vmatpush3.bf16.msra.mxu1 %v11002_v46 }
 0x20f   : > { %v3690_v52 = vpack.c.bf16 %v3686_v62, %v3685_v39  ;;  %v11016_v40 = vld [vmem:[%s17903_s3 + $0xa8] sm:$0xff]   ;;  %v11004_v39 = vld [vmem:[%s17903_s3 + $0x18] sm:$0xff]   ;;  %10169 = vmatprep.subr.bf16.mxu0 %v11015_v15  ;;  %v11017_v62 = vld [vmem:[%s17903_s3 + $0xe0] sm:$0xff]   ;;  %10133 = vmatprep.subr.bf16.mxu1 %v11003_v20 }
 0x210   : > { %10170 = vmatpush3.bf16.msra.mxu0 %v11016_v40 }
 0x211   : > { %10612 = vmatmul.mubr.msk.bf16.gmra.mxu0 %vm3708_vm9, %v3690_v52  ;;  %v11005_v52 = vld [vmem:[%s17903_s3 + $0x50] sm:$0xff]   ;;  %10171 = vmatprep.subr.bf16.mxu0 %v11017_v62 }
 0x212   : > { %10134 = vmatpush3.bf16.msra.mxu1 %v11004_v39 }
 0x213   : > { %10135 = vmatprep.subr.bf16.mxu1 %v11005_v52 }
 0x26c   : > { %v10609_v17 = vpop.f32.mrf.mxu0 }
 0x26d   : > { %v3771_v4 = vadd.f32 %v10609_v17, %v14611_v28  ;;  %v11018_v17 = vld [vmem:[%s17903_s3 + $0xa0] sm:$0xff]  }
 0x26e   : > { %v3762_v55 = vpop.f32.mrf.mxu0  ;;  %10172 = vmatpush3.bf16.msra.mxu0 %v11018_v17 }
 0x26f   : > { %v3795_v57 = vmax.f32 %v3771_v4, 0.0  ;;  %v3763_v13 = vadd.f32 %v14611_v28, %v3762_v55  ;;  %v11006_v4 = vld [vmem:[%s17903_s3 + $0x10] sm:$0xff]   ;;  %v11019_v55 = vld [vmem:[%s17903_s3 + $0xd8] sm:$0xff]  }
 0x270   : > { %v10610_v53 = vpop.f32.mrf.mxu0  ;;  %10136 = vmatpush3.bf16.msra.mxu1 %v11006_v4  ;;  %10173 = vmatprep.subr.bf16.mxu0 %v11019_v55 }
 0x271   : > { %v3793_v56 = vmax.f32 %v3763_v13, 0.0  ;;  %v3774_v60 = vadd.f32 %v10610_v53, %v14611_v28  ;;  %v3884_v48 = vrot.slane %v3795_v57, 7  ;;  %v11007_v57 = vld [vmem:[%s17903_s3 + $0x48] sm:$0xff]   ;;  %v11020_v13 = vld [vmem:[%s17903_s3 + $0x98] sm:$0xff]  }
 0x272   : > { %v3765_v63 = vpop.f32.mrf.mxu0  ;;  %v11008_v53 = vld [vmem:[%s17903_s3 + $0x8] sm:$0xff]   ;;  %10137 = vmatprep.subr.bf16.mxu1 %v11007_v57  ;;  %10174 = vmatpush3.bf16.msra.mxu0 %v11020_v13 }
 0x273   : > { %v3882_v47 = vrot.slane %v3793_v56, 7  ;;  %v3766_v24 = vadd.f32 %v14611_v28, %v3765_v63  ;;  %v3796_v14 = vmax.f32 %v3774_v60, 0.0  ;;  %v14640_v7 = vsel %vm618_vm0, 0.0, %v3884_v48  ;;  %v11022_v56 = vld [vmem:[%s17903_s3 + $0xd0] sm:$0xff]   ;;  %v11009_v60 = vld [vmem:[%s17903_s3 + $0x40] sm:$0xff]  }
 0x274   : > { %v14643_v16 = vsel %vm618_vm0, %v3884_v48, 0.0  ;;  %v3938_v31 = vrot.slane %v14640_v7, 1  ;;  %v11023_v63 = vld [vmem:[%s17903_s3 + $0x90] sm:$0xff]   ;;  %10138 = vmatpush3.bf16.msra.mxu1 %v11008_v53  ;;  %v11010_v48 = vld [vmem:[%s17903_s3] sm:$0xff]   ;;  %10175 = vmatprep.subr.bf16.mxu0 %v11022_v56  ;;  %v3986_v4 = vrot.slane %v14640_v7, 2 }
 0x275   : > { %v14628_v0 = vsel %vm618_vm0, 0.0, %v3882_v47  ;;  %v14631_v44 = vsel %vm618_vm0, %v3882_v47, 0.0  ;;  %v3794_v30 = vmax.f32 %v3766_v24, 0.0  ;;  %v3939_v8 = vrot.slane %v14643_v16, 1  ;;  %10139 = vmatprep.subr.bf16.mxu1 %v11009_v60  ;;  %v14757_v47 = vld [vmem:[%s17903_s3 + $0x118] sm:$0xff]  }
 0x276   : > { %v3932_v27 = vrot.slane %v14628_v0, 1  ;;  %v3933_v29 = vrot.slane %v14631_v44, 1  ;;  %v14657_v6 = vrot.slane %v3796_v14, 7  ;;  %10176 = vmatpush3.bf16.msra.mxu0 %v11023_v63  ;;  %v11024_v14 = vld [vmem:[%s17903_s3 + $0xc8] sm:$0xff]   ;;  %v3987_v55 = vrot.slane %v14643_v16, 2 }
 0x277   : > { %v3883_v18 = vrot.slane %v3794_v30, 7  ;;  %v14694_v51 = vsel %vm3928_vm11, %v3938_v31, %v3939_v8  ;;  %v11025_v30 = vld [vmem:[%s17903_s3 + $0x88] sm:$0xff]   ;;  %10177 = vmatprep.subr.bf16.mxu0 %v11024_v14  ;;  %v3977_v8 = vrot.slane %v17901_v37, 2  ;;  %v3981_v53 = vrot.slane %v14631_v44, 2 }
 0x278   : > { %v14650_v41 = vsel %vm3928_vm11, %v3932_v27, %v3933_v29  ;;  %v14688_v23 = vsel %vm618_vm0, 0.0, %v14657_v6  ;;  %10140 = vmatpush3.bf16.msra.mxu1 %v11010_v48  ;;  %v3909_v50 = vsel %vm618_vm0, %v14657_v6, 0.0  ;;  %v3978_v6 = vrot.slane %v17902_v32, 2 }
 0x279   : > { %v10938_v54 = vpack.i.bf16 %v14650_v41, %v3931_v45  ;;  %v14664_v1 = vsel %vm618_vm0, 0.0, %v3883_v18  ;;  %v14667_v22 = vsel %vm618_vm0, %v3883_v18, 0.0  ;;  %v10943_v25 = vpack.i.bf16 %v14688_v23, %v14640_v7  ;;  %10615 = vmatprep.subr.bf16.mxu1 %v14757_v47 }
 0x27a   : > { %v3935_v43 = vrot.slane %v14664_v1, 1  ;;  %v3936_v34 = vrot.slane %v14667_v22, 1  ;;  %v10933_v3 = vpack.i.bf16 %v14664_v1, %v14628_v0  ;;  %v3941_v45 = vrot.slane %v14688_v23, 1  ;;  %10178 = vmatpush3.bf16.msra.mxu0 %v11025_v30 }
 0x27b   : > { %10939 = vrot.lane.b32.xlu1 %v10938_v54, %s17383_s29  ;;  %v3942_v59 = vrot.slane %v3909_v50, 1  ;;  %10179 = vmatprep.subr.bf16.mxu0 %v11027_v9  ;;  %v3983_v15 = vrot.slane %v14664_v1, 2  ;;  %v14807_v57 = vsel %vm3722_vm5, %v3977_v8, %v3978_v6 }
 0x27c   : > { %v14691_v61 = vsel %vm3928_vm11, %v3935_v43, %v3936_v34  ;;  %10934 = vrot.lane.b32.xlu0 %v10933_v3, %s17383_s29  ;;  %v3989_v43 = vrot.slane %v14688_v23, 2  ;;  %v3990_v34 = vrot.slane %v3909_v50, 2 }
 0x27d   : > { %v10948_v36 = vpack.i.bf16 %v14694_v51, %v14691_v61  ;;  %v14795_v20 = vsel %vm3928_vm11, %v3941_v45, %v3942_v59 }
 0x27e   : > { %10180 = vmatpush3.bf16.msra.mxu0 %v11028_v33 }
 0x27f   : > { %10949 = vrot.lane.b32.xlu1 %v10948_v36, %s17383_s29 }
 0x280   : > { %10944 = vrot.lane.b32.xlu0 %v10943_v25, %s17383_s29  ;;  %v3984_v25 = vrot.slane %v14667_v22, 2  ;;  %v3980_v22 = vrot.slane %v14628_v0, 2  ;;  %s9698_s29 = sshll.u32 %s539_s0, 2 }
 0x281   : > { %s541_s23 = scalar_lea.vmem [#allocation2], %s9698_s29 }
 0x282   : > { %v14822_v48 = vsel %vm3722_vm5, %v3983_v15, %v3984_v25  ;;  %v3982_v14 = vsel %vm3722_vm5, %v3980_v22, %v3981_v53  ;;  %s9632_s18 = sshll.u32 %s541_s23, 4  ;;  %s17089_s18 = int_to_ptr.vmem [resolvable:$true] %s9632_s18 }
 0x283   : > { %p11326_p0 = scmp.lt.s32.totalorder %s17089_s18, %s11324_s22 }
 0x2d1   : > { %v10613_v58 = vpop.f32.mrf.mxu0 }
 0x2d2   : > { %v3787_v12 = vadd.f32 %v10613_v58, %v14611_v28  ;;  %v14825_v58 = vsel %vm3722_vm5, %v3989_v43, %v3990_v34 }
 0x2d3   : > { %v3778_v2 = vpop.f32.mrf.mxu0 }
 0x2d4   : > { %v3779_v42 = vadd.f32 %v14611_v28, %v3778_v2  ;;  %v3799_v31 = vmax.f32 %v3787_v12, 0.0 }
 0x2d5   : > { %v10614_v24 = vpop.f32.mrf.mxu0 }
 0x2d6   : > { %v3797_v27 = vmax.f32 %v3779_v42, 0.0  ;;  %v3790_v29 = vadd.f32 %v10614_v24, %v14611_v28  ;;  %v3888_v40 = vrot.slane %v3799_v31, 7 }
 0x2d7   : > { %v3781_v38 = vpop.f32.mrf.mxu0 }
 0x2d8   : > { %v3886_v18 = vrot.slane %v3797_v27, 7  ;;  %v3800_v49 = vmax.f32 %v3790_v29, 0.0  ;;  %v3782_v26 = vadd.f32 %v14611_v28, %v3781_v38  ;;  %v14818_v63 = vsel %vm618_vm0, 0.0, %v3888_v40 }
 0x2d9   : > { %v3912_v16 = vsel %vm618_vm0, %v3888_v40, 0.0  ;;  %v14842_v38 = vsel %vm3722_vm5, %v3986_v4, %v3987_v55  ;;  %v3950_v30 = vrot.slane %v14818_v63, 1  ;;  %v3998_v59 = vrot.slane %v14818_v63, 2 }
 0x2da   : > { %v14775_v54 = vsel %vm618_vm0, 0.0, %v3886_v18  ;;  %v14778_v35 = vsel %vm618_vm0, %v3886_v18, 0.0  ;;  %v3889_v10 = vrot.slane %v3800_v49, 7  ;;  %v3798_v36 = vmax.f32 %v3782_v26, 0.0 }
 0x2db   : > { %v3944_v3 = vrot.slane %v14775_v54, 1  ;;  %v3945_v32 = vrot.slane %v14778_v35, 1  ;;  %v3951_v45 = vrot.slane %v3912_v16, 1  ;;  %v3999_v18 = vrot.slane %v3912_v16, 2 }
 0x2dc   : > { %v14791_v46 = vsel %vm618_vm0, 0.0, %v3889_v10  ;;  %v3913_v28 = vsel %vm618_vm0, %v3889_v10, 0.0  ;;  %v3887_v52 = vrot.slane %v3798_v36, 7  ;;  %v10963_v49 = vpack.i.bf16 %v14822_v48, %v3982_v14 }
 0x2dd   : > { %v14800_v39 = vsel %vm3928_vm11, %v3944_v3, %v3945_v32  ;;  %v4047_v62 = vrot.slane %v3913_v28, 2  ;;  %v4046_v13 = vrot.slane %v14791_v46, 2  ;;  %v4035_v44 = vrot.slane %v14791_v46, 1 }
 0x2de   : > { %v10958_v17 = vpack.i.bf16 %v14800_v39, %v14795_v20  ;;  %v14813_v56 = vsel %vm618_vm0, 0.0, %v3887_v52  ;;  %v3911_v60 = vsel %vm618_vm0, %v3887_v52, 0.0  ;;  %v10968_v42 = vpack.i.bf16 %v14791_v46, %v14818_v63 }
 0x2df   : > { %v10953_v2 = vpack.i.bf16 %v14813_v56, %v14775_v54  ;;  %v14833_v50 = vsel %vm3722_vm5, %v4046_v13, %v4047_v62  ;;  %v4036_v12 = vrot.slane %v3913_v28, 1  ;;  %v3947_v24 = vrot.slane %v14813_v56, 1 }
 0x2e0   : > { %10959 = vrot.lane.b32.xlu1 %v10958_v17, %s17904_s2  ;;  %v3948_v27 = vrot.slane %v3911_v60, 1  ;;  %v4119_v29 = vpack.c.bf16 %v14807_v57, %v14833_v50  ;;  %v10978_v31 = vpack.i.bf16 %v14825_v58, %v14842_v38  ;;  %v3995_v8 = vrot.slane %v14813_v56, 2 }
 0x2e1   : > { %10954 = vrot.lane.b32.xlu0 %v10953_v2, %s17904_s2  ;;  %v3996_v6 = vrot.slane %v3911_v60, 2  ;;  %v14854_v26 = vsel %vm3928_vm11, %v4035_v44, %v4036_v12  ;;  %v3992_v9 = vrot.slane %v14775_v54, 2  ;;  %v3993_v43 = vrot.slane %v14778_v35, 2 }
 0x2e2   : > { %v14851_v10 = vsel %vm3928_vm11, %v3947_v24, %v3948_v27  ;;  %v14861_v34 = vsel %vm3928_vm11, %v3950_v30, %v3951_v45  ;;  %v14864_v3 = vsel %vm3722_vm5, %v3998_v59, %v3999_v18  ;;  %v11026_v30 = vld [vmem:[%s17903_s3 + $0x110] sm:$0xff]  }
 0x2e3   : > { %v10973_v32 = vpack.i.bf16 %v14861_v34, %v14851_v10  ;;  %v10988_v33 = vpack.i.bf16 %v14864_v3, %v14854_v26  ;;  %v14871_v28 = vsel %vm3722_vm5, %v3995_v8, %v3996_v6  ;;  %v14876_v35 = vsel %vm3722_vm5, %v3992_v9, %v3993_v43 }
 0x2e4   : > { %10969 = vrot.lane.b32.xlu1 %v10968_v42, %s17904_s2  ;;  %v10983_v36 = vpack.i.bf16 %v14871_v28, %v14876_v35 }
 0x2e5   : > { %10964 = vrot.lane.b32.xlu0 %v10963_v49, %s17904_s2 }
 0x2e8   : > { %10979 = vrot.lane.b32.xlu1 %v10978_v31, %s17904_s2 }
 0x2e9   : > { %10974 = vrot.lane.b32.xlu0 %v10973_v32, %s17904_s2 }
 0x2ec   : > { %10989 = vrot.lane.b32.xlu1 %v10988_v33, %s17904_s2 }
 0x2ed   : > { %v10940_v15 = vpop.permute.xlu1 %10939  ;;  %10984 = vrot.lane.b32.xlu0 %v10983_v36, %s17904_s2 }
 0x2ee   : > { %v10942_v25 = vunpack.i.h.bf16 %v10940_v15  ;;  %v10941_v40 = vunpack.i.l.bf16 %v10940_v15  ;;  %v10935_v62 = vpop.permute.xlu0 %10934 }
 0x2ef   : > { %v10937_v52 = vunpack.i.h.bf16 %v10935_v62  ;;  %v10936_v17 = vunpack.i.l.bf16 %v10935_v62 }
 0x2f0   : > { %v14883_v4 = vsel %vm4077_vm12, %v17901_v37, %v10941_v40  ;;  %v4079_v55 = vsel %vm4077_vm12, %v14628_v0, %v10942_v25 }
 0x2f1   : > { %4063 = vrot.lane.b32.xlu0 %v14833_v50, %s17904_s2  ;;  %v10950_v13 = vpop.permute.xlu1 %10949  ;;  %v4086_v60 = vsel %vm4077_vm12, %v14807_v57, %v10936_v17  ;;  %v4087_v16 = vsel %vm4077_vm12, %v3982_v14, %v10937_v52  ;;  %v4103_v42 = vpack.c.bf16 %v4079_v55, %v14883_v4  ;;  %v11031_v57 = vld [vmem:[%s17141_s5 + $0x78] sm:$0xff]  }
 0x2f2   : > { %v10952_v22 = vunpack.i.h.bf16 %v10950_v13  ;;  %v10951_v53 = vunpack.i.l.bf16 %v10950_v13  ;;  %v10945_v44 = vpop.permute.xlu0 %10944  ;;  %v4104_v2 = vpack.c.bf16 %v4087_v16, %v4086_v60  ;;  %v11032_v50 = vld [vmem:[%s17141_s5 + $0x38] sm:$0xff]   ;;  %10213 = vmatprep.subr.bf16.mxu0 %v11031_v57 }
 0x2f3   : > { %v10947_v12 = vunpack.i.h.bf16 %v10945_v44  ;;  %v10946_v24 = vunpack.i.l.bf16 %v10945_v44 }
 0x2f4   : > { %v4080_v0 = vsel %vm4077_vm12, %v14664_v1, %v10951_v53  ;;  %v4081_v27 = vsel %vm4077_vm12, %v14640_v7, %v10952_v22  ;;  %4386 = vmatprep.mubr.bf16.mxu1 %v4104_v2  ;;  %v11029_v7 = vld [vmem:[%s17903_s3 + $0x108] sm:$0xff]   ;;  %v11030_v1 = vld [vmem:[%s17903_s3 + $0x100] sm:$0xff]   ;;  %s11325_s3 = scalar_lea.vmem %s11324_s22, 128 }
 0x2f5   : > { %v4106_v45 = vpack.c.bf16 %v4081_v27, %v4080_v0  ;;  %4387 = vmatmul.mubr.bf16.vlgmr.msra.gmra.mxu1 %v4103_v42  ;;  %v4088_v14 = vsel %vm4077_vm12, %v14822_v48, %v10946_v24  ;;  %v4089_v59 = vsel %vm4077_vm12, %v14842_v38, %v10947_v12 }
 0x2f6   : > { %v4108_v18 = vpack.c.bf16 %v4089_v59, %v4088_v14  ;;  %10616 = vmatpush3.bf16.msra.mxu1 %v14757_v47  ;;  %v4107_v59 = vpack.c.bf16 %v14842_v38, %v14822_v48  ;;  %v4115_v48 = vpack.c.bf16 %v14864_v3, %v14871_v28 }
 0x2f7   : > { %4451 = vmatprep.mubr.bf16.mxu0 %v4106_v45  ;;  %10617 = vmatprep.subr.bf16.mxu1 %v11026_v30 }
 0x2f8   : > { %4394 = vmatprep.mubr.bf16.mxu1 %v4108_v18 }
 0x2fa   : > { %10618 = vmatpush3.bf16.msra.mxu1 %v11026_v30 }
 0x2fb   : > { %10619 = vmatprep.subr.bf16.mxu1 %v11029_v7 }
 0x2fd   : > { %4395 = vmatmul.mubr.bf16.gmra.mxu1 %v4106_v45 }
 0x2fe   : > { %10620 = vmatpush3.bf16.msra.mxu1 %v11029_v7 }
 0x2ff   : > { %10621 = vmatprep.subr.bf16.mxu1 %v11030_v1 }
 0x302   : > { %10622 = vmatpush3.bf16.msra.mxu1 %v11030_v1 }
 0x352   : > { %v10960_v49 = vpop.permute.xlu1 %10959 }
 0x353   : > { %v10962_v31 = vunpack.i.h.bf16 %v10960_v49  ;;  %v10961_v8 = vunpack.i.l.bf16 %v10960_v49  ;;  %v10955_v47 = vpop.permute.xlu0 %10954 }
 0x354   : > { %v10957_v9 = vunpack.i.h.bf16 %v10955_v47  ;;  %v10956_v43 = vunpack.i.l.bf16 %v10955_v47 }
 0x355   : > { %v4082_v36 = vsel %vm4077_vm12, %v14688_v23, %v10961_v8  ;;  %v4083_v15 = vsel %vm4077_vm12, %v14775_v54, %v10962_v31 }
 0x356   : > { %v10970_v6 = vpop.permute.xlu1 %10969  ;;  %v4090_v25 = vsel %vm4077_vm12, %v14825_v58, %v10956_v43  ;;  %v4091_v40 = vsel %vm4077_vm12, %v14876_v35, %v10957_v9  ;;  %v4110_v53 = vpack.c.bf16 %v4083_v15, %v4082_v36  ;;  %v17908_v9 = vld [vmem:[#allocation87_spill] sm:$0xff] }
 0x357   : > { %v10972_v32 = vunpack.i.h.bf16 %v10970_v6  ;;  %v10971_v33 = vunpack.i.l.bf16 %v10970_v6  ;;  %v10965_v17 = vpop.permute.xlu0 %10964  ;;  %v4112_v55 = vpack.c.bf16 %v4091_v40, %v4090_v25 }
 0x358   : > { %v10967_v22 = vunpack.i.h.bf16 %v10965_v17  ;;  %v10966_v23 = vunpack.i.l.bf16 %v10965_v17 }
 0x359   : > { %v4092_v62 = vsel %vm4077_vm12, %v14871_v28, %v10971_v33  ;;  %v4093_v52 = vsel %vm4077_vm12, %v14864_v3, %v10972_v32  ;;  %4402 = vmatprep.mubr.bf16.mxu1 %v4112_v55  ;;  %v17905_v3 = vld [vmem:[#allocation116_spill] sm:$0xff] }
 0x35a   : > { %v4116_v13 = vpack.c.bf16 %v4093_v52, %v4092_v62  ;;  %v10980_v54 = vpop.permute.xlu1 %10979  ;;  %v4095_v60 = vsel %vm4077_vm12, %v14691_v61, %v10967_v22  ;;  %v4094_v16 = vsel %vm4077_vm12, %v14650_v41, %v10966_v23  ;;  %4403 = vmatmul.mubr.bf16.gmra.mxu1 %v4110_v53  ;;  %v17906_v28 = vrot.slane %v17905_v3, 7 }
 0x35b   : > { %v4105_v44 = vpack.c.bf16 %v4095_v60, %v4094_v16  ;;  %v10975_v2 = vpop.permute.xlu0 %10974  ;;  %v10982_v42 = vunpack.i.h.bf16 %v10980_v54  ;;  %v10981_v12 = vunpack.i.l.bf16 %v10980_v54 }
 0x35c   : > { %4410 = vmatprep.mubr.bf16.mxu1 %v4116_v13  ;;  %v10977_v24 = vunpack.i.h.bf16 %v10975_v2  ;;  %v10976_v0 = vunpack.i.l.bf16 %v10975_v2  ;;  %v9725_v2 = vld [vmem:[%s17909_s4] ss:$0 sm:$0xff]  ;;  %s10118_s4 = sshll.u32 %s11508_s28, 6  ;;  %s11319_s28 = scalar_lea.vmem %s17089_s18, 64 }
 0x35d   : > { %4452 = vmatmul.mubr.bf16.vlgmr.msra.gmra.mxu0 %v4105_v44  ;;  %v4096_v41 = vsel %vm4077_vm12, %v14694_v51, %v10981_v12  ;;  %v4097_v45 = vsel %vm4077_vm12, %v14795_v20, %v10982_v42  ;;  %v4111_v51 = vpack.c.bf16 %v14876_v35, %v14825_v58  ;;  %s17094_s30 = scalar_lea.hbm %s17153_s17, %s10118_s4  ;;  %p11320_p11 = scmp.ne.s32.totalorder %s17089_s18, %s11319_s28 }
 0x35e   : > { %4459 = vmatprep.mubr.bf16.mxu0 %v4110_v53  ;;  %v4084_v27 = vsel %vm4077_vm12, %v14813_v56, %v10976_v0  ;;  %v4085_v30 = vsel %vm4077_vm12, %v14818_v63, %v10977_v24  ;;  %v10990_v18 = vpop.permute.xlu1 %10989  ;;  %v4109_v7 = vpack.c.bf16 %v4097_v45, %v4096_v41  ;;  %10214 = vmatpush3.bf16.msra.mxu0 %v11032_v50  ;;  %p11327_p1 = scmp.lt.s32.totalorder %s11325_s3, %s11319_s28 }
 0x35f   : > { %v4114_v61 = vpack.c.bf16 %v4085_v30, %v4084_v27  ;;  %v10985_v14 = vpop.permute.xlu0 %10984  ;;  %v10991_v49 = vunpack.i.l.bf16 %v10990_v18  ;;  %v10992_v35 = vunpack.i.h.bf16 %v10990_v18  ;;  %p11321_p12 = pnand %p11320_p11, %p11525_p5 }
 0x360   : > { %v10987_v56 = vunpack.i.h.bf16 %v10985_v14  ;;  %v10986_v1 = vunpack.i.l.bf16 %v10985_v14  ;;  %p11328_p2 = por %p11327_p1, %p11326_p0 }
 0x361   : > { %v4102_v38 = vsel %vm4077_vm12, %v14791_v46, %v10991_v49  ;;  %p11322_p13 = pneg %p11321_p12 }
 0x362   : > { %4411 = vmatmul.mubr.bf16.gmra.mxu1 %v4114_v61  ;;  %v4098_v20 = vsel %vm4077_vm12, %v14800_v39, %v10986_v1  ;;  %v4099_v63 = vsel %vm4077_vm12, %v14851_v10, %v10987_v56  ;;  %v4118_v8 = vpack.c.bf16 %v14883_v4, %v4102_v38  ;;  %v4100_v10 = vsel %vm4077_vm12, %v14861_v34, %v10992_v35  ;;  %v17907_v4 = vld [vmem:[#allocation39_spill] sm:$0xff] }
 0x363   : > { %10623 = vmatprep.mubr.msk.bf16.mxu1 %vm4077_vm12, %v4107_v59  ;;  %v4113_v31 = vpack.c.bf16 %v4099_v63, %v4098_v20  ;;  %v4064_v58 = vpop.permute.xlu0 %4063  ;;  %v4748_v47 = vsel %vm12587_vm10, %v17907_v4, %v17906_v28  ;;  %p11329_p3 = pnand %p11328_p2, %p11322_p13 }
 0x364   : > { %v4101_v39 = vsel %vm4077_vm12, %v14854_v26, %v4064_v58  ;;  %v5047_v6 = vrot.slane %v4748_v47, %v11537_v5 }
 0x365   : > { %4460 = vmatmul.mubr.bf16.gmra.mxu0 %v4109_v7  ;;  %v4117_v46 = vpack.c.bf16 %v4101_v39, %v4100_v10 }
 0x366   : > { %4467 = vmatprep.mubr.bf16.mxu0 %v4114_v61  ;;  %v5096_v26 = vsel %vm2157_vm3, %v5047_v6, %v17908_v9 }
 0x367   : > { %5106 = vrot.lane.b32.xlu1 %v5096_v26, %s17904_s2 }
 0x36a   : > { %10624 = vmatmul.mubr.msk.bf16.vlgmr.msra.gmra.mxu1 %vm4077_vm12, %v4111_v51 }
 0x36b   : > { %10627 = vmatprep.mubr.msk.bf16.mxu1 %vm4077_vm12, %v4115_v48 }
 0x36d   : > { %4468 = vmatmul.mubr.bf16.gmra.mxu0 %v4113_v31 }
 0x36e   : > { %4475 = vmatprep.mubr.bf16.mxu0 %v4118_v8 }
 0x372   : > { %10628 = vmatmul.mubr.msk.bf16.gmra.mxu1 %vm4077_vm12, %v4119_v29 }
 0x375   : > { %4476 = vmatmul.mubr.bf16.gmra.mxu0 %v4117_v46 }
 0x3b5   : > { %v10141_v29 = vpop.f32.mrf.mxu1 }
 0x3b7   : > { %v10142_v34 = vpop.f32.mrf.mxu1 }
 0x3b8   : > { %v10143_v16 = vadd.f32 %v10142_v34, %v10141_v29 }
 0x3b9   : > { %v10144_v43 = vpop.f32.mrf.mxu1 }
 0x3ba   : > { %v4389_v41 = vadd.f32 %v10143_v16, %v9725_v2 }
 0x3bb   : > { %v10145_v32 = vpop.f32.mrf.mxu1 }
 0x3bc   : > { %v10146_v18 = vadd.f32 %v10145_v32, %v10144_v43 }
 0x3bd   : > { %v10147_v33 = vpop.f32.mrf.mxu1 }
 0x3be   : > { %v4392_v3 = vadd.f32 %v10146_v18, %v9725_v2 }
 0x3bf   : > { %v10148_v36 = vpop.f32.mrf.mxu1 }
 0x3c0   : > { %v10149_v54 = vadd.f32 %v10148_v36, %v10147_v33 }
 0x3c1   : > { %v10150_v15 = vpop.f32.mrf.mxu1 }
 0x3c2   : > { %v4397_v27 = vadd.f32 %v10149_v54, %v9725_v2 }
 0x3c3   : > { %v10151_v25 = vpop.f32.mrf.mxu1 }
 0x3c4   : > { %v10152_v12 = vadd.f32 %v10151_v25, %v10150_v15 }
 0x3c6   : > { %v4400_v7 = vadd.f32 %v10152_v12, %v9725_v2 }
 0x41a   : > { %v10153_v40 = vpop.f32.mrf.mxu1 }
 0x41c   : > { %v10154_v62 = vpop.f32.mrf.mxu1 }
 0x41d   : > { %v10181_v52 = vpop.f32.mrf.mxu0  ;;  %v10155_v49 = vadd.f32 %v10154_v62, %v10153_v40 }
 0x41e   : > { %v10156_v17 = vpop.f32.mrf.mxu1 }
 0x41f   : > { %v10182_v55 = vpop.f32.mrf.mxu0  ;;  %v4405_v47 = vadd.f32 %v10155_v49, %v9725_v2 }
 0x420   : > { %v10157_v13 = vpop.f32.mrf.mxu1  ;;  %v10183_v24 = vadd.f32 %v10182_v55, %v10181_v52 }
 0x421   : > { %v10184_v22 = vpop.f32.mrf.mxu0  ;;  %v10158_v51 = vadd.f32 %v10157_v13, %v10156_v17 }
 0x422   : > { %v10159_v23 = vpop.f32.mrf.mxu1  ;;  %v4454_v1 = vadd.f32 %v10183_v24, %v4389_v41 }
 0x423   : > { %v10185_v53 = vpop.f32.mrf.mxu0  ;;  %v14977_v6 = vadd.f32 %v10158_v51, %v9725_v2  ;;  %v11038_v51 = vld [vmem:[%s17141_s5 + $0xb8] sm:$0xff]  }
 0x424   : > { %v10160_v60 = vpop.f32.mrf.mxu1  ;;  %v10186_v38 = vadd.f32 %v10185_v53, %v10184_v22 }
 0x425   : > { %v10187_v44 = vpop.f32.mrf.mxu0  ;;  %v10161_v31 = vadd.f32 %v10160_v60, %v10159_v23 }
 0x426   : > { %v10162_v42 = vpop.f32.mrf.mxu1  ;;  %v4457_v34 = vadd.f32 %v10186_v38, %v4392_v3 }
 0x427   : > { %v10188_v0 = vpop.f32.mrf.mxu0  ;;  %v14979_v57 = vadd.f32 %v10161_v31, %v9725_v2 }
 0x428   : > { %v10189_v30 = vadd.f32 %v10188_v0, %v10187_v44  ;;  %v10163_v61 = vpop.f32.mrf.mxu1 }
 0x429   : > { %v10190_v45 = vpop.f32.mrf.mxu0  ;;  %v10164_v35 = vadd.f32 %v10163_v61, %v10162_v42 }
 0x42a   : > { %v4462_v14 = vadd.f32 %v10189_v30, %v4397_v27  ;;  %v10625_v59 = vpop.f32.mrf.mxu1 }
 0x42b   : > { %v10191_v56 = vpop.f32.mrf.mxu0  ;;  %v14981_v33 = vadd.f32 %v10164_v35, %v9725_v2 }
 0x42c   : > { %v4527_v20 = vadd.f32 %v10625_v59, %v4462_v14  ;;  %v10192_v63 = vadd.f32 %v10191_v56, %v10190_v45  ;;  %v4518_v48 = vpop.f32.mrf.mxu1 }
 0x42d   : > { %v4519_v8 = vadd.f32 %v4518_v48, %v4454_v1  ;;  %v10193_v58 = vpop.f32.mrf.mxu0 }
 0x42e   : > { %v4551_v39 = vmax.f32 %v4527_v20, 0.0  ;;  %v4465_v10 = vadd.f32 %v10192_v63, %v4400_v7  ;;  %v10626_v46 = vpop.f32.mrf.mxu1 }
 0x42f   : > { %v4549_v28 = vmax.f32 %v4519_v8, 0.0  ;;  %v10194_v4 = vpop.f32.mrf.mxu0 }
 0x430   : > { %v4640_v9 = vrot.slane %v4551_v39, 7  ;;  %v4530_v26 = vadd.f32 %v10626_v46, %v4465_v10  ;;  %v10195_v29 = vadd.f32 %v10194_v4, %v10193_v58  ;;  %v4521_v43 = vpop.f32.mrf.mxu1 }
 0x431   : > { %v4638_v50 = vrot.slane %v4549_v28, 7  ;;  %v10196_v32 = vpop.f32.mrf.mxu0  ;;  %v4522_v16 = vadd.f32 %v4521_v43, %v4457_v34 }
 0x432   : > { %v4656_v36 = vsel %vm618_vm0, 0.0, %v4640_v9  ;;  %v4664_v15 = vsel %vm618_vm0, %v4640_v9, 0.0  ;;  %v4552_v25 = vmax.f32 %v4530_v26, 0.0  ;;  %v10629_v44 = vpop.f32.mrf.mxu1  ;;  %v4470_v2 = vadd.f32 %v10195_v29, %v4405_v47 }
 0x433   : > { %v4809_v40 = vcombine.high %v4656_v36, %v4656_v36  ;;  %v14986_v62 = vrot.slane %v4656_v36, %v11552_v11  ;;  %v14989_v52 = vrot.slane %v4664_v15, %v11552_v11  ;;  %v4654_v17 = vsel %vm618_vm0, 0.0, %v4638_v50  ;;  %v10197_v55 = vpop.f32.mrf.mxu0 }
 0x434   : > { %v4662_v13 = vsel %vm618_vm0, %v4638_v50, 0.0  ;;  %v4792_v22 = vcombine.high %v4654_v17, %v4654_v17  ;;  %v14994_v23 = vrot.slane %v4654_v17, %v11552_v11  ;;  %v4641_v53 = vrot.slane %v4552_v25, 7  ;;  %v4534_v63 = vpop.f32.mrf.mxu1 }
 0x435   : > { %v14997_v54 = vrot.slane %v4809_v40, %v11552_v11  ;;  %v15001_v60 = vcombine.high %v14986_v62, %v14986_v62  ;;  %v10199_v42 = vpop.f32.mrf.mxu0  ;;  %v9770_v12 = vrot.slane %v14986_v62, 9  ;;  %v15012_v27 = vrot.slane %v4662_v13, %v11552_v11 }
 0x436   : > { %v15005_v24 = vrot.slane %v4792_v22, %v11552_v11  ;;  %v15009_v0 = vcombine.high %v14994_v23, %v14994_v23  ;;  %v5163_v45 = vrot.slane %v14986_v62, %v11537_v5  ;;  %v9769_v59 = vrot.slane %v14994_v23, 9  ;;  %v11034_v62 = vld [vmem:[%s17141_s5 + $0x30] sm:$0xff]  }
 0x437   : > { %17910 = vst [vmem:[#allocation14_spill] sm:$0xff] %v14997_v54  ;;  %v4907_v30 = vrot.slane %v15001_v60, 7  ;;  %v17387_v61 = vrot.slane %v14997_v54, 7  ;;  %v10200_v14 = vpop.f32.mrf.mxu0  ;;  %v4657_v56 = vsel %vm618_vm0, 0.0, %v4641_v53  ;;  %v4665_v20 = vsel %vm618_vm0, %v4641_v53, 0.0 }
 0x438   : > { %17911 = vst [vmem:[#allocation27_spill] sm:$0xff] %v15005_v24  ;;  %v4894_v18 = vrot.slane %v15009_v0, 7  ;;  %v17388_v7 = vrot.slane %v15005_v24, 7  ;;  %v4690_v58 = vcombine.high %v4657_v56, %v4657_v56  ;;  %v15044_v39 = vrot.slane %v4657_v56, %v11552_v11 }
 0x439   : > { %v15025_v1 = vsel %vm12587_vm10, %v9770_v12, %v4907_v30  ;;  %v10202_v48 = vpop.f32.mrf.mxu0  ;;  %v15031_v38 = vrot.slane %v4907_v30, 2  ;;  %v15035_v31 = vrot.slane %v17387_v61, 2  ;;  %v15047_v10 = vrot.slane %v4665_v20, %v11552_v11 }
 0x43a   : > { %17912 = vst [vmem:[#allocation12_spill] sm:$0xff] %v15025_v1  ;;  %v15039_v8 = vsel %vm12587_vm10, %v9769_v59, %v4894_v18  ;;  %v15041_v35 = vrot.slane %v4894_v18, 2  ;;  %v4550_v46 = vmax.f32 %v4522_v16, 0.0  ;;  %v15051_v28 = vrot.slane %v17388_v7, 2  ;;  %v10630_v18 = vpop.f32.mrf.mxu1 }
 0x43b   : > { %17913 = vst [vmem:[#allocation28_spill] sm:$0xff] %v15031_v38  ;;  %17914 = vst [vmem:[#allocation15_spill] sm:$0xff] %v15035_v31  ;;  %v10203_v3 = vpop.f32.mrf.mxu0  ;;  %v15054_v4 = vrot.slane %v4690_v58, %v11552_v11  ;;  %v4535_v47 = vadd.f32 %v4534_v63, %v4470_v2  ;;  %v10201_v9 = vadd.f32 %v10200_v14, %v10199_v42 }
 0x43c   : > { %17915 = vst [vmem:[#allocation22_spill] sm:$0xff] %v15039_v8  ;;  %17916 = vst [vmem:[#allocation16_spill] sm:$0xff] %v15041_v35  ;;  %v15058_v26 = vcombine.high %v15044_v39, %v15044_v39  ;;  %v10198_v29 = vadd.f32 %v10197_v55, %v10196_v32  ;;  %v10204_v34 = vadd.f32 %v10203_v3, %v10202_v48  ;;  %v4639_v25 = vrot.slane %v4550_v46, 7 }
 0x43d   : > { %17917 = vst [vmem:[#allocation29_spill] sm:$0xff] %v15051_v28  ;;  %v15063_v43 = vcombine.high %v15054_v4, %v15054_v4  ;;  %v17392_v36 = vrot.slane %v15054_v4, 7  ;;  %v4553_v13 = vmax.f32 %v4535_v47, 0.0  ;;  %v4478_v22 = vadd.f32 %v10201_v9, %v14979_v57 }
 0x43e   : > { %v17393_v40 = vrot.slane %v15058_v26, 7  ;;  %v15073_v32 = vrot.slane %v15058_v26, %v11537_v5  ;;  %v4655_v53 = vsel %vm618_vm0, 0.0, %v4639_v25  ;;  %v4663_v16 = vsel %vm618_vm0, %v4639_v25, 0.0 }
 0x43f   : > { %v15081_v2 = vrot.slane %v17392_v36, 2  ;;  %v4673_v42 = vcombine.high %v4655_v53, %v4655_v53  ;;  %v15084_v12 = vrot.slane %v4655_v53, %v11552_v11  ;;  %v15087_v57 = vrot.slane %v4663_v16, %v11552_v11  ;;  %v4537_v53 = vpop.f32.mrf.mxu1 }
 0x440   : > { %v15091_v30 = vrot.slane %v17393_v40, 2  ;;  %v4642_v59 = vrot.slane %v4553_v13, 7  ;;  %v4543_v56 = vadd.f32 %v10629_v44, %v4478_v22  ;;  %v4473_v48 = vadd.f32 %v10198_v29, %v14977_v6 }
 0x441   : > { %v15095_v20 = vrot.slane %v4673_v42, %v11552_v11  ;;  %v15099_v63 = vcombine.high %v15084_v12, %v15084_v12  ;;  %v4481_v58 = vadd.f32 %v10204_v34, %v14981_v33  ;;  %v15308_v28 = vrot.slane %v15005_v24, %v11537_v5 }
 0x442   : > { %v4658_v47 = vsel %vm618_vm0, 0.0, %v4642_v59  ;;  %v4666_v9 = vsel %vm618_vm0, %v4642_v59, 0.0  ;;  %v4555_v41 = vmax.f32 %v4543_v56, 0.0  ;;  %v4538_v55 = vadd.f32 %v4537_v53, %v4473_v48 }
 0x443   : > { %v15109_v44 = vcombine.high %v15095_v20, %v15095_v20  ;;  %v17390_v25 = vrot.slane %v15099_v63, 7  ;;  %v17389_v13 = vrot.slane %v15095_v20, 7  ;;  %v4826_v29 = vcombine.high %v4658_v47, %v4658_v47 }
 0x444   : > { %v15118_v34 = vrot.slane %v4658_v47, %v11552_v11  ;;  %v15121_v22 = vrot.slane %v4666_v9, %v11552_v11  ;;  %v15129_v42 = vrot.slane %v15099_v63, %v11537_v5  ;;  %v15133_v59 = vrot.slane %v15095_v20, %v11537_v5 }
 0x445   : > { %v15125_v16 = vrot.slane %v17390_v25, 2  ;;  %v15137_v47 = vrot.slane %v17389_v13, 2  ;;  %v15141_v61 = vrot.slane %v4826_v29, %v11552_v11  ;;  %v4644_v6 = vrot.slane %v4555_v41, 7  ;;  %v11033_v41 = vld [vmem:[%s17141_s5 + $0x70] sm:$0xff]  }
 0x446   : > { %v15145_v49 = vcombine.high %v15118_v34, %v15118_v34  ;;  %v9771_v7 = vrot.slane %v15118_v34, 9  ;;  %v4546_v33 = vadd.f32 %v10630_v18, %v4481_v58  ;;  %v15153_v9 = vcombine.high %v14997_v54, %v14997_v54  ;;  %10215 = vmatprep.subr.bf16.mxu0 %v11033_v41 }
 0x447   : > { %17918 = vst [vmem:[#allocation18_spill] sm:$0xff] %v15141_v61  ;;  %v17391_v17 = vrot.slane %v15141_v61, 7  ;;  %v4660_v29 = vsel %vm618_vm0, 0.0, %v4644_v6  ;;  %v4554_v13 = vmax.f32 %v4538_v55, 0.0  ;;  %v15158_v25 = vrot.slane %v15001_v60, %v11537_v5  ;;  %10216 = vmatpush3.bf16.msra.mxu0 %v11034_v62  ;;  %v11041_v62 = vld [vmem:[%s17141_s5 + $0xf0] sm:$0xff]  }
 0x448   : > { %v4920_v56 = vrot.slane %v15145_v49, 7  ;;  %17919 = vst [vmem:[#allocation45_spill] sm:$0xff] %v15153_v9  ;;  %v4556_v46 = vmax.f32 %v4546_v33, 0.0  ;;  %v15170_v58 = vsel %vm618_vm0, %v4644_v6, 0.0  ;;  %v4843_v55 = vcombine.high %v4660_v29, %v4660_v29 }
 0x449   : > { %v15175_v60 = vrot.slane %v4660_v29, %v11552_v11  ;;  %v4643_v53 = vrot.slane %v4554_v13, 7  ;;  %v15179_v15 = vrot.slane %v17391_v17, 2  ;;  %v15186_v6 = vrot.slane %v14997_v54, %v11537_v5 }
 0x44a   : > { %v15165_v18 = vsel %vm12587_vm10, %v9771_v7, %v4920_v56  ;;  %v15172_v33 = vrot.slane %v4920_v56, 2  ;;  %v4645_v3 = vrot.slane %v4556_v46, 7  ;;  %v15182_v7 = vrot.slane %v4843_v55, %v11552_v11 }
 0x44b   : > { %17920 = vst [vmem:[#allocation13_spill] sm:$0xff] %v15165_v18  ;;  %17922 = vst [vmem:[#allocation19_spill] sm:$0xff] %v15175_v60  ;;  %v15190_v56 = vrot.slane %v15153_v9, %v11537_v5  ;;  %v4659_v29 = vsel %vm618_vm0, 0.0, %v4643_v53  ;;  %v4667_v46 = vsel %vm618_vm0, %v4643_v53, 0.0  ;;  %v5211_v41 = vsel %vm2154_vm1, %v15158_v25, %v5163_v45  ;;  %v11035_v45 = vld [vmem:[%s17141_s5 + $0x68] sm:$0xff]   ;;  %v11037_v53 = vld [vmem:[%s17141_s5 + $0xf8] sm:$0xff]  }
 0x44c   : > { %17921 = vst [vmem:[#allocation23_spill] sm:$0xff] %v15172_v33  ;;  %17923 = vst [vmem:[#allocation30_spill] sm:$0xff] %v15179_v15  ;;  %v4661_v13 = vsel %vm618_vm0, 0.0, %v4645_v3  ;;  %v4707_v55 = vcombine.high %v4659_v29, %v4659_v29  ;;  %v15201_v17 = vrot.slane %v4659_v29, %v11552_v11  ;;  %v15204_v48 = vrot.slane %v4667_v46, %v11552_v11 }
 0x44d   : > { %v4945_v36 = vcombine.high %v4661_v13, %v4661_v13  ;;  %v15210_v50 = vrot.slane %v4661_v13, %v11552_v11  ;;  %v4669_v14 = vsel %vm618_vm0, %v4645_v3, 0.0  ;;  %v5212_v13 = vsel %vm1080_vm2, %v15186_v6, %v5211_v41  ;;  %v11036_v41 = vld [vmem:[%s17141_s5 + $0x28] sm:$0xff]   ;;  %10217 = vmatprep.subr.bf16.mxu0 %v11035_v45  ;;  %10235 = vmatprep.subr.bf16.mxu1 %v11037_v53  ;;  %v11039_v53 = vld [vmem:[%s17141_s5 + $0x60] sm:$0xff]   ;;  %v11042_v45 = vld [vmem:[%s17141_s5 + $0xb0] sm:$0xff]  }
 0x44e   : > { %v15219_v29 = vrot.slane %v4707_v55, %v11552_v11  ;;  %v15223_v46 = vcombine.high %v15201_v17, %v15201_v17  ;;  %10236 = vmatpush3.bf16.msra.mxu1 %v11038_v51  ;;  %v15286_v31 = vrot.slane %v4669_v14, %v11552_v11  ;;  %10218 = vmatpush3.bf16.msra.mxu0 %v11036_v41  ;;  %v17927_v41 = vrot.slane %v15044_v39, 9 }
 0x44f   : > { %v15237_v37 = vrot.slane %v4945_v36, %v11552_v11  ;;  %v15241_v3 = vcombine.high %v15210_v50, %v15210_v50  ;;  %10237 = vmatprep.subr.bf16.mxu1 %v11041_v62  ;;  %v15300_v14 = vcombine.high %v15005_v24, %v15005_v24  ;;  %v15304_v62 = vrot.slane %v15009_v0, %v11537_v5  ;;  %v11045_v0 = vld [vmem:[%s17141_s5 + $0xe8] sm:$0xff]  }
 0x450   : > { %v15248_v19 = vcombine.high %v15219_v29, %v15219_v29  ;;  %v17397_v55 = vrot.slane %v15223_v46, 7  ;;  %v15259_v18 = vrot.slane %v15223_v46, %v11537_v5  ;;  %v15263_v15 = vrot.slane %v15219_v29, %v11537_v5  ;;  %10219 = vmatprep.subr.bf16.mxu0 %v11039_v53  ;;  %v11046_v24 = vld [vmem:[%s17141_s5 + $0xa8] sm:$0xff]   ;;  %v11049_v53 = vld [vmem:[%s17141_s5 + $0xe0] sm:$0xff]  }
 0x451   : > { %v15269_v36 = vcombine.high %v15237_v37, %v15237_v37  ;;  %v17925_v1 = vrot.slane %v15219_v29, 7  ;;  %v17928_v54 = vrot.slane %v15054_v4, 7 }
 0x452   : > { %17924 = vst [vmem:[#allocation20_spill] sm:$0xff] %v15263_v15  ;;  %v15279_v33 = vrot.slane %v17397_v55, 2  ;;  %v5213_v55 = vsel %vm2157_vm3, %v15190_v56, %v5212_v13  ;;  %v17926_v13 = vrot.slane %v15058_v26, 7  ;;  %v17929_v26 = vrot.slane %v15063_v43, 7  ;;  %10238 = vmatpush3.bf16.msra.mxu1 %v11042_v45 }
 0x453   : > { %v15283_v40 = vrot.slane %v17925_v1, 2  ;;  %v11040_v1 = vld [vmem:[%s17141_s5 + $0x20] sm:$0xff]   ;;  %5222 = vrot.lane.b32.xlu0 %v5213_v55, %s17904_s2  ;;  %v11043_v55 = vld [vmem:[%s17141_s5 + $0x58] sm:$0xff]   ;;  %v4768_v38 = vsel %vm12587_vm10, %v15091_v30, %v17928_v54  ;;  %v15340_v54 = vrot.slane %v15300_v14, %v11537_v5  ;;  %v17931_v30 = vrot.slane %v14994_v23, %v11537_v5  ;;  %10239 = vmatprep.subr.bf16.mxu1 %v11045_v0 }
 0x454   : > { %v4765_v51 = vsel %vm12587_vm10, %v17927_v41, %v17926_v13  ;;  %v4771_v13 = vsel %vm12587_vm10, %v15081_v2, %v17929_v26  ;;  %v17930_v41 = vmov %v17929_v26  ;;  %10220 = vmatpush3.bf16.msra.mxu0 %v11040_v1  ;;  %v15379_v0 = vrot.slane %v15145_v49, %v11537_v5  ;;  %v11050_v49 = vld [vmem:[%s17141_s5 + $0xa0] sm:$0xff]  }
 0x455   : > { %v4772_v8 = vrot.slane %v17930_v41, 2  ;;  %v5067_v35 = vrot.slane %v4765_v51, %v11537_v5  ;;  %v5208_v2 = vsel %vm2154_vm1, %v15304_v62, %v17931_v30  ;;  %v5071_v51 = vrot.slane %v4768_v38, %v11537_v5  ;;  %v11044_v38 = vld [vmem:[%s17141_s5 + $0x18] sm:$0xff]   ;;  %10221 = vmatprep.subr.bf16.mxu0 %v11043_v55 }
 0x456   : > { %v5209_v45 = vsel %vm1080_vm2, %v15308_v28, %v5208_v2  ;;  %v17932_v41 = vrot.slane %v15047_v10, 7  ;;  %v5075_v15 = vrot.slane %v4771_v13, %v11537_v5  ;;  %v15361_v30 = vcombine.high %v15141_v61, %v15141_v61  ;;  %v11047_v13 = vld [vmem:[%s17141_s5 + $0x50] sm:$0xff]   ;;  %10240 = vmatpush3.bf16.msra.mxu1 %v11046_v24 }
 0x457   : > { %v5210_v2 = vsel %vm2157_vm3, %v15340_v54, %v5209_v45  ;;  %v15383_v45 = vrot.slane %v15141_v61, %v11537_v5  ;;  %10241 = vmatprep.subr.bf16.mxu1 %v11049_v53  ;;  %v17934_v24 = vrot.slane %v15153_v9, 7  ;;  %v15416_v53 = vrot.slane %v15182_v7, %v11537_v5 }
 0x458   : > { %v4774_v23 = vsel %vm12587_vm10, %v4772_v8, %v17932_v41  ;;  %17933 = vst [vmem:[#allocation17_spill] sm:$0xff] %v15361_v30  ;;  %v5100_v8 = vsel %vm2154_vm1, %v5071_v51, %v5067_v35  ;;  %5220 = vrot.lane.b32.xlu1 %v5210_v2, %s17904_s2  ;;  %v17401_v41 = vrot.slane %v15361_v30, 7  ;;  %v15388_v55 = vrot.slane %v15361_v30, %v11537_v5 }
 0x459   : > { %v5079_v26 = vrot.slane %v4774_v23, %v11537_v5  ;;  %v5101_v1 = vsel %vm1080_vm2, %v5075_v15, %v5100_v8  ;;  %v15392_v15 = vcombine.high %v15175_v60, %v15175_v60  ;;  %v15396_v51 = vcombine.high %v15182_v7, %v15182_v7  ;;  %10222 = vmatpush3.bf16.msra.mxu0 %v11044_v38 }
 0x45a   : > { %v17936_v23 = vrot.slane %v15300_v14, 7  ;;  %v17938_v8 = vrot.slane %v15118_v34, %v11537_v5  ;;  %v15426_v61 = vrot.slane %v17401_v41, 2  ;;  %10223 = vmatprep.subr.bf16.mxu0 %v11047_v13  ;;  %v17942_v13 = vrot.slane %v15095_v20, 7  ;;  %10242 = vmatpush3.bf16.msra.mxu1 %v11050_v49  ;;  %v11054_v20 = vld [vmem:[%s17141_s5 + $0x98] sm:$0xff]  }
 0x45b   : > { %v5102_v35 = vsel %vm2157_vm3, %v5079_v26, %v5101_v1  ;;  %v15403_v26 = vrot.slane %v17934_v24, 2  ;;  %v11048_v24 = vld [vmem:[%s17141_s5 + $0x10] sm:$0xff]   ;;  %v15434_v38 = vrot.slane %v15392_v15, %v11537_v5  ;;  %v17946_v41 = vrot.slane %v15201_v17, 9 }
 0x45c   : > { %v15407_v2 = vrot.slane %v17936_v23, 2  ;;  %v5214_v1 = vsel %vm2154_vm1, %v15379_v0, %v17938_v8  ;;  %v11053_v23 = vld [vmem:[%s17141_s5 + $0xd8] sm:$0xff]   ;;  %17939 = vst [vmem:[#allocation21_spill] sm:$0xff] %v15426_v61  ;;  %v5195_v8 = vrot.slane %v15175_v60, %v11537_v5  ;;  %5110 = vrot.lane.b32.xlu1 %v5102_v35, %s17904_s2  ;;  %v15443_v61 = vrot.slane %v15396_v51, %v11537_v5 }
 0x45d   : > { %17935 = vst [vmem:[#allocation31_spill] sm:$0xff] %v15403_v26  ;;  %v5215_v34 = vsel %vm1080_vm2, %v15383_v45, %v5214_v1  ;;  %v11051_v26 = vld [vmem:[%s17141_s5 + $0x48] sm:$0xff]   ;;  %v17940_v1 = vrot.slane %v15099_v63, 7  ;;  %v17941_v60 = vrot.slane %v15084_v12, 9  ;;  %v4755_v9 = vsel %vm12587_vm10, %v15125_v16, %v17942_v13  ;;  %10224 = vmatpush3.bf16.msra.mxu0 %v11048_v24  ;;  %10243 = vmatprep.subr.bf16.mxu1 %v11053_v23  ;;  %v11055_v23 = vld [vmem:[%s17141_s5 + $0x40] sm:$0xff]  }
 0x45e   : > { %17937 = vst [vmem:[#allocation25_spill] sm:$0xff] %v15407_v2  ;;  %v5216_v35 = vsel %vm2157_vm3, %v15388_v55, %v5215_v34  ;;  %v5217_v2 = vsel %vm2154_vm1, %v15434_v38, %v5195_v8  ;;  %v17943_v63 = vrot.slane %v15109_v44, 7  ;;  %v5055_v8 = vrot.slane %v4755_v9, %v11537_v5  ;;  %10225 = vmatprep.subr.bf16.mxu0 %v11051_v26 }
 0x45f   : > { %v4752_v30 = vsel %vm12587_vm10, %v17941_v60, %v17940_v1  ;;  %v5218_v16 = vsel %vm1080_vm2, %v15416_v53, %v5217_v2  ;;  %v17945_v2 = vrot.slane %v15223_v46, 7  ;;  %v17947_v9 = vrot.slane %v15219_v29, 7  ;;  %10244 = vmatpush3.bf16.msra.mxu1 %v11054_v20 }
 0x460   : > { %v4758_v60 = vsel %vm12587_vm10, %v15137_v47, %v17943_v63  ;;  %v17944_v34 = vmov %v17943_v63  ;;  %v5051_v13 = vrot.slane %v4752_v30, %v11537_v5  ;;  %v11052_v47 = vld [vmem:[%s17141_s5 + $0x8] sm:$0xff]   ;;  %v5219_v49 = vsel %vm2157_vm3, %v15443_v61, %v5218_v16  ;;  %5224 = vrot.lane.b32.xlu1 %v5216_v35, %s17904_s2  ;;  %v11057_v35 = vld [vmem:[%s17141_s5 + $0xd0] sm:$0xff]  }
 0x461   : > { %v4759_v1 = vrot.slane %v17944_v34, 2  ;;  %v5059_v63 = vrot.slane %v4758_v60, %v11537_v5  ;;  %v4778_v30 = vsel %vm12587_vm10, %v17946_v41, %v17945_v2  ;;  %v4781_v24 = vsel %vm12587_vm10, %v15279_v33, %v17947_v9  ;;  %5226 = vrot.lane.b32.xlu0 %v5219_v49, %s17904_s2  ;;  %10226 = vmatpush3.bf16.msra.mxu0 %v11052_v47 }
 0x462   : > { %v17948_v46 = vrot.slane %v15087_v57, 7  ;;  %v5097_v29 = vsel %vm2154_vm1, %v5055_v8, %v5051_v13  ;;  %v17949_v60 = vrot.slane %v15248_v19, 7  ;;  %v5087_v13 = vrot.slane %v4781_v24, %v11537_v5  ;;  %10245 = vmatprep.subr.bf16.mxu1 %v11057_v35  ;;  %10227 = vmatprep.subr.bf16.mxu0 %v11055_v23 }
 0x463   : > { %v5098_v49 = vsel %vm1080_vm2, %v5059_v63, %v5097_v29  ;;  %v17951_v8 = vrot.slane %v15204_v48, 7  ;;  %v17953_v63 = vrot.slane %v15210_v50, 9  ;;  %v17958_v23 = vrot.slane %v15396_v51, 7 }
 0x464   : > { %v4761_v41 = vsel %vm12587_vm10, %v4759_v1, %v17948_v46  ;;  %v4784_v33 = vsel %vm12587_vm10, %v15283_v40, %v17949_v60  ;;  %v17950_v26 = vmov %v17949_v60  ;;  %v5083_v1 = vrot.slane %v4778_v30, %v11537_v5  ;;  %v11058_v40 = vld [vmem:[%s17141_s5 + $0x90] sm:$0xff]  }
 0x465   : > { %v4785_v16 = vrot.slane %v17950_v26, 2  ;;  %v5063_v34 = vrot.slane %v4761_v41, %v11537_v5  ;;  %v5091_v9 = vrot.slane %v4784_v33, %v11537_v5  ;;  %v17952_v46 = vrot.slane %v15241_v3, 7  ;;  %v11056_v41 = vld [vmem:[%s17141_s5] sm:$0xff]   ;;  %10246 = vmatpush3.bf16.msra.mxu1 %v11058_v40 }
 0x466   : > { %v5103_v33 = vsel %vm2154_vm1, %v5087_v13, %v5083_v1  ;;  %v17955_v26 = vrot.slane %v15237_v37, 7  ;;  %v11060_v1 = vld [vmem:[%s17141_s5 + $0xc8] sm:$0xff]   ;;  %v15556_v13 = vrot.slane %v17958_v23, 2  ;;  %10228 = vmatpush3.bf16.msra.mxu0 %v11056_v41  ;;  %v5331_v40 = vsel %vm2154_vm1, %v15186_v6, %v15158_v25 }
 0x467   : > { %v4787_v2 = vsel %vm12587_vm10, %v4785_v16, %v17951_v8  ;;  %v4973_v30 = vsel %vm12587_vm10, %v17953_v63, %v17952_v46  ;;  %v17954_v20 = vmov %v17952_v46  ;;  %v5099_v29 = vsel %vm2157_vm3, %v5063_v34, %v5098_v49  ;;  %10247 = vmatprep.subr.bf16.mxu1 %v11060_v1 }
 0x468   : > { %v4974_v24 = vrot.slane %v17954_v20, 2  ;;  %v5095_v60 = vrot.slane %v4787_v2, %v11537_v5  ;;  %v4977_v16 = vrot.slane %v17955_v26, 2  ;;  %v17956_v8 = vrot.slane %v15392_v15, 7  ;;  %5108 = vrot.lane.b32.xlu0 %v5099_v29, %s17904_s2  ;;  %v11061_v20 = vld [vmem:[%s17141_s5 + $0x88] sm:$0xff]  }
 0x469   : > { %v5104_v47 = vsel %vm1080_vm2, %v5091_v9, %v5103_v33  ;;  %v17957_v35 = vmov %v17955_v26  ;;  %v4978_v49 = vrot.slane %v15269_v36, 7  ;;  %v5375_v2 = vrot.slane %v4973_v30, %v11537_v5  ;;  %10248 = vmatpush3.bf16.msra.mxu1 %v11061_v20 }
 0x46a   : > { %v15542_v46 = vrot.slane %v17956_v8, 2  ;;  %v4976_v34 = vsel %vm12587_vm10, %v4974_v24, %v17957_v35  ;;  %v5328_v9 = vsel %vm2154_vm1, %v15308_v28, %v15304_v62  ;;  %v5105_v24 = vsel %vm2157_vm3, %v5095_v60, %v5104_v47 }
 0x46b   : > { %v5379_v63 = vrot.slane %v4976_v34, %v11537_v5  ;;  %v4979_v29 = vsel %vm12587_vm10, %v4977_v16, %v4978_v49  ;;  %v4980_v33 = vrot.slane %v4978_v49, 2  ;;  %v5329_v30 = vsel %vm1080_vm2, %v15340_v54, %v5328_v9 }
 0x46c   : > { %v5383_v26 = vrot.slane %v4979_v29, %v11537_v5  ;;  %v5315_v62 = vrot.slane %v15012_v27, %v11537_v5  ;;  %v17959_v60 = vmov 0.0   ;;  %5112 = vrot.lane.b32.xlu0 %v5105_v24, %s17904_s2  ;;  %v17960_v16 = vrot.slane %v15286_v31, 7 }
 0x46d   : > { %v5388_v28 = vsel %vm2154_vm1, %v5379_v63, %v5375_v2  ;;  %10631 = vmatprep.subr.bf16.mxu0 %v17959_v60  ;;  %v5319_v41 = vrot.slane %v14989_v52, %v11537_v5  ;;  %v5332_v8 = vsel %vm1080_vm2, %v15190_v56, %v5331_v40  ;;  %v5334_v47 = vsel %vm2154_vm1, %v15383_v45, %v15379_v0  ;;  %v11063_v45 = vld [vmem:[%s17141_s5 + $0xc0] sm:$0xff]  }
 0x46e   : > { %v4982_v54 = vsel %vm12587_vm10, %v4980_v33, %v17960_v16  ;;  %v5389_v6 = vsel %vm1080_vm2, %v5383_v26, %v5388_v28  ;;  %v5330_v35 = vsel %vm2157_vm3, %v5315_v62, %v5329_v30  ;;  %v5335_v34 = vsel %vm1080_vm2, %v15388_v55, %v5334_v47  ;;  %v11064_v55 = vld [vmem:[%s17141_s5 + $0x80] sm:$0xff]   ;;  %10249 = vmatprep.subr.bf16.mxu1 %v11063_v45  ;;  %v17963_v62 = vld [vmem:[#allocation20_spill] sm:$0xff] }
 0x46f   : > { %v5387_v25 = vrot.slane %v4982_v54, %v11537_v5  ;;  %v5333_v49 = vsel %vm2157_vm3, %v5319_v41, %v5332_v8  ;;  %v5323_v1 = vrot.slane %v15121_v22, %v11537_v5  ;;  %v15601_v56 = vrot.slane %v15170_v58, %v11552_v11  ;;  %10250 = vmatpush3.bf16.msra.mxu1 %v11064_v55  ;;  %v17969_v45 = vld [vmem:[#allocation27_spill] sm:$0xff] }
 0x470   : > { %v5337_v0 = vsel %vm2154_vm1, %v15416_v53, %v15434_v38  ;;  %v4998_v58 = vrot.slane %v15109_v44, %v11537_v5  ;;  %v5131_v53 = vsel %vm2154_vm1, %v15133_v59, %v15129_v42  ;;  %5340 = vrot.lane.b32.xlu0 %v5330_v35, %s17904_s2  ;;  %v5014_v20 = vrot.slane %v15063_v43, %v11537_v5 }
 0x471   : > { %v5390_v23 = vsel %vm2157_vm3, %v5387_v25, %v5389_v6  ;;  %v5338_v2 = vsel %vm1080_vm2, %v15443_v61, %v5337_v0  ;;  %v5336_v38 = vsel %vm2157_vm3, %v5323_v1, %v5335_v34  ;;  %v4942_v63 = vrot.slane %v15601_v56, 7 }
 0x472   : > { %5391 = vrot.lane.b32.xlu1 %v5390_v23, %s17904_s2  ;;  %v5327_v9 = vrot.slane %v15601_v56, %v11537_v5  ;;  %v5010_v61 = vrot.slane %v15054_v4, %v11537_v5  ;;  %v5132_v44 = vsel %vm1080_vm2, %v4998_v58, %v5131_v53  ;;  %v17961_v24 = vrot.slane %v15044_v39, %v11537_v5 }
 0x473   : > { %v5030_v33 = vrot.slane %v15248_v19, %v11537_v5  ;;  %v17962_v4 = vrot.slane %v15087_v57, %v11537_v5  ;;  %v5137_v40 = vsel %vm2154_vm1, %v17963_v62, %v15259_v18  ;;  %v5359_v57 = vrot.slane %v15241_v3, %v11537_v5 }
 0x474   : > { %v5034_v29 = vsel %vm2154_vm1, %v15073_v32, %v17961_v24  ;;  %v5339_v30 = vsel %vm2157_vm3, %v5327_v9, %v5338_v2  ;;  %v5134_v39 = vsel %vm2154_vm1, %v5010_v61, %v15073_v32  ;;  %5344 = vrot.lane.b32.xlu0 %v5336_v38, %s17904_s2  ;;  %v17964_v32 = vrot.slane %v15047_v10, %v11537_v5  ;;  %v17972_v38 = vld [vmem:[#allocation22_spill] sm:$0xff] }
 0x475   : > { %v15643_v26 = vsel %vm2157_vm3, %v17962_v4, %v5132_v44  ;;  %v5035_v43 = vsel %vm1080_vm2, %v5010_v61, %v5034_v29  ;;  %v5135_v19 = vsel %vm1080_vm2, %v5014_v20, %v5134_v39  ;;  %v5138_v54 = vsel %vm1080_vm2, %v5030_v33, %v5137_v40  ;;  %v17977_v4 = vld [vmem:[#allocation14_spill] sm:$0xff]  ;;  %v17979_v39 = vld [vmem:[#allocation28_spill] sm:$0xff] }
 0x476   : > { %v15649_v28 = vsel %vm2157_vm3, %v5014_v20, %v5035_v43  ;;  %5342 = vrot.lane.b32.xlu1 %v5333_v49, %s17904_s2  ;;  %v15663_v16 = vsel %vm2157_vm3, %v17964_v32, %v5135_v19  ;;  %v5363_v41 = vrot.slane %v15237_v37, %v11537_v5  ;;  %v17965_v8 = vrot.slane %v15182_v7, 7  ;;  %v17974_v20 = vld [vmem:[#allocation29_spill] sm:$0xff] }
 0x477   : > { %v5439_v3 = vcombine.low %v15643_v26, %v15663_v16  ;;  %v17966_v25 = vrot.slane %v15204_v48, %v11537_v5  ;;  %v5367_v10 = vrot.slane %v15269_v36, %v11537_v5  ;;  %v5397_v35 = vrot.slane %v15286_v31, %v11537_v5  ;;  %v17980_v32 = vld [vmem:[#allocation45_spill] sm:$0xff] }
 0x478   : > { %v4938_v47 = vrot.slane %v17965_v8, 2  ;;  %v5398_v37 = vsel %vm2154_vm1, %v5363_v41, %v5359_v57  ;;  %v17967_v34 = vrot.slane %v15084_v12, %v11537_v5  ;;  %v17968_v48 = vrot.slane %v15201_v17, %v11537_v5 }
 0x479   : > { %v15676_v6 = vsel %vm2157_vm3, %v17966_v25, %v5138_v54  ;;  %v5355_v36 = vrot.slane %v15210_v50, %v11537_v5  ;;  %v5399_v0 = vsel %vm1080_vm2, %v5367_v10, %v5398_v37  ;;  %v17970_v55 = vrot.slane %v17969_v45, 7  ;;  %v17982_v54 = vld [vmem:[#allocation15_spill] sm:$0xff]  ;;  %v17989_v45 = vld [vmem:[#allocation17_spill] sm:$0xff] }
 0x47a   : > { %v5031_v49 = vsel %vm2154_vm1, %v15129_v42, %v17967_v34  ;;  %v5037_v1 = vsel %vm2154_vm1, %v15259_v18, %v17968_v48  ;;  %v17971_v42 = vld [vmem:[#allocation16_spill] sm:$0xff]  ;;  %5346 = vrot.lane.b32.xlu1 %v5339_v30, %s17904_s2  ;;  %v5400_v18 = vsel %vm2157_vm3, %v5397_v35, %v5399_v0  ;;  %v5235_v9 = vrot.slane %v17972_v38, %v11537_v5  ;;  %v17984_v25 = vld [vmem:[#allocation31_spill] sm:$0xff]  ;;  %v17994_v38 = vld [vmem:[#allocation13_spill] sm:$0xff] }
 0x47b   : > { %v5032_v31 = vsel %vm1080_vm2, %v15133_v59, %v5031_v49  ;;  %v5038_v12 = vsel %vm1080_vm2, %v17963_v62, %v5037_v1  ;;  %v4898_v17 = vsel %vm12587_vm10, %v17971_v42, %v17970_v55  ;;  %v5368_v59 = vsel %vm2154_vm1, %v5359_v57, %v5355_v36  ;;  %v17986_v1 = vld [vmem:[#allocation18_spill] sm:$0xff]  ;;  %v17988_v0 = vld [vmem:[#allocation23_spill] sm:$0xff] }
 0x47c   : > { %v15708_v50 = vsel %vm2157_vm3, %v4998_v58, %v5032_v31  ;;  %v15711_v23 = vsel %vm2157_vm3, %v5030_v33, %v5038_v12  ;;  %v5444_v2 = vcombine.low %v15676_v6, %v5400_v18  ;;  %v5369_v53 = vsel %vm1080_vm2, %v5363_v41, %v5368_v59  ;;  %v17976_v33 = vld [vmem:[#allocation25_spill] sm:$0xff]  ;;  %v17991_v42 = vld [vmem:[#allocation30_spill] sm:$0xff] }
 0x47d   : > { %v5239_v61 = vrot.slane %v4898_v17, %v11537_v5  ;;  %v15720_v44 = vsel %vm2157_vm3, %v5367_v10, %v5369_v53  ;;  %v17973_v58 = vrot.slane %v15300_v14, 7  ;;  %v17975_v29 = vrot.slane %v15012_v27, 7  ;;  %v17993_v59 = vld [vmem:[#allocation21_spill] sm:$0xff] }
 0x47e   : > { %v17978_v43 = vrot.slane %v17977_v4, 7  ;;  %v15737_v62 = vpack.c.bf16 %v5444_v2, %v5439_v3  ;;  %v17981_v27 = vrot.slane %v17980_v32, 7  ;;  %v17983_v8 = vrot.slane %v14989_v52, 7  ;;  %v17985_v3 = vld [vmem:[#allocation12_spill] sm:$0xff] }
 0x47f   : > { %v4901_v24 = vsel %vm12587_vm10, %v17974_v20, %v17973_v58  ;;  %v4904_v30 = vsel %vm12587_vm10, %v17976_v33, %v17975_v29  ;;  %v5296_v14 = vsel %vm2154_vm1, %v5239_v61, %v5235_v9  ;;  %v5251_v35 = vrot.slane %v17985_v3, %v11537_v5 }
 0x480   : > { %v4911_v19 = vsel %vm12587_vm10, %v17979_v39, %v17978_v43  ;;  %v5243_v40 = vrot.slane %v4901_v24, %v11537_v5  ;;  %v5247_v57 = vrot.slane %v4904_v30, %v11537_v5  ;;  %v4914_v41 = vsel %vm12587_vm10, %v17982_v54, %v17981_v27  ;;  %v5107_v54 = vpop.permute.xlu1 %5106 }
 0x481   : > { %v4917_v10 = vsel %vm12587_vm10, %v17984_v25, %v17983_v8  ;;  %v5255_v37 = vrot.slane %v4911_v19, %v11537_v5  ;;  %v5259_v49 = vrot.slane %v4914_v41, %v11537_v5  ;;  %v17987_v36 = vrot.slane %v17986_v1, 7  ;;  %v18000_v41 = vld [vmem:[#allocation130_spill] sm:$0xff]  ;;  %v18001_v8 = vld [vmem:[#allocation129_spill] sm:$0xff] }
 0x482   : > { %v5297_v34 = vsel %vm1080_vm2, %v5243_v40, %v5296_v14  ;;  %v5263_v48 = vrot.slane %v4917_v10, %v11537_v5  ;;  %v17990_v55 = vrot.slane %v17989_v45, 7  ;;  %v17992_v18 = vrot.slane %v15121_v22, 7  ;;  %v17996_v22 = vld [vmem:[#allocation19_spill] sm:$0xff] }
 0x483   : > { %v4924_v52 = vsel %vm12587_vm10, %v17988_v0, %v17987_v36  ;;  %v5298_v31 = vsel %vm2157_vm3, %v5247_v57, %v5297_v34  ;;  %v5299_v12 = vsel %vm2154_vm1, %v5255_v37, %v5251_v35  ;;  %v5267_v9 = vrot.slane %v17994_v38, %v11537_v5 }
 0x484   : > { %v4927_v17 = vsel %vm12587_vm10, %v17991_v42, %v17990_v55  ;;  %v4930_v2 = vsel %vm12587_vm10, %v17993_v59, %v17992_v18  ;;  %v5300_v53 = vsel %vm1080_vm2, %v5259_v49, %v5299_v12  ;;  %v5271_v61 = vrot.slane %v4924_v52, %v11537_v5  ;;  %v18002_v42 = vld [vmem:[#allocation11_spill] sm:$0xff]  ;;  %v11059_v59 = vld [vmem:[%s17141_s5 + $0x118] sm:$0xff]  }
 0x485   : > { %v5275_v58 = vrot.slane %v4927_v17, %v11537_v5  ;;  %v5301_v20 = vsel %vm2157_vm3, %v5263_v48, %v5300_v53  ;;  %v5279_v24 = vrot.slane %v4930_v2, %v11537_v5  ;;  %v17995_v29 = vrot.slane %v15392_v15, 7 }
 0x486   : > { %v17997_v33 = vrot.slane %v17996_v22, 9  ;;  %v17998_v4 = vrot.slane %v15182_v7, 7  ;;  %v5302_v39 = vsel %vm2154_vm1, %v5271_v61, %v5267_v9  ;;  %v17999_v19 = vrot.slane %v15396_v51, 7  ;;  %v11065_v22 = vld [vmem:[%s17141_s5 + $0x108] sm:$0xff]  }
 0x487   : > { %v4943_v15 = vsel %vm12587_vm10, %v15556_v13, %v4942_v63  ;;  %v5303_v7 = vsel %vm1080_vm2, %v5275_v58, %v5302_v39  ;;  %v5130_v25 = vsel %vm2157_vm3, %v18001_v8, %v18000_v41  ;;  %v5401_v17 = vsel %vm4077_vm12, %v18002_v42, %v5107_v54  ;;  %v18003_v39 = vld [vmem:[#allocation8_spill] sm:$0xff]  ;;  %v9782_v8 = vld [vmem:[%s17142_s6] ss:$0 sm:$0xff] }
 0x488   : > { %v4934_v30 = vsel %vm12587_vm10, %v17997_v33, %v17995_v29  ;;  %v4937_v43 = vsel %vm12587_vm10, %v15542_v46, %v17998_v4  ;;  %v4940_v14 = vsel %vm12587_vm10, %v4938_v47, %v17999_v19  ;;  %v5295_v32 = vrot.slane %v4943_v15, %v11537_v5  ;;  %v11067_v15 = vld [vmem:[%s17143_s7 + $0x78] sm:$0xff]  }
 0x489   : > { %v5283_v40 = vrot.slane %v4934_v30, %v11537_v5  ;;  %v5287_v57 = vrot.slane %v4937_v43, %v11537_v5  ;;  %v5291_v46 = vrot.slane %v4940_v14, %v11537_v5  ;;  %v5304_v51 = vsel %vm2157_vm3, %v5279_v24, %v5303_v7  ;;  %v11072_v7 = vld [vmem:[%s17143_s7 + $0xf8] sm:$0xff]  }
 0x48a   : > { %v15857_v19 = vsel %vm3721_vm4, %v18003_v39, 0.0  ;;  %10284 = vmatprep.subr.bf16.mxu1 %v11072_v7 }
 0x48b   : > { %v5305_v47 = vsel %vm2154_vm1, %v5287_v57, %v5283_v40  ;;  %v5908_v14 = vrot.slane %v15857_v19, 1  ;;  %v11068_v40 = vld [vmem:[%s17143_s7 + $0x38] sm:$0xff]  }
 0x48c   : > { %v5306_v56 = vsel %vm1080_vm2, %v5291_v46, %v5305_v47  ;;  %vm11393_vm2 = vmmov 0   ;;  %v11074_v57 = vld [vmem:[%s17143_s7 + $0xb8] sm:$0xff]   ;;  %v11070_v46 = vld [vmem:[%s17143_s7 + $0x30] sm:$0xff]   ;;  %v11073_v47 = vld [vmem:[%s17143_s7 + $0x28] sm:$0xff]  }
 0x48d   : > { %v5307_v27 = vsel %vm2157_vm3, %v5295_v32, %v5306_v56  ;;  %5912 = vrot.lane.b32.xlu0 %v5908_v14, %s17904_s2  ;;  %v11077_v32 = vld [vmem:[%s17143_s7 + $0xf0] sm:$0xff]   ;;  %v11075_v56 = vld [vmem:[%s17143_s7 + $0x60] sm:$0xff]  }
 0x4c5   : > { %v5223_v63 = vpop.permute.xlu0 %5222 }
 0x4c6   : > { %v5406_v3 = vsel %vm4077_vm12, %v15643_v26, %v5223_v63 }
 0x4ca   : > { %v5221_v13 = vpop.permute.xlu1 %5220 }
 0x4cb   : > { %v5405_v35 = vsel %vm4077_vm12, %v5130_v25, %v5221_v13 }
 0x4cc   : > { %v9775_v1 = vcombine.low %v5405_v35, %v5406_v3  ;;  %v11078_v35 = vld [vmem:[%s17143_s7 + $0xb0] sm:$0xff]  }
 0x4ce   : > { %v5111_v10 = vpop.permute.xlu1 %5110 }
 0x4cf   : > { %v5403_v12 = vsel %vm4077_vm12, %v15649_v28, %v5111_v10 }
 0x4d2   : > { %v5225_v37 = vpop.permute.xlu1 %5224 }
 0x4d3   : > { %v5227_v34 = vpop.permute.xlu0 %5226  ;;  %v5407_v49 = vsel %vm4077_vm12, %v15663_v16, %v5225_v37 }
 0x4d4   : > { %v5408_v48 = vsel %vm4077_vm12, %v15676_v6, %v5227_v34 }
 0x4d5   : > { %v9779_v36 = vcombine.low %v5407_v49, %v5408_v48 }
 0x4d7   : > { %v5456_v52 = vpack.c.bf16 %v9779_v36, %v9775_v1 }
 0x4d9   : > { %5717 = vmatprep.mubr.bf16.mxu0 %v5456_v52  ;;  %v11080_v52 = vld [vmem:[%s17143_s7 + $0x18] sm:$0xff]  }
 0x4da   : > { %v5109_v0 = vpop.permute.xlu0 %5108 }
 0x4db   : > { %v5402_v26 = vsel %vm4077_vm12, %v15708_v50, %v5109_v0  ;;  %v11079_v0 = vld [vmem:[%s17143_s7 + $0x58] sm:$0xff]  }
 0x4dc   : > { %v9777_v45 = vcombine.low %v5402_v26, %v5403_v12  ;;  %v9774_v6 = vcombine.low %v5401_v17, %v5402_v26 }
 0x4de   : > { %v5113_v55 = vpop.permute.xlu0 %5112 }
 0x4df   : > { %v5404_v16 = vsel %vm4077_vm12, %v15711_v23, %v5113_v55  ;;  %v11062_v23 = vld [vmem:[%s17141_s5 + $0x110] sm:$0xff]   ;;  %v11082_v55 = vld [vmem:[%s17143_s7 + $0xa8] sm:$0xff]  }
 0x4e0   : > { %v9778_v18 = vcombine.low %v5403_v12, %v5404_v16  ;;  %v11081_v12 = vld [vmem:[%s17143_s7 + $0xe8] sm:$0xff]  }
 0x4e2   : > { %v5455_v2 = vpack.c.bf16 %v9778_v18, %v9774_v6  ;;  %v5341_v53 = vpop.permute.xlu0 %5340 }
 0x4e3   : > { %v5409_v9 = vsel %vm4077_vm12, %v5298_v31, %v5341_v53  ;;  %v11085_v53 = vld [vmem:[%s17143_s7 + $0xe0] sm:$0xff]  }
 0x4e4   : > { %v5392_v28 = vpop.permute.xlu1 %5391  ;;  %5718 = vmatmul.mubr.bf16.vlgmr.msra.gmra.mxu0 %v5455_v2  ;;  %v11083_v2 = vld [vmem:[%s17143_s7 + $0x50] sm:$0xff]  }
 0x4e5   : > { %v5413_v50 = vsel %vm4077_vm12, %v15720_v44, %v5392_v28  ;;  %10632 = vmatpush3.bf16.msra.mxu0 %v11059_v59  ;;  %10639 = vmatprep.mubr.msk.bf16.mxu0 %vm11393_vm2, %v17959_v60  ;;  %v11084_v28 = vld [vmem:[%s17143_s7 + $0x10] sm:$0xff]  }
 0x4e6   : > { %v9781_v38 = vcombine.low %v5404_v16, %v5413_v50  ;;  %v5345_v24 = vpop.permute.xlu0 %5344  ;;  %10633 = vmatprep.subr.bf16.mxu0 %v17959_v60 }
 0x4e7   : > { %v5411_v31 = vsel %vm4077_vm12, %v5304_v51, %v5345_v24  ;;  %v11071_v51 = vld [vmem:[%s17143_s7 + $0x68] sm:$0xff]  }
 0x4e8   : > { %v5343_v61 = vpop.permute.xlu1 %5342  ;;  %v5458_v58 = vpack.c.bf16 %v9781_v38, %v9777_v45  ;;  %v11086_v38 = vld [vmem:[%s17143_s7 + $0xa0] sm:$0xff]  }
 0x4e9   : > { %v5410_v44 = vsel %vm4077_vm12, %v5301_v20, %v5343_v61  ;;  %10634 = vmatpush3.bf16.msra.mxu0 %v11062_v23  ;;  %v11066_v20 = vld [vmem:[%s17141_s5 + $0x100] sm:$0xff]  }
 0x4ea   : > { %v9776_v29 = vcombine.low %v5409_v9, %v5410_v44  ;;  %5758 = vmatprep.mubr.bf16.mxu1 %v5458_v58  ;;  %10635 = vmatprep.subr.bf16.mxu0 %v17959_v60 }
 0x4ec   : > { %v5347_v33 = vpop.permute.xlu1 %5346 }
 0x4ed   : > { %v5412_v30 = vsel %vm4077_vm12, %v5307_v27, %v5347_v33  ;;  %10636 = vmatpush3.bf16.msra.mxu0 %v11065_v22  ;;  %v11076_v27 = vld [vmem:[%s17143_s7 + $0x20] sm:$0xff]   ;;  %v11089_v22 = vld [vmem:[%s17143_s7 + $0xd8] sm:$0xff]  }
 0x4ee   : > { %v9780_v4 = vcombine.low %v5411_v31, %v5412_v30  ;;  %10637 = vmatprep.subr.bf16.mxu0 %v17959_v60  ;;  %v11088_v31 = vld [vmem:[%s17143_s7 + $0x8] sm:$0xff]   ;;  %v11090_v30 = vld [vmem:[%s17143_s7 + $0x98] sm:$0xff]  }
 0x4f0   : > { %v5457_v43 = vpack.c.bf16 %v9780_v4, %v9776_v29  ;;  %v11087_v29 = vld [vmem:[%s17143_s7 + $0x48] sm:$0xff]  }
 0x4f1   : > { %10638 = vmatpush3.bf16.msra.mxu0 %v11066_v20 }
 0x4f2   : > { %5759 = vmatmul.mubr.bf16.vlgmr.msra.gmra.mxu1 %v5457_v43  ;;  %10262 = vmatprep.subr.bf16.mxu0 %v11067_v15 }
 0x4f3   : > { %10285 = vmatpush3.bf16.msra.mxu1 %v11074_v57  ;;  %v11091_v57 = vld [vmem:[%s17143_s7 + $0x40] sm:$0xff]  }
 0x4f4   : > { %10640 = vmatmul.mubr.msk.bf16.vlgmr.msra.gmra.mxu0 %vm4077_vm12, %v15737_v62  ;;  %v11069_v62 = vld [vmem:[%s17143_s7 + $0x70] sm:$0xff]   ;;  %10286 = vmatprep.subr.bf16.mxu1 %v11077_v32 }
 0x4f5   : > { %10263 = vmatpush3.bf16.msra.mxu0 %v11068_v40  ;;  %v11093_v32 = vld [vmem:[%s17143_s7 + $0xd0] sm:$0xff]  }
 0x4f6   : > { %10264 = vmatprep.subr.bf16.mxu0 %v11069_v62 }
 0x4f7   : > { %10287 = vmatpush3.bf16.msra.mxu1 %v11078_v35 }
 0x4f8   : > { %10288 = vmatprep.subr.bf16.mxu1 %v11081_v12 }
 0x4f9   : > { %10265 = vmatpush3.bf16.msra.mxu0 %v11070_v46  ;;  %v11092_v46 = vld [vmem:[%s17143_s7] sm:$0xff]  }
 0x4fa   : > { %10266 = vmatprep.subr.bf16.mxu0 %v11071_v51  ;;  %v11094_v51 = vld [vmem:[%s17143_s7 + $0x90] sm:$0xff]  }
 0x4fb   : > { %10289 = vmatpush3.bf16.msra.mxu1 %v11082_v55 }
 0x4fc   : > { %10290 = vmatprep.subr.bf16.mxu1 %v11085_v53 }
 0x4fd   : > { %10267 = vmatpush3.bf16.msra.mxu0 %v11073_v47 }
 0x4fe   : > { %10268 = vmatprep.subr.bf16.mxu0 %v11075_v56 }
 0x4ff   : > { %10291 = vmatpush3.bf16.msra.mxu1 %v11086_v38 }
 0x500   : > { %10292 = vmatprep.subr.bf16.mxu1 %v11089_v22 }
 0x501   : > { %10269 = vmatpush3.bf16.msra.mxu0 %v11076_v27  ;;  %v11095_v27 = vld [vmem:[%s17143_s7 + $0xc8] sm:$0xff]  }
 0x502   : > { %10270 = vmatprep.subr.bf16.mxu0 %v11079_v0 }
 0x503   : > { %10293 = vmatpush3.bf16.msra.mxu1 %v11090_v30 }
 0x504   : > { %10294 = vmatprep.subr.bf16.mxu1 %v11093_v32 }
 0x505   : > { %10271 = vmatpush3.bf16.msra.mxu0 %v11080_v52  ;;  %v16009_v52 = vrot.slane %v15857_v19, 2 }
 0x506   : > { %10272 = vmatprep.subr.bf16.mxu0 %v11083_v2 }
 0x507   : > { %10295 = vmatpush3.bf16.msra.mxu1 %v11094_v51 }
 0x508   : > { %10296 = vmatprep.subr.bf16.mxu1 %v11095_v27  ;;  %v11105_v27 = vld [vmem:[%s17145_s9 + $0x70] sm:$0xff]  }
 0x509   : > { %10273 = vmatpush3.bf16.msra.mxu0 %v11084_v28 }
 0x50a   : > { %10274 = vmatprep.subr.bf16.mxu0 %v11087_v29 }
 0x50d   : > { %10275 = vmatpush3.bf16.msra.mxu0 %v11088_v31 }
 0x50e   : > { %10276 = vmatprep.subr.bf16.mxu0 %v11091_v57 }
 0x511   : > { %10277 = vmatpush3.bf16.msra.mxu0 %v11092_v46 }
 0x512   : > { %10643 = vmatprep.subr.bf16.mxu0 %v17959_v60 }
 0x5a4   : > { %v10229_v54 = vpop.f32.mrf.mxu0 }
 0x5a6   : > { %v10230_v13 = vpop.f32.mrf.mxu0 }
 0x5a7   : > { %v10231_v41 = vadd.f32 %v10230_v13, %v10229_v54  ;;  %v11097_v54 = vld [vmem:[%s17143_s7 + $0x88] sm:$0xff]  }
 0x5a8   : > { %v10232_v63 = vpop.f32.mrf.mxu0  ;;  %10297 = vmatpush3.bf16.msra.mxu1 %v11097_v54  ;;  %v11109_v54 = vld [vmem:[%s17145_s9 + $0xf8] sm:$0xff]  }
 0x5a9   : > { %v5720_v37 = vadd.f32 %v10231_v41, %v9782_v8 }
 0x5aa   : > { %v10233_v25 = vpop.f32.mrf.mxu0 }
 0x5ab   : > { %v10234_v34 = vadd.f32 %v10233_v25, %v10232_v63  ;;  %v11100_v25 = vld [vmem:[%s17143_s7 + $0x80] sm:$0xff]  }
 0x5ad   : > { %v5723_v42 = vadd.f32 %v10234_v34, %v9782_v8  ;;  %v11098_v8 = vld [vmem:[%s17143_s7 + $0xc0] sm:$0xff]   ;;  %v5913_v34 = vpop.permute.xlu0 %5912 }
 0x5ae   : > { %10298 = vmatprep.subr.bf16.mxu1 %v11098_v8  ;;  %v16021_v28 = vsel %vm4077_vm12, %v15857_v19, %v5913_v34  ;;  %v11107_v8 = vld [vmem:[%s17145_s9 + $0x68] sm:$0xff]  }
 0x5af   : > { %10299 = vmatpush3.bf16.msra.mxu1 %v11100_v25  ;;  %v11108_v25 = vld [vmem:[%s17145_s9 + $0x28] sm:$0xff]  }
 0x5b2   : > { %v10251_v10 = vpop.f32.mrf.mxu1 }
 0x5b4   : > { %v10252_v3 = vpop.f32.mrf.mxu1  ;;  %v5801_v1 = vpop.f32.mrf.mxu0 }
 0x5b5   : > { %v10253_v49 = vadd.f32 %v10252_v3, %v10251_v10 }
 0x5b6   : > { %v10254_v48 = vpop.f32.mrf.mxu1  ;;  %v10641_v45 = vpop.f32.mrf.mxu0 }
 0x5b7   : > { %v5761_v36 = vadd.f32 %v10253_v49, %v5720_v37 }
 0x5b8   : > { %v10255_v26 = vpop.f32.mrf.mxu1  ;;  %v5804_v6 = vpop.f32.mrf.mxu0 }
 0x5b9   : > { %v10256_v17 = vadd.f32 %v10255_v26, %v10254_v48  ;;  %v5802_v16 = vadd.f32 %v5801_v1, %v5761_v36 }
 0x5ba   : > { %v10642_v50 = vpop.f32.mrf.mxu0 }
 0x5bb   : > { %v5808_v18 = vmax.f32 %v5802_v16, 0.0  ;;  %v5764_v59 = vadd.f32 %v10256_v17, %v5723_v42 }
 0x5bd   : > { %v5812_v9 = vcombine.high %v5808_v18, %v5808_v18  ;;  %v5887_v23 = vrot.slane %v5808_v18, 7  ;;  %v5805_v61 = vadd.f32 %v5804_v6, %v5764_v59 }
 0x5bf   : > { %v5888_v58 = vrot.slane %v5812_v9, 7  ;;  %v5809_v24 = vmax.f32 %v5805_v61, 0.0  ;;  %v5895_v44 = vsel %vm618_vm0, 0.0, %v5887_v23 }
 0x5c0   : > { %v15935_v33 = vsel %vm3721_vm4, %v5895_v44, 0.0 }
 0x5c1   : > { %v5813_v4 = vcombine.high %v5809_v24, %v5809_v24  ;;  %v5889_v20 = vrot.slane %v5809_v24, 7  ;;  %5933 = vrot.lane.b32.xlu0 %v15935_v33, %s17904_s2  ;;  %v5896_v43 = vsel %vm618_vm0, 0.0, %v5888_v58  ;;  %v5909_v7 = vrot.slane %v15935_v33, 1  ;;  %v11096_v58 = vld [vmem:[%s17143_s7 + $0x118] sm:$0xff]  }
 0x5c2   : > { %v15944_v14 = vsel %vm3721_vm4, %v5896_v43, 0.0  ;;  %v5925_v3 = vrot.slane %v15935_v33, 2 }
 0x5c3   : > { %v5890_v15 = vrot.slane %v5813_v4, 7  ;;  %5935 = vrot.lane.b32.xlu1 %v15944_v14, %s17904_s2  ;;  %v5897_v40 = vsel %vm618_vm0, 0.0, %v5889_v20  ;;  %v5910_v47 = vrot.slane %v15944_v14, 1  ;;  %v15988_v63 = vrot.slane %v15944_v14, 2  ;;  %v11099_v4 = vld [vmem:[%s17143_s7 + $0x110] sm:$0xff]  }
 0x5c4   : > { %v15950_v62 = vsel %vm3721_vm4, %v5897_v40, 0.0 }
 0x5c5   : > { %5937 = vrot.lane.b32.xlu0 %v15950_v62, %s17904_s2  ;;  %v5898_v56 = vsel %vm618_vm0, 0.0, %v5890_v15  ;;  %v5911_v41 = vrot.slane %v15950_v62, 1  ;;  %v5927_v37 = vrot.slane %v15950_v62, 2 }
 0x5c6   : > { %v15982_v13 = vsel %vm3721_vm4, %v5898_v56, 0.0  ;;  %v11104_v56 = vld [vmem:[%s17145_s9 + $0x38] sm:$0xff]  }
 0x5c7   : > { %5914 = vrot.lane.b32.xlu1 %v5909_v7, %s17904_s2  ;;  %v5945_v10 = vrot.slane %v15982_v13, 1  ;;  %v5950_v35 = vrot.slane %v15982_v13, 2  ;;  %v6004_v32 = vcombine.low %v15988_v63, %v5927_v37 }
 0x5c9   : > { %5916 = vrot.lane.b32.xlu0 %v5910_v47, %s17904_s2  ;;  %v6009_v46 = vcombine.low %v5950_v35, %v16009_v52 }
 0x5cb   : > { %5939 = vrot.lane.b32.xlu1 %v15982_v13, %s17904_s2  ;;  %v6024_v51 = vpack.c.bf16 %v6009_v46, %v6004_v32 }
 0x5cd   : > { %5953 = vrot.lane.b32.xlu0 %v15988_v63, %s17904_s2 }
 0x5cf   : > { %5918 = vrot.lane.b32.xlu1 %v5911_v41, %s17904_s2 }
 0x5d1   : > { %5963 = vrot.lane.b32.xlu0 %v5945_v10, %s17904_s2 }
 0x5d3   : > { %5951 = vrot.lane.b32.xlu1 %v5925_v3, %s17904_s2 }
 0x5d5   : > { %5957 = vrot.lane.b32.xlu0 %v5950_v35, %s17904_s2 }
 0x5d7   : > { %5955 = vrot.lane.b32.xlu1 %v5927_v37, %s17904_s2 }
 0x633   : > { %v5934_v49 = vpop.permute.xlu0 %5933 }
 0x634   : > { %v5970_v45 = vsel %vm4077_vm12, %v16009_v52, %v5934_v49 }
 0x635   : > { %v5936_v48 = vpop.permute.xlu1 %5935 }
 0x636   : > { %v5971_v12 = vsel %vm4077_vm12, %v5925_v3, %v5936_v48  ;;  %v11112_v3 = vld [vmem:[%s17145_s9 + $0x20] sm:$0xff]  }
 0x637   : > { %v5938_v1 = vpop.permute.xlu0 %5937  ;;  %v9821_v17 = vcombine.low %v5970_v45, %v5971_v12  ;;  %v9828_v48 = vld [vmem:[%s17144_s8] ss:$0 sm:$0xff] }
 0x638   : > { %v5972_v55 = vsel %vm4077_vm12, %v15988_v63, %v5938_v1  ;;  %v11106_v63 = vld [vmem:[%s17145_s9 + $0x30] sm:$0xff]  }
 0x639   : > { %v5915_v36 = vpop.permute.xlu1 %5914 }
 0x63a   : > { %v5967_v18 = vsel %vm4077_vm12, %v15935_v33, %v5915_v36 }
 0x63b   : > { %v5917_v0 = vpop.permute.xlu0 %5916  ;;  %v9820_v38 = vcombine.low %v16021_v28, %v5967_v18 }
 0x63c   : > { %v5968_v53 = vsel %vm4077_vm12, %v15944_v14, %v5917_v0  ;;  %v11102_v14 = vld [vmem:[%s17143_s7 + $0x100] sm:$0xff]  }
 0x63d   : > { %v5940_v26 = vpop.permute.xlu1 %5939 }
 0x63e   : > { %v5973_v42 = vsel %vm4077_vm12, %v5927_v37, %v5940_v26 }
 0x63f   : > { %v9825_v16 = vcombine.low %v5972_v55, %v5973_v42  ;;  %v5954_v6 = vpop.permute.xlu0 %5953  ;;  %v11114_v42 = vld [vmem:[%s17145_s9 + $0x58] sm:$0xff]  }
 0x640   : > { %v5975_v43 = vsel %vm4077_vm12, %v5910_v47, %v5954_v6  ;;  %v11103_v47 = vld [vmem:[%s17145_s9 + $0x78] sm:$0xff]  }
 0x641   : > { %v5919_v59 = vpop.permute.xlu1 %5918  ;;  %v6021_v2 = vpack.c.bf16 %v9825_v16, %v9821_v17  ;;  %10311 = vmatprep.subr.bf16.mxu1 %v11103_v47  ;;  %v11115_v17 = vld [vmem:[%s17145_s9 + $0xb0] sm:$0xff]   ;;  %v11116_v16 = vld [vmem:[%s17145_s9 + $0x18] sm:$0xff]  }
 0x642   : > { %v5969_v50 = vsel %vm4077_vm12, %v15950_v62, %v5919_v59 }
 0x643   : > { %v9823_v9 = vcombine.low %v5968_v53, %v5969_v50  ;;  %6282 = vmatprep.mubr.bf16.mxu0 %v6021_v2  ;;  %v5964_v23 = vpop.permute.xlu0 %5963  ;;  %v11117_v53 = vld [vmem:[%s17145_s9 + $0xe8] sm:$0xff]  }
 0x644   : > { %v5978_v61 = vsel %vm4077_vm12, %v15982_v13, %v5964_v23  ;;  %v11111_v13 = vld [vmem:[%s17145_s9 + $0xb8] sm:$0xff]   ;;  %v11118_v23 = vld [vmem:[%s17145_s9 + $0x50] sm:$0xff]  }
 0x645   : > { %v6020_v24 = vpack.c.bf16 %v9823_v9, %v9820_v38  ;;  %v9827_v44 = vcombine.low %v5978_v61, %v16021_v28  ;;  %v5952_v29 = vpop.permute.xlu1 %5951  ;;  %v11119_v61 = vld [vmem:[%s17145_s9 + $0xa8] sm:$0xff]  }
 0x646   : > { %v5974_v30 = vsel %vm4077_vm12, %v5909_v7, %v5952_v29  ;;  %v11101_v7 = vld [vmem:[%s17143_s7 + $0x108] sm:$0xff]  }
 0x647   : > { %6283 = vmatmul.mubr.bf16.vlgmr.msra.gmra.mxu0 %v6020_v24  ;;  %v5958_v31 = vpop.permute.xlu0 %5957  ;;  %v6023_v22 = vpack.c.bf16 %v9827_v44, %v9823_v9  ;;  %v9822_v40 = vcombine.low %v5974_v30, %v5975_v43  ;;  %v11121_v44 = vld [vmem:[%s17145_s9 + $0xe0] sm:$0xff]  }
 0x648   : > { %10644 = vmatpush3.bf16.msra.mxu0 %v11096_v58  ;;  %10651 = vmatprep.mubr.msk.bf16.mxu0 %vm11393_vm2, %v17959_v60  ;;  %v5977_v33 = vsel %vm4077_vm12, %v5945_v10, %v5958_v31  ;;  %v11110_v10 = vld [vmem:[%s17145_s9 + $0x60] sm:$0xff]   ;;  %v11120_v58 = vld [vmem:[%s17145_s9 + $0x10] sm:$0xff]  }
 0x649   : > { %v5956_v20 = vpop.permute.xlu1 %5955  ;;  %6323 = vmatprep.mubr.bf16.mxu1 %v6023_v22  ;;  %10645 = vmatprep.subr.bf16.mxu0 %v17959_v60  ;;  %v11122_v22 = vld [vmem:[%s17145_s9 + $0x48] sm:$0xff]   ;;  %v11123_v30 = vld [vmem:[%s17145_s9 + $0xa0] sm:$0xff]  }
 0x64a   : > { %v5976_v15 = vsel %vm4077_vm12, %v5911_v41, %v5956_v20  ;;  %v11113_v41 = vld [vmem:[%s17145_s9 + $0xf0] sm:$0xff]  }
 0x64b   : > { %v9826_v62 = vcombine.low %v5976_v15, %v5977_v33 }
 0x64c   : > { %10646 = vmatpush3.bf16.msra.mxu0 %v11099_v4  ;;  %v11124_v4 = vld [vmem:[%s17145_s9 + $0x8] sm:$0xff]  }
 0x64d   : > { %v6022_v57 = vpack.c.bf16 %v9826_v62, %v9822_v40  ;;  %10647 = vmatprep.subr.bf16.mxu0 %v17959_v60 }
 0x64f   : > { %6324 = vmatmul.mubr.bf16.vlgmr.msra.gmra.mxu1 %v6022_v57  ;;  %v11125_v57 = vld [vmem:[%s17145_s9 + $0xd8] sm:$0xff]  }
 0x650   : > { %10648 = vmatpush3.bf16.msra.mxu0 %v11101_v7  ;;  %10312 = vmatpush3.bf16.msra.mxu1 %v11104_v56 }
 0x651   : > { %10649 = vmatprep.subr.bf16.mxu0 %v17959_v60  ;;  %10313 = vmatprep.subr.bf16.mxu1 %v11105_v27 }
 0x654   : > { %10650 = vmatpush3.bf16.msra.mxu0 %v11102_v14  ;;  %10314 = vmatpush3.bf16.msra.mxu1 %v11106_v63  ;;  %v11128_v63 = vld [vmem:[%s17145_s9] sm:$0xff]  }
 0x655   : > { %10333 = vmatprep.subr.bf16.mxu0 %v11109_v54  ;;  %10315 = vmatprep.subr.bf16.mxu1 %v11107_v8  ;;  %v11126_v54 = vld [vmem:[%s17145_s9 + $0x40] sm:$0xff]  }
 0x657   : > { %10652 = vmatmul.mubr.msk.bf16.vlgmr.msra.gmra.mxu0 %vm4077_vm12, %v6024_v51 }
 0x658   : > { %10334 = vmatpush3.bf16.msra.mxu0 %v11111_v13  ;;  %10316 = vmatpush3.bf16.msra.mxu1 %v11108_v25  ;;  %v11127_v13 = vld [vmem:[%s17145_s9 + $0x98] sm:$0xff]  }
 0x659   : > { %10335 = vmatprep.subr.bf16.mxu0 %v11113_v41  ;;  %10317 = vmatprep.subr.bf16.mxu1 %v11110_v10  ;;  %v11129_v41 = vld [vmem:[%s17145_s9 + $0xd0] sm:$0xff]  }
 0x65a   : > { %v11130_v10 = vld [vmem:[%s17145_s9 + $0x90] sm:$0xff]  }
 0x65c   : > { %10318 = vmatpush3.bf16.msra.mxu1 %v11112_v3  ;;  %10336 = vmatpush3.bf16.msra.mxu0 %v11115_v17 }
 0x65d   : > { %10319 = vmatprep.subr.bf16.mxu1 %v11114_v42  ;;  %10337 = vmatprep.subr.bf16.mxu0 %v11117_v53 }
 0x660   : > { %10320 = vmatpush3.bf16.msra.mxu1 %v11116_v16  ;;  %10338 = vmatpush3.bf16.msra.mxu0 %v11119_v61 }
 0x661   : > { %10321 = vmatprep.subr.bf16.mxu1 %v11118_v23  ;;  %10339 = vmatprep.subr.bf16.mxu0 %v11121_v44 }
 0x664   : > { %10322 = vmatpush3.bf16.msra.mxu1 %v11120_v58  ;;  %10340 = vmatpush3.bf16.msra.mxu0 %v11123_v30 }
 0x665   : > { %10323 = vmatprep.subr.bf16.mxu1 %v11122_v22  ;;  %10341 = vmatprep.subr.bf16.mxu0 %v11125_v57 }
 0x668   : > { %10324 = vmatpush3.bf16.msra.mxu1 %v11124_v4  ;;  %10342 = vmatpush3.bf16.msra.mxu0 %v11127_v13  ;;  %v11131_v4 = vld [vmem:[%s17145_s9 + $0x118] sm:$0xff]  }
 0x669   : > { %10325 = vmatprep.subr.bf16.mxu1 %v11126_v54  ;;  %10343 = vmatprep.subr.bf16.mxu0 %v11129_v41 }
 0x66c   : > { %10326 = vmatpush3.bf16.msra.mxu1 %v11128_v63  ;;  %10344 = vmatpush3.bf16.msra.mxu0 %v11130_v10  ;;  %v7040_v10 = vcombine.high %v15857_v19, %v15857_v19 }
 0x66d   : > { %10655 = vmatprep.subr.bf16.mxu1 %v17959_v60 }
 0x707   : > { %v10278_v35 = vpop.f32.mrf.mxu0 }
 0x709   : > { %v10279_v37 = vpop.f32.mrf.mxu0 }
 0x70a   : > { %v10280_v49 = vadd.f32 %v10279_v37, %v10278_v35  ;;  %v11132_v35 = vld [vmem:[%s17145_s9 + $0xc8] sm:$0xff]  }
 0x70b   : > { %v10281_v34 = vpop.f32.mrf.mxu0  ;;  %10345 = vmatprep.subr.bf16.mxu0 %v11132_v35  ;;  %v7047_v35 = vrot.slane %v7040_v10, %v11552_v11 }
 0x70c   : > { %v6285_v12 = vadd.f32 %v10280_v49, %v9828_v48  ;;  %v11133_v49 = vld [vmem:[%s17145_s9 + $0x88] sm:$0xff]  }
 0x70d   : > { %v10282_v1 = vpop.f32.mrf.mxu0  ;;  %10346 = vmatpush3.bf16.msra.mxu0 %v11133_v49 }
 0x70e   : > { %v10283_v26 = vadd.f32 %v10282_v1, %v10281_v34 }
 0x70f   : > { %v10300_v36 = vpop.f32.mrf.mxu1 }
 0x710   : > { %v6288_v59 = vadd.f32 %v10283_v26, %v9828_v48 }
 0x711   : > { %v10301_v0 = vpop.f32.mrf.mxu1 }
 0x712   : > { %v10302_v45 = vadd.f32 %v10301_v0, %v10300_v36  ;;  %v11135_v36 = vld [vmem:[%s17145_s9 + $0xc0] sm:$0xff]  }
 0x713   : > { %v10303_v55 = vpop.f32.mrf.mxu1  ;;  %v11136_v0 = vld [vmem:[%s17145_s9 + $0x80] sm:$0xff]   ;;  %10347 = vmatprep.subr.bf16.mxu0 %v11135_v36 }
 0x714   : > { %v6326_v6 = vadd.f32 %v10302_v45, %v6285_v12  ;;  %10348 = vmatpush3.bf16.msra.mxu0 %v11136_v0 }
 0x715   : > { %v10304_v18 = vpop.f32.mrf.mxu1 }
 0x716   : > { %v10305_v2 = vadd.f32 %v10304_v18, %v10303_v55 }
 0x717   : > { %v6366_v50 = vpop.f32.mrf.mxu0 }
 0x718   : > { %v6367_v38 = vadd.f32 %v6366_v50, %v6326_v6  ;;  %v6329_v9 = vadd.f32 %v10305_v2, %v6288_v59 }
 0x719   : > { %v10653_v24 = vpop.f32.mrf.mxu0 }
 0x71a   : > { %v6373_v29 = vmax.f32 %v6367_v38, 0.0 }
 0x71b   : > { %v6369_v31 = vpop.f32.mrf.mxu0 }
 0x71c   : > { %v6377_v20 = vcombine.high %v6373_v29, %v6373_v29  ;;  %v6452_v43 = vrot.slane %v6373_v29, 7  ;;  %v6370_v33 = vadd.f32 %v6369_v31, %v6329_v9 }
 0x71d   : > { %v10654_v15 = vpop.f32.mrf.mxu0 }
 0x71e   : > { %v6453_v40 = vrot.slane %v6377_v20, 7  ;;  %v6374_v62 = vmax.f32 %v6370_v33, 0.0  ;;  %v6460_v7 = vsel %vm618_vm0, 0.0, %v6452_v43 }
 0x71f   : > { %v16133_v14 = vsel %vm3721_vm4, %v6460_v7, 0.0 }
 0x720   : > { %v6378_v46 = vcombine.high %v6374_v62, %v6374_v62  ;;  %v6454_v32 = vrot.slane %v6374_v62, 7  ;;  %6490 = vrot.lane.b32.xlu1 %v16133_v14, %s17904_s2  ;;  %v6461_v51 = vsel %vm618_vm0, 0.0, %v6453_v40  ;;  %v6471_v27 = vrot.slane %v16133_v14, 1  ;;  %v11134_v40 = vld [vmem:[%s17145_s9 + $0x110] sm:$0xff]  }
 0x721   : > { %v16139_v47 = vsel %vm3721_vm4, %v6461_v51, 0.0  ;;  %v6483_v12 = vrot.slane %v16133_v14, 2 }
 0x722   : > { %v6455_v56 = vrot.slane %v6378_v46, 7  ;;  %6492 = vrot.lane.b32.xlu0 %v16139_v47, %s17904_s2  ;;  %v6472_v8 = vrot.slane %v16139_v47, 1  ;;  %v6462_v25 = vsel %vm618_vm0, 0.0, %v6454_v32  ;;  %v16188_v1 = vrot.slane %v16139_v47, 2 }
 0x723   : > { %v16172_v37 = vsel %vm3721_vm4, %v6462_v25, 0.0  ;;  %v7030_v25 = vrot.slane %v15857_v19, %v11552_v11  ;;  %v11139_v19 = vld [vmem:[%s17147_s11 + $0x78] sm:$0xff]  }
 0x724   : > { %6474 = vrot.lane.b32.xlu1 %v6471_v27, %s17904_s2  ;;  %v6463_v3 = vsel %vm618_vm0, 0.0, %v6455_v56  ;;  %v6473_v48 = vrot.slane %v16172_v37, 1  ;;  %v6485_v45 = vrot.slane %v16172_v37, 2  ;;  %10360 = vmatprep.subr.bf16.mxu0 %v11139_v19 }
 0x725   : > { %v16178_v34 = vsel %vm3721_vm4, %v6463_v3, 0.0  ;;  %v7031_v3 = vcombine.high %v7030_v25, %v7030_v25 }
 0x726   : > { %6476 = vrot.lane.b32.xlu0 %v6472_v8, %s17904_s2  ;;  %v6502_v26 = vrot.slane %v16178_v34, 1  ;;  %v6507_v55 = vrot.slane %v16178_v34, 2  ;;  %v6559_v41 = vcombine.low %v16188_v1, %v6485_v45 }
 0x728   : > { %6494 = vrot.lane.b32.xlu1 %v16172_v37, %s17904_s2 }
 0x72a   : > { %6496 = vrot.lane.b32.xlu0 %v16178_v34, %s17904_s2 }
 0x72c   : > { %6478 = vrot.lane.b32.xlu1 %v6473_v48, %s17904_s2 }
 0x72e   : > { %6510 = vrot.lane.b32.xlu0 %v16188_v1, %s17904_s2 }
 0x730   : > { %6508 = vrot.lane.b32.xlu1 %v6483_v12, %s17904_s2 }
 0x732   : > { %6520 = vrot.lane.b32.xlu0 %v6502_v26, %s17904_s2 }
 0x734   : > { %6512 = vrot.lane.b32.xlu1 %v6485_v45, %s17904_s2 }
 0x736   : > { %6514 = vrot.lane.b32.xlu0 %v6507_v55, %s17904_s2 }
 0x792   : > { %v6491_v42 = vpop.permute.xlu1 %6490 }
 0x793   : > { %v6526_v53 = vsel %vm4077_vm12, %v16009_v52, %v6491_v42  ;;  %v11141_v42 = vld [vmem:[%s17147_s11 + $0x70] sm:$0xff]  }
 0x794   : > { %v6493_v17 = vpop.permute.xlu0 %6492 }
 0x795   : > { %v6527_v59 = vsel %vm4077_vm12, %v6483_v12, %v6493_v17  ;;  %v7189_v17 = vrot.slane %v7047_v35, %v11537_v5 }
 0x796   : > { %v6475_v16 = vpop.permute.xlu1 %6474  ;;  %v9867_v23 = vcombine.low %v6526_v53, %v6527_v59 }
 0x797   : > { %v6523_v50 = vsel %vm4077_vm12, %v16133_v14, %v6475_v16  ;;  %v11143_v16 = vld [vmem:[%s17147_s11 + $0xf8] sm:$0xff]  }
 0x798   : > { %v6477_v6 = vpop.permute.xlu0 %6476  ;;  %v9866_v29 = vcombine.low %v16021_v28, %v6523_v50 }
 0x799   : > { %v6524_v24 = vsel %vm4077_vm12, %v16139_v47, %v6477_v6  ;;  %v11138_v47 = vld [vmem:[%s17145_s9 + $0x100] sm:$0xff]   ;;  %v11144_v6 = vld [vmem:[%s17147_s11 + $0xb8] sm:$0xff]  }
 0x79a   : > { %v6495_v18 = vpop.permute.xlu1 %6494 }
 0x79b   : > { %v6528_v38 = vsel %vm4077_vm12, %v16188_v1, %v6495_v18 }
 0x79c   : > { %v6497_v2 = vpop.permute.xlu0 %6496 }
 0x79d   : > { %v6529_v9 = vsel %vm4077_vm12, %v6485_v45, %v6497_v2  ;;  %v7145_v45 = vrot.slane %v7030_v25, %v11537_v5  ;;  %v11142_v2 = vld [vmem:[%s17147_s11 + $0x30] sm:$0xff]  }
 0x79e   : > { %v9871_v61 = vcombine.low %v6528_v38, %v6529_v9  ;;  %v6479_v58 = vpop.permute.xlu1 %6478 }
 0x79f   : > { %v6525_v44 = vsel %vm4077_vm12, %v16172_v37, %v6479_v58  ;;  %v9912_v37 = vrot.slane %v7030_v25, 9 }
 0x7a0   : > { %v9869_v31 = vcombine.low %v6524_v24, %v6525_v44  ;;  %v6511_v22 = vpop.permute.xlu0 %6510  ;;  %v6576_v30 = vpack.c.bf16 %v9871_v61, %v9867_v23  ;;  %v9874_v23 = vld [vmem:[%s17146_s10] ss:$0 sm:$0xff] }
 0x7a1   : > { %v6531_v51 = vsel %vm4077_vm12, %v6472_v8, %v6511_v22 }
 0x7a2   : > { %v6575_v20 = vpack.c.bf16 %v9869_v31, %v9866_v29  ;;  %v6509_v43 = vpop.permute.xlu1 %6508  ;;  %6837 = vmatprep.mubr.bf16.mxu1 %v6576_v30 }
 0x7a3   : > { %v6530_v57 = vsel %vm4077_vm12, %v6471_v27, %v6509_v43  ;;  %v6564_v27 = vcombine.low %v6507_v55, %v16009_v52  ;;  %v7058_v52 = vrot.slane %v7031_v3, 7  ;;  %v7149_v55 = vrot.slane %v7031_v3, %v11537_v5 }
 0x7a4   : > { %6838 = vmatmul.mubr.bf16.vlgmr.msra.gmra.mxu1 %v6575_v20  ;;  %v6521_v33 = vpop.permute.xlu0 %6520  ;;  %v9868_v13 = vcombine.low %v6530_v57, %v6531_v51 }
 0x7a5   : > { %10656 = vmatpush3.bf16.msra.mxu1 %v11131_v4  ;;  %v6534_v15 = vsel %vm4077_vm12, %v16178_v34, %v6521_v33  ;;  %10663 = vmatprep.mubr.msk.bf16.mxu1 %vm11393_vm2, %v17959_v60  ;;  %v6579_v8 = vpack.c.bf16 %v6564_v27, %v6559_v41  ;;  %v7061_v34 = vrot.slane %v7047_v35, 7  ;;  %v7059_v49 = vsel %vm12587_vm10, %v9912_v37, %v7058_v52  ;;  %v11148_v41 = vld [vmem:[%s17147_s11 + $0xb0] sm:$0xff]   ;;  %v11151_v37 = vld [vmem:[%s17147_s11 + $0xe8] sm:$0xff]  }
 0x7a6   : > { %v9873_v62 = vcombine.low %v6534_v15, %v16021_v28  ;;  %v6513_v7 = vpop.permute.xlu1 %6512  ;;  %10657 = vmatprep.subr.bf16.mxu1 %v17959_v60  ;;  %v11137_v28 = vld [vmem:[%s17145_s9 + $0x108] sm:$0xff]   ;;  %v7165_v1 = vrot.slane %v7059_v49, %v11537_v5  ;;  %v16282_v18 = vsel %vm2154_vm1, %v7149_v55, %v7145_v45  ;;  %v16285_v59 = vsel %vm2154_vm1, %v7189_v17, %v7149_v55  ;;  %v11150_v49 = vld [vmem:[%s17147_s11 + $0x20] sm:$0xff]  }
 0x7a7   : > { %v6532_v56 = vsel %vm4077_vm12, %v6473_v48, %v6513_v7  ;;  %v7060_v48 = vrot.slane %v7058_v52, 2 }
 0x7a8   : > { %v6515_v46 = vpop.permute.xlu0 %6514  ;;  %v6578_v32 = vpack.c.bf16 %v9873_v62, %v9869_v31 }
 0x7a9   : > { %10658 = vmatpush3.bf16.msra.mxu1 %v11134_v40  ;;  %v6533_v54 = vsel %vm4077_vm12, %v6502_v26, %v6515_v46  ;;  %v7062_v36 = vsel %vm12587_vm10, %v7060_v48, %v7061_v34  ;;  %v11140_v26 = vld [vmem:[%s17147_s11 + $0x38] sm:$0xff]   ;;  %v11152_v48 = vld [vmem:[%s17147_s11 + $0xa8] sm:$0xff]  }
 0x7aa   : > { %v9872_v63 = vcombine.low %v6532_v56, %v6533_v54  ;;  %6878 = vmatprep.mubr.bf16.mxu0 %v6578_v32  ;;  %10659 = vmatprep.subr.bf16.mxu1 %v17959_v60  ;;  %v7169_v0 = vrot.slane %v7062_v36, %v11537_v5 }
 0x7ac   : > { %v6577_v14 = vpack.c.bf16 %v9872_v63, %v9868_v13  ;;  %v7178_v12 = vsel %vm2154_vm1, %v7169_v0, %v7165_v1  ;;  %v11145_v63 = vld [vmem:[%s17147_s11 + $0x68] sm:$0xff]  }
 0x7ad   : > { %10660 = vmatpush3.bf16.msra.mxu1 %v11137_v28  ;;  %7180 = vrot.lane.b32.xlu1 %v7178_v12, %s17904_s2 }
 0x7ae   : > { %6879 = vmatmul.mubr.bf16.vlgmr.msra.gmra.mxu0 %v6577_v14  ;;  %10661 = vmatprep.subr.bf16.mxu1 %v17959_v60  ;;  %v11146_v14 = vld [vmem:[%s17147_s11 + $0x28] sm:$0xff]  }
 0x7af   : > { %10361 = vmatpush3.bf16.msra.mxu0 %v11140_v26 }
 0x7b0   : > { %10362 = vmatprep.subr.bf16.mxu0 %v11141_v42 }
 0x7b1   : > { %10662 = vmatpush3.bf16.msra.mxu1 %v11138_v47  ;;  %v11147_v47 = vld [vmem:[%s17147_s11 + $0xf0] sm:$0xff]  }
 0x7b2   : > { %10382 = vmatprep.subr.bf16.mxu1 %v11143_v16 }
 0x7b3   : > { %10363 = vmatpush3.bf16.msra.mxu0 %v11142_v2 }
 0x7b4   : > { %10664 = vmatmul.mubr.msk.bf16.vlgmr.msra.gmra.mxu1 %vm4077_vm12, %v6579_v8  ;;  %v11149_v8 = vld [vmem:[%s17147_s11 + $0x60] sm:$0xff]   ;;  %10364 = vmatprep.subr.bf16.mxu0 %v11145_v63 }
 0x7b5   : > { %10383 = vmatpush3.bf16.msra.mxu1 %v11144_v6 }
 0x7b6   : > { %10384 = vmatprep.subr.bf16.mxu1 %v11147_v47 }
 0x7b7   : > { %10365 = vmatpush3.bf16.msra.mxu0 %v11146_v14 }
 0x7b8   : > { %10366 = vmatprep.subr.bf16.mxu0 %v11149_v8 }
 0x7b9   : > { %10385 = vmatpush3.bf16.msra.mxu1 %v11148_v41 }
 0x7ba   : > { %10386 = vmatprep.subr.bf16.mxu1 %v11151_v37 }
 0x7bb   : > { %10367 = vmatpush3.bf16.msra.mxu0 %v11150_v49 }
 0x7bd   : > { %10387 = vmatpush3.bf16.msra.mxu1 %v11152_v48  ;;  %v11159_v48 = vld [vmem:[%s17147_s11 + $0xd8] sm:$0xff]  }
 0x864   : > { %v10327_v53 = vpop.f32.mrf.mxu1 }
 0x866   : > { %v10328_v50 = vpop.f32.mrf.mxu1 }
 0x867   : > { %v10329_v9 = vadd.f32 %v10328_v50, %v10327_v53 }
 0x868   : > { %v10330_v38 = vpop.f32.mrf.mxu1 }
 0x869   : > { %v6840_v44 = vadd.f32 %v10329_v9, %v9874_v23 }
 0x86a   : > { %v10331_v61 = vpop.f32.mrf.mxu1 }
 0x86b   : > { %v10332_v29 = vadd.f32 %v10331_v61, %v10330_v38 }
 0x86d   : > { %v6843_v43 = vadd.f32 %v10332_v29, %v9874_v23  ;;  %v11153_v29 = vld [vmem:[%s17147_s11 + $0x58] sm:$0xff]  }
 0x86e   : > { %v10349_v58 = vpop.f32.mrf.mxu0  ;;  %10368 = vmatprep.subr.bf16.mxu0 %v11153_v29 }
 0x870   : > { %v10350_v24 = vpop.f32.mrf.mxu0 }
 0x871   : > { %v10351_v31 = vadd.f32 %v10350_v24, %v10349_v58 }
 0x872   : > { %v10352_v22 = vpop.f32.mrf.mxu0 }
 0x873   : > { %v6881_v30 = vadd.f32 %v10351_v31, %v6840_v44  ;;  %v11154_v31 = vld [vmem:[%s17147_s11 + $0x18] sm:$0xff]  }
 0x874   : > { %v6921_v4 = vpop.f32.mrf.mxu1  ;;  %v10353_v20 = vpop.f32.mrf.mxu0  ;;  %10369 = vmatpush3.bf16.msra.mxu0 %v11154_v31 }
 0x875   : > { %v6922_v33 = vadd.f32 %v6921_v4, %v6881_v30  ;;  %v10354_v15 = vadd.f32 %v10353_v20, %v10352_v22  ;;  %v11155_v22 = vld [vmem:[%s17147_s11 + $0xe0] sm:$0xff]  }
 0x876   : > { %v10665_v40 = vpop.f32.mrf.mxu1  ;;  %10388 = vmatprep.subr.bf16.mxu1 %v11155_v22 }
 0x877   : > { %v6928_v62 = vmax.f32 %v6922_v33, 0.0  ;;  %v6884_v7 = vadd.f32 %v10354_v15, %v6843_v43  ;;  %v11156_v33 = vld [vmem:[%s17147_s11 + $0xa0] sm:$0xff]  }
 0x878   : > { %v6924_v57 = vpop.f32.mrf.mxu1  ;;  %10389 = vmatpush3.bf16.msra.mxu1 %v11156_v33 }
 0x879   : > { %v6932_v46 = vcombine.high %v6928_v62, %v6928_v62  ;;  %v7007_v32 = vrot.slane %v6928_v62, 7  ;;  %v6925_v51 = vadd.f32 %v6924_v57, %v6884_v7  ;;  %10390 = vmatprep.subr.bf16.mxu1 %v11159_v48 }
 0x87a   : > { %v10666_v56 = vpop.f32.mrf.mxu1 }
 0x87b   : > { %v7008_v54 = vrot.slane %v6932_v46, 7  ;;  %v7015_v28 = vsel %vm618_vm0, 0.0, %v7007_v32  ;;  %v6929_v13 = vmax.f32 %v6925_v51, 0.0 }
 0x87c   : > { %v7019_v27 = vsel %vm3721_vm4, %v7015_v28, 0.0 }
 0x87d   : > { %v7016_v25 = vsel %vm618_vm0, 0.0, %v7008_v54  ;;  %v16312_v10 = vrot.slane %v7019_v27, %v11552_v11  ;;  %v7088_v3 = vcombine.high %v7019_v27, %v7019_v27  ;;  %v6933_v35 = vcombine.high %v6929_v13, %v6929_v13 }
 0x87e   : > { %v7020_v52 = vsel %vm3721_vm4, %v7016_v25, 0.0  ;;  %v7009_v34 = vrot.slane %v6929_v13, 7 }
 0x87f   : > { %v16325_v1 = vrot.slane %v7020_v52, %v11552_v11  ;;  %v7048_v36 = vcombine.high %v7020_v52, %v7020_v52  ;;  %v7010_v0 = vrot.slane %v6933_v35, 7  ;;  %v16330_v19 = vcombine.high %v16312_v10, %v16312_v10  ;;  %v11158_v35 = vld [vmem:[%s17147_s11 + $0x10] sm:$0xff]  }
 0x880   : > { %v7017_v12 = vsel %vm618_vm0, 0.0, %v7009_v34  ;;  %v16333_v26 = vrot.slane %v7088_v3, %v11552_v11  ;;  %v7201_v17 = vrot.slane %v16312_v10, %v11537_v5  ;;  %v9914_v50 = vrot.slane %v16312_v10, 9  ;;  %v11157_v3 = vld [vmem:[%s17147_s11 + $0x50] sm:$0xff]  }
 0x881   : > { %v16336_v45 = vrot.slane %v7048_v36, %v11552_v11  ;;  %v7018_v55 = vsel %vm618_vm0, 0.0, %v7010_v0  ;;  %v7021_v42 = vsel %vm3721_vm4, %v7017_v12, 0.0  ;;  %v16344_v16 = vcombine.high %v16325_v1, %v16325_v1  ;;  %10370 = vmatprep.subr.bf16.mxu0 %v11157_v3 }
 0x882   : > { %v7022_v6 = vsel %vm3721_vm4, %v7018_v55, 0.0  ;;  %v16348_v2 = vrot.slane %v7021_v42, %v11552_v11  ;;  %v7205_v53 = vrot.slane %v16330_v19, %v11537_v5  ;;  %v7106_v23 = vrot.slane %v16330_v19, 7  ;;  %10371 = vmatpush3.bf16.msra.mxu0 %v11158_v35 }
 0x883   : > { %v16354_v38 = vrot.slane %v7022_v6, %v11552_v11  ;;  %v7127_v9 = vcombine.high %v7022_v6, %v7022_v6  ;;  %v7068_v61 = vrot.slane %v16336_v45, 7  ;;  %v7096_v58 = vcombine.high %v7021_v42, %v7021_v42 }
 0x884   : > { %v7214_v24 = vsel %vm2154_vm1, %v7205_v53, %v7201_v17  ;;  %v7245_v44 = vrot.slane %v16333_v26, %v11537_v5  ;;  %v9915_v30 = vrot.slane %v16348_v2, 9  ;;  %v7109_v43 = vrot.slane %v16333_v26, 7  ;;  %v11160_v26 = vld [vmem:[%s17147_s11 + $0x98] sm:$0xff]  }
 0x885   : > { %v7126_v4 = vcombine.high %v16354_v38, %v16354_v38  ;;  %v16374_v20 = vrot.slane %v7127_v9, %v11552_v11  ;;  %7216 = vrot.lane.b32.xlu1 %v7214_v24, %s17904_s2  ;;  %v7108_v15 = vrot.slane %v7106_v23, 2  ;;  %v9913_v40 = vrot.slane %v16325_v1, 9  ;;  %v11163_v24 = vld [vmem:[%s17147_s11 + $0xd0] sm:$0xff]   ;;  %10391 = vmatpush3.bf16.msra.mxu1 %v11160_v26 }
 0x886   : > { %v7065_v62 = vrot.slane %v16344_v16, 7  ;;  %v7087_v7 = vcombine.high %v16348_v2, %v16348_v2  ;;  %v7250_v46 = vsel %vm2154_vm1, %v7245_v44, %v7205_v53  ;;  %v9916_v32 = vrot.slane %v16354_v38, 9  ;;  %v11165_v44 = vld [vmem:[%s17147_s11 + $0x40] sm:$0xff]   ;;  %10392 = vmatprep.subr.bf16.mxu1 %v11163_v24 }
 0x887   : > { %v7140_v57 = vrot.slane %v16374_v20, 7  ;;  %v7137_v51 = vrot.slane %v7126_v4, 7  ;;  %v7209_v47 = vrot.slane %v16348_v2, %v11537_v5  ;;  %v7103_v27 = vrot.slane %v7096_v58, %v11552_v11  ;;  %v11162_v58 = vld [vmem:[%s17147_s11 + $0x8] sm:$0xff]   ;;  %v11166_v2 = vld [vmem:[%s17147_s11] sm:$0xff]  }
 0x888   : > { %v7066_v56 = vsel %vm12587_vm10, %v9913_v40, %v7065_v62  ;;  %v7067_v54 = vrot.slane %v7065_v62, 2  ;;  %v7113_v28 = vrot.slane %v7087_v7, 7  ;;  %v16391_v13 = vrot.slane %v7087_v7, %v11537_v5 }
 0x889   : > { %7252 = vrot.lane.b32.xlu1 %v7250_v46, %s17904_s2  ;;  %v7138_v63 = vsel %vm12587_vm10, %v9916_v32, %v7137_v51  ;;  %v7139_v14 = vrot.slane %v7137_v51, 2  ;;  %v7283_v41 = vrot.slane %v16374_v20, %v11537_v5  ;;  %v7173_v25 = vrot.slane %v7066_v56, %v11537_v5  ;;  %v11169_v32 = vld [vmem:[%s17147_s11 + $0xc0] sm:$0xff]   ;;  %v7181_v51 = vpop.permute.xlu1 %7180 }
 0x88a   : > { %v7069_v8 = vsel %vm12587_vm10, %v7067_v54, %v7068_v61  ;;  %v7271_v10 = vrot.slane %v7138_v63, %v11537_v5  ;;  %v7115_v34 = vrot.slane %v7113_v28, 2  ;;  %v7215_v49 = vsel %vm2154_vm1, %v16391_v13, %v7209_v47  ;;  %v11161_v61 = vld [vmem:[%s17147_s11 + $0x48] sm:$0xff]  }
 0x88b   : > { %v7177_v37 = vrot.slane %v7069_v8, %v11537_v5  ;;  %v7141_v52 = vsel %vm12587_vm10, %v7139_v14, %v7140_v57  ;;  %v7116_v0 = vrot.slane %v7103_v27, 7  ;;  %v7107_v12 = vsel %vm12587_vm10, %v9914_v50, %v7106_v23  ;;  %10372 = vmatprep.subr.bf16.mxu0 %v11161_v61  ;;  %v11168_v57 = vld [vmem:[%s17147_s11 + $0x88] sm:$0xff]   ;;  %v11174_v61 = vld [vmem:[%s17147_s11 + $0x100] sm:$0xff]  }
 0x88c   : > { %v7275_v36 = vrot.slane %v7141_v52, %v11537_v5  ;;  %v7110_v19 = vsel %vm12587_vm10, %v7108_v15, %v7109_v43  ;;  %v7249_v42 = vrot.slane %v7103_v27, %v11537_v5  ;;  %v7225_v17 = vrot.slane %v7107_v12, %v11537_v5  ;;  %10373 = vmatpush3.bf16.msra.mxu0 %v11162_v58 }
 0x88d   : > { %v7179_v55 = vsel %vm2154_vm1, %v7177_v37, %v7173_v25  ;;  %v7229_v6 = vrot.slane %v7110_v19, %v11537_v5  ;;  %v7153_v50 = vrot.slane %v16325_v1, %v11537_v5  ;;  %v7157_v9 = vrot.slane %v16344_v16, %v11537_v5  ;;  %10374 = vmatprep.subr.bf16.mxu0 %v11165_v44  ;;  %v11178_v44 = vld [vmem:[%s17149_s13 + $0xb8] sm:$0xff]  }
 0x88e   : > { %7182 = vrot.lane.b32.xlu0 %v7179_v55, %s17904_s2  ;;  %v7276_v53 = vsel %vm2154_vm1, %v7275_v36, %v7271_v10  ;;  %v7261_v23 = vrot.slane %v16354_v38, %v11537_v5  ;;  %v7265_v16 = vrot.slane %v7126_v4, %v11537_v5  ;;  %v7193_v38 = vrot.slane %v16336_v45, %v11537_v5  ;;  %v11164_v45 = vld [vmem:[%s17147_s11 + $0x90] sm:$0xff]   ;;  %v11170_v55 = vld [vmem:[%s17147_s11 + $0x118] sm:$0xff]  }
 0x88f   : > { %7277 = vrot.lane.b32.xlu1 %v7276_v53, %s17904_s2  ;;  %v7238_v1 = vsel %vm2154_vm1, %v7229_v6, %v7225_v17  ;;  %v7159_v29 = vsel %vm2154_vm1, %v7157_v9, %v7153_v50  ;;  %v7114_v31 = vsel %vm12587_vm10, %v9915_v30, %v7113_v28  ;;  %v7117_v22 = vsel %vm12587_vm10, %v7115_v34, %v7116_v0  ;;  %v11172_v50 = vld [vmem:[%s17147_s11 + $0x110] sm:$0xff]  }
 0x890   : > { %v7266_v4 = vsel %vm2154_vm1, %v7265_v16, %v7261_v23  ;;  %v7195_v20 = vsel %vm2154_vm1, %v7193_v38, %v7157_v9  ;;  %v7284_v43 = vsel %vm2154_vm1, %v7283_v41, %v7265_v16  ;;  %v7233_v33 = vrot.slane %v7114_v31, %v11537_v5  ;;  %10393 = vmatpush3.bf16.msra.mxu1 %v11164_v45  ;;  %v11173_v23 = vld [vmem:[%s17147_s11 + $0x108] sm:$0xff]   ;;  %v11176_v16 = vld [vmem:[%s17149_s13 + $0xf8] sm:$0xff]   ;;  %v11180_v31 = vld [vmem:[%s17149_s13 + $0xf0] sm:$0xff]  }
 0x891   : > { %v7322_v30 = vrot.slane %v7195_v20, %v11552_v11  ;;  %v7346_v15 = vrot.slane %v7284_v43, %v11552_v11  ;;  %v7237_v40 = vrot.slane %v7117_v22, %v11537_v5  ;;  %v7251_v46 = vsel %vm2154_vm1, %v7249_v42, %v16391_v13  ;;  %10375 = vmatpush3.bf16.msra.mxu0 %v11166_v2  ;;  %v11171_v5 = vld [vmem:[%s17147_s11 + $0x80] sm:$0xff]   ;;  %v11177_v38 = vld [vmem:[%s17149_s13 + $0x38] sm:$0xff]   ;;  %v11181_v22 = vld [vmem:[%s17149_s13 + $0x30] sm:$0xff]  }
 0x892   : > { %7218 = vrot.lane.b32.xlu0 %v7215_v49, %s17904_s2  ;;  %10394 = vmatprep.subr.bf16.mxu1 %v11167_v21  ;;  %v7285_v56 = vsel %vm4077_vm12, %v16282_v18, %v7181_v51  ;;  %v11182_v45 = vld [vmem:[%s17149_s13 + $0xb0] sm:$0xff]   ;;  %v11185_v43 = vld [vmem:[%s17149_s13 + $0x28] sm:$0xff]   ;;  %v11187_v2 = vld [vmem:[%s17149_s13 + $0x60] sm:$0xff]  }
 0x893   : > { %v7365_v62 = vcombine.low %v7322_v30, %v7346_v15  ;;  %v7239_v7 = vsel %vm2154_vm1, %v7237_v40, %v7233_v33  ;;  %10667 = vmatprep.subr.bf16.mxu0 %v17959_v60  ;;  %v11186_v33 = vld [vmem:[%s17149_s13 + $0xa8] sm:$0xff]   ;;  %v11188_v21 = vld [vmem:[%s17149_s13 + $0xe0] sm:$0xff]   ;;  %v11191_v40 = vld [vmem:[%s17149_s13 + $0x58] sm:$0xff]   ;;  %vm7889_vm1 = vcmask 1042432  }
 0x894   : > { %10395 = vmatpush3.bf16.msra.mxu1 %v11168_v57  ;;  %v11189_v30 = vld [vmem:[%s17149_s13 + $0x20] sm:$0xff]   ;;  %v11194_v57 = vld [vmem:[%s17149_s13 + $0x98] sm:$0xff]   ;;  %v11198_v51 = vld [vmem:[%s17149_s13 + $0x90] sm:$0xff]  }
 0x895   : > { %10396 = vmatprep.subr.bf16.mxu1 %v11169_v32  ;;  %v7372_v58 = vrot.slane %v7365_v62, %v11552_v11  ;;  %v11190_v15 = vld [vmem:[%s17149_s13 + $0xa0] sm:$0xff]   ;;  %v11192_v62 = vld [vmem:[%s17149_s13 + $0xd8] sm:$0xff]   ;;  %v11196_v32 = vld [vmem:[%s17149_s13 + $0xd0] sm:$0xff]  }
 0x896   : > { %7254 = vrot.lane.b32.xlu0 %v7251_v46, %s17904_s2  ;;  %v11195_v46 = vld [vmem:[%s17149_s13 + $0x50] sm:$0xff]   ;;  %s17096_s2 = scalar_lea.sflag [#allocation3], %s539_s0 }
 0x897   : > { %v7382_v24 = vpack.c.bf16 %v7372_v58, %v7372_v58 }
 0x898   : > { %10397 = vmatpush3.bf16.msra.mxu1 %v11171_v5  ;;  %v11197_v5 = vld [vmem:[%s17149_s13 + $0x10] sm:$0xff]  }
 0x8f7   : > { %v7217_v54 = vpop.permute.xlu1 %7216 }
 0x8f8   : > { %v7287_v28 = vsel %vm4077_vm12, %v16285_v59, %v7217_v54  ;;  %v11200_v54 = vld [vmem:[%s17149_s13 + $0xc8] sm:$0xff]  }
 0x8f9   : > { %v7299_v13 = vcombine.low %v7285_v56, %v7287_v28  ;;  %v11199_v56 = vld [vmem:[%s17149_s13 + $0x48] sm:$0xff]  }
 0x8fa   : > { %v11201_v28 = vld [vmem:[%s17149_s13 + $0x8] sm:$0xff]  }
 0x8fb   : > { %v7253_v63 = vpop.permute.xlu1 %7252  ;;  %v7307_v35 = vrot.slane %v7299_v13, %v11552_v11  ;;  %v11202_v13 = vld [vmem:[%s17149_s13 + $0x88] sm:$0xff]  }
 0x8fc   : > { %v7289_v47 = vsel %vm4077_vm12, %v7238_v1, %v7253_v63  ;;  %v11175_v1 = vld [vmem:[%s17149_s13 + $0x78] sm:$0xff]   ;;  %v11203_v63 = vld [vmem:[%s17149_s13 + $0x40] sm:$0xff]  }
 0x8fd   : > { %10409 = vmatprep.subr.bf16.mxu1 %v11175_v1 }
 0x900   : > { %v7183_v14 = vpop.permute.xlu0 %7182 }
 0x901   : > { %v7286_v27 = vsel %vm4077_vm12, %v7159_v29, %v7183_v14  ;;  %v7278_v10 = vpop.permute.xlu1 %7277  ;;  %v11179_v29 = vld [vmem:[%s17149_s13 + $0x70] sm:$0xff]   ;;  %v11204_v14 = vld [vmem:[%s17149_s13 + $0xc0] sm:$0xff]  }
 0x902   : > { %v7300_v41 = vcombine.low %v7289_v47, %v7286_v27  ;;  %v7291_v59 = vsel %vm4077_vm12, %v7266_v4, %v7278_v10  ;;  %v11183_v4 = vld [vmem:[%s17149_s13 + $0x68] sm:$0xff]   ;;  %v11205_v47 = vld [vmem:[%s17149_s13] sm:$0xff]  }
 0x904   : > { %v7219_v8 = vpop.permute.xlu0 %7218  ;;  %v7314_v48 = vrot.slane %v7300_v41, %v11552_v11  ;;  %v11207_v41 = vld [vmem:[%s17149_s13 + $0x178] sm:$0xff]  }
 0x905   : > { %v7288_v25 = vsel %vm4077_vm12, %v7195_v20, %v7219_v8  ;;  %v11184_v20 = vld [vmem:[%s17149_s13 + $0xe8] sm:$0xff]   ;;  %v11208_v8 = vld [vmem:[%s17149_s13 + $0x1f8] sm:$0xff]  }
 0x906   : > { %v7323_v3 = vcombine.low %v7286_v27, %v7288_v25  ;;  %v11206_v27 = vld [vmem:[%s17149_s13 + $0x80] sm:$0xff]  }
 0x908   : > { %v7331_v18 = vrot.slane %v7323_v3, %v11552_v11  ;;  %v7255_v37 = vpop.permute.xlu0 %7254 }
 0x909   : > { %v7290_v52 = vsel %vm4077_vm12, %v7239_v7, %v7255_v37  ;;  %v11193_v7 = vld [vmem:[%s17149_s13 + $0x18] sm:$0xff]  }
 0x90a   : > { %v9917_v34 = vcombine.low %v7307_v35, %v7331_v18  ;;  %v7324_v49 = vcombine.low %v7290_v52, %v7291_v59 }
 0x90c   : > { %v7338_v36 = vrot.slane %v7324_v49, %v11552_v11  ;;  %v7355_v0 = vrot.slane %v9917_v34, %v11552_v11  ;;  %v9919_v34 = vld [vmem:[%s17148_s12] ss:$0 sm:$0xff] }
 0x90e   : > { %v9918_v12 = vcombine.low %v7314_v48, %v7338_v36  ;;  %v7363_v19 = vcombine.high %v7355_v0, %v7355_v0  ;;  %v7378_v17 = vpack.c.bf16 %v7355_v0, %v7355_v0 }
 0x910   : > { %v7379_v26 = vpack.c.bf16 %v7363_v19, %v7363_v19  ;;  %v7362_v42 = vrot.slane %v9918_v12, %v11552_v11 }
 0x912   : > { %7640 = vmatprep.mubr.bf16.mxu0 %v7379_v26  ;;  %v7364_v6 = vcombine.high %v7362_v42, %v7362_v42  ;;  %v7380_v9 = vpack.c.bf16 %v7362_v42, %v7362_v42  ;;  %v7890_v42 = vsel %vm7889_vm1, %v18003_v39, 0.0 }
 0x913   : > { %7641 = vmatmul.mubr.bf16.vlgmr.msra.gmra.mxu0 %v7378_v17 }
 0x914   : > { %10668 = vmatpush3.bf16.msra.mxu0 %v11170_v55  ;;  %v7381_v53 = vpack.c.bf16 %v7364_v6, %v7364_v6  ;;  %10675 = vmatprep.mubr.msk.bf16.mxu0 %vm11393_vm2, %v17959_v60 }
 0x915   : > { %10669 = vmatprep.subr.bf16.mxu0 %v17959_v60 }
 0x916   : > { %7680 = vmatprep.mubr.bf16.mxu1 %v7381_v53  ;;  %v7895_v53 = vrot.slane %v7890_v42, 1 }
 0x917   : > { %7681 = vmatmul.mubr.bf16.vlgmr.msra.gmra.mxu1 %v7380_v9 }
 0x918   : > { %10670 = vmatpush3.bf16.msra.mxu0 %v11172_v50  ;;  %10410 = vmatpush3.bf16.msra.mxu1 %v11177_v38  ;;  %v7902_v1 = vcombine.low %v7890_v42, %v7895_v53  ;;  %v11225_v53 = vld [vmem:[%s17149_s13 + $0x118] sm:$0xff]  }
 0x919   : > { %10671 = vmatprep.subr.bf16.mxu0 %v17959_v60  ;;  %10411 = vmatprep.subr.bf16.mxu1 %v11179_v29 }
 0x91c   : > { %10672 = vmatpush3.bf16.msra.mxu0 %v11173_v23  ;;  %10412 = vmatpush3.bf16.msra.mxu1 %v11181_v22 }
 0x91d   : > { %10673 = vmatprep.subr.bf16.mxu0 %v17959_v60  ;;  %10413 = vmatprep.subr.bf16.mxu1 %v11183_v4 }
 0x920   : > { %10674 = vmatpush3.bf16.msra.mxu0 %v11174_v61  ;;  %10414 = vmatpush3.bf16.msra.mxu1 %v11185_v43  ;;  %v16636_v61 = vrot.slane %v7890_v42, 2  ;;  %v11222_v42 = vld [vmem:[%s17149_s13 + $0x1a0] sm:$0xff]  }
 0x921   : > { %10431 = vmatprep.subr.bf16.mxu0 %v11176_v16  ;;  %10415 = vmatprep.subr.bf16.mxu1 %v11187_v2 }
 0x923   : > { %10676 = vmatmul.mubr.msk.bf16.vlgmr.msra.gmra.mxu0 %vm4077_vm12, %v7382_v24 }
 0x924   : > { %10432 = vmatpush3.bf16.msra.mxu0 %v11178_v44  ;;  %10416 = vmatpush3.bf16.msra.mxu1 %v11189_v30 }
 0x925   : > { %10433 = vmatprep.subr.bf16.mxu0 %v11180_v31  ;;  %10417 = vmatprep.subr.bf16.mxu1 %v11191_v40 }
 0x928   : > { %10434 = vmatpush3.bf16.msra.mxu0 %v11182_v45  ;;  %10418 = vmatpush3.bf16.msra.mxu1 %v11193_v7 }
 0x929   : > { %10435 = vmatprep.subr.bf16.mxu0 %v11184_v20  ;;  %10419 = vmatprep.subr.bf16.mxu1 %v11195_v46  ;;  %v16648_v20 = vrot.slane %v7902_v1, %v11552_v11  ;;  %v11231_v1 = vld [vmem:[%s17149_s13 + $0x148] sm:$0xff]  }
 0x92c   : > { %10436 = vmatpush3.bf16.msra.mxu0 %v11186_v33  ;;  %10420 = vmatpush3.bf16.msra.mxu1 %v11197_v5 }
 0x92d   : > { %10437 = vmatprep.subr.bf16.mxu0 %v11188_v21  ;;  %10421 = vmatprep.subr.bf16.mxu1 %v11199_v56 }
 0x930   : > { %10438 = vmatpush3.bf16.msra.mxu0 %v11190_v15  ;;  %10422 = vmatpush3.bf16.msra.mxu1 %v11201_v28 }
 0x931   : > { %10439 = vmatprep.subr.bf16.mxu0 %v11192_v62  ;;  %10423 = vmatprep.subr.bf16.mxu1 %v11203_v63 }
 0x934   : > { %10440 = vmatpush3.bf16.msra.mxu0 %v11194_v57  ;;  %10424 = vmatpush3.bf16.msra.mxu1 %v11205_v47 }
 0x935   : > { %10441 = vmatprep.subr.bf16.mxu0 %v11196_v32  ;;  %10453 = vmatprep.subr.bf16.mxu1 %v11207_v41 }
 0x938   : > { %10442 = vmatpush3.bf16.msra.mxu0 %v11198_v51 }
 0x939   : > { %10443 = vmatprep.subr.bf16.mxu0 %v11200_v54 }
 0x93c   : > { %10444 = vmatpush3.bf16.msra.mxu0 %v11202_v13 }
 0x93d   : > { %10445 = vmatprep.subr.bf16.mxu0 %v11204_v14 }
 0x940   : > { %10446 = vmatpush3.bf16.msra.mxu0 %v11206_v27  ;;  %v11209_v27 = vld [vmem:[%s17149_s13 + $0x138] sm:$0xff]  }
 0x941   : > { %10475 = vmatprep.subr.bf16.mxu0 %v11208_v8 }
 0x9d3   : > { %v10376_v25 = vpop.f32.mrf.mxu0 }
 0x9d5   : > { %v10377_v10 = vpop.f32.mrf.mxu0 }
 0x9d6   : > { %v10378_v52 = vadd.f32 %v10377_v10, %v10376_v25 }
 0x9d7   : > { %v10379_v3 = vpop.f32.mrf.mxu0  ;;  %v10398_v35 = vpop.f32.mrf.mxu1 }
 0x9d8   : > { %v7643_v36 = vadd.f32 %v10378_v52, %v9919_v34  ;;  %v11210_v3 = vld [vmem:[%s17149_s13 + $0x1b8] sm:$0xff]   ;;  %v11212_v52 = vld [vmem:[%s17149_s13 + $0x1f0] sm:$0xff]  }
 0x9d9   : > { %v10380_v18 = vpop.f32.mrf.mxu0  ;;  %v10399_v37 = vpop.f32.mrf.mxu1  ;;  %v11213_v34 = vld [vmem:[%s17149_s13 + $0x130] sm:$0xff]  }
 0x9da   : > { %v10400_v48 = vadd.f32 %v10399_v37, %v10398_v35 }
 0x9db   : > { %v10401_v59 = vpop.f32.mrf.mxu1 }
 0x9dc   : > { %v7683_v0 = vadd.f32 %v10400_v48, %v7643_v36  ;;  %v11211_v59 = vld [vmem:[%s17149_s13 + $0x170] sm:$0xff]   ;;  %v11215_v48 = vld [vmem:[%s17149_s13 + $0x168] sm:$0xff]  }
 0x9dd   : > { %v10402_v49 = vpop.f32.mrf.mxu1  ;;  %v11216_v36 = vld [vmem:[%s17149_s13 + $0x1e8] sm:$0xff]  }
 0x9de   : > { %v11214_v49 = vld [vmem:[%s17149_s13 + $0x1b0] sm:$0xff]  }
 0x9e3   : > { %v7722_v12 = vpop.f32.mrf.mxu0 }
 0x9e4   : > { %v7723_v19 = vadd.f32 %v7722_v12, %v7683_v0  ;;  %v11217_v0 = vld [vmem:[%s17149_s13 + $0x128] sm:$0xff]  }
 0x9e5   : > { %v10677_v26 = vpop.f32.mrf.mxu0  ;;  %v11218_v12 = vld [vmem:[%s17149_s13 + $0x1a8] sm:$0xff]  }
 0x9e6   : > { %v7728_v55 = vmax.f32 %v7723_v19, 0.0  ;;  %v11219_v19 = vld [vmem:[%s17149_s13 + $0x160] sm:$0xff]  }
 0x9e7   : > { %v7725_v17 = vpop.f32.mrf.mxu0  ;;  %v11220_v26 = vld [vmem:[%s17149_s13 + $0x1e0] sm:$0xff]  }
 0x9e8   : > { %v7736_v6 = vrot.slane %v7728_v55, %v11552_v11  ;;  %v11221_v55 = vld [vmem:[%s17149_s13 + $0x120] sm:$0xff]   ;;  %v11223_v17 = vld [vmem:[%s17149_s13 + $0x158] sm:$0xff]  }
 0x9e9   : > { %v10678_v50 = vpop.f32.mrf.mxu0 }
 0x9ea   : > { %v7737_v9 = vcombine.high %v7736_v6, %v7736_v6  ;;  %v7883_v23 = vrot.slane %v7736_v6, 7  ;;  %v11224_v6 = vld [vmem:[%s17149_s13 + $0x1d8] sm:$0xff]  }
 0x9eb   : > { %v11226_v50 = vld [vmem:[%s17149_s13 + $0x198] sm:$0xff]  }
 0x9ec   : > { %v7884_v58 = vrot.slane %v7737_v9, 7  ;;  %v7887_v24 = vsel %vm618_vm0, 0.0, %v7883_v23  ;;  %v11227_v9 = vld [vmem:[%s17149_s13 + $0x150] sm:$0xff]  }
 0x9ed   : > { %v7891_v16 = vsel %vm7889_vm1, %v7887_v24, 0.0  ;;  %v11228_v23 = vld [vmem:[%s17149_s13 + $0x1d0] sm:$0xff]  }
 0x9ee   : > { %v7888_v38 = vsel %vm618_vm0, 0.0, %v7884_v58  ;;  %v7896_v44 = vrot.slane %v7891_v16, 1  ;;  %v7898_v29 = vrot.slane %v7891_v16, 2  ;;  %v7903_v31 = vcombine.low %v16636_v61, %v7891_v16  ;;  %v11229_v58 = vld [vmem:[%s17149_s13 + $0x110] sm:$0xff]  }
 0x9ef   : > { %v16642_v39 = vsel %vm7889_vm1, %v7888_v38, 0.0  ;;  %v11230_v24 = vld [vmem:[%s17149_s13 + $0x190] sm:$0xff]   ;;  %v11233_v38 = vld [vmem:[%s17149_s13 + $0x108] sm:$0xff]  }
 0x9f0   : > { %v7900_v22 = vrot.slane %v16642_v39, 1  ;;  %v7901_v45 = vrot.slane %v16642_v39, 2  ;;  %v7943_v4 = vcombine.low %v7891_v16, %v7896_v44  ;;  %v7944_v43 = vcombine.low %v7898_v29, %v16642_v39  ;;  %v11232_v16 = vld [vmem:[%s17149_s13 + $0x1c8] sm:$0xff]  }
 0x9f1   : > { %v7919_v33 = vcombine.low %v7896_v44, %v7898_v29  ;;  %v7917_v15 = vrot.slane %v7903_v31, %v11552_v11  ;;  %v11234_v44 = vld [vmem:[%s17149_s13 + $0x188] sm:$0xff]   ;;  %v11235_v29 = vld [vmem:[%s17149_s13 + $0x140] sm:$0xff]  }
 0x9f2   : > { %v7951_v2 = vrot.slane %v7943_v4, %v11552_v11  ;;  %v7960_v21 = vcombine.low %v7900_v22, %v7901_v45  ;;  %v7920_v30 = vcombine.low %v16642_v39, %v7900_v22  ;;  %v7958_v40 = vrot.slane %v7944_v43, %v11552_v11  ;;  %v11236_v31 = vld [vmem:[%s17149_s13 + $0x1c0] sm:$0xff]   ;;  %v11239_v43 = vld [vmem:[%s17149_s13 + $0x238] sm:$0xff]  }
 0x9f3   : > { %v7927_v7 = vrot.slane %v7919_v33, %v11552_v11  ;;  %v11237_v22 = vld [vmem:[%s17149_s13 + $0x100] sm:$0xff]  }
 0x9f4   : > { %v9957_v62 = vcombine.low %v16648_v20, %v7951_v2  ;;  %v7967_v57 = vrot.slane %v7960_v21, %v11552_v11  ;;  %v7934_v46 = vrot.slane %v7920_v30, %v11552_v11  ;;  %v9958_v32 = vcombine.low %v7917_v15, %v7958_v40  ;;  %v11238_v4 = vld [vmem:[%s17149_s13 + $0x180] sm:$0xff]   ;;  %v11240_v21 = vld [vmem:[%s17149_s13 + $0x230] sm:$0xff]   ;;  %v11241_v30 = vld [vmem:[%s17149_s13 + $0x228] sm:$0xff]  }
 0x9f5   : > { %v11242_v15 = vld [vmem:[%s17149_s13 + $0x220] sm:$0xff]   ;;  %v11243_v40 = vld [vmem:[%s17149_s13 + $0x218] sm:$0xff]  }
 0x9f6   : > { %v7984_v5 = vrot.slane %v9957_v62, %v11552_v11  ;;  %v9959_v51 = vcombine.low %v7927_v7, %v7967_v57  ;;  %v9960_v56 = vcombine.low %v7934_v46, %v16648_v20  ;;  %v7991_v54 = vrot.slane %v9958_v32, %v11552_v11  ;;  %v11244_v62 = vld [vmem:[%s17149_s13 + $0x210] sm:$0xff]   ;;  %v11245_v46 = vld [vmem:[%s17149_s13 + $0x208] sm:$0xff]  }
 0x9f7   : > { %v7942_v7 = vrot.slane %v7901_v45, %v11552_v11  ;;  %v16799_v57 = vrot.slane %v16636_v61, %v11552_v11 }
 0x9f8   : > { %v7992_v28 = vcombine.high %v7984_v5, %v7984_v5  ;;  %v16665_v13 = vrot.slane %v9959_v51, %v11552_v11  ;;  %v16668_v63 = vrot.slane %v9960_v56, %v11552_v11  ;;  %v7993_v14 = vcombine.high %v7991_v54, %v7991_v54  ;;  %v11247_v51 = vld [vmem:[%s17151_s15 + $0x78] sm:$0xff]  }
 0x9f9   : > { %v8029_v10 = vpack.c.bf16 %v7984_v5, %v7984_v5  ;;  %v8031_v35 = vpack.c.bf16 %v7991_v54, %v7991_v54  ;;  %v8012_v32 = vcombine.low %v7942_v7, %v16799_v57  ;;  %v11246_v5 = vld [vmem:[%s17149_s13 + $0x200] sm:$0xff]   ;;  %v11248_v56 = vld [vmem:[%s17151_s15 + $0xf8] sm:$0xff]  }
 0x9fa   : > { %v8030_v47 = vpack.c.bf16 %v7992_v28, %v7992_v28  ;;  %v8010_v41 = vcombine.high %v16665_v13, %v16665_v13  ;;  %v8011_v8 = vcombine.high %v16668_v63, %v16668_v63  ;;  %v8032_v25 = vpack.c.bf16 %v7993_v14, %v7993_v14  ;;  %v11249_v54 = vld [vmem:[%s17151_s15 + $0x38] sm:$0xff]   ;;  %v11253_v14 = vld [vmem:[%s17151_s15 + $0x30] sm:$0xff]  }
 0x9fb   : > { %v8033_v33 = vpack.c.bf16 %v16665_v13, %v16665_v13  ;;  %v8035_v2 = vpack.c.bf16 %v16668_v63, %v16668_v63  ;;  %v8019_v39 = vrot.slane %v8012_v32, %v11552_v11  ;;  %v11250_v28 = vld [vmem:[%s17151_s15 + $0xb8] sm:$0xff]   ;;  %v11251_v13 = vld [vmem:[%s17151_s15 + $0x70] sm:$0xff]  }
 0x9fc   : > { %8508 = vmatprep.mubr.bf16.mxu1 %v8030_v47  ;;  %v8034_v18 = vpack.c.bf16 %v8010_v41, %v8010_v41  ;;  %v8036_v37 = vpack.c.bf16 %v8011_v8, %v8011_v8  ;;  %8548 = vmatprep.mubr.bf16.mxu0 %v8032_v25  ;;  %v11252_v63 = vld [vmem:[%s17151_s15 + $0xf0] sm:$0xff]   ;;  %v11256_v41 = vld [vmem:[%s17151_s15 + $0xe8] sm:$0xff]  }
 0x9fd   : > { %8509 = vmatmul.mubr.bf16.vlgmr.msra.gmra.mxu1 %v8029_v10  ;;  %8549 = vmatmul.mubr.bf16.vlgmr.msra.gmra.mxu0 %v8031_v35  ;;  %v8037_v45 = vpack.c.bf16 %v8019_v39, %v8019_v39  ;;  %v11254_v47 = vld [vmem:[%s17151_s15 + $0xb0] sm:$0xff]   ;;  %v11257_v8 = vld [vmem:[%s17151_s15 + $0x28] sm:$0xff]   ;;  %v11259_v10 = vld [vmem:[%s17151_s15 + $0x60] sm:$0xff]  }
 0x9fe   : > { %10454 = vmatpush3.bf16.msra.mxu1 %v11209_v27  ;;  %10476 = vmatpush3.bf16.msra.mxu0 %v11210_v3  ;;  %v11255_v27 = vld [vmem:[%s17151_s15 + $0x68] sm:$0xff]   ;;  %v11260_v3 = vld [vmem:[%s17151_s15 + $0xe0] sm:$0xff]  }
 0x9ff   : > { %8588 = vmatprep.mubr.bf16.mxu1 %v8034_v18  ;;  %8628 = vmatprep.mubr.bf16.mxu0 %v8036_v37  ;;  %v11258_v25 = vld [vmem:[%s17151_s15 + $0xa8] sm:$0xff]   ;;  %v11261_v35 = vld [vmem:[%s17151_s15 + $0x20] sm:$0xff]   ;;  %v11263_v37 = vld [vmem:[%s17151_s15 + $0x58] sm:$0xff]  }
 0xa00   : > { %10455 = vmatprep.subr.bf16.mxu1 %v11211_v59  ;;  %10477 = vmatprep.subr.bf16.mxu0 %v11212_v52  ;;  %v11262_v18 = vld [vmem:[%s17151_s15 + $0xa0] sm:$0xff]   ;;  %v11264_v59 = vld [vmem:[%s17151_s15 + $0xd8] sm:$0xff]  }
 0xa01   : > { %v11265_v52 = vld [vmem:[%s17151_s15 + $0x18] sm:$0xff]  }
 0xa02   : > { %10456 = vmatpush3.bf16.msra.mxu1 %v11213_v34  ;;  %10478 = vmatpush3.bf16.msra.mxu0 %v11214_v49  ;;  %v11266_v34 = vld [vmem:[%s17151_s15 + $0x98] sm:$0xff]   ;;  %v11267_v49 = vld [vmem:[%s17151_s15 + $0x50] sm:$0xff]  }
 0xa03   : > { %10457 = vmatprep.subr.bf16.mxu1 %v11215_v48  ;;  %10479 = vmatprep.subr.bf16.mxu0 %v11216_v36  ;;  %v11268_v48 = vld [vmem:[%s17151_s15 + $0xd0] sm:$0xff]  }
 0xa04   : > { %v11269_v36 = vld [vmem:[%s17151_s15 + $0x10] sm:$0xff]  }
 0xa06   : > { %10458 = vmatpush3.bf16.msra.mxu1 %v11217_v0  ;;  %10480 = vmatpush3.bf16.msra.mxu0 %v11218_v12  ;;  %v11270_v0 = vld [vmem:[%s17151_s15 + $0x90] sm:$0xff]   ;;  %v11271_v12 = vld [vmem:[%s17151_s15 + $0x48] sm:$0xff]  }
 0xa07   : > { %10459 = vmatprep.subr.bf16.mxu1 %v11219_v19  ;;  %10481 = vmatprep.subr.bf16.mxu0 %v11220_v26  ;;  %v11272_v19 = vld [vmem:[%s17151_s15 + $0xc8] sm:$0xff]  }
 0xa08   : > { %v11273_v26 = vld [vmem:[%s17151_s15 + $0x8] sm:$0xff]  }
 0xa0a   : > { %10460 = vmatpush3.bf16.msra.mxu1 %v11221_v55  ;;  %10482 = vmatpush3.bf16.msra.mxu0 %v11222_v42  ;;  %v11274_v55 = vld [vmem:[%s17151_s15 + $0x88] sm:$0xff]   ;;  %v11275_v42 = vld [vmem:[%s17151_s15 + $0x40] sm:$0xff]  }
 0xa0b   : > { %10461 = vmatprep.subr.bf16.mxu1 %v11223_v17  ;;  %10483 = vmatprep.subr.bf16.mxu0 %v11224_v6  ;;  %v11276_v17 = vld [vmem:[%s17151_s15 + $0xc0] sm:$0xff]  }
 0xa0c   : > { %v11277_v6 = vld [vmem:[%s17151_s15] sm:$0xff]  }
 0xa0e   : > { %10462 = vmatpush3.bf16.msra.mxu1 %v11225_v53  ;;  %10484 = vmatpush3.bf16.msra.mxu0 %v11226_v50  ;;  %v11278_v53 = vld [vmem:[%s17151_s15 + $0x80] sm:$0xff]   ;;  %v11279_v50 = vld [vmem:[%s17151_s15 + $0x178] sm:$0xff]  }
 0xa0f   : > { %10463 = vmatprep.subr.bf16.mxu1 %v11227_v9  ;;  %10485 = vmatprep.subr.bf16.mxu0 %v11228_v23  ;;  %v11280_v9 = vld [vmem:[%s17151_s15 + $0x1f8] sm:$0xff]  }
 0xa12   : > { %10464 = vmatpush3.bf16.msra.mxu1 %v11229_v58  ;;  %10486 = vmatpush3.bf16.msra.mxu0 %v11230_v24 }
 0xa13   : > { %10465 = vmatprep.subr.bf16.mxu1 %v11231_v1  ;;  %10487 = vmatprep.subr.bf16.mxu0 %v11232_v16 }
 0xa16   : > { %10466 = vmatpush3.bf16.msra.mxu1 %v11233_v38  ;;  %10488 = vmatpush3.bf16.msra.mxu0 %v11234_v44 }
 0xa17   : > { %10467 = vmatprep.subr.bf16.mxu1 %v11235_v29  ;;  %10489 = vmatprep.subr.bf16.mxu0 %v11236_v31 }
 0xa1a   : > { %10468 = vmatpush3.bf16.msra.mxu1 %v11237_v22  ;;  %10490 = vmatpush3.bf16.msra.mxu0 %v11238_v4 }
 0xa1b   : > { %10679 = vmatprep.subr.bf16.mxu1 %v17959_v60  ;;  %10506 = vmatprep.subr.bf16.mxu0 %v11247_v51 }
 0xa1d   : > { %8589 = vmatmul.mubr.bf16.vlgmr.msra.gmra.mxu1 %v8033_v33  ;;  %8629 = vmatmul.mubr.bf16.vlgmr.msra.gmra.mxu0 %v8035_v2 }
 0xa1e   : > { %10680 = vmatpush3.bf16.msra.mxu1 %v11239_v43  ;;  %10695 = vmatprep.mubr.msk.bf16.mxu1 %vm11393_vm2, %v17959_v60 }
 0xa1f   : > { %10681 = vmatprep.subr.bf16.mxu1 %v17959_v60  ;;  %10507 = vmatpush3.bf16.msra.mxu0 %v11249_v54 }
 0xa20   : > { %10508 = vmatprep.subr.bf16.mxu0 %v11251_v13 }
 0xa22   : > { %10682 = vmatpush3.bf16.msra.mxu1 %v11240_v21 }
 0xa23   : > { %10683 = vmatprep.subr.bf16.mxu1 %v17959_v60  ;;  %10509 = vmatpush3.bf16.msra.mxu0 %v11253_v14 }
 0xa24   : > { %10510 = vmatprep.subr.bf16.mxu0 %v11255_v27 }
 0xa26   : > { %10684 = vmatpush3.bf16.msra.mxu1 %v11241_v30 }
 0xa27   : > { %10685 = vmatprep.subr.bf16.mxu1 %v17959_v60  ;;  %10511 = vmatpush3.bf16.msra.mxu0 %v11257_v8 }
 0xa28   : > { %10512 = vmatprep.subr.bf16.mxu0 %v11259_v10 }
 0xa2a   : > { %10686 = vmatpush3.bf16.msra.mxu1 %v11242_v15 }
 0xa2b   : > { %10687 = vmatprep.subr.bf16.mxu1 %v17959_v60  ;;  %10513 = vmatpush3.bf16.msra.mxu0 %v11261_v35 }
 0xa2c   : > { %10514 = vmatprep.subr.bf16.mxu0 %v11263_v37 }
 0xa2e   : > { %10688 = vmatpush3.bf16.msra.mxu1 %v11243_v40  ;;  %v9961_v40 = vld [vmem:[%s17150_s14] ss:$0 sm:$0xff] }
 0xa2f   : > { %10689 = vmatprep.subr.bf16.mxu1 %v17959_v60  ;;  %10515 = vmatpush3.bf16.msra.mxu0 %v11265_v52 }
 0xa30   : > { %10516 = vmatprep.subr.bf16.mxu0 %v11267_v49 }
 0xa32   : > { %10690 = vmatpush3.bf16.msra.mxu1 %v11244_v62 }
 0xa33   : > { %10691 = vmatprep.subr.bf16.mxu1 %v17959_v60  ;;  %10517 = vmatpush3.bf16.msra.mxu0 %v11269_v36 }
 0xa34   : > { %10518 = vmatprep.subr.bf16.mxu0 %v11271_v12 }
 0xa36   : > { %10692 = vmatpush3.bf16.msra.mxu1 %v11245_v46 }
 0xa37   : > { %10693 = vmatprep.subr.bf16.mxu1 %v17959_v60  ;;  %10519 = vmatpush3.bf16.msra.mxu0 %v11273_v26 }
 0xa38   : > { %10520 = vmatprep.subr.bf16.mxu0 %v11275_v42 }
 0xa3a   : > { %10694 = vmatpush3.bf16.msra.mxu1 %v11246_v5 }
 0xa3b   : > { %10528 = vmatprep.subr.bf16.mxu1 %v11248_v56  ;;  %10521 = vmatpush3.bf16.msra.mxu0 %v11277_v6 }
 0xa3c   : > { %10550 = vmatprep.subr.bf16.mxu0 %v11279_v50 }
 0xa3d   : > { %10696 = vmatmul.mubr.bf16.vlgmr.msra.gmra.mxu1 %v8037_v45 }
 0xa3e   : > { %10529 = vmatpush3.bf16.msra.mxu1 %v11250_v28 }
 0xa3f   : > { %10530 = vmatprep.subr.bf16.mxu1 %v11252_v63 }
 0xa42   : > { %10531 = vmatpush3.bf16.msra.mxu1 %v11254_v47 }
 0xa43   : > { %10532 = vmatprep.subr.bf16.mxu1 %v11256_v41 }
 0xa46   : > { %10533 = vmatpush3.bf16.msra.mxu1 %v11258_v25 }
 0xa47   : > { %10534 = vmatprep.subr.bf16.mxu1 %v11260_v3 }
 0xa4a   : > { %10535 = vmatpush3.bf16.msra.mxu1 %v11262_v18 }
 0xa4b   : > { %10536 = vmatprep.subr.bf16.mxu1 %v11264_v59 }
 0xa4e   : > { %10537 = vmatpush3.bf16.msra.mxu1 %v11266_v34 }
 0xa4f   : > { %10538 = vmatprep.subr.bf16.mxu1 %v11268_v48 }
 0xa52   : > { %10539 = vmatpush3.bf16.msra.mxu1 %v11270_v0 }
 0xa53   : > { %10540 = vmatprep.subr.bf16.mxu1 %v11272_v19 }
 0xa56   : > { %10541 = vmatpush3.bf16.msra.mxu1 %v11274_v55 }
 0xa57   : > { %10542 = vmatprep.subr.bf16.mxu1 %v11276_v17 }
 0xa5a   : > { %10543 = vmatpush3.bf16.msra.mxu1 %v11278_v53 }
 0xa5b   : > { %10572 = vmatprep.subr.bf16.mxu1 %v11280_v9 }
 0xabd   : > { %v10425_v23 = vpop.f32.mrf.mxu1  ;;  %v10447_v58 = vpop.f32.mrf.mxu0 }
 0xabf   : > { %v10426_v24 = vpop.f32.mrf.mxu1  ;;  %v10448_v1 = vpop.f32.mrf.mxu0 }
 0xac0   : > { %v10427_v15 = vadd.f32 %v10426_v24, %v10425_v23  ;;  %v10449_v7 = vadd.f32 %v10448_v1, %v10447_v58 }
 0xac1   : > { %v10428_v16 = vpop.f32.mrf.mxu1  ;;  %v10450_v38 = vpop.f32.mrf.mxu0 }
 0xac2   : > { %v8511_v62 = vadd.f32 %v10427_v15, %v9961_v40  ;;  %v11285_v15 = vld [vmem:[%s17151_s15 + $0x130] sm:$0xff]  }
 0xac3   : > { %v10429_v44 = vpop.f32.mrf.mxu1  ;;  %v10451_v29 = vpop.f32.mrf.mxu0  ;;  %v11286_v40 = vld [vmem:[%s17151_s15 + $0x1b0] sm:$0xff]  }
 0xac4   : > { %v8551_v32 = vadd.f32 %v10449_v7, %v8511_v62  ;;  %v11281_v44 = vld [vmem:[%s17151_s15 + $0x138] sm:$0xff]   ;;  %v11287_v62 = vld [vmem:[%s17151_s15 + $0x168] sm:$0xff]  }
 0xac5   : > { %v11288_v7 = vld [vmem:[%s17151_s15 + $0x1e8] sm:$0xff]  }
 0xadd   : > { %v10469_v31 = vpop.f32.mrf.mxu1  ;;  %v10491_v22 = vpop.f32.mrf.mxu0 }
 0xadf   : > { %v10470_v4 = vpop.f32.mrf.mxu1  ;;  %v10492_v43 = vpop.f32.mrf.mxu0 }
 0xae0   : > { %v10471_v46 = vadd.f32 %v10470_v4, %v10469_v31  ;;  %v10493_v39 = vadd.f32 %v10492_v43, %v10491_v22  ;;  %v11282_v4 = vld [vmem:[%s17151_s15 + $0x1b8] sm:$0xff]  }
 0xae1   : > { %v10472_v33 = vpop.f32.mrf.mxu1  ;;  %v10494_v2 = vpop.f32.mrf.mxu0 }
 0xae2   : > { %v8591_v5 = vadd.f32 %v10471_v46, %v8551_v32  ;;  %v11289_v46 = vld [vmem:[%s17151_s15 + $0x128] sm:$0xff]  }
 0xae3   : > { %v10473_v21 = vpop.f32.mrf.mxu1  ;;  %v10495_v30 = vpop.f32.mrf.mxu0  ;;  %v11290_v32 = vld [vmem:[%s17151_s15 + $0x1a8] sm:$0xff]  }
 0xae4   : > { %v8631_v45 = vadd.f32 %v10493_v39, %v8591_v5  ;;  %v11283_v21 = vld [vmem:[%s17151_s15 + $0x170] sm:$0xff]   ;;  %v11291_v5 = vld [vmem:[%s17151_s15 + $0x160] sm:$0xff]  }
 0xae5   : > { %v11284_v30 = vld [vmem:[%s17151_s15 + $0x1f0] sm:$0xff]   ;;  %v11292_v39 = vld [vmem:[%s17151_s15 + $0x1e0] sm:$0xff]  }
 0xafd   : > { %v8670_v51 = vpop.f32.mrf.mxu1 }
 0xafe   : > { %v8671_v56 = vadd.f32 %v8670_v51, %v8631_v45  ;;  %v11293_v45 = vld [vmem:[%s17151_s15 + $0x120] sm:$0xff]  }
 0xaff   : > { %v10697_v54 = vpop.f32.mrf.mxu1  ;;  %v11294_v51 = vld [vmem:[%s17151_s15 + $0x1a0] sm:$0xff]  }
 0xb00   : > { %v8676_v28 = vmax.f32 %v8671_v56, 0.0  ;;  %v11295_v56 = vld [vmem:[%s17151_s15 + $0x158] sm:$0xff]  }
 0xb01   : > { %v8673_v13 = vpop.f32.mrf.mxu1  ;;  %v11296_v54 = vld [vmem:[%s17151_s15 + $0x1d8] sm:$0xff]  }
 0xb02   : > { %v8684_v63 = vrot.slane %v8676_v28, %v11552_v11  ;;  %v11297_v28 = vld [vmem:[%s17151_s15 + $0x118] sm:$0xff]  }
 0xb03   : > { %v10698_v14 = vpop.f32.mrf.mxu1  ;;  %v11298_v13 = vld [vmem:[%s17151_s15 + $0x198] sm:$0xff]  }
 0xb04   : > { %v8685_v47 = vcombine.high %v8684_v63, %v8684_v63  ;;  %v8831_v27 = vrot.slane %v8684_v63, 7  ;;  %v11299_v63 = vld [vmem:[%s17151_s15 + $0x150] sm:$0xff]  }
 0xb05   : > { %v11300_v14 = vld [vmem:[%s17151_s15 + $0x1d0] sm:$0xff]  }
 0xb06   : > { %v8832_v41 = vrot.slane %v8685_v47, 7  ;;  %v8835_v8 = vsel %vm618_vm0, 0.0, %v8831_v27  ;;  %v11301_v47 = vld [vmem:[%s17151_s15 + $0x110] sm:$0xff]  }
 0xb07   : > { %v8837_v25 = vsel %vm7889_vm1, %v8835_v8, 0.0  ;;  %v11302_v27 = vld [vmem:[%s17151_s15 + $0x190] sm:$0xff]   ;;  %v11304_v8 = vld [vmem:[%s17151_s15 + $0x1c8] sm:$0xff]  }
 0xb08   : > { %v8836_v10 = vsel %vm618_vm0, 0.0, %v8832_v41  ;;  %v8840_v3 = vrot.slane %v8837_v25, 1  ;;  %v8841_v35 = vrot.slane %v8837_v25, 2  ;;  %v8845_v37 = vcombine.low %v16636_v61, %v8837_v25  ;;  %v11303_v41 = vld [vmem:[%s17151_s15 + $0x148] sm:$0xff]  }
 0xb09   : > { %v16921_v18 = vsel %vm7889_vm1, %v8836_v10, 0.0  ;;  %v11306_v10 = vld [vmem:[%s17151_s15 + $0x188] sm:$0xff]  }
 0xb0a   : > { %v8843_v59 = vrot.slane %v16921_v18, 1  ;;  %v8844_v52 = vrot.slane %v16921_v18, 2  ;;  %v8878_v34 = vcombine.low %v8837_v25, %v8840_v3  ;;  %v8879_v49 = vcombine.low %v8841_v35, %v16921_v18  ;;  %v11305_v25 = vld [vmem:[%s17151_s15 + $0x108] sm:$0xff]  }
 0xb0b   : > { %v8854_v48 = vcombine.low %v8840_v3, %v8841_v35  ;;  %v8852_v19 = vrot.slane %v8845_v37, %v11552_v11  ;;  %v11307_v3 = vld [vmem:[%s17151_s15 + $0x140] sm:$0xff]  }
 0xb0c   : > { %v8886_v36 = vrot.slane %v8878_v34, %v11552_v11  ;;  %v8895_v0 = vcombine.low %v8843_v59, %v8844_v52  ;;  %v8855_v12 = vcombine.low %v16921_v18, %v8843_v59  ;;  %v8893_v26 = vrot.slane %v8879_v49, %v11552_v11  ;;  %v11308_v35 = vld [vmem:[%s17151_s15 + $0x1c0] sm:$0xff]   ;;  %v11311_v34 = vld [vmem:[%s17151_s15 + $0x238] sm:$0xff]  }
 0xb0d   : > { %v8862_v55 = vrot.slane %v8854_v48, %v11552_v11  ;;  %v11309_v37 = vld [vmem:[%s17151_s15 + $0x100] sm:$0xff]  }
 0xb0e   : > { %v10034_v61 = vcombine.low %v16648_v20, %v8886_v36  ;;  %v8902_v42 = vrot.slane %v8895_v0, %v11552_v11  ;;  %v8869_v17 = vrot.slane %v8855_v12, %v11552_v11  ;;  %v10035_v6 = vcombine.low %v8852_v19, %v8893_v26  ;;  %v11310_v59 = vld [vmem:[%s17151_s15 + $0x180] sm:$0xff]   ;;  %v11312_v36 = vld [vmem:[%s17151_s15 + $0x230] sm:$0xff]   ;;  %v11313_v0 = vld [vmem:[%s17151_s15 + $0x228] sm:$0xff]  }
 0xb0f   : > { %v11314_v12 = vld [vmem:[%s17151_s15 + $0x220] sm:$0xff]   ;;  %v11315_v19 = vld [vmem:[%s17151_s15 + $0x218] sm:$0xff]   ;;  %v11316_v26 = vld [vmem:[%s17151_s15 + $0x210] sm:$0xff]  }
 0xb10   : > { %v8912_v53 = vrot.slane %v10034_v61, %v11552_v11  ;;  %v10036_v50 = vcombine.low %v8862_v55, %v8902_v42  ;;  %v10037_v9 = vcombine.low %v8869_v17, %v16648_v20  ;;  %v8919_v23 = vrot.slane %v10035_v6, %v11552_v11  ;;  %v11317_v55 = vld [vmem:[%s17151_s15 + $0x208] sm:$0xff]   ;;  %v11318_v17 = vld [vmem:[%s17151_s15 + $0x200] sm:$0xff]  }
 0xb11   : > { %v8877_v61 = vrot.slane %v8844_v52, %v11552_v11 }
 0xb12   : > { %v8920_v58 = vcombine.high %v8912_v53, %v8912_v53  ;;  %v16941_v24 = vrot.slane %v10036_v50, %v11552_v11  ;;  %v16944_v1 = vrot.slane %v10037_v9, %v11552_v11  ;;  %v8921_v16 = vcombine.high %v8919_v23, %v8919_v23 }
 0xb13   : > { %v8957_v22 = vpack.c.bf16 %v8912_v53, %v8912_v53  ;;  %v8959_v43 = vpack.c.bf16 %v8919_v23, %v8919_v23  ;;  %v8940_v42 = vcombine.low %v8877_v61, %v16799_v57 }
 0xb14   : > { %v8958_v38 = vpack.c.bf16 %v8920_v58, %v8920_v58  ;;  %v8938_v29 = vcombine.high %v16941_v24, %v16941_v24  ;;  %v8939_v20 = vcombine.high %v16944_v1, %v16944_v1  ;;  %v8960_v31 = vpack.c.bf16 %v8921_v16, %v8921_v16 }
 0xb15   : > { %v8961_v49 = vpack.c.bf16 %v16941_v24, %v16941_v24  ;;  %v8963_v48 = vpack.c.bf16 %v16944_v1, %v16944_v1  ;;  %v8947_v6 = vrot.slane %v8940_v42, %v11552_v11 }
 0xb16   : > { %9436 = vmatprep.mubr.bf16.mxu0 %v8958_v38  ;;  %v8962_v33 = vpack.c.bf16 %v8938_v29, %v8938_v29  ;;  %v8964_v2 = vpack.c.bf16 %v8939_v20, %v8939_v20  ;;  %9476 = vmatprep.mubr.bf16.mxu1 %v8960_v31 }
 0xb17   : > { %9437 = vmatmul.mubr.bf16.vlgmr.msra.gmra.mxu0 %v8957_v22  ;;  %9477 = vmatmul.mubr.bf16.vlgmr.msra.gmra.mxu1 %v8959_v43  ;;  %v8965_v18 = vpack.c.bf16 %v8947_v6, %v8947_v6 }
 0xb18   : > { %10551 = vmatpush3.bf16.msra.mxu0 %v11281_v44  ;;  %10573 = vmatpush3.bf16.msra.mxu1 %v11282_v4  ;;  %v10038_v4 = vld [vmem:[%s17152_s16] ss:$0 sm:$0xff] }
 0xb19   : > { %9516 = vmatprep.mubr.bf16.mxu0 %v8962_v33  ;;  %9556 = vmatprep.mubr.bf16.mxu1 %v8964_v2 }
 0xb1a   : > { %10552 = vmatprep.subr.bf16.mxu0 %v11283_v21  ;;  %10574 = vmatprep.subr.bf16.mxu1 %v11284_v30 }
 0xb1c   : > { %10553 = vmatpush3.bf16.msra.mxu0 %v11285_v15  ;;  %10575 = vmatpush3.bf16.msra.mxu1 %v11286_v40 }
 0xb1d   : > { %10554 = vmatprep.subr.bf16.mxu0 %v11287_v62  ;;  %10576 = vmatprep.subr.bf16.mxu1 %v11288_v7 }
 0xb20   : > { %10555 = vmatpush3.bf16.msra.mxu0 %v11289_v46  ;;  %10577 = vmatpush3.bf16.msra.mxu1 %v11290_v32 }
 0xb21   : > { %10556 = vmatprep.subr.bf16.mxu0 %v11291_v5  ;;  %10578 = vmatprep.subr.bf16.mxu1 %v11292_v39 }
 0xb24   : > { %10557 = vmatpush3.bf16.msra.mxu0 %v11293_v45  ;;  %10579 = vmatpush3.bf16.msra.mxu1 %v11294_v51 }
 0xb25   : > { %10558 = vmatprep.subr.bf16.mxu0 %v11295_v56  ;;  %10580 = vmatprep.subr.bf16.mxu1 %v11296_v54 }
 0xb28   : > { %10559 = vmatpush3.bf16.msra.mxu0 %v11297_v28  ;;  %10581 = vmatpush3.bf16.msra.mxu1 %v11298_v13 }
 0xb29   : > { %10560 = vmatprep.subr.bf16.mxu0 %v11299_v63  ;;  %10582 = vmatprep.subr.bf16.mxu1 %v11300_v14 }
 0xb2c   : > { %10561 = vmatpush3.bf16.msra.mxu0 %v11301_v47  ;;  %10583 = vmatpush3.bf16.msra.mxu1 %v11302_v27 }
 0xb2d   : > { %10562 = vmatprep.subr.bf16.mxu0 %v11303_v41  ;;  %10584 = vmatprep.subr.bf16.mxu1 %v11304_v8 }
 0xb30   : > { %10563 = vmatpush3.bf16.msra.mxu0 %v11305_v25  ;;  %10585 = vmatpush3.bf16.msra.mxu1 %v11306_v10 }
 0xb31   : > { %10564 = vmatprep.subr.bf16.mxu0 %v11307_v3  ;;  %10586 = vmatprep.subr.bf16.mxu1 %v11308_v35 }
 0xb34   : > { %10565 = vmatpush3.bf16.msra.mxu0 %v11309_v37  ;;  %10587 = vmatpush3.bf16.msra.mxu1 %v11310_v59 }
 0xb35   : > { %10699 = vmatprep.subr.bf16.mxu0 %v17959_v60 }
 0xb37   : > { %9517 = vmatmul.mubr.bf16.vlgmr.msra.gmra.mxu0 %v8961_v49  ;;  %9557 = vmatmul.mubr.bf16.vlgmr.msra.gmra.mxu1 %v8963_v48 }
 0xb38   : > { %10700 = vmatpush3.bf16.msra.mxu0 %v11311_v34  ;;  %10715 = vmatprep.mubr.msk.bf16.mxu0 %vm11393_vm2, %v17959_v60 }
 0xb39   : > { %10701 = vmatprep.subr.bf16.mxu0 %v17959_v60 }
 0xb3c   : > { %10702 = vmatpush3.bf16.msra.mxu0 %v11312_v36 }
 0xb3d   : > { %10703 = vmatprep.subr.bf16.mxu0 %v17959_v60 }
 0xb40   : > { %10704 = vmatpush3.bf16.msra.mxu0 %v11313_v0 }
 0xb41   : > { %10705 = vmatprep.subr.bf16.mxu0 %v17959_v60 }
 0xb44   : > { %10706 = vmatpush3.bf16.msra.mxu0 %v11314_v12 }
 0xb45   : > { %10707 = vmatprep.subr.bf16.mxu0 %v17959_v60 }
 0xb48   : > { %10708 = vmatpush3.bf16.msra.mxu0 %v11315_v19 }
 0xb49   : > { %10709 = vmatprep.subr.bf16.mxu0 %v17959_v60 }
 0xb4c   : > { %10710 = vmatpush3.bf16.msra.mxu0 %v11316_v26 }
 0xb4d   : > { %10711 = vmatprep.subr.bf16.mxu0 %v17959_v60 }
 0xb50   : > { %10712 = vmatpush3.bf16.msra.mxu0 %v11317_v55 }
 0xb51   : > { %10713 = vmatprep.subr.bf16.mxu0 %v17959_v60 }
 0xb54   : > { %10714 = vmatpush3.bf16.msra.mxu0 %v11318_v17 }
 0xb57   : > { %10716 = vmatmul.mubr.bf16.vlgmr.msra.gmra.mxu0 %v8965_v18 }
 0xbd7   : > { %v10522_v52 = vpop.f32.mrf.mxu0  ;;  %v10544_v53 = vpop.f32.mrf.mxu1 }
 0xbd9   : > { %v10523_v50 = vpop.f32.mrf.mxu0  ;;  %v10545_v9 = vpop.f32.mrf.mxu1 }
 0xbda   : > { %v10524_v22 = vadd.f32 %v10523_v50, %v10522_v52  ;;  %v10546_v33 = vadd.f32 %v10545_v9, %v10544_v53 }
 0xbdb   : > { %v10525_v23 = vpop.f32.mrf.mxu0  ;;  %v10547_v58 = vpop.f32.mrf.mxu1 }
 0xbdc   : > { %v9439_v43 = vadd.f32 %v10524_v22, %v10038_v4 }
 0xbdd   : > { %v10526_v24 = vpop.f32.mrf.mxu0  ;;  %v10548_v57 = vpop.f32.mrf.mxu1 }
 0xbde   : > { %v9479_v21 = vadd.f32 %v10546_v33, %v9439_v43 }
 0xbf7   : > { %v10566_v1 = vpop.f32.mrf.mxu0  ;;  %v10588_v16 = vpop.f32.mrf.mxu1 }
 0xbf9   : > { %v10567_v38 = vpop.f32.mrf.mxu0  ;;  %v10589_v44 = vpop.f32.mrf.mxu1 }
 0xbfa   : > { %v10568_v2 = vadd.f32 %v10567_v38, %v10566_v1  ;;  %v10590_v15 = vadd.f32 %v10589_v44, %v10588_v16 }
 0xbfb   : > { %v10569_v29 = vpop.f32.mrf.mxu0  ;;  %v10591_v60 = vpop.f32.mrf.mxu1 }
 0xbfc   : > { %v9519_v30 = vadd.f32 %v10568_v2, %v9479_v21 }
 0xbfd   : > { %v10570_v20 = vpop.f32.mrf.mxu0  ;;  %v10592_v31 = vpop.f32.mrf.mxu1 }
 0xbfe   : > { %v9559_v40 = vadd.f32 %v10590_v15, %v9519_v30 }
 0xc17   : > { %v9598_v62 = vpop.f32.mrf.mxu0 }
 0xc18   : > { %v9599_v7 = vadd.f32 %v9598_v62, %v9559_v40 }
 0xc19   : > { %v10717_v46 = vpop.f32.mrf.mxu0 }
 0xc1a   : > { %v9604_v32 = vmax.f32 %v9599_v7, 0.0 }
 0xc1b   : > { %v9601_v5 = vpop.f32.mrf.mxu0 }
 0xc1c   : > { %v9612_v39 = vrot.slane %v9604_v32, %v11552_v11  ;;  %10111 = vst.sshfl [vmem:[%s541_s23] sm:$0x3 pattern:$0x76325410] %v9604_v32 }
 0xc1d   : > { %v10718_v45 = vpop.f32.mrf.mxu0 }
 0xc1e   : > { %v9613_v51 = vcombine.high %v9612_v39, %v9612_v39 }
 0xc20   : > { %9617 = vst [vmem:[%s541_s23 + $0x2] sm:$0x3] %v9613_v51 }
 0xc21   : > { %11332 = shalt.err (!%p11329_p3)
}
 0xc22   : > { %s11333_s0 = scalar_lea.hbm %s17094_s30, 64  ;;  %s11337_s4 = scalar_lea.hbm %s17153_s17, 128 }
 0xc23   : > { %p11334_p4 = scmp.ne.s32.totalorder %s17094_s30, %s11333_s0  ;;  %p11338_p9 = scmp.lt.s32.totalorder %s17094_s30, %s17153_s17 }
 0xc24   : > { %p11339_p10 = scmp.lt.s32.totalorder %s11337_s4, %s11333_s0 }
 0xc25   : > { %p11335_p7 = pnand %p11334_p4, %p11525_p5 }
 0xc26   : > { %p11340_p11 = por %p11339_p10, %p11338_p9 }
 0xc27   : > { %p11336_p8 = pneg %p11335_p7 }
 0xc29   : > { %p11341_p12 = pnand %p11340_p11, %p11336_p8 }
 0xc2b   : > { %11344 = shalt.err (!%p11341_p12)
}
 0xc2c   : > { %s11395_s28 = smov 32   ;;  %s11396_s21 = smov 2  }
 0xc2d   : > { %10719 = dma.vmem_to_hbm [thread:$0]  (%p11525_p5), %s17089_s18, 64, %s17094_s30, %s17096_s2, %s11395_s28, %s11395_s28, %s11396_s21  }
 0xc2e PF: > { %p10725_p13 = scmp.ge.s32.totalorder %s11379_s27, 2  ;;  %s9647_s22 = sand.u32 1, %s11367_s24  }
 0xc2f   : > { %s9648_s3 = scalar_lea.sflag [#allocation3], %s9647_s22 }
 0xc30   : > { %p10722_p0 = pnand %p10725_p13, %p11529_p6 }
 0xc32   : > { %p10723_p1 = pneg %p10722_p0 }
 0xc34   : > { %11362 = dma.done.wait (%p10723_p1), %s9648_s3, 64  }
 0xc35   : > { %11364 = vsyncadd (%p10723_p1), %s9648_s3, 4294967232  ;;  %s18004_s27 = sld [smem:[#allocation6_spill]]  ;;  %s18007_s24 = smov %s11371_s25 }
 0xc36   : > { %s18005_s0 = sld [smem:[#allocation5_spill]] }
 0xc37   : > { %s18006_s26 = sld [smem:[#allocation7_spill]] }
 0xc3b   : > { %p27_p2 = scmp.ge.s32.totalorder %s18004_s27, 4  }
 0xc3c   : > { %s18008_s25 = smov %s18005_s0 }
 0xc3d   :  { %29 = sbr.rel (!%p27_p2) target bundleno = 9 (0x9), region = 123 }
 0xc42   :  { %9653 = vsyncpa [#allocation3], 1 }
 0xc43   :  { %9655 = vsyncpa [#allocation3 + $0x1], 1 }

</bundles_post_ra>
